<compile_context>
chip_gen: v7x
topology: tpu7x:2x2x1
jax: 0.10.0
libtpu: 0.0.40
codegen_flags: <defaults>
</compile_context>

<pallas_src>
import numpy as np

import jax
import jax.numpy as jnp
from jax import lax
from jax.experimental import pallas as pl
from jax.experimental.pallas import tpu as pltpu


TB = 8            # images per grid step (batch tile, multiple of 8 sublanes)
NUM_CLASS = 10
PAD_N = 128       # lane-dense padded logit width written to HBM
NEG_BIG = -1e30   # bias of padded logit lanes (never wins max, exp() == 0)


# ----------------------------------------------------------------------------
# Fused kernel: conv1 -> pool1 -> conv2 -> pool2 -> fc1 -> fc2 -> fc3 -> lsm
# ----------------------------------------------------------------------------
def _lenet_kernel(x_ref, t1_ref, b1_ref, p1r_ref, p1c_ref,
                  t2_ref, b2_ref, p2r_ref, p2c_ref,
                  wf1_ref, bf1_ref, wf2_ref, bf2_ref, wf3_ref, bf3_ref,
                  o_ref, xpad_buf, p1_buf, p2_buf):
    f32 = jnp.float32
    tb = x_ref.shape[0]

    def bc(w):      # (K, N) -> (tb, K, N): feed the batched MXU matmul below
        return jnp.broadcast_to(w, (tb,) + w.shape)

    def bmm(a, b):  # (tb, M, K) @ (tb, K, N) -> (tb, M, N), f32 accumulation
        return lax.dot_general(
            a, b,
            dimension_numbers=(((2,), (1,)), ((0,), (0,))),
            preferred_element_type=f32)

    # ---- conv1: 1 -> 6 channels, k=5, stride 1, pad 2, ReLU -----------------
    # H padding lives in a VMEM scratch; W padding is folded into the Toeplitz
    # weights (output columns that would read padding simply have no weight
    # rows).  Output lanes are channel-blocked: lane = co*28 + j.
    xpad_buf[...] = jnp.zeros(xpad_buf.shape, f32)
    xpad_buf[:, 2:30, :] = x_ref[...]

    acc1 = bmm(xpad_buf[:, 0:28, :], bc(t1_ref[0]))
    for kh in range(1, 5):
        acc1 = acc1 + bmm(xpad_buf[:, kh:kh + 28, :], bc(t1_ref[kh]))
    acc1 = jnp.maximum(acc1 + b1_ref[...], 0.0)            # (tb, 28, 168)

    # ---- pool1: 2x2 / stride 2 as max of even/odd selection matmuls --------
    hmax = jnp.maximum(bmm(bc(p1r_ref[0]), acc1),
                       bmm(bc(p1r_ref[1]), acc1))          # (tb, 14, 168)
    p1_buf[...] = jnp.maximum(bmm(hmax, bc(p1c_ref[0])),
                              bmm(hmax, bc(p1c_ref[1])))   # (tb, 14, 84)

    # ---- conv2: 6 -> 16 channels, k=5, valid, ReLU --------------------------
    acc2 = bmm(p1_buf[:, 0:10, :], bc(t2_ref[0]))
    for kh in range(1, 5):
        acc2 = acc2 + bmm(p1_buf[:, kh:kh + 10, :], bc(t2_ref[kh]))
    acc2 = jnp.maximum(acc2 + b2_ref[...], 0.0)            # (tb, 10, 160)

    # ---- pool2 --------------------------------------------------------------
    h2 = jnp.maximum(bmm(bc(p2r_ref[0]), acc2),
                     bmm(bc(p2r_ref[1]), acc2))            # (tb, 5, 160)
    p2_buf[...] = jnp.maximum(bmm(h2, bc(p2c_ref[0])),
                              bmm(h2, bc(p2c_ref[1])))     # (tb, 5, 80)

    # ---- fc1 (torch.flatten's channel-major order folded into weights) -----
    h1 = bmm(p2_buf[:, 0:1, :], bc(wf1_ref[0]))
    for ph in range(1, 5):
        h1 = h1 + bmm(p2_buf[:, ph:ph + 1, :], bc(wf1_ref[ph]))
    h1 = jnp.maximum(h1 + bf1_ref[...], 0.0)               # (tb, 1, 120)

    # ---- fc2 ----------------------------------------------------------------
    h2f = jnp.maximum(bmm(h1, bc(wf2_ref[...])) + bf2_ref[...], 0.0)  # (tb,1,84)

    # ---- fc3 + log_softmax over 128 lane-dense padded logits ---------------
    logits = bmm(h2f, bc(wf3_ref[...])) + bf3_ref[...]     # (tb, 1, 128)
    m = jnp.max(logits, axis=-1, keepdims=True)
    z = logits - m
    lse = jnp.log(jnp.sum(jnp.exp(z), axis=-1, keepdims=True))
    o_ref[...] = z - lse


# ----------------------------------------------------------------------------
# Wrapper
# ----------------------------------------------------------------------------
def lenet_forward(x_nchw, kp, *, block_b=TB):
    """x_nchw: (B, 1, 28, 28) float32 -> (B, 10) log-probabilities."""
    B = x_nchw.shape[0]
    x = x_nchw.reshape(B, 28, 28).astype(jnp.float32)

    # Pad the batch to a multiple of the batch tile.
    Bp = ((B + block_b - 1) // block_b) * block_b
    if Bp != B:
        x = jnp.concatenate([x, jnp.zeros((Bp - B, 28, 28), jnp.float32)], 0)

    weights = [kp["t1"], kp["b1"], kp["p1r"], kp["p1c"],
               kp["t2"], kp["b2"], kp["p2r"], kp["p2c"],
               kp["wf1"], kp["bf1"], kp["wf2"], kp["bf2"],
               kp["wf3"], kp["bf3"]]

    def full_spec(a):
        nd = a.ndim
        return pl.BlockSpec(a.shape, lambda i, _nd=nd: (0,) * _nd)

    in_specs = [pl.BlockSpec((block_b, 28, 28), lambda i: (i, 0, 0))]
    in_specs += [full_spec(w) for w in weights]

    weight_bytes = sum(int(w.size) * 4 for w in weights)
    cost = pl.CostEstimate(
        flops=int(4.2e6) * Bp,            # ~2.1M (padded) MACs per image
        transcendentals=130 * Bp,         # exp/log of the softmax
        bytes_accessed=int(x.size) * 4 + weight_bytes + Bp * PAD_N * 4)

    out = pl.pallas_call(
        _lenet_kernel,
        out_shape=jax.ShapeDtypeStruct((Bp, 1, PAD_N), jnp.float32),
        grid=(Bp // block_b,),
        in_specs=in_specs,
        out_specs=pl.BlockSpec((block_b, 1, PAD_N), lambda i: (i, 0, 0)),
        scratch_shapes=[pltpu.VMEM((block_b, 32, 28), jnp.float32),
                        pltpu.VMEM((block_b, 14, 84), jnp.float32),
                        pltpu.VMEM((block_b, 5, 80), jnp.float32)],
        compiler_params=pltpu.CompilerParams(
            dimension_semantics=("parallel",),   # v7x: shard tiles over 2 TCs
            vmem_limit_bytes=32 * 1024 * 1024),  # safe on v5e/v6e/v7x
        cost_estimate=cost,
    )(x, *weights)

    return out[:B, 0, :NUM_CLASS]


# ----------------------------------------------------------------------------
# Parameter preparation (done once, on host): Toeplitz conv weights, pooling
# selectors, fc1 flatten permutation, lane-padded fc3.
# ----------------------------------------------------------------------------
def prepare_kernel_params(torch_params, num_class=NUM_CLASS):
    (w1, b1, w2, b2, wf1, bf1, wf2, bf2, wf3, bf3) = [
        np.asarray(p, np.float32) for p in torch_params]

    # conv1: T1[kh, w_in, co*28 + j] = w1[co, 0, kh, kw], w_in = j + kw - 2
    t1 = np.zeros((5, 28, 6 * 28), np.float32)
    for kh in range(5):
        for co in range(6):
            for j in range(28):
                for kw in range(5):
                    w_in = j + kw - 2
                    if 0 <= w_in < 28:
                        t1[kh, w_in, co * 28 + j] = w1[co, 0, kh, kw]

    # conv2: T2[kh, ci*14 + (j+kw), co*10 + j] = w2[co, ci, kh, kw]
    t2 = np.zeros((5, 6 * 14, 16 * 10), np.float32)
    for kh in range(5):
        for co in range(16):
            for ci in range(6):
                for j in range(10):
                    for kw in range(5):
                        t2[kh, ci * 14 + j + kw, co * 10 + j] = w2[co, ci, kh, kw]

    def row_sel(h):                        # (2, h//2, h): even/odd row picks
        r = np.zeros((2, h // 2, h), np.float32)
        for p in range(h // 2):
            r[0, p, 2 * p] = 1.0
            r[1, p, 2 * p + 1] = 1.0
        return r

    def col_sel(c, w):                     # (2, c*w, c*(w//2)): per-channel cols
        s = np.zeros((2, c * w, c * (w // 2)), np.float32)
        for ch in range(c):
            for p in range(w // 2):
                s[0, ch * w + 2 * p, ch * (w // 2) + p] = 1.0
                s[1, ch * w + 2 * p + 1, ch * (w // 2) + p] = 1.0
        return s

    # fc1: fold torch.flatten(NCHW) index (co*25 + ph*5 + pw) into the kernel
    # layout (row = ph, lane = co*5 + pw).
    wf1r = np.zeros((5, 16 * 5, 120), np.float32)
    for ph in range(5):
        for co in range(16):
            for pw in range(5):
                wf1r[ph, co * 5 + pw, :] = wf1[:, co * 25 + ph * 5 + pw]

    # fc3: pad to 128 lanes; padded lanes get weight 0 and bias NEG_BIG.
    wf3p = np.zeros((84, PAD_N), np.float32)
    wf3p[:, :num_class] = wf3.T
    bf3p = np.full((1, PAD_N), NEG_BIG, np.float32)
    bf3p[0, :num_class] = bf3

    kp = {
        "t1": t1,
        "b1": np.repeat(b1, 28).reshape(1, 6 * 28),
        "p1r": row_sel(28), "p1c": col_sel(6, 28),
        "t2": t2,
        "b2": np.repeat(b2, 10).reshape(1, 16 * 10),
        "p2r": row_sel(10), "p2c": col_sel(16, 10),
        "wf1": wf1r, "bf1": bf1.reshape(1, 120),
        "wf2": np.ascontiguousarray(wf2.T), "bf2": bf2.reshape(1, 84),
        "wf3": wf3p, "bf3": bf3p,
    }
    return {k: jnp.asarray(v, jnp.float32) for k, v in kp.items()}


# ----------------------------------------------------------------------------
# Deterministic parameter init (PyTorch layouts)
# ----------------------------------------------------------------------------
def init_torch_params(key, num_class=NUM_CLASS):
    ks = jax.random.split(key, 10)

    def u(k, shape, fan_in):
        bound = 1.0 / np.sqrt(fan_in)
        return jax.random.uniform(k, shape, jnp.float32, -bound, bound)

    w1 = u(ks[0], (6, 1, 5, 5), 25)
    b1 = u(ks[1], (6,), 25)
    w2 = u(ks[2], (16, 6, 5, 5), 150)
    b2 = u(ks[3], (16,), 150)
    wf1 = u(ks[4], (120, 400), 400)
    bf1 = u(ks[5], (120,), 400)
    wf2 = u(ks[6], (84, 120), 120)
    bf2 = u(ks[7], (84,), 120)
    wf3 = u(ks[8], (num_class, 84), 84)
    bf3 = u(ks[9], (num_class,), 84)
    return (w1, b1, w2, b2, wf1, bf1, wf2, bf2, wf3, bf3)


# ----------------------------------------------------------------------------
# Pure-JAX reference (PyTorch semantics, NCHW) for validation
# ----------------------------------------------------------------------------
def lenet_reference(x_nchw, torch_params):
    w1, b1, w2, b2, wf1, bf1, wf2, bf2, wf3, bf3 = torch_params
    y = lax.conv_general_dilated(
        x_nchw, w1, (1, 1), ((2, 2), (2, 2)),
        dimension_numbers=("NCHW", "OIHW", "NCHW"))
    y = jnp.maximum(y + b1[None, :, None, None], 0.0)
    y = lax.reduce_window(y, -jnp.inf, lax.max, (1, 1, 2, 2), (1, 1, 2, 2), "VALID")
    y = lax.conv_general_dilated(
        y, w2, (1, 1), ((0, 0), (0, 0)),
        dimension_numbers=("NCHW", "OIHW", "NCHW"))
    y = jnp.maximum(y + b2[None, :, None, None], 0.0)
    y = lax.reduce_window(y, -jnp.inf, lax.max, (1, 1, 2, 2), (1, 1, 2, 2), "VALID")
    y = y.reshape(y.shape[0], -1)           # (B, 400), channel-major flatten
    y = jnp.maximum(y @ wf1.T + bf1, 0.0)
    y = jnp.maximum(y @ wf2.T + bf2, 0.0)
    y = y @ wf3.T + bf3
    return jax.nn.log_softmax(y, axis=1)


if __name__ == "__main__":
    key = jax.random.PRNGKey(0)
    k_x, k_p = jax.random.split(key)

    B = 16   # two batch tiles of TB=8 -> a real 2-step "parallel" grid
    x = jax.random.normal(k_x, (B, 1, 28, 28), dtype=jnp.float32)

    torch_params = init_torch_params(k_p, num_class=NUM_CLASS)
    kparams = prepare_kernel_params(torch_params, num_class=NUM_CLASS)

    out = jax.block_until_ready(lenet_forward(x, kparams))
    ref = jax.block_until_ready(lenet_reference(x, torch_params))

    assert out.shape == (B, NUM_CLASS), out.shape
    assert bool(jnp.all(jnp.isfinite(out)))
    max_diff = float(jnp.max(jnp.abs(out - ref)))
    assert jnp.allclose(out, ref, atol=2e-2, rtol=2e-2), f"max abs diff {max_diff}"

    print("KERNEL_OK")
</pallas_src>

<mosaic_0001>
module attributes {stable_mosaic.version = 11 : i64} {
  func.func @_lenet_kernel(%arg0: i32, %arg1: memref<8x28x28xf32, #tpu.memory_space<vmem>>, %arg2: memref<5x28x168xf32, #tpu.memory_space<vmem>>, %arg3: memref<1x168xf32, #tpu.memory_space<vmem>>, %arg4: memref<2x14x28xf32, #tpu.memory_space<vmem>>, %arg5: memref<2x168x84xf32, #tpu.memory_space<vmem>>, %arg6: memref<5x84x160xf32, #tpu.memory_space<vmem>>, %arg7: memref<1x160xf32, #tpu.memory_space<vmem>>, %arg8: memref<2x5x10xf32, #tpu.memory_space<vmem>>, %arg9: memref<2x160x80xf32, #tpu.memory_space<vmem>>, %arg10: memref<5x80x120xf32, #tpu.memory_space<vmem>>, %arg11: memref<1x120xf32, #tpu.memory_space<vmem>>, %arg12: memref<120x84xf32, #tpu.memory_space<vmem>>, %arg13: memref<1x84xf32, #tpu.memory_space<vmem>>, %arg14: memref<84x128xf32, #tpu.memory_space<vmem>>, %arg15: memref<1x128xf32, #tpu.memory_space<vmem>>, %arg16: memref<8x1x128xf32, #tpu.memory_space<vmem>>, %arg17: memref<8x32x28xf32, #tpu.memory_space<vmem>>, %arg18: memref<8x14x84xf32, #tpu.memory_space<vmem>>, %arg19: memref<8x5x80xf32, #tpu.memory_space<vmem>>) attributes {dimension_semantics = [#tpu.dimension_semantics<parallel>], iteration_bounds = array<i64: 2>, scalar_prefetch = 0 : i64, scratch_operands = 3 : i64, tpu.core_type = #tpu.core_type<tc>, window_params = [{transform_indices = @transform_0, window_bounds = array<i64: 8, 28, 28>}, {pipeline_mode = #tpu.pipeline_mode<synchronous>, transform_indices = @transform_1, window_bounds = array<i64: 5, 28, 168>}, {pipeline_mode = #tpu.pipeline_mode<synchronous>, transform_indices = @transform_2, window_bounds = array<i64: 1, 168>}, {pipeline_mode = #tpu.pipeline_mode<synchronous>, transform_indices = @transform_3, window_bounds = array<i64: 2, 14, 28>}, {pipeline_mode = #tpu.pipeline_mode<synchronous>, transform_indices = @transform_4, window_bounds = array<i64: 2, 168, 84>}, {pipeline_mode = #tpu.pipeline_mode<synchronous>, transform_indices = @transform_5, window_bounds = array<i64: 5, 84, 160>}, {pipeline_mode = #tpu.pipeline_mode<synchronous>, transform_indices = @transform_6, window_bounds = array<i64: 1, 160>}, {pipeline_mode = #tpu.pipeline_mode<synchronous>, transform_indices = @transform_7, window_bounds = array<i64: 2, 5, 10>}, {pipeline_mode = #tpu.pipeline_mode<synchronous>, transform_indices = @transform_8, window_bounds = array<i64: 2, 160, 80>}, {pipeline_mode = #tpu.pipeline_mode<synchronous>, transform_indices = @transform_9, window_bounds = array<i64: 5, 80, 120>}, {pipeline_mode = #tpu.pipeline_mode<synchronous>, transform_indices = @transform_10, window_bounds = array<i64: 1, 120>}, {pipeline_mode = #tpu.pipeline_mode<synchronous>, transform_indices = @transform_11, window_bounds = array<i64: 120, 84>}, {pipeline_mode = #tpu.pipeline_mode<synchronous>, transform_indices = @transform_12, window_bounds = array<i64: 1, 84>}, {pipeline_mode = #tpu.pipeline_mode<synchronous>, transform_indices = @transform_13, window_bounds = array<i64: 84, 128>}, {pipeline_mode = #tpu.pipeline_mode<synchronous>, transform_indices = @transform_14, window_bounds = array<i64: 1, 128>}, {transform_indices = @transform_15, window_bounds = array<i64: 8, 1, 128>}]} {
    %cst = arith.constant 0.000000e+00 : f32
    %0 = vector.broadcast %cst : f32 to vector<8x32x28xf32>
    %c0 = arith.constant 0 : index
    %c0_0 = arith.constant 0 : index
    %c0_1 = arith.constant 0 : index
    %1 = vector.load %arg17[%c0, %c0_0, %c0_1] : memref<8x32x28xf32, #tpu.memory_space<vmem>>, vector<8x32x28xf32>
    tpu.vector_store %arg17[%c0, %c0_0, %c0_1], %0 {strides = array<i32>} : memref<8x32x28xf32, #tpu.memory_space<vmem>>, vector<8x32x28xf32>,
    %c0_2 = arith.constant 0 : index
    %c0_3 = arith.constant 0 : index
    %c0_4 = arith.constant 0 : index
    %2 = vector.load %arg1[%c0_2, %c0_3, %c0_4] : memref<8x28x28xf32, #tpu.memory_space<vmem>>, vector<8x28x28xf32>
    %c0_5 = arith.constant 0 : index
    %c2 = arith.constant 2 : index
    %c0_6 = arith.constant 0 : index
    %3 = vector.load %arg17[%c0_5, %c2, %c0_6] : memref<8x32x28xf32, #tpu.memory_space<vmem>>, vector<8x28x28xf32>
    tpu.vector_store %arg17[%c0_5, %c2, %c0_6], %2 {strides = array<i32>} : memref<8x32x28xf32, #tpu.memory_space<vmem>>, vector<8x28x28xf32>,
    %c0_7 = arith.constant 0 : index
    %c0_8 = arith.constant 0 : index
    %c0_9 = arith.constant 0 : index
    %4 = vector.load %arg17[%c0_7, %c0_8, %c0_9] : memref<8x32x28xf32, #tpu.memory_space<vmem>>, vector<8x28x28xf32>
    %c0_10 = arith.constant 0 : index
    %c0_11 = arith.constant 0 : index
    %c0_12 = arith.constant 0 : index
    %5 = vector.load %arg2[%c0_10, %c0_11, %c0_12] : memref<5x28x168xf32, #tpu.memory_space<vmem>>, vector<1x28x168xf32>
    %6 = vector.shape_cast %5 : vector<1x28x168xf32> to vector<28x168xf32>
    %7 = vector.shape_cast %6 : vector<28x168xf32> to vector<1x28x168xf32>
    %8 = vector.broadcast %7 : vector<1x28x168xf32> to vector<8x28x168xf32>
    %cst_13 = arith.constant dense<0.000000e+00> : vector<8x28x168xf32>
    %9 = tpu.matmul %4, %8, %cst_13 {dimension_numbers = #tpu.dot_dimension_numbers<[2], [1], [1], [2], [0, 0, 0, 1, 1, 2], [0], [0]>} : vector<8x28x28xf32>, vector<8x28x168xf32>, vector<8x28x168xf32> -> vector<8x28x168xf32>
    %c0_14 = arith.constant 0 : index
    %c1 = arith.constant 1 : index
    %c0_15 = arith.constant 0 : index
    %10 = vector.load %arg17[%c0_14, %c1, %c0_15] : memref<8x32x28xf32, #tpu.memory_space<vmem>>, vector<8x28x28xf32>
    %c1_16 = arith.constant 1 : index
    %c0_17 = arith.constant 0 : index
    %c0_18 = arith.constant 0 : index
    %11 = vector.load %arg2[%c1_16, %c0_17, %c0_18] : memref<5x28x168xf32, #tpu.memory_space<vmem>>, vector<1x28x168xf32>
    %12 = vector.shape_cast %11 : vector<1x28x168xf32> to vector<28x168xf32>
    %13 = vector.shape_cast %12 : vector<28x168xf32> to vector<1x28x168xf32>
    %14 = vector.broadcast %13 : vector<1x28x168xf32> to vector<8x28x168xf32>
    %cst_19 = arith.constant dense<0.000000e+00> : vector<8x28x168xf32>
    %15 = tpu.matmul %10, %14, %cst_19 {dimension_numbers = #tpu.dot_dimension_numbers<[2], [1], [1], [2], [0, 0, 0, 1, 1, 2], [0], [0]>} : vector<8x28x28xf32>, vector<8x28x168xf32>, vector<8x28x168xf32> -> vector<8x28x168xf32>
    %16 = arith.addf %9, %15 : vector<8x28x168xf32>
    %c0_20 = arith.constant 0 : index
    %c2_21 = arith.constant 2 : index
    %c0_22 = arith.constant 0 : index
    %17 = vector.load %arg17[%c0_20, %c2_21, %c0_22] : memref<8x32x28xf32, #tpu.memory_space<vmem>>, vector<8x28x28xf32>
    %c2_23 = arith.constant 2 : index
    %c0_24 = arith.constant 0 : index
    %c0_25 = arith.constant 0 : index
    %18 = vector.load %arg2[%c2_23, %c0_24, %c0_25] : memref<5x28x168xf32, #tpu.memory_space<vmem>>, vector<1x28x168xf32>
    %19 = vector.shape_cast %18 : vector<1x28x168xf32> to vector<28x168xf32>
    %20 = vector.shape_cast %19 : vector<28x168xf32> to vector<1x28x168xf32>
    %21 = vector.broadcast %20 : vector<1x28x168xf32> to vector<8x28x168xf32>
    %cst_26 = arith.constant dense<0.000000e+00> : vector<8x28x168xf32>
    %22 = tpu.matmul %17, %21, %cst_26 {dimension_numbers = #tpu.dot_dimension_numbers<[2], [1], [1], [2], [0, 0, 0, 1, 1, 2], [0], [0]>} : vector<8x28x28xf32>, vector<8x28x168xf32>, vector<8x28x168xf32> -> vector<8x28x168xf32>
    %23 = arith.addf %16, %22 : vector<8x28x168xf32>
    %c0_27 = arith.constant 0 : index
    %c3 = arith.constant 3 : index
    %c0_28 = arith.constant 0 : index
    %24 = vector.load %arg17[%c0_27, %c3, %c0_28] : memref<8x32x28xf32, #tpu.memory_space<vmem>>, vector<8x28x28xf32>
    %c3_29 = arith.constant 3 : index
    %c0_30 = arith.constant 0 : index
    %c0_31 = arith.constant 0 : index
    %25 = vector.load %arg2[%c3_29, %c0_30, %c0_31] : memref<5x28x168xf32, #tpu.memory_space<vmem>>, vector<1x28x168xf32>
    %26 = vector.shape_cast %25 : vector<1x28x168xf32> to vector<28x168xf32>
    %27 = vector.shape_cast %26 : vector<28x168xf32> to vector<1x28x168xf32>
    %28 = vector.broadcast %27 : vector<1x28x168xf32> to vector<8x28x168xf32>
    %cst_32 = arith.constant dense<0.000000e+00> : vector<8x28x168xf32>
    %29 = tpu.matmul %24, %28, %cst_32 {dimension_numbers = #tpu.dot_dimension_numbers<[2], [1], [1], [2], [0, 0, 0, 1, 1, 2], [0], [0]>} : vector<8x28x28xf32>, vector<8x28x168xf32>, vector<8x28x168xf32> -> vector<8x28x168xf32>
    %30 = arith.addf %23, %29 : vector<8x28x168xf32>
    %c0_33 = arith.constant 0 : index
    %c4 = arith.constant 4 : index
    %c0_34 = arith.constant 0 : index
    %31 = vector.load %arg17[%c0_33, %c4, %c0_34] : memref<8x32x28xf32, #tpu.memory_space<vmem>>, vector<8x28x28xf32>
    %c4_35 = arith.constant 4 : index
    %c0_36 = arith.constant 0 : index
    %c0_37 = arith.constant 0 : index
    %32 = vector.load %arg2[%c4_35, %c0_36, %c0_37] : memref<5x28x168xf32, #tpu.memory_space<vmem>>, vector<1x28x168xf32>
    %33 = vector.shape_cast %32 : vector<1x28x168xf32> to vector<28x168xf32>
    %34 = vector.shape_cast %33 : vector<28x168xf32> to vector<1x28x168xf32>
    %35 = vector.broadcast %34 : vector<1x28x168xf32> to vector<8x28x168xf32>
    %cst_38 = arith.constant dense<0.000000e+00> : vector<8x28x168xf32>
    %36 = tpu.matmul %31, %35, %cst_38 {dimension_numbers = #tpu.dot_dimension_numbers<[2], [1], [1], [2], [0, 0, 0, 1, 1, 2], [0], [0]>} : vector<8x28x28xf32>, vector<8x28x168xf32>, vector<8x28x168xf32> -> vector<8x28x168xf32>
    %37 = arith.addf %30, %36 : vector<8x28x168xf32>
    %c0_39 = arith.constant 0 : index
    %c0_40 = arith.constant 0 : index
    %38 = vector.load %arg3[%c0_39, %c0_40] : memref<1x168xf32, #tpu.memory_space<vmem>>, vector<1x168xf32>
    %39 = vector.shape_cast %38 : vector<1x168xf32> to vector<1x1x168xf32>
    %40 = vector.broadcast %39 : vector<1x1x168xf32> to vector<8x28x168xf32>
    %41 = arith.addf %37, %40 : vector<8x28x168xf32>
    %cst_41 = arith.constant 0.000000e+00 : f32
    %42 = vector.broadcast %cst_41 : f32 to vector<8x28x168xf32>
    %43 = arith.maximumf %41, %42 : vector<8x28x168xf32>
    %c0_42 = arith.constant 0 : index
    %c0_43 = arith.constant 0 : index
    %c0_44 = arith.constant 0 : index
    %44 = vector.load %arg4[%c0_42, %c0_43, %c0_44] : memref<2x14x28xf32, #tpu.memory_space<vmem>>, vector<1x14x28xf32>
    %45 = vector.shape_cast %44 : vector<1x14x28xf32> to vector<14x28xf32>
    %46 = vector.shape_cast %45 : vector<14x28xf32> to vector<1x14x28xf32>
    %47 = vector.broadcast %46 : vector<1x14x28xf32> to vector<8x14x28xf32>
    %cst_45 = arith.constant dense<0.000000e+00> : vector<8x14x168xf32>
    %48 = tpu.matmul %47, %43, %cst_45 {dimension_numbers = #tpu.dot_dimension_numbers<[2], [1], [1], [2], [0, 0, 0, 1, 1, 2], [0], [0]>} : vector<8x14x28xf32>, vector<8x28x168xf32>, vector<8x14x168xf32> -> vector<8x14x168xf32>
    %c1_46 = arith.constant 1 : index
    %c0_47 = arith.constant 0 : index
    %c0_48 = arith.constant 0 : index
    %49 = vector.load %arg4[%c1_46, %c0_47, %c0_48] : memref<2x14x28xf32, #tpu.memory_space<vmem>>, vector<1x14x28xf32>
    %50 = vector.shape_cast %49 : vector<1x14x28xf32> to vector<14x28xf32>
    %51 = vector.shape_cast %50 : vector<14x28xf32> to vector<1x14x28xf32>
    %52 = vector.broadcast %51 : vector<1x14x28xf32> to vector<8x14x28xf32>
    %cst_49 = arith.constant dense<0.000000e+00> : vector<8x14x168xf32>
    %53 = tpu.matmul %52, %43, %cst_49 {dimension_numbers = #tpu.dot_dimension_numbers<[2], [1], [1], [2], [0, 0, 0, 1, 1, 2], [0], [0]>} : vector<8x14x28xf32>, vector<8x28x168xf32>, vector<8x14x168xf32> -> vector<8x14x168xf32>
    %54 = arith.maximumf %48, %53 : vector<8x14x168xf32>
    %c0_50 = arith.constant 0 : index
    %c0_51 = arith.constant 0 : index
    %c0_52 = arith.constant 0 : index
    %55 = vector.load %arg5[%c0_50, %c0_51, %c0_52] : memref<2x168x84xf32, #tpu.memory_space<vmem>>, vector<1x168x84xf32>
    %56 = vector.shape_cast %55 : vector<1x168x84xf32> to vector<168x84xf32>
    %57 = vector.shape_cast %56 : vector<168x84xf32> to vector<1x168x84xf32>
    %58 = vector.broadcast %57 : vector<1x168x84xf32> to vector<8x168x84xf32>
    %cst_53 = arith.constant dense<0.000000e+00> : vector<8x14x84xf32>
    %59 = tpu.matmul %54, %58, %cst_53 {dimension_numbers = #tpu.dot_dimension_numbers<[2], [1], [1], [2], [0, 0, 0, 1, 1, 2], [0], [0]>} : vector<8x14x168xf32>, vector<8x168x84xf32>, vector<8x14x84xf32> -> vector<8x14x84xf32>
    %c1_54 = arith.constant 1 : index
    %c0_55 = arith.constant 0 : index
    %c0_56 = arith.constant 0 : index
    %60 = vector.load %arg5[%c1_54, %c0_55, %c0_56] : memref<2x168x84xf32, #tpu.memory_space<vmem>>, vector<1x168x84xf32>
    %61 = vector.shape_cast %60 : vector<1x168x84xf32> to vector<168x84xf32>
    %62 = vector.shape_cast %61 : vector<168x84xf32> to vector<1x168x84xf32>
    %63 = vector.broadcast %62 : vector<1x168x84xf32> to vector<8x168x84xf32>
    %cst_57 = arith.constant dense<0.000000e+00> : vector<8x14x84xf32>
    %64 = tpu.matmul %54, %63, %cst_57 {dimension_numbers = #tpu.dot_dimension_numbers<[2], [1], [1], [2], [0, 0, 0, 1, 1, 2], [0], [0]>} : vector<8x14x168xf32>, vector<8x168x84xf32>, vector<8x14x84xf32> -> vector<8x14x84xf32>
    %65 = arith.maximumf %59, %64 : vector<8x14x84xf32>
    %c0_58 = arith.constant 0 : index
    %c0_59 = arith.constant 0 : index
    %c0_60 = arith.constant 0 : index
    %66 = vector.load %arg18[%c0_58, %c0_59, %c0_60] : memref<8x14x84xf32, #tpu.memory_space<vmem>>, vector<8x14x84xf32>
    tpu.vector_store %arg18[%c0_58, %c0_59, %c0_60], %65 {strides = array<i32>} : memref<8x14x84xf32, #tpu.memory_space<vmem>>, vector<8x14x84xf32>,
    %c0_61 = arith.constant 0 : index
    %c0_62 = arith.constant 0 : index
    %c0_63 = arith.constant 0 : index
    %67 = vector.load %arg18[%c0_61, %c0_62, %c0_63] : memref<8x14x84xf32, #tpu.memory_space<vmem>>, vector<8x10x84xf32>
    %c0_64 = arith.constant 0 : index
    %c0_65 = arith.constant 0 : index
    %c0_66 = arith.constant 0 : index
    %68 = vector.load %arg6[%c0_64, %c0_65, %c0_66] : memref<5x84x160xf32, #tpu.memory_space<vmem>>, vector<1x84x160xf32>
    %69 = vector.shape_cast %68 : vector<1x84x160xf32> to vector<84x160xf32>
    %70 = vector.shape_cast %69 : vector<84x160xf32> to vector<1x84x160xf32>
    %71 = vector.broadcast %70 : vector<1x84x160xf32> to vector<8x84x160xf32>
    %cst_67 = arith.constant dense<0.000000e+00> : vector<8x10x160xf32>
    %72 = tpu.matmul %67, %71, %cst_67 {dimension_numbers = #tpu.dot_dimension_numbers<[2], [1], [1], [2], [0, 0, 0, 1, 1, 2], [0], [0]>} : vector<8x10x84xf32>, vector<8x84x160xf32>, vector<8x10x160xf32> -> vector<8x10x160xf32>
    %c0_68 = arith.constant 0 : index
    %c1_69 = arith.constant 1 : index
    %c0_70 = arith.constant 0 : index
    %73 = vector.load %arg18[%c0_68, %c1_69, %c0_70] : memref<8x14x84xf32, #tpu.memory_space<vmem>>, vector<8x10x84xf32>
    %c1_71 = arith.constant 1 : index
    %c0_72 = arith.constant 0 : index
    %c0_73 = arith.constant 0 : index
    %74 = vector.load %arg6[%c1_71, %c0_72, %c0_73] : memref<5x84x160xf32, #tpu.memory_space<vmem>>, vector<1x84x160xf32>
    %75 = vector.shape_cast %74 : vector<1x84x160xf32> to vector<84x160xf32>
    %76 = vector.shape_cast %75 : vector<84x160xf32> to vector<1x84x160xf32>
    %77 = vector.broadcast %76 : vector<1x84x160xf32> to vector<8x84x160xf32>
    %cst_74 = arith.constant dense<0.000000e+00> : vector<8x10x160xf32>
    %78 = tpu.matmul %73, %77, %cst_74 {dimension_numbers = #tpu.dot_dimension_numbers<[2], [1], [1], [2], [0, 0, 0, 1, 1, 2], [0], [0]>} : vector<8x10x84xf32>, vector<8x84x160xf32>, vector<8x10x160xf32> -> vector<8x10x160xf32>
    %79 = arith.addf %72, %78 : vector<8x10x160xf32>
    %c0_75 = arith.constant 0 : index
    %c2_76 = arith.constant 2 : index
    %c0_77 = arith.constant 0 : index
    %80 = vector.load %arg18[%c0_75, %c2_76, %c0_77] : memref<8x14x84xf32, #tpu.memory_space<vmem>>, vector<8x10x84xf32>
    %c2_78 = arith.constant 2 : index
    %c0_79 = arith.constant 0 : index
    %c0_80 = arith.constant 0 : index
    %81 = vector.load %arg6[%c2_78, %c0_79, %c0_80] : memref<5x84x160xf32, #tpu.memory_space<vmem>>, vector<1x84x160xf32>
    %82 = vector.shape_cast %81 : vector<1x84x160xf32> to vector<84x160xf32>
    %83 = vector.shape_cast %82 : vector<84x160xf32> to vector<1x84x160xf32>
    %84 = vector.broadcast %83 : vector<1x84x160xf32> to vector<8x84x160xf32>
    %cst_81 = arith.constant dense<0.000000e+00> : vector<8x10x160xf32>
    %85 = tpu.matmul %80, %84, %cst_81 {dimension_numbers = #tpu.dot_dimension_numbers<[2], [1], [1], [2], [0, 0, 0, 1, 1, 2], [0], [0]>} : vector<8x10x84xf32>, vector<8x84x160xf32>, vector<8x10x160xf32> -> vector<8x10x160xf32>
    %86 = arith.addf %79, %85 : vector<8x10x160xf32>
    %c0_82 = arith.constant 0 : index
    %c3_83 = arith.constant 3 : index
    %c0_84 = arith.constant 0 : index
    %87 = vector.load %arg18[%c0_82, %c3_83, %c0_84] : memref<8x14x84xf32, #tpu.memory_space<vmem>>, vector<8x10x84xf32>
    %c3_85 = arith.constant 3 : index
    %c0_86 = arith.constant 0 : index
    %c0_87 = arith.constant 0 : index
    %88 = vector.load %arg6[%c3_85, %c0_86, %c0_87] : memref<5x84x160xf32, #tpu.memory_space<vmem>>, vector<1x84x160xf32>
    %89 = vector.shape_cast %88 : vector<1x84x160xf32> to vector<84x160xf32>
    %90 = vector.shape_cast %89 : vector<84x160xf32> to vector<1x84x160xf32>
    %91 = vector.broadcast %90 : vector<1x84x160xf32> to vector<8x84x160xf32>
    %cst_88 = arith.constant dense<0.000000e+00> : vector<8x10x160xf32>
    %92 = tpu.matmul %87, %91, %cst_88 {dimension_numbers = #tpu.dot_dimension_numbers<[2], [1], [1], [2], [0, 0, 0, 1, 1, 2], [0], [0]>} : vector<8x10x84xf32>, vector<8x84x160xf32>, vector<8x10x160xf32> -> vector<8x10x160xf32>
    %93 = arith.addf %86, %92 : vector<8x10x160xf32>
    %c0_89 = arith.constant 0 : index
    %c4_90 = arith.constant 4 : index
    %c0_91 = arith.constant 0 : index
    %94 = vector.load %arg18[%c0_89, %c4_90, %c0_91] : memref<8x14x84xf32, #tpu.memory_space<vmem>>, vector<8x10x84xf32>
    %c4_92 = arith.constant 4 : index
    %c0_93 = arith.constant 0 : index
    %c0_94 = arith.constant 0 : index
    %95 = vector.load %arg6[%c4_92, %c0_93, %c0_94] : memref<5x84x160xf32, #tpu.memory_space<vmem>>, vector<1x84x160xf32>
    %96 = vector.shape_cast %95 : vector<1x84x160xf32> to vector<84x160xf32>
    %97 = vector.shape_cast %96 : vector<84x160xf32> to vector<1x84x160xf32>
    %98 = vector.broadcast %97 : vector<1x84x160xf32> to vector<8x84x160xf32>
    %cst_95 = arith.constant dense<0.000000e+00> : vector<8x10x160xf32>
    %99 = tpu.matmul %94, %98, %cst_95 {dimension_numbers = #tpu.dot_dimension_numbers<[2], [1], [1], [2], [0, 0, 0, 1, 1, 2], [0], [0]>} : vector<8x10x84xf32>, vector<8x84x160xf32>, vector<8x10x160xf32> -> vector<8x10x160xf32>
    %100 = arith.addf %93, %99 : vector<8x10x160xf32>
    %c0_96 = arith.constant 0 : index
    %c0_97 = arith.constant 0 : index
    %101 = vector.load %arg7[%c0_96, %c0_97] : memref<1x160xf32, #tpu.memory_space<vmem>>, vector<1x160xf32>
    %102 = vector.shape_cast %101 : vector<1x160xf32> to vector<1x1x160xf32>
    %103 = vector.broadcast %102 : vector<1x1x160xf32> to vector<8x10x160xf32>
    %104 = arith.addf %100, %103 : vector<8x10x160xf32>
    %cst_98 = arith.constant 0.000000e+00 : f32
    %105 = vector.broadcast %cst_98 : f32 to vector<8x10x160xf32>
    %106 = arith.maximumf %104, %105 : vector<8x10x160xf32>
    %c0_99 = arith.constant 0 : index
    %c0_100 = arith.constant 0 : index
    %c0_101 = arith.constant 0 : index
    %107 = vector.load %arg8[%c0_99, %c0_100, %c0_101] : memref<2x5x10xf32, #tpu.memory_space<vmem>>, vector<1x5x10xf32>
    %108 = vector.shape_cast %107 : vector<1x5x10xf32> to vector<5x10xf32>
    %109 = vector.shape_cast %108 : vector<5x10xf32> to vector<1x5x10xf32>
    %110 = vector.broadcast %109 : vector<1x5x10xf32> to vector<8x5x10xf32>
    %cst_102 = arith.constant dense<0.000000e+00> : vector<8x5x160xf32>
    %111 = tpu.matmul %110, %106, %cst_102 {dimension_numbers = #tpu.dot_dimension_numbers<[2], [1], [1], [2], [0, 0, 0, 1, 1, 2], [0], [0]>} : vector<8x5x10xf32>, vector<8x10x160xf32>, vector<8x5x160xf32> -> vector<8x5x160xf32>
    %c1_103 = arith.constant 1 : index
    %c0_104 = arith.constant 0 : index
    %c0_105 = arith.constant 0 : index
    %112 = vector.load %arg8[%c1_103, %c0_104, %c0_105] : memref<2x5x10xf32, #tpu.memory_space<vmem>>, vector<1x5x10xf32>
    %113 = vector.shape_cast %112 : vector<1x5x10xf32> to vector<5x10xf32>
    %114 = vector.shape_cast %113 : vector<5x10xf32> to vector<1x5x10xf32>
    %115 = vector.broadcast %114 : vector<1x5x10xf32> to vector<8x5x10xf32>
    %cst_106 = arith.constant dense<0.000000e+00> : vector<8x5x160xf32>
    %116 = tpu.matmul %115, %106, %cst_106 {dimension_numbers = #tpu.dot_dimension_numbers<[2], [1], [1], [2], [0, 0, 0, 1, 1, 2], [0], [0]>} : vector<8x5x10xf32>, vector<8x10x160xf32>, vector<8x5x160xf32> -> vector<8x5x160xf32>
    %117 = arith.maximumf %111, %116 : vector<8x5x160xf32>
    %c0_107 = arith.constant 0 : index
    %c0_108 = arith.constant 0 : index
    %c0_109 = arith.constant 0 : index
    %118 = vector.load %arg9[%c0_107, %c0_108, %c0_109] : memref<2x160x80xf32, #tpu.memory_space<vmem>>, vector<1x160x80xf32>
    %119 = vector.shape_cast %118 : vector<1x160x80xf32> to vector<160x80xf32>
    %120 = vector.shape_cast %119 : vector<160x80xf32> to vector<1x160x80xf32>
    %121 = vector.broadcast %120 : vector<1x160x80xf32> to vector<8x160x80xf32>
    %cst_110 = arith.constant dense<0.000000e+00> : vector<8x5x80xf32>
    %122 = tpu.matmul %117, %121, %cst_110 {dimension_numbers = #tpu.dot_dimension_numbers<[2], [1], [1], [2], [0, 0, 0, 1, 1, 2], [0], [0]>} : vector<8x5x160xf32>, vector<8x160x80xf32>, vector<8x5x80xf32> -> vector<8x5x80xf32>
    %c1_111 = arith.constant 1 : index
    %c0_112 = arith.constant 0 : index
    %c0_113 = arith.constant 0 : index
    %123 = vector.load %arg9[%c1_111, %c0_112, %c0_113] : memref<2x160x80xf32, #tpu.memory_space<vmem>>, vector<1x160x80xf32>
    %124 = vector.shape_cast %123 : vector<1x160x80xf32> to vector<160x80xf32>
    %125 = vector.shape_cast %124 : vector<160x80xf32> to vector<1x160x80xf32>
    %126 = vector.broadcast %125 : vector<1x160x80xf32> to vector<8x160x80xf32>
    %cst_114 = arith.constant dense<0.000000e+00> : vector<8x5x80xf32>
    %127 = tpu.matmul %117, %126, %cst_114 {dimension_numbers = #tpu.dot_dimension_numbers<[2], [1], [1], [2], [0, 0, 0, 1, 1, 2], [0], [0]>} : vector<8x5x160xf32>, vector<8x160x80xf32>, vector<8x5x80xf32> -> vector<8x5x80xf32>
    %128 = arith.maximumf %122, %127 : vector<8x5x80xf32>
    %c0_115 = arith.constant 0 : index
    %c0_116 = arith.constant 0 : index
    %c0_117 = arith.constant 0 : index
    %129 = vector.load %arg19[%c0_115, %c0_116, %c0_117] : memref<8x5x80xf32, #tpu.memory_space<vmem>>, vector<8x5x80xf32>
    tpu.vector_store %arg19[%c0_115, %c0_116, %c0_117], %128 {strides = array<i32>} : memref<8x5x80xf32, #tpu.memory_space<vmem>>, vector<8x5x80xf32>,
    %c0_118 = arith.constant 0 : index
    %c0_119 = arith.constant 0 : index
    %c0_120 = arith.constant 0 : index
    %130 = vector.load %arg19[%c0_118, %c0_119, %c0_120] : memref<8x5x80xf32, #tpu.memory_space<vmem>>, vector<8x1x80xf32>
    %c0_121 = arith.constant 0 : index
    %c0_122 = arith.constant 0 : index
    %c0_123 = arith.constant 0 : index
    %131 = vector.load %arg10[%c0_121, %c0_122, %c0_123] : memref<5x80x120xf32, #tpu.memory_space<vmem>>, vector<1x80x120xf32>
    %132 = vector.shape_cast %131 : vector<1x80x120xf32> to vector<80x120xf32>
    %133 = vector.shape_cast %132 : vector<80x120xf32> to vector<1x80x120xf32>
    %134 = vector.broadcast %133 : vector<1x80x120xf32> to vector<8x80x120xf32>
    %cst_124 = arith.constant dense<0.000000e+00> : vector<8x1x120xf32>
    %135 = tpu.matmul %130, %134, %cst_124 {dimension_numbers = #tpu.dot_dimension_numbers<[2], [1], [1], [2], [0, 0, 0, 1, 1, 2], [0], [0]>} : vector<8x1x80xf32>, vector<8x80x120xf32>, vector<8x1x120xf32> -> vector<8x1x120xf32>
    %c0_125 = arith.constant 0 : index
    %c1_126 = arith.constant 1 : index
    %c0_127 = arith.constant 0 : index
    %136 = vector.load %arg19[%c0_125, %c1_126, %c0_127] : memref<8x5x80xf32, #tpu.memory_space<vmem>>, vector<8x1x80xf32>
    %c1_128 = arith.constant 1 : index
    %c0_129 = arith.constant 0 : index
    %c0_130 = arith.constant 0 : index
    %137 = vector.load %arg10[%c1_128, %c0_129, %c0_130] : memref<5x80x120xf32, #tpu.memory_space<vmem>>, vector<1x80x120xf32>
    %138 = vector.shape_cast %137 : vector<1x80x120xf32> to vector<80x120xf32>
    %139 = vector.shape_cast %138 : vector<80x120xf32> to vector<1x80x120xf32>
    %140 = vector.broadcast %139 : vector<1x80x120xf32> to vector<8x80x120xf32>
    %cst_131 = arith.constant dense<0.000000e+00> : vector<8x1x120xf32>
    %141 = tpu.matmul %136, %140, %cst_131 {dimension_numbers = #tpu.dot_dimension_numbers<[2], [1], [1], [2], [0, 0, 0, 1, 1, 2], [0], [0]>} : vector<8x1x80xf32>, vector<8x80x120xf32>, vector<8x1x120xf32> -> vector<8x1x120xf32>
    %142 = arith.addf %135, %141 : vector<8x1x120xf32>
    %c0_132 = arith.constant 0 : index
    %c2_133 = arith.constant 2 : index
    %c0_134 = arith.constant 0 : index
    %143 = vector.load %arg19[%c0_132, %c2_133, %c0_134] : memref<8x5x80xf32, #tpu.memory_space<vmem>>, vector<8x1x80xf32>
    %c2_135 = arith.constant 2 : index
    %c0_136 = arith.constant 0 : index
    %c0_137 = arith.constant 0 : index
    %144 = vector.load %arg10[%c2_135, %c0_136, %c0_137] : memref<5x80x120xf32, #tpu.memory_space<vmem>>, vector<1x80x120xf32>
    %145 = vector.shape_cast %144 : vector<1x80x120xf32> to vector<80x120xf32>
    %146 = vector.shape_cast %145 : vector<80x120xf32> to vector<1x80x120xf32>
    %147 = vector.broadcast %146 : vector<1x80x120xf32> to vector<8x80x120xf32>
    %cst_138 = arith.constant dense<0.000000e+00> : vector<8x1x120xf32>
    %148 = tpu.matmul %143, %147, %cst_138 {dimension_numbers = #tpu.dot_dimension_numbers<[2], [1], [1], [2], [0, 0, 0, 1, 1, 2], [0], [0]>} : vector<8x1x80xf32>, vector<8x80x120xf32>, vector<8x1x120xf32> -> vector<8x1x120xf32>
    %149 = arith.addf %142, %148 : vector<8x1x120xf32>
    %c0_139 = arith.constant 0 : index
    %c3_140 = arith.constant 3 : index
    %c0_141 = arith.constant 0 : index
    %150 = vector.load %arg19[%c0_139, %c3_140, %c0_141] : memref<8x5x80xf32, #tpu.memory_space<vmem>>, vector<8x1x80xf32>
    %c3_142 = arith.constant 3 : index
    %c0_143 = arith.constant 0 : index
    %c0_144 = arith.constant 0 : index
    %151 = vector.load %arg10[%c3_142, %c0_143, %c0_144] : memref<5x80x120xf32, #tpu.memory_space<vmem>>, vector<1x80x120xf32>
    %152 = vector.shape_cast %151 : vector<1x80x120xf32> to vector<80x120xf32>
    %153 = vector.shape_cast %152 : vector<80x120xf32> to vector<1x80x120xf32>
    %154 = vector.broadcast %153 : vector<1x80x120xf32> to vector<8x80x120xf32>
    %cst_145 = arith.constant dense<0.000000e+00> : vector<8x1x120xf32>
    %155 = tpu.matmul %150, %154, %cst_145 {dimension_numbers = #tpu.dot_dimension_numbers<[2], [1], [1], [2], [0, 0, 0, 1, 1, 2], [0], [0]>} : vector<8x1x80xf32>, vector<8x80x120xf32>, vector<8x1x120xf32> -> vector<8x1x120xf32>
    %156 = arith.addf %149, %155 : vector<8x1x120xf32>
    %c0_146 = arith.constant 0 : index
    %c4_147 = arith.constant 4 : index
    %c0_148 = arith.constant 0 : index
    %157 = vector.load %arg19[%c0_146, %c4_147, %c0_148] : memref<8x5x80xf32, #tpu.memory_space<vmem>>, vector<8x1x80xf32>
    %c4_149 = arith.constant 4 : index
    %c0_150 = arith.constant 0 : index
    %c0_151 = arith.constant 0 : index
    %158 = vector.load %arg10[%c4_149, %c0_150, %c0_151] : memref<5x80x120xf32, #tpu.memory_space<vmem>>, vector<1x80x120xf32>
    %159 = vector.shape_cast %158 : vector<1x80x120xf32> to vector<80x120xf32>
    %160 = vector.shape_cast %159 : vector<80x120xf32> to vector<1x80x120xf32>
    %161 = vector.broadcast %160 : vector<1x80x120xf32> to vector<8x80x120xf32>
    %cst_152 = arith.constant dense<0.000000e+00> : vector<8x1x120xf32>
    %162 = tpu.matmul %157, %161, %cst_152 {dimension_numbers = #tpu.dot_dimension_numbers<[2], [1], [1], [2], [0, 0, 0, 1, 1, 2], [0], [0]>} : vector<8x1x80xf32>, vector<8x80x120xf32>, vector<8x1x120xf32> -> vector<8x1x120xf32>
    %163 = arith.addf %156, %162 : vector<8x1x120xf32>
    %c0_153 = arith.constant 0 : index
    %c0_154 = arith.constant 0 : index
    %164 = vector.load %arg11[%c0_153, %c0_154] : memref<1x120xf32, #tpu.memory_space<vmem>>, vector<1x120xf32>
    %165 = vector.shape_cast %164 : vector<1x120xf32> to vector<1x1x120xf32>
    %166 = vector.broadcast %165 : vector<1x1x120xf32> to vector<8x1x120xf32>
    %167 = arith.addf %163, %166 : vector<8x1x120xf32>
    %cst_155 = arith.constant 0.000000e+00 : f32
    %168 = vector.broadcast %cst_155 : f32 to vector<8x1x120xf32>
    %169 = arith.maximumf %167, %168 : vector<8x1x120xf32>
    %c0_156 = arith.constant 0 : index
    %c0_157 = arith.constant 0 : index
    %170 = vector.load %arg12[%c0_156, %c0_157] : memref<120x84xf32, #tpu.memory_space<vmem>>, vector<120x84xf32>
    %171 = vector.shape_cast %170 : vector<120x84xf32> to vector<1x120x84xf32>
    %172 = vector.broadcast %171 : vector<1x120x84xf32> to vector<8x120x84xf32>
    %cst_158 = arith.constant dense<0.000000e+00> : vector<8x1x84xf32>
    %173 = tpu.matmul %169, %172, %cst_158 {dimension_numbers = #tpu.dot_dimension_numbers<[2], [1], [1], [2], [0, 0, 0, 1, 1, 2], [0], [0]>} : vector<8x1x120xf32>, vector<8x120x84xf32>, vector<8x1x84xf32> -> vector<8x1x84xf32>
    %c0_159 = arith.constant 0 : index
    %c0_160 = arith.constant 0 : index
    %174 = vector.load %arg13[%c0_159, %c0_160] : memref<1x84xf32, #tpu.memory_space<vmem>>, vector<1x84xf32>
    %175 = vector.shape_cast %174 : vector<1x84xf32> to vector<1x1x84xf32>
    %176 = vector.broadcast %175 : vector<1x1x84xf32> to vector<8x1x84xf32>
    %177 = arith.addf %173, %176 : vector<8x1x84xf32>
    %cst_161 = arith.constant 0.000000e+00 : f32
    %178 = vector.broadcast %cst_161 : f32 to vector<8x1x84xf32>
    %179 = arith.maximumf %177, %178 : vector<8x1x84xf32>
    %c0_162 = arith.constant 0 : index
    %c0_163 = arith.constant 0 : index
    %180 = vector.load %arg14[%c0_162, %c0_163] : memref<84x128xf32, #tpu.memory_space<vmem>>, vector<84x128xf32>
    %181 = vector.shape_cast %180 : vector<84x128xf32> to vector<1x84x128xf32>
    %182 = vector.broadcast %181 : vector<1x84x128xf32> to vector<8x84x128xf32>
    %cst_164 = arith.constant dense<0.000000e+00> : vector<8x1x128xf32>
    %183 = tpu.matmul %179, %182, %cst_164 {dimension_numbers = #tpu.dot_dimension_numbers<[2], [1], [1], [2], [0, 0, 0, 1, 1, 2], [0], [0]>} : vector<8x1x84xf32>, vector<8x84x128xf32>, vector<8x1x128xf32> -> vector<8x1x128xf32>
    %c0_165 = arith.constant 0 : index
    %c0_166 = arith.constant 0 : index
    %184 = vector.load %arg15[%c0_165, %c0_166] : memref<1x128xf32, #tpu.memory_space<vmem>>, vector<1x128xf32>
    %185 = vector.shape_cast %184 : vector<1x128xf32> to vector<1x1x128xf32>
    %186 = vector.broadcast %185 : vector<1x1x128xf32> to vector<8x1x128xf32>
    %187 = arith.addf %183, %186 : vector<8x1x128xf32>
    %cst_167 = arith.constant dense<0xFF800000> : vector<8x1xf32>
    %188 = vector.multi_reduction <maximumf>, %187, %cst_167 [2] : vector<8x1x128xf32> to vector<8x1xf32>
    %189 = vector.shape_cast %188 : vector<8x1xf32> to vector<8x1x1xf32>
    %190 = vector.broadcast %189 : vector<8x1x1xf32> to vector<8x1x128xf32>
    %191 = arith.subf %187, %190 : vector<8x1x128xf32>
    %192 = math.exp %191 : vector<8x1x128xf32>
    %cst_168 = arith.constant dense<0.000000e+00> : vector<8x1xf32>
    %193 = vector.multi_reduction <add>, %192, %cst_168 [2] : vector<8x1x128xf32> to vector<8x1xf32>
    %194 = vector.shape_cast %193 : vector<8x1xf32> to vector<8x1x1xf32>
    %195 = math.log %194 : vector<8x1x1xf32>
    %196 = vector.broadcast %195 : vector<8x1x1xf32> to vector<8x1x128xf32>
    %197 = arith.subf %191, %196 : vector<8x1x128xf32>
    %c0_169 = arith.constant 0 : index
    %c0_170 = arith.constant 0 : index
    %c0_171 = arith.constant 0 : index
    %198 = vector.load %arg16[%c0_169, %c0_170, %c0_171] : memref<8x1x128xf32, #tpu.memory_space<vmem>>, vector<8x1x128xf32>
    tpu.vector_store %arg16[%c0_169, %c0_170, %c0_171], %197 {strides = array<i32>} : memref<8x1x128xf32, #tpu.memory_space<vmem>>, vector<8x1x128xf32>,
    return
  }
  func.func @transform_0(%arg0: i32) -> (i32, i32, i32) {
    %c0_i32 = arith.constant 0 : i32
    %c0_i32_0 = arith.constant 0 : i32
    %c0_i32_1 = arith.constant 0 : i32
    return %arg0, %c0_i32, %c0_i32_0 : i32, i32, i32
  }
  func.func @transform_1(%arg0: i32) -> (i32, i32, i32) {
    %c0_i32 = arith.constant 0 : i32
    %c0_i32_0 = arith.constant 0 : i32
    %c0_i32_1 = arith.constant 0 : i32
    %c0_i32_2 = arith.constant 0 : i32
    return %c0_i32, %c0_i32_0, %c0_i32_1 : i32, i32, i32
  }
  func.func @transform_2(%arg0: i32) -> (i32, i32) {
    %c0_i32 = arith.constant 0 : i32
    %c0_i32_0 = arith.constant 0 : i32
    %c0_i32_1 = arith.constant 0 : i32
    return %c0_i32, %c0_i32_0 : i32, i32
  }
  func.func @transform_3(%arg0: i32) -> (i32, i32, i32) {
    %c0_i32 = arith.constant 0 : i32
    %c0_i32_0 = arith.constant 0 : i32
    %c0_i32_1 = arith.constant 0 : i32
    %c0_i32_2 = arith.constant 0 : i32
    return %c0_i32, %c0_i32_0, %c0_i32_1 : i32, i32, i32
  }
  func.func @transform_4(%arg0: i32) -> (i32, i32, i32) {
    %c0_i32 = arith.constant 0 : i32
    %c0_i32_0 = arith.constant 0 : i32
    %c0_i32_1 = arith.constant 0 : i32
    %c0_i32_2 = arith.constant 0 : i32
    return %c0_i32, %c0_i32_0, %c0_i32_1 : i32, i32, i32
  }
  func.func @transform_5(%arg0: i32) -> (i32, i32, i32) {
    %c0_i32 = arith.constant 0 : i32
    %c0_i32_0 = arith.constant 0 : i32
    %c0_i32_1 = arith.constant 0 : i32
    %c0_i32_2 = arith.constant 0 : i32
    return %c0_i32, %c0_i32_0, %c0_i32_1 : i32, i32, i32
  }
  func.func @transform_6(%arg0: i32) -> (i32, i32) {
    %c0_i32 = arith.constant 0 : i32
    %c0_i32_0 = arith.constant 0 : i32
    %c0_i32_1 = arith.constant 0 : i32
    return %c0_i32, %c0_i32_0 : i32, i32
  }
  func.func @transform_7(%arg0: i32) -> (i32, i32, i32) {
    %c0_i32 = arith.constant 0 : i32
    %c0_i32_0 = arith.constant 0 : i32
    %c0_i32_1 = arith.constant 0 : i32
    %c0_i32_2 = arith.constant 0 : i32
    return %c0_i32, %c0_i32_0, %c0_i32_1 : i32, i32, i32
  }
  func.func @transform_8(%arg0: i32) -> (i32, i32, i32) {
    %c0_i32 = arith.constant 0 : i32
    %c0_i32_0 = arith.constant 0 : i32
    %c0_i32_1 = arith.constant 0 : i32
    %c0_i32_2 = arith.constant 0 : i32
    return %c0_i32, %c0_i32_0, %c0_i32_1 : i32, i32, i32
  }
  func.func @transform_9(%arg0: i32) -> (i32, i32, i32) {
    %c0_i32 = arith.constant 0 : i32
    %c0_i32_0 = arith.constant 0 : i32
    %c0_i32_1 = arith.constant 0 : i32
    %c0_i32_2 = arith.constant 0 : i32
    return %c0_i32, %c0_i32_0, %c0_i32_1 : i32, i32, i32
  }
  func.func @transform_10(%arg0: i32) -> (i32, i32) {
    %c0_i32 = arith.constant 0 : i32
    %c0_i32_0 = arith.constant 0 : i32
    %c0_i32_1 = arith.constant 0 : i32
    return %c0_i32, %c0_i32_0 : i32, i32
  }
  func.func @transform_11(%arg0: i32) -> (i32, i32) {
    %c0_i32 = arith.constant 0 : i32
    %c0_i32_0 = arith.constant 0 : i32
    %c0_i32_1 = arith.constant 0 : i32
    return %c0_i32, %c0_i32_0 : i32, i32
  }
  func.func @transform_12(%arg0: i32) -> (i32, i32) {
    %c0_i32 = arith.constant 0 : i32
    %c0_i32_0 = arith.constant 0 : i32
    %c0_i32_1 = arith.constant 0 : i32
    return %c0_i32, %c0_i32_0 : i32, i32
  }
  func.func @transform_13(%arg0: i32) -> (i32, i32) {
    %c0_i32 = arith.constant 0 : i32
    %c0_i32_0 = arith.constant 0 : i32
    %c0_i32_1 = arith.constant 0 : i32
    return %c0_i32, %c0_i32_0 : i32, i32
  }
  func.func @transform_14(%arg0: i32) -> (i32, i32) {
    %c0_i32 = arith.constant 0 : i32
    %c0_i32_0 = arith.constant 0 : i32
    %c0_i32_1 = arith.constant 0 : i32
    return %c0_i32, %c0_i32_0 : i32, i32
  }
  func.func @transform_15(%arg0: i32) -> (i32, i32, i32) {
    %c0_i32 = arith.constant 0 : i32
    %c0_i32_0 = arith.constant 0 : i32
    %c0_i32_1 = arith.constant 0 : i32
    return %arg0, %c0_i32, %c0_i32_0 : i32, i32, i32
  }
}

</mosaic_0001>

<bundles_post_ra>
// kernel: tpu_custom_call.1
= control target key start
LH: loop header
LB: loop body
LE: loop exit
PB: predicated region body
PF: predicated region fallthrough
CT: control target
= control target key end

     0   :  { %20 = vsyncpa [#allocation6], 0  ;;  %s30680_s0 = inlined_call_operand.vmem [shape: f32[16,28,28], index: 0, kind: input, shape index: {}]   ;;  %s30681_s1 = inlined_call_operand.vmem [shape: f32[5,28,168], index: 1, kind: input, shape index: {}]   ;;  %s30682_s2 = inlined_call_operand.vmem [shape: f32[1,168], index: 2, kind: input, shape index: {}]   ;;  %s30683_s3 = inlined_call_operand.vmem [shape: f32[2,14,28], index: 3, kind: input, shape index: {}]   ;;  %s30684_s4 = inlined_call_operand.vmem [shape: f32[2,168,84], index: 4, kind: input, shape index: {}]   ;;  %s30685_s5 = inlined_call_operand.vmem [shape: f32[5,84,160], index: 5, kind: input, shape index: {}]   ;;  %s30686_s6 = inlined_call_operand.vmem [shape: f32[1,160], index: 6, kind: input, shape index: {}]   ;;  %s30687_s7 = inlined_call_operand.vmem [shape: f32[2,5,10], index: 7, kind: input, shape index: {}]   ;;  %s30688_s8 = inlined_call_operand.vmem [shape: f32[2,160,80], index: 8, kind: input, shape index: {}]   ;;  %s30689_s9 = inlined_call_operand.vmem [shape: f32[5,80,120], index: 9, kind: input, shape index: {}]   ;;  %s30690_s10 = inlined_call_operand.vmem [shape: f32[1,120], index: 10, kind: input, shape index: {}]   ;;  %s30691_s11 = inlined_call_operand.vmem [shape: f32[120,84], index: 11, kind: input, shape index: {}]   ;;  %s30692_s12 = inlined_call_operand.vmem [shape: f32[1,84], index: 12, kind: input, shape index: {}]   ;;  %s30693_s13 = inlined_call_operand.vmem [shape: f32[84,128], index: 13, kind: input, shape index: {}]   ;;  %s30694_s14 = inlined_call_operand.vmem [shape: f32[1,128], index: 14, kind: input, shape index: {}]   ;;  %s30695_s15 = inlined_call_operand.hbm [shape: f32[16,1,128], index: 15, kind: output, shape index: {}]  }
   0x1   :  { %22 = vsyncpa [#allocation6 + $0x1], 0  ;;  %s25241_s18 = smov 0   ;;  %s25243_s19 = smov 0  }
   0x2   :  { %s25245_s20 = smov 0   ;;  %s25247_s21 = smov 0  }
   0x3 LB: > { %30700 = sst [smem:[#allocation8_spill]] %s25148_s20  ;;  %s25262_s22 = sadd.s32 4294967295, %s25152_s21   ;;  %s25152_s21 = sphi %s25247_s21, %s30712_s21   ;;  %s25148_s20 = sphi %s25245_s20, %s30714_s20   ;;  %s25144_s19 = sphi %s25243_s19, %s30716_s19   ;;  %s25140_s18 = sphi %s25241_s18, %s30715_s18  }
   0x4   : > { %s18434_s23 = sadd.s32 4294967294, %s25152_s21   ;;  %s25266_s24 = sadd.s32 1, %s25152_s21  }
   0x5   : > { %30701 = sst [smem:[#allocation9_spill]] %s25266_s24  ;;  %s355_s25 = sadd.s32 1, %s25148_s20 }
   0x6   : > { %s352_s26 = ssub.s32 %s25152_s21, %s25266_s24  ;;  %p365_p0 = scmp.ne.s32.totalorder %s25148_s20, %s25144_s19 }
   0x7   : > { %p353_p1 = scmp.eq.s32.totalorder %s352_s26, 0  ;;  %p366_p2 = scmp.eq.s32.totalorder %s25262_s22, 1 }
   0x8   : > { %p371_p3 = scmp.ne.s32.totalorder %s25144_s19, %s25140_s18  ;;  %p372_p4 = scmp.eq.s32.totalorder %s18434_s23, 1 }
   0x9   : > { %s25277_s27 = scalar_select %p353_p1, %s25148_s20, %s355_s25  }
   0xa   : > { %p25279_p5 = por %p366_p2, %p365_p0  ;;  %p25283_p6 = por %p372_p4, %p371_p3 }
   0xb   : > { %30702 = sst [smem:[#allocation10_spill]] %s25277_s27  ;;  %p18437_p7 = scmp.ge.s32.totalorder %s25152_s21, 1 }
   0xc   : > { %s30704_s29 = scalar_select %p25283_p6, 1, 0 }
   0xd   : > { %p442_p8 = scmp.lt.s32.totalorder %s25152_s21, 3 }
   0xe   : > { %30705 = sst [smem:[#allocation11_spill]] %s30704_s29 }
   0xf   : > { %p443_p9 = pnand %p18437_p7, %p442_p8 }
  0x10   : > { %v18443_v0 = vld [vmem:[%s30681_s1 + $0x48] sm:$0xff] (!%p443_p9)  ;;  %v18445_v1 = vld [vmem:[%s30681_s1 + $0x58] sm:$0xff] (!%p443_p9)  ;;  %v18442_v2 = vld [vmem:[%s30681_s1 + $0x40] sm:$0xff] (!%p443_p9)  ;;  %vm690_vm0 = vcmask (!%p443_p9), 1043456   ;;  %v25154_v7 = vmov (!%p443_p9), 0.0   ;;  %s18439_s17 = sshll.u32 (!%p443_p9), %s25262_s22, 3 }
  0x11   : > { %446 = sbr.rel (%p443_p9) target bundleno = 3986 (0xf92), region = 80  ;;  %v25298_v3 = vpack.c.bf16 (!%p443_p9), %v18445_v1, %v18443_v0  ;;  %v18444_v4 = vld [vmem:[%s30681_s1 + $0x50] sm:$0xff] (!%p443_p9)  ;;  %v18447_v5 = vld [vmem:[%s30681_s1 + $0x68] sm:$0xff] (!%p443_p9)  ;;  %v18449_v6 = vld [vmem:[%s30681_s1 + $0x78] sm:$0xf] (!%p443_p9)  ;;  %761 = vmatprep.mubr.f32.mxu0 (!%p443_p9), %v25154_v7  ;;  %862 = vmatprep.mubr.f32.mxu1 (!%p443_p9), %v25154_v7  ;;  %vm499_vm1 = vcmask (!%p443_p9), 228352  }
  0x12   : > { %v25312_v8 = vpack.c.bf16 (!%p443_p9), %v18444_v4, %v18442_v2  ;;  %v25314_v9 = vpack.c.bf16 (!%p443_p9), %v18449_v6, %v18447_v5  ;;  %vm25155_vm2 = vmmov (!%p443_p9), 1   ;;  %v18446_v11 = vld [vmem:[%s30681_s1 + $0x60] sm:$0xff] (!%p443_p9)  ;;  %v18448_v12 = vld [vmem:[%s30681_s1 + $0x70] sm:$0xf] (!%p443_p9)  ;;  %p25330_p10 = scmp.lt.s32.totalorder (!%p443_p9), %s18439_s17, 15  ;;  %500 = vst.msk [vmem:[#allocation2] sm:$0xff] (!%p443_p9), %vm499_vm1, %v25154_v7 }
  0x13   : > { %vm25318_vm3 = vmpackc.low (!%p443_p9), %vm690_vm0, %vm25155_vm2  ;;  %501 = vst.msk [vmem:[#allocation2 + $0x8] sm:$0xff] (!%p443_p9), %vm499_vm1, %v25154_v7  ;;  %21326 = vmatprep.subr.bf16.mxu0 (!%p443_p9), %v25298_v3  ;;  %21336 = vmatprep.subr.bf16.mxu1 (!%p443_p9), %v25298_v3  ;;  %v25402_v13 = vpack.c.bf16 (!%p443_p9), %v18448_v12, %v18446_v11  ;;  %vm567_vm4 = vcmask (!%p443_p9), 224256   ;;  %v630_v0 = vld [vmem:[%s30681_s1 + $0x8] sm:$0xff] (!%p443_p9)  ;;  %v632_v1 = vld [vmem:[%s30681_s1 + $0x18] sm:$0xff] (!%p443_p9)  ;;  %vm6554_vm5 = vcmask (!%p443_p9), 326656   ;;  %vm7841_vm6 = vcmask (!%p443_p9), 687104  }
  0x14   : > { %502 = vst.msk [vmem:[#allocation2 + $0x10] sm:$0xff] (!%p443_p9), %vm499_vm1, %v25154_v7  ;;  %503 = vst.msk [vmem:[#allocation2 + $0x18] sm:$0xff] (!%p443_p9), %vm499_vm1, %v25154_v7  ;;  %21328 = vmatpush1.bf16.msra.mxu0 (!%p443_p9), %v25312_v8  ;;  %21338 = vmatpush1.bf16.msra.mxu1 (!%p443_p9), %v25312_v8  ;;  %v25573_v4 = vpack.c.bf16 (!%p443_p9), %v632_v1, %v630_v0  ;;  %v629_v11 = vld [vmem:[%s30681_s1] sm:$0xff] (!%p443_p9)  ;;  %v631_v12 = vld [vmem:[%s30681_s1 + $0x10] sm:$0xff] (!%p443_p9)  ;;  %vm7843_vm7 = vcmask (!%p443_p9), 685056   ;;  %vm11580_vm8 = vcmask (!%p443_p9), 1041408  }
  0x15   : > { %504 = vst.msk [vmem:[#allocation2 + $0x20] sm:$0xff] (!%p443_p9), %vm499_vm1, %v25154_v7  ;;  %505 = vst.msk [vmem:[#allocation2 + $0x28] sm:$0xff] (!%p443_p9), %vm499_vm1, %v25154_v7  ;;  %21331 = vmatprep.subr.msk.bf16.mxu0 (!%p443_p9), %vm25318_vm3, %v25314_v9  ;;  %21341 = vmatprep.subr.msk.bf16.mxu1 (!%p443_p9), %vm25318_vm3, %v25314_v9  ;;  %v18552_v0 = vld [vmem:[%s30681_s1 + $0xb0] sm:$0xf] (!%p443_p9)  ;;  %vm11576_vm10 = vcmask (!%p443_p9), 80896   ;;  %vm12806_vm11 = vcmask (!%p443_p9), 261120  }
  0x16   : > { %506 = vst.msk [vmem:[#allocation2 + $0x30] sm:$0xff] (!%p443_p9), %vm499_vm1, %v25154_v7  ;;  %507 = vst.msk [vmem:[#allocation2 + $0x38] sm:$0xff] (!%p443_p9), %vm499_vm1, %v25154_v7  ;;  %v6535_v10 = vld [vmem:[%s30684_s4 + $0x10] sm:$0xff] (!%p443_p9)  ;;  %vm25157_vm12 = vmmov (!%p443_p9), 0   ;;  %vm13980_vm13 = vcmask (!%p443_p9), 651264   ;;  %vm14026_vm14 = vcmask (!%p443_p9), 654336  }
  0x17   : > { %508 = vst.msk [vmem:[#allocation2 + $0x40] sm:$0xff] (!%p443_p9), %vm499_vm1, %v25154_v7  ;;  %509 = vst.msk [vmem:[#allocation2 + $0x48] sm:$0xff] (!%p443_p9), %vm499_vm1, %v25154_v7  ;;  %vm17061_vm15 = vcmask (!%p443_p9), 982016   ;;  %s488_s24 = sand.u32 (!%p443_p9), 1, %s25144_s19   ;;  %s19276_s23 = sshll.u32 (!%p443_p9), %s25262_s22, 7 }
  0x18   : > { %510 = vst.msk [vmem:[#allocation2 + $0x50] sm:$0xff] %vm499_vm1, %v25154_v7  ;;  %511 = vst.msk [vmem:[#allocation2 + $0x58] sm:$0xff] %vm499_vm1, %v25154_v7  ;;  %s30718_s17 = smov (!%p25330_p10, %s18439_s17), 15  ;;  %21334 = vmatpush1.bf16.msk.msra.mxu0 %vm25318_vm3, %v25402_v13  ;;  %21344 = vmatpush1.bf16.msk.msra.mxu1 %vm25318_vm3, %v25402_v13  ;;  %s18438_s27 = sshll.u32 %s488_s24, 3 }
  0x19   : > { %512 = vst.msk [vmem:[#allocation2 + $0x60] sm:$0xff] %vm499_vm1, %v25154_v7  ;;  %513 = vst.msk [vmem:[#allocation2 + $0x68] sm:$0xff] %vm499_vm1, %v25154_v7  ;;  %s19275_s25 = sshll.u32 %s30718_s17, 5  ;;  %21346 = vmatprep.subr.bf16.mxu0 %v25298_v3  ;;  %21356 = vmatprep.subr.bf16.mxu1 %v25298_v3  ;;  %s30611_s29 = scalar_lea.vmem [#allocation5], %s18438_s27 }
  0x1a   : > { %514 = vst.msk [vmem:[#allocation2 + $0x70] sm:$0xff] %vm499_vm1, %v25154_v7  ;;  %515 = vst.msk [vmem:[#allocation2 + $0x78] sm:$0xff] %vm499_vm1, %v25154_v7  ;;  %s25417_s16 = scalar_lea.vmem %s30680_s0, %s19275_s25  ;;  %s18372_s25 = sshll.u32 %s30611_s29, 4  ;;  %s30632_s25 = int_to_ptr.vmem [resolvable:$true] %s18372_s25 }
  0x1b   : > { %516 = vst.msk [vmem:[#allocation2 + $0x80] sm:$0xff] %vm499_vm1, %v25154_v7  ;;  %517 = vst.msk [vmem:[#allocation2 + $0x88] sm:$0xff] %vm499_vm1, %v25154_v7  ;;  %v532_v14 = vld [vmem:[%s25417_s16] sm:$0xff]  ;;  %v533_v16 = vld [vmem:[%s25417_s16 + $0x8] sm:$0xff]  ;;  %s30639_s22 = scalar_lea.sflag [#allocation6], %s488_s24  ;;  %s25090_s17 = scalar_lea.vmem %s30632_s25, 128 }
  0x1c   : > { %518 = vst.msk [vmem:[#allocation2 + $0x90] sm:$0xff] %vm499_vm1, %v25154_v7  ;;  %519 = vst.msk [vmem:[#allocation2 + $0x98] sm:$0xff] %vm499_vm1, %v25154_v7  ;;  %v536_v15 = vld [vmem:[%s25417_s16 + $0x20] sm:$0xff]  ;;  %v537_v17 = vld [vmem:[%s25417_s16 + $0x28] sm:$0xff]  ;;  %p25091_p11 = scmp.ne.s32.totalorder %s30632_s25, %s25090_s17  ;;  %s25158_s20 = smov [#allocation5]  }
  0x1d   : > { %520 = vst.msk [vmem:[#allocation2 + $0xa0] sm:$0xff] %vm499_vm1, %v25154_v7  ;;  %521 = vst.msk [vmem:[#allocation2 + $0xa8] sm:$0xff] %vm499_vm1, %v25154_v7  ;;  %v534_v18 = vld [vmem:[%s25417_s16 + $0x10] sm:$0xff]  ;;  %v535_v20 = vld [vmem:[%s25417_s16 + $0x18] sm:$0xf]  ;;  %s25094_s27 = sshll.u32 %s25158_s20, 4  ;;  %s25095_s27 = int_to_ptr.vmem [resolvable:$false] %s25094_s27 }
  0x1e   : > { %522 = vst.msk [vmem:[#allocation2 + $0xb0] sm:$0xff] %vm499_vm1, %v25154_v7  ;;  %523 = vst.msk [vmem:[#allocation2 + $0xb8] sm:$0xff] %vm499_vm1, %v25154_v7  ;;  %v538_v19 = vld [vmem:[%s25417_s16 + $0x30] sm:$0xff]  ;;  %v539_v21 = vld [vmem:[%s25417_s16 + $0x38] sm:$0xf]  ;;  %p25092_p12 = pnand %p25091_p11, %p25279_p5  ;;  %p25097_p0 = scmp.lt.s32.totalorder %s30632_s25, %s25095_s27 }
  0x1f   : > { %524 = vst.msk [vmem:[#allocation2 + $0xc0] sm:$0xff] %vm499_vm1, %v25154_v7  ;;  %525 = vst.msk [vmem:[#allocation2 + $0xc8] sm:$0xff] %vm499_vm1, %v25154_v7  ;;  %v540_v22 = vld [vmem:[%s25417_s16 + $0x40] sm:$0xff]  ;;  %v541_v24 = vld [vmem:[%s25417_s16 + $0x48] sm:$0xff] }
  0x20   : > { %526 = vst.msk [vmem:[#allocation2 + $0xd0] sm:$0xff] %vm499_vm1, %v25154_v7  ;;  %527 = vst.msk [vmem:[#allocation2 + $0xd8] sm:$0xff] %vm499_vm1, %v25154_v7  ;;  %v544_v23 = vld [vmem:[%s25417_s16 + $0x60] sm:$0xff]  ;;  %v545_v25 = vld [vmem:[%s25417_s16 + $0x68] sm:$0xff]  ;;  %p25093_p13 = pneg %p25092_p12 }
  0x21   : > { %528 = vst.msk [vmem:[#allocation2 + $0xe0] sm:$0xff] %vm499_vm1, %v25154_v7  ;;  %529 = vst.msk [vmem:[#allocation2 + $0xe8] sm:$0xff] %vm499_vm1, %v25154_v7  ;;  %v542_v26 = vld [vmem:[%s25417_s16 + $0x50] sm:$0xff]  ;;  %v543_v28 = vld [vmem:[%s25417_s16 + $0x58] sm:$0xf] }
  0x22   : > { %530 = vst.msk [vmem:[#allocation2 + $0xf0] sm:$0xff] %vm499_vm1, %v25154_v7  ;;  %531 = vst.msk [vmem:[#allocation2 + $0xf8] sm:$0xff] %vm499_vm1, %v25154_v7  ;;  %v546_v27 = vld [vmem:[%s25417_s16 + $0x70] sm:$0xff]  ;;  %v547_v29 = vld [vmem:[%s25417_s16 + $0x78] sm:$0xf] }
  0x23   : > { %564 = vst.msk [vmem:[#allocation2 + $0x2] sm:$0xff] %vm499_vm1, %v532_v14  ;;  %569 = vst.msk [vmem:[#allocation2 + $0x22] sm:$0xff] %vm499_vm1, %v536_v15  ;;  %v548_v30 = vld [vmem:[%s25417_s16 + $0x80] sm:$0xff]  ;;  %v549_v32 = vld [vmem:[%s25417_s16 + $0x88] sm:$0xff] }
  0x24   : > { %565 = vst.msk [vmem:[#allocation2 + $0xa] sm:$0xff] %vm499_vm1, %v533_v16  ;;  %570 = vst.msk [vmem:[#allocation2 + $0x2a] sm:$0xff] %vm499_vm1, %v537_v17  ;;  %v552_v31 = vld [vmem:[%s25417_s16 + $0xa0] sm:$0xff]  ;;  %v553_v33 = vld [vmem:[%s25417_s16 + $0xa8] sm:$0xff]  ;;  %v25607_v17 = vpack.c.bf16 %v631_v12, %v629_v11 }
  0x25   : > { %566 = vst.msk [vmem:[#allocation2 + $0x12] sm:$0xff] %vm499_vm1, %v534_v18  ;;  %571 = vst.msk [vmem:[#allocation2 + $0x32] sm:$0xff] %vm499_vm1, %v538_v19  ;;  %v550_v34 = vld [vmem:[%s25417_s16 + $0x90] sm:$0xff]  ;;  %v551_v36 = vld [vmem:[%s25417_s16 + $0x98] sm:$0xf] }
  0x26   : > { %568 = vst.msk [vmem:[#allocation2 + $0x1a] sm:$0xf] %vm567_vm4, %v535_v20  ;;  %572 = vst.msk [vmem:[#allocation2 + $0x3a] sm:$0xf] %vm567_vm4, %v539_v21  ;;  %v554_v35 = vld [vmem:[%s25417_s16 + $0xb0] sm:$0xff]  ;;  %v556_v45 = vld [vmem:[%s25417_s16 + $0xc0] sm:$0xff] }
  0x27   : > { %573 = vst.msk [vmem:[#allocation2 + $0x42] sm:$0xff] %vm499_vm1, %v540_v22  ;;  %577 = vst.msk [vmem:[#allocation2 + $0x62] sm:$0xff] %vm499_vm1, %v544_v23  ;;  %v555_v37 = vld [vmem:[%s25417_s16 + $0xb8] sm:$0xf]  ;;  %v560_v46 = vld [vmem:[%s25417_s16 + $0xe0] sm:$0xff] }
  0x28   : > { %574 = vst.msk [vmem:[#allocation2 + $0x4a] sm:$0xff] %vm499_vm1, %v541_v24  ;;  %578 = vst.msk [vmem:[#allocation2 + $0x6a] sm:$0xff] %vm499_vm1, %v545_v25  ;;  %v557_v47 = vld [vmem:[%s25417_s16 + $0xc8] sm:$0xff]  ;;  %v558_v49 = vld [vmem:[%s25417_s16 + $0xd0] sm:$0xff] }
  0x29   : > { %575 = vst.msk [vmem:[#allocation2 + $0x52] sm:$0xff] %vm499_vm1, %v542_v26  ;;  %579 = vst.msk [vmem:[#allocation2 + $0x72] sm:$0xff] %vm499_vm1, %v546_v27  ;;  %v561_v48 = vld [vmem:[%s25417_s16 + $0xe8] sm:$0xff]  ;;  %v562_v50 = vld [vmem:[%s25417_s16 + $0xf0] sm:$0xff] }
  0x2a   : > { %576 = vst.msk [vmem:[#allocation2 + $0x5a] sm:$0xf] %vm567_vm4, %v543_v28  ;;  %580 = vst.msk [vmem:[#allocation2 + $0x7a] sm:$0xf] %vm567_vm4, %v547_v29  ;;  %v637_v38 = vld [vmem:[#allocation2 + $0x1] sm:$0xff] }
  0x2b   : > { %581 = vst.msk [vmem:[#allocation2 + $0x82] sm:$0xff] %vm499_vm1, %v548_v30  ;;  %585 = vst.msk [vmem:[#allocation2 + $0xa2] sm:$0xff] %vm499_vm1, %v552_v31  ;;  %v641_v39 = vld [vmem:[#allocation2 + $0x21] sm:$0xff]  ;;  %18452 = vmatmul.mubr.msk.f32.vlgmr.msra.gmra.mrb[0].mxu0 %vm499_vm1, %v637_v38  ;;  %v638_v40 = vld [vmem:[#allocation2 + $0x9] sm:$0xff] }
  0x2c   : > { %582 = vst.msk [vmem:[#allocation2 + $0x8a] sm:$0xff] %vm499_vm1, %v549_v32  ;;  %586 = vst.msk [vmem:[#allocation2 + $0xaa] sm:$0xff] %vm499_vm1, %v553_v33  ;;  %18458 = vmatmul.mubr.msk.f32.vlgmr.msra.gmra.mrb[0].mxu1 %vm499_vm1, %v641_v39  ;;  %21348 = vmatpush1.bf16.msra.mxu0 %v25312_v8  ;;  %v642_v41 = vld [vmem:[#allocation2 + $0x29] sm:$0xff]  ;;  %v639_v42 = vld [vmem:[#allocation2 + $0x11] sm:$0xff] }
  0x2d   : > { %583 = vst.msk [vmem:[#allocation2 + $0x92] sm:$0xff] %vm499_vm1, %v550_v34  ;;  %587 = vst.msk [vmem:[#allocation2 + $0xb2] sm:$0xff] %vm499_vm1, %v554_v35  ;;  %21358 = vmatpush1.bf16.msra.mxu1 %v25312_v8  ;;  %767 = vmatprep.mubr.f32.mxu0 %v25154_v7  ;;  %v643_v43 = vld [vmem:[#allocation2 + $0x31] sm:$0xff]  ;;  %v640_v44 = vld [vmem:[#allocation2 + $0x19] sm:$0xf] }
  0x2e   : > { %584 = vst.msk [vmem:[#allocation2 + $0x9a] sm:$0xf] %vm567_vm4, %v551_v36  ;;  %588 = vst.msk [vmem:[#allocation2 + $0xba] sm:$0xf] %vm567_vm4, %v555_v37  ;;  %868 = vmatprep.mubr.f32.mxu1 %v25154_v7  ;;  %21351 = vmatprep.subr.msk.bf16.mxu0 %vm25318_vm3, %v25314_v9  ;;  %v644_v51 = vld [vmem:[#allocation2 + $0x39] sm:$0xf] }
  0x2f   : > { %21361 = vmatprep.subr.msk.bf16.mxu1 %vm25318_vm3, %v25314_v9  ;;  %18453 = vmatmul.mubr.msk.f32.gmra.mrb[2].mxu0 %vm499_vm1, %v638_v40  ;;  %589 = vst.msk [vmem:[#allocation2 + $0xc2] sm:$0xff] %vm499_vm1, %v556_v45  ;;  %593 = vst.msk [vmem:[#allocation2 + $0xe2] sm:$0xff] %vm499_vm1, %v560_v46  ;;  %v559_v52 = vld [vmem:[%s25417_s16 + $0xd8] sm:$0xf]  ;;  %v645_v54 = vld [vmem:[#allocation2 + $0x41] sm:$0xff] }
  0x30   : > { %18459 = vmatmul.mubr.msk.f32.gmra.mrb[2].mxu1 %vm499_vm1, %v642_v41  ;;  %773 = vmatprep.mubr.f32.mxu0 %v25154_v7  ;;  %590 = vst.msk [vmem:[#allocation2 + $0xca] sm:$0xff] %vm499_vm1, %v557_v47  ;;  %594 = vst.msk [vmem:[#allocation2 + $0xea] sm:$0xff] %vm499_vm1, %v561_v48  ;;  %v563_v53 = vld [vmem:[%s25417_s16 + $0xf8] sm:$0xf]  ;;  %v649_v55 = vld [vmem:[#allocation2 + $0x61] sm:$0xff]  ;;  %s30630_s16 = scalar_lea.hbm %s30695_s15, %s19276_s23  ;;  %s25096_s23 = scalar_lea.vmem %s25095_s27, 256 }
  0x31   : > { %874 = vmatprep.mubr.f32.mxu1 %v25154_v7  ;;  %21354 = vmatpush1.bf16.msk.msra.mxu0 %vm25318_vm3, %v25402_v13  ;;  %591 = vst.msk [vmem:[#allocation2 + $0xd2] sm:$0xff] %vm499_vm1, %v558_v49  ;;  %595 = vst.msk [vmem:[#allocation2 + $0xf2] sm:$0xff] %vm499_vm1, %v562_v50  ;;  %v646_v56 = vld [vmem:[#allocation2 + $0x49] sm:$0xff]  ;;  %v647_v58 = vld [vmem:[#allocation2 + $0x51] sm:$0xff]  ;;  %p25098_p1 = scmp.lt.s32.totalorder %s25096_s23, %s25090_s17 }
  0x32   : > { %21364 = vmatpush1.bf16.msk.msra.mxu1 %vm25318_vm3, %v25402_v13  ;;  %21366 = vmatprep.subr.bf16.mxu0 %v25298_v3  ;;  %592 = vst.msk [vmem:[#allocation2 + $0xda] sm:$0xf] %vm567_vm4, %v559_v52  ;;  %596 = vst.msk [vmem:[#allocation2 + $0xfa] sm:$0xf] %vm567_vm4, %v563_v53  ;;  %v650_v57 = vld [vmem:[#allocation2 + $0x69] sm:$0xff]  ;;  %v651_v59 = vld [vmem:[#allocation2 + $0x71] sm:$0xff] }
  0x33   : > { %21376 = vmatprep.subr.bf16.mxu1 %v25298_v3  ;;  %18454 = vmatmul.mubr.msk.f32.gmra.mrb[4].mxu0 %vm499_vm1, %v639_v42  ;;  %v648_v60 = vld [vmem:[#allocation2 + $0x59] sm:$0xf]  ;;  %v653_v62 = vld [vmem:[#allocation2 + $0x81] sm:$0xff]  ;;  %v654_v2 = vld [vmem:[#allocation2 + $0x89] sm:$0xff]  ;;  %p25099_p2 = por %p25098_p1, %p25097_p0 }
  0x34   : > { %18460 = vmatmul.mubr.msk.f32.gmra.mrb[4].mxu1 %vm499_vm1, %v643_v43  ;;  %779 = vmatprep.mubr.f32.mxu0 %v25154_v7  ;;  %v652_v61 = vld [vmem:[#allocation2 + $0x79] sm:$0xf]  ;;  %v657_v63 = vld [vmem:[#allocation2 + $0xa1] sm:$0xff]  ;;  %v655_v5 = vld [vmem:[#allocation2 + $0x91] sm:$0xff] }
  0x35   : > { %880 = vmatprep.mubr.f32.mxu1 %v25154_v7  ;;  %v659_v6 = vld [vmem:[#allocation2 + $0xb1] sm:$0xff]  ;;  %v633_v19 = vld [vmem:[%s30681_s1 + $0x20] sm:$0xff]  ;;  %v598_v30 = vld [vmem:[#allocation2 + $0x8] sm:$0xff]  ;;  %p25100_p3 = pnand %p25099_p2, %p25093_p13 }
  0x36   : > { %v636_v14 = vld [vmem:[%s30681_s1 + $0x38] sm:$0xf]  ;;  %v661_v15 = vld [vmem:[#allocation2 + $0xc1] sm:$0xff]  ;;  %v635_v20 = vld [vmem:[%s30681_s1 + $0x30] sm:$0xf] }
  0x37   : > { %18455 = vmatmul.mubr.msk.f32.gmra.mrb[6].mxu0 %vm499_vm1, %v640_v44  ;;  %v665_v16 = vld [vmem:[#allocation2 + $0xe1] sm:$0xff]  ;;  %v662_v21 = vld [vmem:[#allocation2 + $0xc9] sm:$0xff]  ;;  %v25623_v23 = vpack.c.bf16 %v635_v20, %v633_v19  ;;  %v600_v34 = vld [vmem:[#allocation2 + $0x18] sm:$0xf] }
  0x38   : > { %18461 = vmatmul.mubr.msk.f32.gmra.mrb[6].mxu1 %vm499_vm1, %v644_v51  ;;  %963 = vmatprep.mubr.f32.mxu0 %v25154_v7  ;;  %v666_v22 = vld [vmem:[#allocation2 + $0xe9] sm:$0xff]  ;;  %v663_v24 = vld [vmem:[#allocation2 + $0xd1] sm:$0xff]  ;;  %v597_v28 = vld [vmem:[#allocation2] sm:$0xff] }
  0x39   : > { %1064 = vmatprep.mubr.f32.mxu1 %v25154_v7  ;;  %v667_v25 = vld [vmem:[#allocation2 + $0xf1] sm:$0xff]  ;;  %v664_v26 = vld [vmem:[#allocation2 + $0xd9] sm:$0xf]  ;;  %v601_v29 = vld [vmem:[#allocation2 + $0x20] sm:$0xff] }
  0x3a   : > { %v668_v27 = vld [vmem:[#allocation2 + $0xf9] sm:$0xf]  ;;  %v602_v31 = vld [vmem:[#allocation2 + $0x28] sm:$0xff]  ;;  %v599_v32 = vld [vmem:[#allocation2 + $0x10] sm:$0xff] }
  0x3b   : > { %18464 = vmatmul.mubr.msk.f32.vlgmr.msra.gmra.mrb[8].mxu0 %vm499_vm1, %v645_v54  ;;  %v603_v33 = vld [vmem:[#allocation2 + $0x30] sm:$0xff]  ;;  %v604_v35 = vld [vmem:[#allocation2 + $0x38] sm:$0xf]  ;;  %v605_v36 = vld [vmem:[#allocation2 + $0x40] sm:$0xff] }
  0x3c   : > { %18470 = vmatmul.mubr.msk.f32.vlgmr.msra.gmra.mrb[8].mxu1 %vm499_vm1, %v649_v55  ;;  %21368 = vmatpush1.bf16.msra.mxu0 %v25312_v8  ;;  %v609_v37 = vld [vmem:[#allocation2 + $0x60] sm:$0xff]  ;;  %v606_v38 = vld [vmem:[#allocation2 + $0x48] sm:$0xff]  ;;  %v607_v40 = vld [vmem:[#allocation2 + $0x50] sm:$0xff] }
  0x3d   : > { %21378 = vmatpush1.bf16.msra.mxu1 %v25312_v8  ;;  %969 = vmatprep.mubr.f32.mxu0 %v25154_v7  ;;  %v610_v39 = vld [vmem:[#allocation2 + $0x68] sm:$0xff]  ;;  %v611_v41 = vld [vmem:[#allocation2 + $0x70] sm:$0xff]  ;;  %v608_v42 = vld [vmem:[#allocation2 + $0x58] sm:$0xf] }
  0x3e   : > { %1070 = vmatprep.mubr.f32.mxu1 %v25154_v7  ;;  %21371 = vmatprep.subr.msk.bf16.mxu0 %vm25318_vm3, %v25314_v9  ;;  %v612_v43 = vld [vmem:[#allocation2 + $0x78] sm:$0xf]  ;;  %v613_v44 = vld [vmem:[#allocation2 + $0x80] sm:$0xff]  ;;  %v18547_v46 = vld [vmem:[%s30681_s1 + $0x88] sm:$0xff] }
  0x3f   : > { %21381 = vmatprep.subr.msk.bf16.mxu1 %vm25318_vm3, %v25314_v9  ;;  %18465 = vmatmul.mubr.msk.f32.gmra.mrb[10].mxu0 %vm499_vm1, %v646_v56  ;;  %v617_v45 = vld [vmem:[#allocation2 + $0xa0] sm:$0xff]  ;;  %v18549_v47 = vld [vmem:[%s30681_s1 + $0x98] sm:$0xff]  ;;  %v614_v48 = vld [vmem:[#allocation2 + $0x88] sm:$0xff] }
  0x40   : > { %18471 = vmatmul.mubr.msk.f32.gmra.mrb[10].mxu1 %vm499_vm1, %v650_v57  ;;  %975 = vmatprep.mubr.f32.mxu0 %v25154_v7  ;;  %v618_v49 = vld [vmem:[#allocation2 + $0xa8] sm:$0xff]  ;;  %v25733_v50 = vpack.c.bf16 %v18549_v47, %v18547_v46  ;;  %v615_v51 = vld [vmem:[#allocation2 + $0x90] sm:$0xff]  ;;  %v616_v53 = vld [vmem:[#allocation2 + $0x98] sm:$0xf] }
  0x41   : > { %1076 = vmatprep.mubr.f32.mxu1 %v25154_v7  ;;  %21374 = vmatpush1.bf16.msk.msra.mxu0 %vm25318_vm3, %v25402_v13  ;;  %v619_v52 = vld [vmem:[#allocation2 + $0xb0] sm:$0xff]  ;;  %v620_v54 = vld [vmem:[#allocation2 + $0xb8] sm:$0xf]  ;;  %v18546_v55 = vld [vmem:[%s30681_s1 + $0x80] sm:$0xff] }
  0x42   : > { %21384 = vmatpush1.bf16.msk.msra.mxu1 %vm25318_vm3, %v25402_v13  ;;  %21386 = vmatprep.subr.bf16.mxu0 %v25298_v3  ;;  %v18548_v56 = vld [vmem:[%s30681_s1 + $0x90] sm:$0xff]  ;;  %v18551_v57 = vld [vmem:[%s30681_s1 + $0xa8] sm:$0xff]  ;;  %vm28600_vm9 = vmpackc.low %vm11580_vm8, %vm25155_vm2 }
  0x43   : > { %21396 = vmatprep.subr.bf16.mxu1 %v25298_v3  ;;  %18466 = vmatmul.mubr.msk.f32.gmra.mrb[12].mxu0 %vm499_vm1, %v647_v58  ;;  %v658_v3 = vld [vmem:[#allocation2 + $0xa9] sm:$0xff]  ;;  %v18553_v58 = vld [vmem:[%s30681_s1 + $0xb8] sm:$0xf] }
  0x44   : > { %18472 = vmatmul.mubr.msk.f32.gmra.mrb[12].mxu1 %vm499_vm1, %v651_v59  ;;  %981 = vmatprep.mubr.f32.mxu0 %v25154_v7  ;;  %v621_v59 = vld [vmem:[#allocation2 + $0xc0] sm:$0xff]  ;;  %v622_v1 = vld [vmem:[#allocation2 + $0xc8] sm:$0xff]  ;;  %v18608_v46 = vld [vmem:[%s30681_s1 + $0xf0] sm:$0xf] }
  0x45   : > { %1082 = vmatprep.mubr.f32.mxu1 %v25154_v7  ;;  %v2311_v11 = vld [vmem:[#allocation2 + $0x22] sm:$0xff]  ;;  %v2308_v12 = vld [vmem:[#allocation2 + $0xa] sm:$0xff] }
  0x46   : > { %v2319_v19 = vld [vmem:[#allocation2 + $0x62] sm:$0xff]  ;;  %v2316_v20 = vld [vmem:[#allocation2 + $0x4a] sm:$0xff] }
  0x47   : > { %18467 = vmatmul.mubr.msk.f32.gmra.mrb[14].mxu0 %vm499_vm1, %v648_v60  ;;  %v625_v60 = vld [vmem:[#allocation2 + $0xe0] sm:$0xff]  ;;  %v2332_v47 = vld [vmem:[#allocation2 + $0xca] sm:$0xff] }
  0x48   : > { %18473 = vmatmul.mubr.msk.f32.gmra.mrb[14].mxu1 %vm499_vm1, %v652_v61  ;;  %1165 = vmatprep.mubr.f32.mxu0 %v25154_v7  ;;  %v25767_v61 = vpack.c.bf16 %v18548_v56, %v18546_v55  ;;  %v3230_v55 = vld [vmem:[#allocation2 + $0x23] sm:$0xff]  ;;  %v3227_v56 = vld [vmem:[#allocation2 + $0xb] sm:$0xff] }
  0x49   : > { %1266 = vmatprep.mubr.f32.mxu1 %v25154_v7 }
  0x4b   : > { %18476 = vmatmul.mubr.msk.f32.vlgmr.msra.gmra.mrb[16].mxu0 %vm499_vm1, %v653_v62  ;;  %v25769_v62 = vpack.c.bf16 %v18553_v58, %v18551_v57  ;;  %v3231_v57 = vld [vmem:[#allocation2 + $0x2b] sm:$0xff]  ;;  %v3228_v58 = vld [vmem:[#allocation2 + $0x13] sm:$0xff] }
  0x4c   : > { %18482 = vmatmul.mubr.msk.f32.vlgmr.msra.gmra.mrb[16].mxu1 %vm499_vm1, %v657_v63  ;;  %21388 = vmatpush1.bf16.msra.mxu0 %v25312_v8  ;;  %v18550_v63 = vld [vmem:[%s30681_s1 + $0xa0] sm:$0xff] }
  0x4d   : > { %21398 = vmatpush1.bf16.msra.mxu1 %v25312_v8  ;;  %1171 = vmatprep.mubr.f32.mxu0 %v25154_v7  ;;  %v656_v8 = vld [vmem:[#allocation2 + $0x99] sm:$0xf] }
  0x4e   : > { %1272 = vmatprep.mubr.f32.mxu1 %v25154_v7  ;;  %21391 = vmatprep.subr.msk.bf16.mxu0 %vm25318_vm3, %v25314_v9 }
  0x4f   : > { %21401 = vmatprep.subr.msk.bf16.mxu1 %vm25318_vm3, %v25314_v9  ;;  %18477 = vmatmul.mubr.msk.f32.gmra.mrb[18].mxu0 %vm499_vm1, %v654_v2  ;;  %v660_v9 = vld [vmem:[#allocation2 + $0xb9] sm:$0xf]  ;;  %v626_v2 = vld [vmem:[#allocation2 + $0xe8] sm:$0xff] }
  0x50   : > { %18483 = vmatmul.mubr.msk.f32.gmra.mrb[18].mxu1 %vm499_vm1, %v658_v3  ;;  %1177 = vmatprep.mubr.f32.mxu0 %v25154_v7  ;;  %v25783_v3 = vpack.c.bf16 %v18552_v0, %v18550_v63  ;;  %v3238_v63 = vld [vmem:[#allocation2 + $0x63] sm:$0xff]  ;;  %v3235_v0 = vld [vmem:[#allocation2 + $0x4b] sm:$0xff] }
  0x51   : > { %1278 = vmatprep.mubr.f32.mxu1 %v25154_v7  ;;  %21394 = vmatpush1.bf16.msk.msra.mxu0 %vm25318_vm3, %v25402_v13 }
  0x52   : > { %21404 = vmatpush1.bf16.msk.msra.mxu1 %vm25318_vm3, %v25402_v13  ;;  %21406 = vmatprep.subr.bf16.mxu0 %v25573_v4  ;;  %v634_v13 = vld [vmem:[%s30681_s1 + $0x28] sm:$0xff] }
  0x53   : > { %21416 = vmatprep.subr.bf16.mxu1 %v25573_v4  ;;  %18478 = vmatmul.mubr.msk.f32.gmra.mrb[20].mxu0 %vm499_vm1, %v655_v5  ;;  %v25609_v18 = vpack.c.bf16 %v636_v14, %v634_v13  ;;  %v627_v5 = vld [vmem:[#allocation2 + $0xf0] sm:$0xff] }
  0x54   : > { %18484 = vmatmul.mubr.msk.f32.gmra.mrb[20].mxu1 %vm499_vm1, %v659_v6  ;;  %1183 = vmatprep.mubr.f32.mxu0 %v25154_v7  ;;  %v624_v6 = vld [vmem:[#allocation2 + $0xd8] sm:$0xf]  ;;  %v2312_v13 = vld [vmem:[#allocation2 + $0x2a] sm:$0xff] }
  0x55   : > { %1284 = vmatprep.mubr.f32.mxu1 %v25154_v7  ;;  %v2309_v14 = vld [vmem:[#allocation2 + $0x12] sm:$0xff] }
  0x57   : > { %18479 = vmatmul.mubr.msk.f32.gmra.mrb[22].mxu0 %vm499_vm1, %v656_v8  ;;  %v628_v8 = vld [vmem:[#allocation2 + $0xf8] sm:$0xf] }
  0x58   : > { %18485 = vmatmul.mubr.msk.f32.gmra.mrb[22].mxu1 %vm499_vm1, %v660_v9  ;;  %1367 = vmatprep.mubr.f32.mxu0 %v25154_v7  ;;  %v2307_v9 = vld [vmem:[#allocation2 + $0x2] sm:$0xff] }
  0x59   : > { %1468 = vmatprep.mubr.f32.mxu1 %v25154_v7 }
  0x5b   : > { %18488 = vmatmul.mubr.msk.f32.vlgmr.msra.gmra.mrb[24].mxu0 %vm499_vm1, %v661_v15  ;;  %v2313_v15 = vld [vmem:[#allocation2 + $0x32] sm:$0xff] }
  0x5c   : > { %18494 = vmatmul.mubr.msk.f32.vlgmr.msra.gmra.mrb[24].mxu1 %vm499_vm1, %v665_v16  ;;  %21408 = vmatpush1.bf16.msra.mxu0 %v25607_v17  ;;  %v2310_v16 = vld [vmem:[#allocation2 + $0x1a] sm:$0xf] }
  0x5d   : > { %21418 = vmatpush1.bf16.msra.mxu1 %v25607_v17  ;;  %1373 = vmatprep.mubr.f32.mxu0 %v25154_v7 }
  0x5e   : > { %1474 = vmatprep.mubr.f32.mxu1 %v25154_v7  ;;  %21411 = vmatprep.subr.msk.bf16.mxu0 %vm25318_vm3, %v25609_v18 }
  0x5f   : > { %21421 = vmatprep.subr.msk.bf16.mxu1 %vm25318_vm3, %v25609_v18  ;;  %18489 = vmatmul.mubr.msk.f32.gmra.mrb[26].mxu0 %vm499_vm1, %v662_v21  ;;  %v2320_v21 = vld [vmem:[#allocation2 + $0x6a] sm:$0xff] }
  0x60   : > { %18495 = vmatmul.mubr.msk.f32.gmra.mrb[26].mxu1 %vm499_vm1, %v666_v22  ;;  %1379 = vmatprep.mubr.f32.mxu0 %v25154_v7  ;;  %v2317_v22 = vld [vmem:[#allocation2 + $0x52] sm:$0xff] }
  0x61   : > { %1480 = vmatprep.mubr.f32.mxu1 %v25154_v7  ;;  %21414 = vmatpush1.bf16.msk.msra.mxu0 %vm25318_vm3, %v25623_v23 }
  0x62   : > { %21424 = vmatpush1.bf16.msk.msra.mxu1 %vm25318_vm3, %v25623_v23  ;;  %21426 = vmatprep.subr.bf16.mxu0 %v25573_v4 }
  0x63   : > { %21436 = vmatprep.subr.bf16.mxu1 %v25573_v4  ;;  %18490 = vmatmul.mubr.msk.f32.gmra.mrb[28].mxu0 %vm499_vm1, %v663_v24  ;;  %v2318_v24 = vld [vmem:[#allocation2 + $0x5a] sm:$0xf] }
  0x64   : > { %18496 = vmatmul.mubr.msk.f32.gmra.mrb[28].mxu1 %vm499_vm1, %v667_v25  ;;  %1385 = vmatprep.mubr.f32.mxu0 %v25154_v7  ;;  %v2322_v25 = vld [vmem:[#allocation2 + $0x7a] sm:$0xf] }
  0x65   : > { %1486 = vmatprep.mubr.f32.mxu1 %v25154_v7 }
  0x67   : > { %18491 = vmatmul.mubr.msk.f32.gmra.mrb[30].mxu0 %vm499_vm1, %v664_v26  ;;  %v2323_v26 = vld [vmem:[#allocation2 + $0x82] sm:$0xff] }
  0x68   : > { %18497 = vmatmul.mubr.msk.f32.gmra.mrb[30].mxu1 %vm499_vm1, %v668_v27  ;;  %1575 = vmatprep.mubr.f32.mxu0 %v25154_v7  ;;  %v2327_v27 = vld [vmem:[#allocation2 + $0xa2] sm:$0xff] }
  0x69   : > { %1676 = vmatprep.mubr.f32.mxu1 %v25154_v7 }
  0x6b   : > { %18500 = vmatmul.mubr.msk.f32.vlgmr.msra.gmra.mrb[0].mxu0 %vm499_vm1, %v597_v28  ;;  %v18603_v28 = vld [vmem:[%s30681_s1 + $0xc8] sm:$0xff] }
  0x6c   : > { %18506 = vmatmul.mubr.msk.f32.vlgmr.msra.gmra.mrb[0].mxu1 %vm499_vm1, %v601_v29  ;;  %21428 = vmatpush1.bf16.msra.mxu0 %v25607_v17  ;;  %v18605_v29 = vld [vmem:[%s30681_s1 + $0xd8] sm:$0xff] }
  0x6d   : > { %21438 = vmatpush1.bf16.msra.mxu1 %v25607_v17  ;;  %1581 = vmatprep.mubr.f32.mxu0 %v25154_v7 }
  0x6e   : > { %1682 = vmatprep.mubr.f32.mxu1 %v25154_v7  ;;  %21431 = vmatprep.subr.msk.bf16.mxu0 %vm25318_vm3, %v25609_v18 }
  0x6f   : > { %21441 = vmatprep.subr.msk.bf16.mxu1 %vm25318_vm3, %v25609_v18  ;;  %18501 = vmatmul.mubr.msk.f32.gmra.mrb[2].mxu0 %vm499_vm1, %v598_v30  ;;  %v2324_v30 = vld [vmem:[#allocation2 + $0x8a] sm:$0xff] }
  0x70   : > { %18507 = vmatmul.mubr.msk.f32.gmra.mrb[2].mxu1 %vm499_vm1, %v602_v31  ;;  %1587 = vmatprep.mubr.f32.mxu0 %v25154_v7  ;;  %v2328_v31 = vld [vmem:[#allocation2 + $0xaa] sm:$0xff] }
  0x71   : > { %1688 = vmatprep.mubr.f32.mxu1 %v25154_v7  ;;  %21434 = vmatpush1.bf16.msk.msra.mxu0 %vm25318_vm3, %v25623_v23 }
  0x72   : > { %21444 = vmatpush1.bf16.msk.msra.mxu1 %vm25318_vm3, %v25623_v23  ;;  %21446 = vmatprep.subr.bf16.mxu0 %v25573_v4 }
  0x73   : > { %21456 = vmatprep.subr.bf16.mxu1 %v25573_v4  ;;  %18502 = vmatmul.mubr.msk.f32.gmra.mrb[4].mxu0 %vm499_vm1, %v599_v32  ;;  %v25893_v32 = vpack.c.bf16 %v18605_v29, %v18603_v28  ;;  %v18664_v28 = vld [vmem:[%s30681_s1 + $0x130] sm:$0xf] }
  0x74   : > { %18508 = vmatmul.mubr.msk.f32.gmra.mrb[4].mxu1 %vm499_vm1, %v603_v33  ;;  %1593 = vmatprep.mubr.f32.mxu0 %v25154_v7  ;;  %v2325_v33 = vld [vmem:[#allocation2 + $0x92] sm:$0xff] }
  0x75   : > { %1694 = vmatprep.mubr.f32.mxu1 %v25154_v7  ;;  %v3251_v29 = vld [vmem:[#allocation2 + $0xcb] sm:$0xff] }
  0x77   : > { %18503 = vmatmul.mubr.msk.f32.gmra.mrb[6].mxu0 %vm499_vm1, %v600_v34  ;;  %v2329_v34 = vld [vmem:[#allocation2 + $0xb2] sm:$0xff] }
  0x78   : > { %18509 = vmatmul.mubr.msk.f32.gmra.mrb[6].mxu1 %vm499_vm1, %v604_v35  ;;  %1777 = vmatprep.mubr.f32.mxu0 %v25154_v7  ;;  %v2326_v35 = vld [vmem:[#allocation2 + $0x9a] sm:$0xf] }
  0x79   : > { %1878 = vmatprep.mubr.f32.mxu1 %v25154_v7 }
  0x7b   : > { %18512 = vmatmul.mubr.msk.f32.vlgmr.msra.gmra.mrb[8].mxu0 %vm499_vm1, %v605_v36  ;;  %v2330_v36 = vld [vmem:[#allocation2 + $0xba] sm:$0xf] }
  0x7c   : > { %18518 = vmatmul.mubr.msk.f32.vlgmr.msra.gmra.mrb[8].mxu1 %vm499_vm1, %v609_v37  ;;  %21448 = vmatpush1.bf16.msra.mxu0 %v25607_v17  ;;  %v18602_v37 = vld [vmem:[%s30681_s1 + $0xc0] sm:$0xff] }
  0x7d   : > { %21458 = vmatpush1.bf16.msra.mxu1 %v25607_v17  ;;  %1783 = vmatprep.mubr.f32.mxu0 %v25154_v7 }
  0x7e   : > { %1884 = vmatprep.mubr.f32.mxu1 %v25154_v7  ;;  %21451 = vmatprep.subr.msk.bf16.mxu0 %vm25318_vm3, %v25609_v18 }
  0x7f   : > { %21461 = vmatprep.subr.msk.bf16.mxu1 %vm25318_vm3, %v25609_v18  ;;  %18513 = vmatmul.mubr.msk.f32.gmra.mrb[10].mxu0 %vm499_vm1, %v606_v38  ;;  %v18604_v38 = vld [vmem:[%s30681_s1 + $0xd0] sm:$0xff] }
  0x80   : > { %18519 = vmatmul.mubr.msk.f32.gmra.mrb[10].mxu1 %vm499_vm1, %v610_v39  ;;  %1789 = vmatprep.mubr.f32.mxu0 %v25154_v7  ;;  %v18607_v39 = vld [vmem:[%s30681_s1 + $0xe8] sm:$0xff] }
  0x81   : > { %1890 = vmatprep.mubr.f32.mxu1 %v25154_v7  ;;  %21454 = vmatpush1.bf16.msk.msra.mxu0 %vm25318_vm3, %v25623_v23 }
  0x82   : > { %21464 = vmatpush1.bf16.msk.msra.mxu1 %vm25318_vm3, %v25623_v23  ;;  %21466 = vmatprep.subr.bf16.mxu0 %v25573_v4 }
  0x83   : > { %21476 = vmatprep.subr.bf16.mxu1 %v25573_v4  ;;  %18514 = vmatmul.mubr.msk.f32.gmra.mrb[12].mxu0 %vm499_vm1, %v607_v40  ;;  %v623_v4 = vld [vmem:[#allocation2 + $0xd0] sm:$0xff]  ;;  %v18609_v40 = vld [vmem:[%s30681_s1 + $0xf8] sm:$0xf] }
  0x84   : > { %18520 = vmatmul.mubr.msk.f32.gmra.mrb[12].mxu1 %vm499_vm1, %v611_v41  ;;  %1795 = vmatprep.mubr.f32.mxu0 %v25154_v7  ;;  %v2331_v41 = vld [vmem:[#allocation2 + $0xc2] sm:$0xff] }
  0x85   : > { %1896 = vmatprep.mubr.f32.mxu1 %v25154_v7 }
  0x87   : > { %18515 = vmatmul.mubr.msk.f32.gmra.mrb[14].mxu0 %vm499_vm1, %v608_v42  ;;  %v2335_v42 = vld [vmem:[#allocation2 + $0xe2] sm:$0xff] }
  0x88   : > { %18521 = vmatmul.mubr.msk.f32.gmra.mrb[14].mxu1 %vm499_vm1, %v612_v43  ;;  %1979 = vmatprep.mubr.f32.mxu0 %v25154_v7  ;;  %v25927_v43 = vpack.c.bf16 %v18604_v38, %v18602_v37  ;;  %v4149_v37 = vld [vmem:[#allocation2 + $0x24] sm:$0xff]  ;;  %v4146_v38 = vld [vmem:[#allocation2 + $0xc] sm:$0xff] }
  0x89   : > { %2080 = vmatprep.mubr.f32.mxu1 %v25154_v7 }
  0x8b   : > { %18524 = vmatmul.mubr.msk.f32.vlgmr.msra.gmra.mrb[16].mxu0 %vm499_vm1, %v613_v44  ;;  %v25929_v44 = vpack.c.bf16 %v18609_v40, %v18607_v39  ;;  %v4150_v39 = vld [vmem:[#allocation2 + $0x2c] sm:$0xff]  ;;  %v4147_v40 = vld [vmem:[#allocation2 + $0x14] sm:$0xff] }
  0x8c   : > { %18530 = vmatmul.mubr.msk.f32.vlgmr.msra.gmra.mrb[16].mxu1 %vm499_vm1, %v617_v45  ;;  %21468 = vmatpush1.bf16.msra.mxu0 %v25607_v17  ;;  %v18606_v45 = vld [vmem:[%s30681_s1 + $0xe0] sm:$0xff] }
  0x8d   : > { %21478 = vmatpush1.bf16.msra.mxu1 %v25607_v17  ;;  %1985 = vmatprep.mubr.f32.mxu0 %v25154_v7  ;;  %v2314_v17 = vld [vmem:[#allocation2 + $0x3a] sm:$0xf] }
  0x8e   : > { %2086 = vmatprep.mubr.f32.mxu1 %v25154_v7  ;;  %21471 = vmatprep.subr.msk.bf16.mxu0 %vm25318_vm3, %v25609_v18 }
  0x8f   : > { %21481 = vmatprep.subr.msk.bf16.mxu1 %vm25318_vm3, %v25609_v18  ;;  %18525 = vmatmul.mubr.msk.f32.gmra.mrb[18].mxu0 %vm499_vm1, %v614_v48  ;;  %v2315_v18 = vld [vmem:[#allocation2 + $0x42] sm:$0xff]  ;;  %v2336_v48 = vld [vmem:[#allocation2 + $0xea] sm:$0xff] }
  0x90   : > { %18531 = vmatmul.mubr.msk.f32.gmra.mrb[18].mxu1 %vm499_vm1, %v618_v49  ;;  %1991 = vmatprep.mubr.f32.mxu0 %v25154_v7  ;;  %v25943_v49 = vpack.c.bf16 %v18608_v46, %v18606_v45  ;;  %v4157_v45 = vld [vmem:[#allocation2 + $0x64] sm:$0xff]  ;;  %v4154_v46 = vld [vmem:[#allocation2 + $0x4c] sm:$0xff] }
  0x91   : > { %2092 = vmatprep.mubr.f32.mxu1 %v25154_v7  ;;  %21474 = vmatpush1.bf16.msk.msra.mxu0 %vm25318_vm3, %v25623_v23 }
  0x92   : > { %21484 = vmatpush1.bf16.msk.msra.mxu1 %vm25318_vm3, %v25623_v23  ;;  %21486 = vmatprep.subr.bf16.mxu0 %v25733_v50  ;;  %v2321_v23 = vld [vmem:[#allocation2 + $0x72] sm:$0xff] }
  0x93   : > { %21496 = vmatprep.subr.bf16.mxu1 %v25733_v50  ;;  %18526 = vmatmul.mubr.msk.f32.gmra.mrb[20].mxu0 %vm499_vm1, %v615_v51  ;;  %v2337_v51 = vld [vmem:[#allocation2 + $0xf2] sm:$0xff] }
  0x94   : > { %18532 = vmatmul.mubr.msk.f32.gmra.mrb[20].mxu1 %vm499_vm1, %v619_v52  ;;  %1997 = vmatprep.mubr.f32.mxu0 %v25154_v7  ;;  %v2334_v52 = vld [vmem:[#allocation2 + $0xda] sm:$0xf] }
  0x95   : > { %2098 = vmatprep.mubr.f32.mxu1 %v25154_v7 }
  0x97   : > { %18527 = vmatmul.mubr.msk.f32.gmra.mrb[22].mxu0 %vm499_vm1, %v616_v53  ;;  %v2338_v53 = vld [vmem:[#allocation2 + $0xfa] sm:$0xf] }
  0x98   : > { %18533 = vmatmul.mubr.msk.f32.gmra.mrb[22].mxu1 %vm499_vm1, %v620_v54  ;;  %2181 = vmatprep.mubr.f32.mxu0 %v25154_v7  ;;  %v3226_v54 = vld [vmem:[#allocation2 + $0x3] sm:$0xff] }
  0x99   : > { %2282 = vmatprep.mubr.f32.mxu1 %v25154_v7 }
  0x9b   : > { %18536 = vmatmul.mubr.msk.f32.vlgmr.msra.gmra.mrb[24].mxu0 %vm499_vm1, %v621_v59  ;;  %v3232_v59 = vld [vmem:[#allocation2 + $0x33] sm:$0xff] }
  0x9c   : > { %18542 = vmatmul.mubr.msk.f32.vlgmr.msra.gmra.mrb[24].mxu1 %vm499_vm1, %v625_v60  ;;  %21488 = vmatpush1.bf16.msra.mxu0 %v25767_v61  ;;  %v3229_v60 = vld [vmem:[#allocation2 + $0x1b] sm:$0xf] }
  0x9d   : > { %21498 = vmatpush1.bf16.msra.mxu1 %v25767_v61  ;;  %2187 = vmatprep.mubr.f32.mxu0 %v25154_v7 }
  0x9e   : > { %2288 = vmatprep.mubr.f32.mxu1 %v25154_v7  ;;  %21491 = vmatprep.subr.msk.bf16.mxu0 %vm25318_vm3, %v25769_v62 }
  0x9f   : > { %21501 = vmatprep.subr.msk.bf16.mxu1 %vm25318_vm3, %v25769_v62  ;;  %18537 = vmatmul.mubr.msk.f32.gmra.mrb[26].mxu0 %vm499_vm1, %v622_v1  ;;  %v3239_v1 = vld [vmem:[#allocation2 + $0x6b] sm:$0xff] }
  0xa0   : > { %18543 = vmatmul.mubr.msk.f32.gmra.mrb[26].mxu1 %vm499_vm1, %v626_v2  ;;  %2193 = vmatprep.mubr.f32.mxu0 %v25154_v7  ;;  %v3236_v2 = vld [vmem:[#allocation2 + $0x53] sm:$0xff] }
  0xa1   : > { %2294 = vmatprep.mubr.f32.mxu1 %v25154_v7  ;;  %21494 = vmatpush1.bf16.msk.msra.mxu0 %vm25318_vm3, %v25783_v3 }
  0xa2   : > { %21504 = vmatpush1.bf16.msk.msra.mxu1 %vm25318_vm3, %v25783_v3  ;;  %21506 = vmatprep.subr.bf16.mxu0 %v25733_v50 }
  0xa3   : > { %21516 = vmatprep.subr.bf16.mxu1 %v25733_v50  ;;  %18538 = vmatmul.mubr.msk.f32.gmra.mrb[28].mxu0 %vm499_vm1, %v623_v4  ;;  %v3237_v4 = vld [vmem:[#allocation2 + $0x5b] sm:$0xf] }
  0xa4   : > { %18544 = vmatmul.mubr.msk.f32.gmra.mrb[28].mxu1 %vm499_vm1, %v627_v5  ;;  %2199 = vmatprep.mubr.f32.mxu0 %v25154_v7  ;;  %v3241_v5 = vld [vmem:[#allocation2 + $0x7b] sm:$0xf] }
  0xa5   : > { %2300 = vmatprep.mubr.f32.mxu1 %v25154_v7 }
  0xa7   : > { %18539 = vmatmul.mubr.msk.f32.gmra.mrb[30].mxu0 %vm499_vm1, %v624_v6  ;;  %v3242_v6 = vld [vmem:[#allocation2 + $0x83] sm:$0xff] }
  0xa8   : > { %18545 = vmatmul.mubr.msk.f32.gmra.mrb[30].mxu1 %vm499_vm1, %v628_v8  ;;  %2430 = vmatprep.mubr.f32.mxu0 %v25154_v7  ;;  %v3246_v8 = vld [vmem:[#allocation2 + $0xa3] sm:$0xff] }
  0xa9   : > { %2531 = vmatprep.mubr.f32.mxu1 %v25154_v7 }
  0xab   : > { %18556 = vmatmul.mubr.msk.f32.vlgmr.msra.gmra.mrb[0].mxu0 %vm499_vm1, %v2307_v9  ;;  %v18659_v9 = vld [vmem:[%s30681_s1 + $0x108] sm:$0xff] }
  0xac   : > { %18562 = vmatmul.mubr.msk.f32.vlgmr.msra.gmra.mrb[0].mxu1 %vm499_vm1, %v2311_v11  ;;  %21508 = vmatpush1.bf16.msra.mxu0 %v25767_v61  ;;  %v18661_v11 = vld [vmem:[%s30681_s1 + $0x118] sm:$0xff] }
  0xad   : > { %21518 = vmatpush1.bf16.msra.mxu1 %v25767_v61  ;;  %2436 = vmatprep.mubr.f32.mxu0 %v25154_v7 }
  0xae   : > { %2537 = vmatprep.mubr.f32.mxu1 %v25154_v7  ;;  %21511 = vmatprep.subr.msk.bf16.mxu0 %vm25318_vm3, %v25769_v62 }
  0xaf   : > { %21521 = vmatprep.subr.msk.bf16.mxu1 %vm25318_vm3, %v25769_v62  ;;  %18557 = vmatmul.mubr.msk.f32.gmra.mrb[2].mxu0 %vm499_vm1, %v2308_v12  ;;  %v3243_v12 = vld [vmem:[#allocation2 + $0x8b] sm:$0xff] }
  0xb0   : > { %18563 = vmatmul.mubr.msk.f32.gmra.mrb[2].mxu1 %vm499_vm1, %v2312_v13  ;;  %2442 = vmatprep.mubr.f32.mxu0 %v25154_v7  ;;  %v3247_v13 = vld [vmem:[#allocation2 + $0xab] sm:$0xff] }
  0xb1   : > { %2543 = vmatprep.mubr.f32.mxu1 %v25154_v7  ;;  %21514 = vmatpush1.bf16.msk.msra.mxu0 %vm25318_vm3, %v25783_v3 }
  0xb2   : > { %21524 = vmatpush1.bf16.msk.msra.mxu1 %vm25318_vm3, %v25783_v3  ;;  %21526 = vmatprep.subr.bf16.mxu0 %v25733_v50 }
  0xb3   : > { %21536 = vmatprep.subr.bf16.mxu1 %v25733_v50  ;;  %18558 = vmatmul.mubr.msk.f32.gmra.mrb[4].mxu0 %vm499_vm1, %v2309_v14  ;;  %v26053_v14 = vpack.c.bf16 %v18661_v11, %v18659_v9 }
  0xb4   : > { %18564 = vmatmul.mubr.msk.f32.gmra.mrb[4].mxu1 %vm499_vm1, %v2313_v15  ;;  %2448 = vmatprep.mubr.f32.mxu0 %v25154_v7  ;;  %v3244_v15 = vld [vmem:[#allocation2 + $0x93] sm:$0xff] }
  0xb5   : > { %2549 = vmatprep.mubr.f32.mxu1 %v25154_v7 }
  0xb7   : > { %18559 = vmatmul.mubr.msk.f32.gmra.mrb[6].mxu0 %vm499_vm1, %v2310_v16  ;;  %v3248_v16 = vld [vmem:[#allocation2 + $0xb3] sm:$0xff] }
  0xb8   : > { %18565 = vmatmul.mubr.msk.f32.gmra.mrb[6].mxu1 %vm499_vm1, %v2314_v17  ;;  %2632 = vmatprep.mubr.f32.mxu0 %v25154_v7  ;;  %v3245_v17 = vld [vmem:[#allocation2 + $0x9b] sm:$0xf] }
  0xb9   : > { %2733 = vmatprep.mubr.f32.mxu1 %v25154_v7 }
  0xbb   : > { %18568 = vmatmul.mubr.msk.f32.vlgmr.msra.gmra.mrb[8].mxu0 %vm499_vm1, %v2315_v18  ;;  %v3249_v18 = vld [vmem:[#allocation2 + $0xbb] sm:$0xf] }
  0xbc   : > { %18574 = vmatmul.mubr.msk.f32.vlgmr.msra.gmra.mrb[8].mxu1 %vm499_vm1, %v2319_v19  ;;  %21528 = vmatpush1.bf16.msra.mxu0 %v25767_v61  ;;  %v18658_v19 = vld [vmem:[%s30681_s1 + $0x100] sm:$0xff] }
  0xbd   : > { %21538 = vmatpush1.bf16.msra.mxu1 %v25767_v61  ;;  %2638 = vmatprep.mubr.f32.mxu0 %v25154_v7 }
  0xbe   : > { %2739 = vmatprep.mubr.f32.mxu1 %v25154_v7  ;;  %21531 = vmatprep.subr.msk.bf16.mxu0 %vm25318_vm3, %v25769_v62 }
  0xbf   : > { %21541 = vmatprep.subr.msk.bf16.mxu1 %vm25318_vm3, %v25769_v62  ;;  %18569 = vmatmul.mubr.msk.f32.gmra.mrb[10].mxu0 %vm499_vm1, %v2316_v20  ;;  %v18660_v20 = vld [vmem:[%s30681_s1 + $0x110] sm:$0xff] }
  0xc0   : > { %18575 = vmatmul.mubr.msk.f32.gmra.mrb[10].mxu1 %vm499_vm1, %v2320_v21  ;;  %2644 = vmatprep.mubr.f32.mxu0 %v25154_v7  ;;  %v18663_v21 = vld [vmem:[%s30681_s1 + $0x128] sm:$0xff] }
  0xc1   : > { %2745 = vmatprep.mubr.f32.mxu1 %v25154_v7  ;;  %21534 = vmatpush1.bf16.msk.msra.mxu0 %vm25318_vm3, %v25783_v3 }
  0xc2   : > { %21544 = vmatpush1.bf16.msk.msra.mxu1 %vm25318_vm3, %v25783_v3  ;;  %21546 = vmatprep.subr.bf16.mxu0 %v25733_v50 }
  0xc3   : > { %21556 = vmatprep.subr.bf16.mxu1 %v25733_v50  ;;  %18570 = vmatmul.mubr.msk.f32.gmra.mrb[12].mxu0 %vm499_vm1, %v2317_v22  ;;  %v2333_v50 = vld [vmem:[#allocation2 + $0xd2] sm:$0xff] }
  0xc4   : > { %18576 = vmatmul.mubr.msk.f32.gmra.mrb[12].mxu1 %vm499_vm1, %v2321_v23  ;;  %2650 = vmatprep.mubr.f32.mxu0 %v25154_v7  ;;  %v18665_v22 = vld [vmem:[%s30681_s1 + $0x138] sm:$0xf]  ;;  %v3250_v23 = vld [vmem:[#allocation2 + $0xc3] sm:$0xff] }
  0xc5   : > { %2751 = vmatprep.mubr.f32.mxu1 %v25154_v7 }
  0xc7   : > { %18571 = vmatmul.mubr.msk.f32.gmra.mrb[14].mxu0 %vm499_vm1, %v2318_v24  ;;  %v3254_v24 = vld [vmem:[#allocation2 + $0xe3] sm:$0xff] }
  0xc8   : > { %18577 = vmatmul.mubr.msk.f32.gmra.mrb[14].mxu1 %vm499_vm1, %v2322_v25  ;;  %2834 = vmatprep.mubr.f32.mxu0 %v25154_v7  ;;  %v26087_v25 = vpack.c.bf16 %v18660_v20, %v18658_v19 }
  0xc9   : > { %2935 = vmatprep.mubr.f32.mxu1 %v25154_v7 }
  0xcb   : > { %18580 = vmatmul.mubr.msk.f32.vlgmr.msra.gmra.mrb[16].mxu0 %vm499_vm1, %v2323_v26  ;;  %v26089_v26 = vpack.c.bf16 %v18665_v22, %v18663_v21 }
  0xcc   : > { %18586 = vmatmul.mubr.msk.f32.vlgmr.msra.gmra.mrb[16].mxu1 %vm499_vm1, %v2327_v27  ;;  %21548 = vmatpush1.bf16.msra.mxu0 %v25767_v61  ;;  %v18662_v27 = vld [vmem:[%s30681_s1 + $0x120] sm:$0xff] }
  0xcd   : > { %21558 = vmatpush1.bf16.msra.mxu1 %v25767_v61  ;;  %2840 = vmatprep.mubr.f32.mxu0 %v25154_v7  ;;  %v3233_v61 = vld [vmem:[#allocation2 + $0x3b] sm:$0xf] }
  0xce   : > { %2941 = vmatprep.mubr.f32.mxu1 %v25154_v7  ;;  %21551 = vmatprep.subr.msk.bf16.mxu0 %vm25318_vm3, %v25769_v62 }
  0xcf   : > { %21561 = vmatprep.subr.msk.bf16.mxu1 %vm25318_vm3, %v25769_v62  ;;  %18581 = vmatmul.mubr.msk.f32.gmra.mrb[18].mxu0 %vm499_vm1, %v2324_v30  ;;  %v3234_v62 = vld [vmem:[#allocation2 + $0x43] sm:$0xff]  ;;  %v3255_v30 = vld [vmem:[#allocation2 + $0xeb] sm:$0xff] }
  0xd0   : > { %18587 = vmatmul.mubr.msk.f32.gmra.mrb[18].mxu1 %vm499_vm1, %v2328_v31  ;;  %2846 = vmatprep.mubr.f32.mxu0 %v25154_v7  ;;  %v26103_v31 = vpack.c.bf16 %v18664_v28, %v18662_v27 }
  0xd1   : > { %2947 = vmatprep.mubr.f32.mxu1 %v25154_v7  ;;  %21554 = vmatpush1.bf16.msk.msra.mxu0 %vm25318_vm3, %v25783_v3 }
  0xd2   : > { %21564 = vmatpush1.bf16.msk.msra.mxu1 %vm25318_vm3, %v25783_v3  ;;  %21566 = vmatprep.subr.bf16.mxu0 %v25893_v32  ;;  %v3240_v3 = vld [vmem:[#allocation2 + $0x73] sm:$0xff] }
  0xd3   : > { %21576 = vmatprep.subr.bf16.mxu1 %v25893_v32  ;;  %18582 = vmatmul.mubr.msk.f32.gmra.mrb[20].mxu0 %vm499_vm1, %v2325_v33  ;;  %v3256_v33 = vld [vmem:[#allocation2 + $0xf3] sm:$0xff] }
  0xd4   : > { %18588 = vmatmul.mubr.msk.f32.gmra.mrb[20].mxu1 %vm499_vm1, %v2329_v34  ;;  %2852 = vmatprep.mubr.f32.mxu0 %v25154_v7  ;;  %v3253_v34 = vld [vmem:[#allocation2 + $0xdb] sm:$0xf] }
  0xd5   : > { %2953 = vmatprep.mubr.f32.mxu1 %v25154_v7 }
  0xd7   : > { %18583 = vmatmul.mubr.msk.f32.gmra.mrb[22].mxu0 %vm499_vm1, %v2326_v35  ;;  %v3257_v35 = vld [vmem:[#allocation2 + $0xfb] sm:$0xf] }
  0xd8   : > { %18589 = vmatmul.mubr.msk.f32.gmra.mrb[22].mxu1 %vm499_vm1, %v2330_v36  ;;  %3036 = vmatprep.mubr.f32.mxu0 %v25154_v7  ;;  %v4145_v36 = vld [vmem:[#allocation2 + $0x4] sm:$0xff] }
  0xd9   : > { %3137 = vmatprep.mubr.f32.mxu1 %v25154_v7 }
  0xdb   : > { %18592 = vmatmul.mubr.msk.f32.vlgmr.msra.gmra.mrb[24].mxu0 %vm499_vm1, %v2331_v41  ;;  %v4151_v41 = vld [vmem:[#allocation2 + $0x34] sm:$0xff] }
  0xdc   : > { %18598 = vmatmul.mubr.msk.f32.vlgmr.msra.gmra.mrb[24].mxu1 %vm499_vm1, %v2335_v42  ;;  %21568 = vmatpush1.bf16.msra.mxu0 %v25927_v43  ;;  %v4148_v42 = vld [vmem:[#allocation2 + $0x1c] sm:$0xf] }
  0xdd   : > { %21578 = vmatpush1.bf16.msra.mxu1 %v25927_v43  ;;  %3042 = vmatprep.mubr.f32.mxu0 %v25154_v7 }
  0xde   : > { %3143 = vmatprep.mubr.f32.mxu1 %v25154_v7  ;;  %21571 = vmatprep.subr.msk.bf16.mxu0 %vm25318_vm3, %v25929_v44 }
  0xdf   : > { %21581 = vmatprep.subr.msk.bf16.mxu1 %vm25318_vm3, %v25929_v44  ;;  %18593 = vmatmul.mubr.msk.f32.gmra.mrb[26].mxu0 %vm499_vm1, %v2332_v47  ;;  %v4158_v47 = vld [vmem:[#allocation2 + $0x6c] sm:$0xff] }
  0xe0   : > { %18599 = vmatmul.mubr.msk.f32.gmra.mrb[26].mxu1 %vm499_vm1, %v2336_v48  ;;  %3048 = vmatprep.mubr.f32.mxu0 %v25154_v7  ;;  %v4155_v48 = vld [vmem:[#allocation2 + $0x54] sm:$0xff] }
  0xe1   : > { %3149 = vmatprep.mubr.f32.mxu1 %v25154_v7  ;;  %21574 = vmatpush1.bf16.msk.msra.mxu0 %vm25318_vm3, %v25943_v49 }
  0xe2   : > { %21584 = vmatpush1.bf16.msk.msra.mxu1 %vm25318_vm3, %v25943_v49  ;;  %21586 = vmatprep.subr.bf16.mxu0 %v25893_v32 }
  0xe3   : > { %21596 = vmatprep.subr.bf16.mxu1 %v25893_v32  ;;  %18594 = vmatmul.mubr.msk.f32.gmra.mrb[28].mxu0 %vm499_vm1, %v2333_v50  ;;  %v4156_v50 = vld [vmem:[#allocation2 + $0x5c] sm:$0xf] }
  0xe4   : > { %18600 = vmatmul.mubr.msk.f32.gmra.mrb[28].mxu1 %vm499_vm1, %v2337_v51  ;;  %3054 = vmatprep.mubr.f32.mxu0 %v25154_v7  ;;  %v4160_v51 = vld [vmem:[#allocation2 + $0x7c] sm:$0xf] }
  0xe5   : > { %3155 = vmatprep.mubr.f32.mxu1 %v25154_v7 }
  0xe7   : > { %18595 = vmatmul.mubr.msk.f32.gmra.mrb[30].mxu0 %vm499_vm1, %v2334_v52  ;;  %v4161_v52 = vld [vmem:[#allocation2 + $0x84] sm:$0xff] }
  0xe8   : > { %18601 = vmatmul.mubr.msk.f32.gmra.mrb[30].mxu1 %vm499_vm1, %v2338_v53  ;;  %3349 = vmatprep.mubr.f32.mxu0 %v25154_v7  ;;  %v4165_v53 = vld [vmem:[#allocation2 + $0xa4] sm:$0xff] }
  0xe9   : > { %3450 = vmatprep.mubr.f32.mxu1 %v25154_v7 }
  0xeb   : > { %18612 = vmatmul.mubr.msk.f32.vlgmr.msra.gmra.mrb[0].mxu0 %vm499_vm1, %v3226_v54  ;;  %v4162_v54 = vld [vmem:[#allocation2 + $0x8c] sm:$0xff] }
  0xec   : > { %18618 = vmatmul.mubr.msk.f32.vlgmr.msra.gmra.mrb[0].mxu1 %vm499_vm1, %v3230_v55  ;;  %21588 = vmatpush1.bf16.msra.mxu0 %v25927_v43  ;;  %v4166_v55 = vld [vmem:[#allocation2 + $0xac] sm:$0xff] }
  0xed   : > { %21598 = vmatpush1.bf16.msra.mxu1 %v25927_v43  ;;  %3355 = vmatprep.mubr.f32.mxu0 %v25154_v7 }
  0xee   : > { %3456 = vmatprep.mubr.f32.mxu1 %v25154_v7  ;;  %21591 = vmatprep.subr.msk.bf16.mxu0 %vm25318_vm3, %v25929_v44 }
  0xef   : > { %21601 = vmatprep.subr.msk.bf16.mxu1 %vm25318_vm3, %v25929_v44  ;;  %18613 = vmatmul.mubr.msk.f32.gmra.mrb[2].mxu0 %vm499_vm1, %v3227_v56  ;;  %v4163_v56 = vld [vmem:[#allocation2 + $0x94] sm:$0xff] }
  0xf0   : > { %18619 = vmatmul.mubr.msk.f32.gmra.mrb[2].mxu1 %vm499_vm1, %v3231_v57  ;;  %3361 = vmatprep.mubr.f32.mxu0 %v25154_v7  ;;  %v4167_v57 = vld [vmem:[#allocation2 + $0xb4] sm:$0xff] }
  0xf1   : > { %3462 = vmatprep.mubr.f32.mxu1 %v25154_v7  ;;  %21594 = vmatpush1.bf16.msk.msra.mxu0 %vm25318_vm3, %v25943_v49 }
  0xf2   : > { %21604 = vmatpush1.bf16.msk.msra.mxu1 %vm25318_vm3, %v25943_v49  ;;  %21606 = vmatprep.subr.bf16.mxu0 %v25893_v32 }
  0xf3   : > { %21616 = vmatprep.subr.bf16.mxu1 %v25893_v32  ;;  %18614 = vmatmul.mubr.msk.f32.gmra.mrb[4].mxu0 %vm499_vm1, %v3228_v58  ;;  %v4164_v58 = vld [vmem:[#allocation2 + $0x9c] sm:$0xf] }
  0xf4   : > { %18620 = vmatmul.mubr.msk.f32.gmra.mrb[4].mxu1 %vm499_vm1, %v3232_v59  ;;  %3367 = vmatprep.mubr.f32.mxu0 %v25154_v7  ;;  %v4168_v59 = vld [vmem:[#allocation2 + $0xbc] sm:$0xf] }
  0xf5   : > { %3468 = vmatprep.mubr.f32.mxu1 %v25154_v7 }
  0xf7   : > { %18615 = vmatmul.mubr.msk.f32.gmra.mrb[6].mxu0 %vm499_vm1, %v3229_v60  ;;  %v4169_v60 = vld [vmem:[#allocation2 + $0xc4] sm:$0xff] }
  0xf8   : > { %18621 = vmatmul.mubr.msk.f32.gmra.mrb[6].mxu1 %vm499_vm1, %v3233_v61  ;;  %3551 = vmatprep.mubr.f32.mxu0 %v25154_v7  ;;  %v4173_v61 = vld [vmem:[#allocation2 + $0xe4] sm:$0xff] }
  0xf9   : > { %3652 = vmatprep.mubr.f32.mxu1 %v25154_v7 }
  0xfb   : > { %18624 = vmatmul.mubr.msk.f32.vlgmr.msra.gmra.mrb[8].mxu0 %vm499_vm1, %v3234_v62  ;;  %v4170_v62 = vld [vmem:[#allocation2 + $0xcc] sm:$0xff] }
  0xfc   : > { %18630 = vmatmul.mubr.msk.f32.vlgmr.msra.gmra.mrb[8].mxu1 %vm499_vm1, %v3238_v63  ;;  %21608 = vmatpush1.bf16.msra.mxu0 %v25927_v43  ;;  %v4174_v63 = vld [vmem:[#allocation2 + $0xec] sm:$0xff] }
  0xfd   : > { %21618 = vmatpush1.bf16.msra.mxu1 %v25927_v43  ;;  %3557 = vmatprep.mubr.f32.mxu0 %v25154_v7 }
  0xfe   : > { %3658 = vmatprep.mubr.f32.mxu1 %v25154_v7  ;;  %21611 = vmatprep.subr.msk.bf16.mxu0 %vm25318_vm3, %v25929_v44 }
  0xff   : > { %21621 = vmatprep.subr.msk.bf16.mxu1 %vm25318_vm3, %v25929_v44  ;;  %18625 = vmatmul.mubr.msk.f32.gmra.mrb[10].mxu0 %vm499_vm1, %v3235_v0  ;;  %v4171_v0 = vld [vmem:[#allocation2 + $0xd4] sm:$0xff] }
 0x100   : > { %18631 = vmatmul.mubr.msk.f32.gmra.mrb[10].mxu1 %vm499_vm1, %v3239_v1  ;;  %3563 = vmatprep.mubr.f32.mxu0 %v25154_v7  ;;  %v4175_v1 = vld [vmem:[#allocation2 + $0xf4] sm:$0xff] }
 0x101   : > { %3664 = vmatprep.mubr.f32.mxu1 %v25154_v7  ;;  %21614 = vmatpush1.bf16.msk.msra.mxu0 %vm25318_vm3, %v25943_v49 }
 0x102   : > { %21624 = vmatpush1.bf16.msk.msra.mxu1 %vm25318_vm3, %v25943_v49  ;;  %21626 = vmatprep.subr.bf16.mxu0 %v25893_v32 }
 0x103   : > { %21636 = vmatprep.subr.bf16.mxu1 %v25893_v32  ;;  %18626 = vmatmul.mubr.msk.f32.gmra.mrb[12].mxu0 %vm499_vm1, %v3236_v2  ;;  %v3252_v32 = vld [vmem:[#allocation2 + $0xd3] sm:$0xff]  ;;  %v4172_v2 = vld [vmem:[#allocation2 + $0xdc] sm:$0xf] }
 0x104   : > { %18632 = vmatmul.mubr.msk.f32.gmra.mrb[12].mxu1 %vm499_vm1, %v3240_v3  ;;  %3569 = vmatprep.mubr.f32.mxu0 %v25154_v7  ;;  %v4176_v3 = vld [vmem:[#allocation2 + $0xfc] sm:$0xf] }
 0x105   : > { %3670 = vmatprep.mubr.f32.mxu1 %v25154_v7 }
 0x107   : > { %18627 = vmatmul.mubr.msk.f32.gmra.mrb[14].mxu0 %vm499_vm1, %v3237_v4  ;;  %v5066_v4 = vlaneseq }
 0x108   : > { %18633 = vmatmul.mubr.msk.f32.gmra.mrb[14].mxu1 %vm499_vm1, %v3241_v5  ;;  %3753 = vmatprep.mubr.f32.mxu0 %v25154_v7 }
 0x109   : > { %3854 = vmatprep.mubr.f32.mxu1 %v25154_v7  ;;  %v26241_v5 = vshrl.u32 %v5066_v4, 7 }
 0x10b   : > { %18636 = vmatmul.mubr.msk.f32.vlgmr.msra.gmra.mrb[16].mxu0 %vm499_vm1, %v3242_v6  ;;  %v5068_v6 = vsub.s32 0, %v26241_v5  ;;  %v5072_v9 = vsub.s32 1, %v26241_v5 }
 0x10c   : > { %18642 = vmatmul.mubr.msk.f32.vlgmr.msra.gmra.mrb[16].mxu1 %vm499_vm1, %v3246_v8  ;;  %21628 = vmatpush1.bf16.msra.mxu0 %v25927_v43  ;;  %v5064_v8 = vld [vmem:[%s30682_s2] sm:$0x3] }
 0x10d   : > { %21638 = vmatpush1.bf16.msra.mxu1 %v25927_v43  ;;  %3759 = vmatprep.mubr.f32.mxu0 %v25154_v7  ;;  %v4152_v43 = vld [vmem:[#allocation2 + $0x3c] sm:$0xf]  ;;  %v26250_v11 = vrot.slane %v5064_v8, %v5068_v6 }
 0x10e   : > { %3860 = vmatprep.mubr.f32.mxu1 %v25154_v7  ;;  %21631 = vmatprep.subr.msk.bf16.mxu0 %vm25318_vm3, %v25929_v44 }
 0x10f   : > { %21641 = vmatprep.subr.msk.bf16.mxu1 %vm25318_vm3, %v25929_v44  ;;  %18637 = vmatmul.mubr.msk.f32.gmra.mrb[18].mxu0 %vm499_vm1, %v3243_v12  ;;  %v4153_v44 = vld [vmem:[#allocation2 + $0x44] sm:$0xff] }
 0x110   : > { %18643 = vmatmul.mubr.msk.f32.gmra.mrb[18].mxu1 %vm499_vm1, %v3247_v13  ;;  %3765 = vmatprep.mubr.f32.mxu0 %v25154_v7 }
 0x111   : > { %3866 = vmatprep.mubr.f32.mxu1 %v25154_v7  ;;  %21634 = vmatpush1.bf16.msk.msra.mxu0 %vm25318_vm3, %v25943_v49 }
 0x112   : > { %21644 = vmatpush1.bf16.msk.msra.mxu1 %vm25318_vm3, %v25943_v49  ;;  %21646 = vmatprep.subr.bf16.mxu0 %v26053_v14  ;;  %v4159_v49 = vld [vmem:[#allocation2 + $0x74] sm:$0xff] }
 0x113   : > { %21656 = vmatprep.subr.bf16.mxu1 %v26053_v14  ;;  %18638 = vmatmul.mubr.msk.f32.gmra.mrb[20].mxu0 %vm499_vm1, %v3244_v15 }
 0x114   : > { %18644 = vmatmul.mubr.msk.f32.gmra.mrb[20].mxu1 %vm499_vm1, %v3248_v16  ;;  %3771 = vmatprep.mubr.f32.mxu0 %v25154_v7 }
 0x115   : > { %3872 = vmatprep.mubr.f32.mxu1 %v25154_v7 }
 0x117   : > { %18639 = vmatmul.mubr.msk.f32.gmra.mrb[22].mxu0 %vm499_vm1, %v3245_v17 }
 0x118   : > { %18645 = vmatmul.mubr.msk.f32.gmra.mrb[22].mxu1 %vm499_vm1, %v3249_v18  ;;  %3955 = vmatprep.mubr.f32.mxu0 %v25154_v7 }
 0x119   : > { %4056 = vmatprep.mubr.f32.mxu1 %v25154_v7 }
 0x11b   : > { %18648 = vmatmul.mubr.msk.f32.vlgmr.msra.gmra.mrb[24].mxu0 %vm499_vm1, %v3250_v23 }
 0x11c   : > { %18654 = vmatmul.mubr.msk.f32.vlgmr.msra.gmra.mrb[24].mxu1 %vm499_vm1, %v3254_v24  ;;  %21648 = vmatpush1.bf16.msra.mxu0 %v26087_v25 }
 0x11d   : > { %21658 = vmatpush1.bf16.msra.mxu1 %v26087_v25  ;;  %3961 = vmatprep.mubr.f32.mxu0 %v25154_v7 }
 0x11e   : > { %4062 = vmatprep.mubr.f32.mxu1 %v25154_v7  ;;  %21651 = vmatprep.subr.msk.bf16.mxu0 %vm25318_vm3, %v26089_v26 }
 0x11f   : > { %21661 = vmatprep.subr.msk.bf16.mxu1 %vm25318_vm3, %v26089_v26  ;;  %18649 = vmatmul.mubr.msk.f32.gmra.mrb[26].mxu0 %vm499_vm1, %v3251_v29 }
 0x120   : > { %18655 = vmatmul.mubr.msk.f32.gmra.mrb[26].mxu1 %vm499_vm1, %v3255_v30  ;;  %3967 = vmatprep.mubr.f32.mxu0 %v25154_v7 }
 0x121   : > { %4068 = vmatprep.mubr.f32.mxu1 %v25154_v7  ;;  %21654 = vmatpush1.bf16.msk.msra.mxu0 %vm25318_vm3, %v26103_v31 }
 0x122   : > { %21664 = vmatpush1.bf16.msk.msra.mxu1 %vm25318_vm3, %v26103_v31  ;;  %21666 = vmatprep.subr.bf16.mxu0 %v26053_v14 }
 0x123   : > { %21676 = vmatprep.subr.bf16.mxu1 %v26053_v14  ;;  %18650 = vmatmul.mubr.msk.f32.gmra.mrb[28].mxu0 %vm499_vm1, %v3252_v32 }
 0x124   : > { %18656 = vmatmul.mubr.msk.f32.gmra.mrb[28].mxu1 %vm499_vm1, %v3256_v33  ;;  %3973 = vmatprep.mubr.f32.mxu0 %v25154_v7 }
 0x125   : > { %4074 = vmatprep.mubr.f32.mxu1 %v25154_v7 }
 0x127   : > { %18651 = vmatmul.mubr.msk.f32.gmra.mrb[30].mxu0 %vm499_vm1, %v3253_v34 }
 0x128   : > { %18657 = vmatmul.mubr.msk.f32.gmra.mrb[30].mxu1 %vm499_vm1, %v3257_v35  ;;  %4268 = vmatprep.mubr.f32.mxu0 %v25154_v7 }
 0x129   : > { %4369 = vmatprep.mubr.f32.mxu1 %v25154_v7 }
 0x12b   : > { %18668 = vmatmul.mubr.msk.f32.vlgmr.msra.gmra.mrb[0].mxu0 %vm499_vm1, %v4145_v36 }
 0x12c   : > { %18674 = vmatmul.mubr.msk.f32.vlgmr.msra.gmra.mrb[0].mxu1 %vm499_vm1, %v4149_v37  ;;  %21668 = vmatpush1.bf16.msra.mxu0 %v26087_v25 }
 0x12d   : > { %21678 = vmatpush1.bf16.msra.mxu1 %v26087_v25  ;;  %4274 = vmatprep.mubr.f32.mxu0 %v25154_v7 }
 0x12e   : > { %4375 = vmatprep.mubr.f32.mxu1 %v25154_v7  ;;  %21671 = vmatprep.subr.msk.bf16.mxu0 %vm25318_vm3, %v26089_v26 }
 0x12f   : > { %21681 = vmatprep.subr.msk.bf16.mxu1 %vm25318_vm3, %v26089_v26  ;;  %18669 = vmatmul.mubr.msk.f32.gmra.mrb[2].mxu0 %vm499_vm1, %v4146_v38 }
 0x130   : > { %18675 = vmatmul.mubr.msk.f32.gmra.mrb[2].mxu1 %vm499_vm1, %v4150_v39  ;;  %4280 = vmatprep.mubr.f32.mxu0 %v25154_v7 }
 0x131   : > { %4381 = vmatprep.mubr.f32.mxu1 %v25154_v7  ;;  %21674 = vmatpush1.bf16.msk.msra.mxu0 %vm25318_vm3, %v26103_v31 }
 0x132   : > { %21684 = vmatpush1.bf16.msk.msra.mxu1 %vm25318_vm3, %v26103_v31  ;;  %21686 = vmatprep.subr.bf16.mxu0 %v26053_v14 }
 0x133   : > { %21696 = vmatprep.subr.bf16.mxu1 %v26053_v14  ;;  %18670 = vmatmul.mubr.msk.f32.gmra.mrb[4].mxu0 %vm499_vm1, %v4147_v40 }
 0x134   : > { %18676 = vmatmul.mubr.msk.f32.gmra.mrb[4].mxu1 %vm499_vm1, %v4151_v41  ;;  %4286 = vmatprep.mubr.f32.mxu0 %v25154_v7 }
 0x135   : > { %4387 = vmatprep.mubr.f32.mxu1 %v25154_v7 }
 0x137   : > { %18671 = vmatmul.mubr.msk.f32.gmra.mrb[6].mxu0 %vm499_vm1, %v4148_v42 }
 0x138   : > { %18677 = vmatmul.mubr.msk.f32.gmra.mrb[6].mxu1 %vm499_vm1, %v4152_v43  ;;  %4470 = vmatprep.mubr.f32.mxu0 %v25154_v7 }
 0x139   : > { %4571 = vmatprep.mubr.f32.mxu1 %v25154_v7 }
 0x13b   : > { %18680 = vmatmul.mubr.msk.f32.vlgmr.msra.gmra.mrb[8].mxu0 %vm499_vm1, %v4153_v44 }
 0x13c   : > { %18686 = vmatmul.mubr.msk.f32.vlgmr.msra.gmra.mrb[8].mxu1 %vm499_vm1, %v4157_v45  ;;  %21688 = vmatpush1.bf16.msra.mxu0 %v26087_v25 }
 0x13d   : > { %21698 = vmatpush1.bf16.msra.mxu1 %v26087_v25  ;;  %4476 = vmatprep.mubr.f32.mxu0 %v25154_v7 }
 0x13e   : > { %4577 = vmatprep.mubr.f32.mxu1 %v25154_v7  ;;  %21691 = vmatprep.subr.msk.bf16.mxu0 %vm25318_vm3, %v26089_v26 }
 0x13f   : > { %21701 = vmatprep.subr.msk.bf16.mxu1 %vm25318_vm3, %v26089_v26  ;;  %18681 = vmatmul.mubr.msk.f32.gmra.mrb[10].mxu0 %vm499_vm1, %v4154_v46 }
 0x140   : > { %18687 = vmatmul.mubr.msk.f32.gmra.mrb[10].mxu1 %vm499_vm1, %v4158_v47  ;;  %4482 = vmatprep.mubr.f32.mxu0 %v25154_v7 }
 0x141   : > { %4583 = vmatprep.mubr.f32.mxu1 %v25154_v7  ;;  %21694 = vmatpush1.bf16.msk.msra.mxu0 %vm25318_vm3, %v26103_v31 }
 0x142   : > { %21704 = vmatpush1.bf16.msk.msra.mxu1 %vm25318_vm3, %v26103_v31  ;;  %21706 = vmatprep.subr.bf16.mxu0 %v26053_v14 }
 0x143   : > { %21716 = vmatprep.subr.bf16.mxu1 %v26053_v14  ;;  %18682 = vmatmul.mubr.msk.f32.gmra.mrb[12].mxu0 %vm499_vm1, %v4155_v48  ;;  %v26254_v14 = vrot.slane %v5064_v8, %v5072_v9 }
 0x144   : > { %18688 = vmatmul.mubr.msk.f32.gmra.mrb[12].mxu1 %vm499_vm1, %v4159_v49  ;;  %4488 = vmatprep.mubr.f32.mxu0 %v25154_v7 }
 0x145   : > { %4589 = vmatprep.mubr.f32.mxu1 %v25154_v7 }
 0x147   : > { %18683 = vmatmul.mubr.msk.f32.gmra.mrb[14].mxu0 %vm499_vm1, %v4156_v50 }
 0x148   : > { %18689 = vmatmul.mubr.msk.f32.gmra.mrb[14].mxu1 %vm499_vm1, %v4160_v51  ;;  %4672 = vmatprep.mubr.f32.mxu0 %v25154_v7 }
 0x149   : > { %4773 = vmatprep.mubr.f32.mxu1 %v25154_v7 }
 0x14b   : > { %18692 = vmatmul.mubr.msk.f32.vlgmr.msra.gmra.mrb[16].mxu0 %vm499_vm1, %v4161_v52 }
 0x14c   : > { %18698 = vmatmul.mubr.msk.f32.vlgmr.msra.gmra.mrb[16].mxu1 %vm499_vm1, %v4165_v53  ;;  %21708 = vmatpush1.bf16.msra.mxu0 %v26087_v25 }
 0x14d   : > { %21718 = vmatpush1.bf16.msra.mxu1 %v26087_v25  ;;  %4678 = vmatprep.mubr.f32.mxu0 %v25154_v7 }
 0x14e   : > { %4779 = vmatprep.mubr.f32.mxu1 %v25154_v7  ;;  %21711 = vmatprep.subr.msk.bf16.mxu0 %vm25318_vm3, %v26089_v26 }
 0x14f   : > { %21721 = vmatprep.subr.msk.bf16.mxu1 %vm25318_vm3, %v26089_v26  ;;  %18693 = vmatmul.mubr.msk.f32.gmra.mrb[18].mxu0 %vm499_vm1, %v4162_v54 }
 0x150   : > { %18699 = vmatmul.mubr.msk.f32.gmra.mrb[18].mxu1 %vm499_vm1, %v4166_v55  ;;  %4684 = vmatprep.mubr.f32.mxu0 %v25154_v7 }
 0x151   : > { %4785 = vmatprep.mubr.f32.mxu1 %v25154_v7  ;;  %21714 = vmatpush1.bf16.msk.msra.mxu0 %vm25318_vm3, %v26103_v31 }
 0x152   : > { %21724 = vmatpush1.bf16.msk.msra.mxu1 %vm25318_vm3, %v26103_v31 }
 0x153   : > { %18694 = vmatmul.mubr.msk.f32.gmra.mrb[20].mxu0 %vm499_vm1, %v4163_v56 }
 0x154   : > { %18700 = vmatmul.mubr.msk.f32.gmra.mrb[20].mxu1 %vm499_vm1, %v4167_v57  ;;  %4690 = vmatprep.mubr.f32.mxu0 %v25154_v7 }
 0x155   : > { %4791 = vmatprep.mubr.f32.mxu1 %v25154_v7 }
 0x157   : > { %18695 = vmatmul.mubr.msk.f32.gmra.mrb[22].mxu0 %vm499_vm1, %v4164_v58 }
 0x158   : > { %18701 = vmatmul.mubr.msk.f32.gmra.mrb[22].mxu1 %vm499_vm1, %v4168_v59  ;;  %4874 = vmatprep.mubr.f32.mxu0 %v25154_v7 }
 0x159   : > { %4975 = vmatprep.mubr.f32.mxu1 %v25154_v7 }
 0x15b   : > { %18704 = vmatmul.mubr.msk.f32.vlgmr.msra.gmra.mrb[24].mxu0 %vm499_vm1, %v4169_v60 }
 0x15c   : > { %18710 = vmatmul.mubr.msk.f32.vlgmr.msra.gmra.mrb[24].mxu1 %vm499_vm1, %v4173_v61  ;;  %4880 = vmatprep.mubr.f32.mxu0 %v25154_v7 }
 0x15d   : > { %4981 = vmatprep.mubr.f32.mxu1 %v25154_v7 }
 0x15f   : > { %18705 = vmatmul.mubr.msk.f32.gmra.mrb[26].mxu0 %vm499_vm1, %v4170_v62 }
 0x160   : > { %18711 = vmatmul.mubr.msk.f32.gmra.mrb[26].mxu1 %vm499_vm1, %v4174_v63  ;;  %4886 = vmatprep.mubr.f32.mxu0 %v25154_v7 }
 0x161   : > { %4987 = vmatprep.mubr.f32.mxu1 %v25154_v7 }
 0x163   : > { %18706 = vmatmul.mubr.msk.f32.gmra.mrb[28].mxu0 %vm499_vm1, %v4171_v0 }
 0x164   : > { %18712 = vmatmul.mubr.msk.f32.gmra.mrb[28].mxu1 %vm499_vm1, %v4175_v1  ;;  %4892 = vmatprep.mubr.f32.mxu0 %v25154_v7 }
 0x165   : > { %4993 = vmatprep.mubr.f32.mxu1 %v25154_v7 }
 0x167   : > { %18707 = vmatmul.mubr.msk.f32.gmra.mrb[30].mxu0 %vm499_vm1, %v4172_v2 }
 0x168   : > { %18713 = vmatmul.mubr.msk.f32.gmra.mrb[30].mxu1 %vm499_vm1, %v4176_v3  ;;  %5282 = vmatprep.mubr.f32.mxu0 %v25154_v7 }
 0x169   : > { %5365 = vmatprep.mubr.f32.mxu1 %v25154_v7 }
 0x1fe   : > { %v4270_v12 = vpop.f32.mrb[0].mxu0 }
 0x1ff   : > { %v4371_v13 = vpop.f32.mrb[0].mxu1  ;;  %v4272_v15 = vpop.f32.mrb[1].mxu0  ;;  %v5076_v17 = vadd.f32 %v26250_v11, %v4270_v12 }
 0x200   : > { %v4373_v16 = vpop.f32.mrb[1].mxu1  ;;  %v5084_v18 = vadd.f32 %v26250_v11, %v4371_v13  ;;  %v5077_v19 = vadd.f32 %v26254_v14, %v4272_v15 }
 0x201   : > { %v5085_v20 = vadd.f32 %v26254_v14, %v4373_v16  ;;  %v5140_v29 = vmax.f32 %v5076_v17, 0.0 }
 0x202   : > { %v4276_v21 = vpop.f32.mrb[2].mxu0  ;;  %v5148_v30 = vmax.f32 %v5084_v18, 0.0  ;;  %v5141_v33 = vmax.f32 %v5077_v19, 0.0 }
 0x203   : > { %v4377_v22 = vpop.f32.mrb[2].mxu1  ;;  %v5078_v23 = vadd.f32 %v26250_v11, %v4276_v21  ;;  %v4278_v25 = vpop.f32.mrb[3].mxu0  ;;  %v5149_v34 = vmax.f32 %v5085_v20, 0.0 }
 0x204   : > { %v5086_v24 = vadd.f32 %v26250_v11, %v4377_v22  ;;  %v4379_v26 = vpop.f32.mrb[3].mxu1  ;;  %v5079_v27 = vadd.f32 %v26254_v14, %v4278_v25 }
 0x205   : > { %v5087_v28 = vadd.f32 %v26254_v14, %v4379_v26  ;;  %v5142_v31 = vmax.f32 %v5078_v23, 0.0  ;;  %v26313_v26 = vld [vmem:[%s30683_s3] sm:$0xff] }
 0x206   : > { %v5150_v32 = vmax.f32 %v5086_v24, 0.0  ;;  %v5143_v35 = vmax.f32 %v5079_v27, 0.0  ;;  %v4282_v37 = vpop.f32.mrb[4].mxu0 }
 0x207   : > { %v5151_v36 = vmax.f32 %v5087_v28, 0.0  ;;  %v4383_v38 = vpop.f32.mrb[4].mxu1  ;;  %v26264_v39 = vpack.c.bf16 %v5142_v31, %v5140_v29  ;;  %v4284_v41 = vpop.f32.mrb[5].mxu0  ;;  %v5080_v45 = vadd.f32 %v26250_v11, %v4282_v37 }
 0x208   : > { %v26266_v40 = vpack.c.bf16 %v5150_v32, %v5148_v30  ;;  %v4385_v42 = vpop.f32.mrb[5].mxu1  ;;  %v26268_v43 = vpack.c.bf16 %v5143_v35, %v5141_v33  ;;  %v5088_v46 = vadd.f32 %v26250_v11, %v4383_v38  ;;  %v5081_v47 = vadd.f32 %v26254_v14, %v4284_v41 }
 0x209   : > { %v26270_v44 = vpack.c.bf16 %v5151_v36, %v5149_v34  ;;  %v5089_v48 = vadd.f32 %v26254_v14, %v4385_v42  ;;  %v5144_v57 = vmax.f32 %v5080_v45, 0.0 }
 0x20a   : > { %v4288_v49 = vpop.f32.mrb[6].mxu0  ;;  %21726 = vmatprep.subr.bf16.mxu0 %v26268_v43  ;;  %v5152_v58 = vmax.f32 %v5088_v46, 0.0  ;;  %v5145_v61 = vmax.f32 %v5081_v47, 0.0 }
 0x20b   : > { %v4389_v50 = vpop.f32.mrb[6].mxu1  ;;  %21736 = vmatprep.subr.bf16.mxu1 %v26270_v44  ;;  %v5082_v51 = vadd.f32 %v26250_v11, %v4288_v49  ;;  %v4290_v53 = vpop.f32.mrb[7].mxu0  ;;  %21728 = vmatpush1.bf16.msra.mxu0 %v26264_v39  ;;  %v5153_v62 = vmax.f32 %v5089_v48, 0.0 }
 0x20c   : > { %v5090_v52 = vadd.f32 %v26250_v11, %v4389_v50  ;;  %v4391_v54 = vpop.f32.mrb[7].mxu1  ;;  %21738 = vmatpush1.bf16.msra.mxu1 %v26266_v40  ;;  %v5083_v55 = vadd.f32 %v26254_v14, %v4290_v53 }
 0x20d   : > { %v5091_v56 = vadd.f32 %v26254_v14, %v4391_v54  ;;  %v5146_v59 = vmax.f32 %v5082_v51, 0.0  ;;  %v26336_v51 = vld [vmem:[%s30683_s3 + $0x8] sm:$0x3f] }
 0x20e   : > { %v5154_v60 = vmax.f32 %v5090_v52, 0.0  ;;  %v5147_v63 = vmax.f32 %v5083_v55, 0.0  ;;  %v4472_v1 = vpop.f32.mrb[8].mxu0 }
 0x20f   : > { %v5155_v0 = vmax.f32 %v5091_v56, 0.0  ;;  %v4573_v2 = vpop.f32.mrb[8].mxu1  ;;  %v26284_v3 = vpack.c.bf16 %v5146_v59, %v5144_v57  ;;  %v4474_v8 = vpop.f32.mrb[9].mxu0  ;;  %v5092_v16 = vadd.f32 %v26250_v11, %v4472_v1 }
 0x210   : > { %v26286_v4 = vpack.c.bf16 %v5154_v60, %v5152_v58  ;;  %v4575_v12 = vpop.f32.mrb[9].mxu1  ;;  %v26288_v13 = vpack.c.bf16 %v5147_v63, %v5145_v61  ;;  %v5100_v17 = vadd.f32 %v26250_v11, %v4573_v2  ;;  %v5093_v18 = vadd.f32 %v26254_v14, %v4474_v8 }
 0x211   : > { %v26290_v15 = vpack.c.bf16 %v5155_v0, %v5153_v62  ;;  %v5101_v19 = vadd.f32 %v26254_v14, %v4575_v12  ;;  %v5156_v29 = vmax.f32 %v5092_v16, 0.0 }
 0x212   : > { %v4478_v20 = vpop.f32.mrb[10].mxu0  ;;  %21731 = vmatprep.subr.msk.bf16.mxu0 %vm25318_vm3, %v26288_v13  ;;  %v5164_v30 = vmax.f32 %v5100_v17, 0.0  ;;  %v5157_v33 = vmax.f32 %v5093_v18, 0.0 }
 0x213   : > { %v4579_v21 = vpop.f32.mrb[10].mxu1  ;;  %21741 = vmatprep.subr.msk.bf16.mxu1 %vm25318_vm3, %v26290_v15  ;;  %v5094_v22 = vadd.f32 %v26250_v11, %v4478_v20  ;;  %v4480_v24 = vpop.f32.mrb[11].mxu0  ;;  %21734 = vmatpush1.bf16.msk.msra.mxu0 %vm25318_vm3, %v26284_v3  ;;  %v5165_v34 = vmax.f32 %v5101_v19, 0.0 }
 0x214   : > { %v5102_v23 = vadd.f32 %v26250_v11, %v4579_v21  ;;  %v4581_v25 = vpop.f32.mrb[11].mxu1  ;;  %21744 = vmatpush1.bf16.msk.msra.mxu1 %vm25318_vm3, %v26286_v4  ;;  %v5095_v27 = vadd.f32 %v26254_v14, %v4480_v24 }
 0x215   : > { %v5103_v28 = vadd.f32 %v26254_v14, %v4581_v25  ;;  %v5158_v31 = vmax.f32 %v5094_v22, 0.0 }
 0x216   : > { %v5166_v32 = vmax.f32 %v5102_v23, 0.0  ;;  %v5159_v35 = vmax.f32 %v5095_v27, 0.0  ;;  %v4484_v37 = vpop.f32.mrb[12].mxu0  ;;  %18716 = vmatmul.mubr.msk.f32.vlgmr.msra.gmra.mrb[32].mxu0 %vm499_vm1, %v26313_v26 }
 0x217   : > { %v5167_v36 = vmax.f32 %v5103_v28, 0.0  ;;  %v4585_v38 = vpop.f32.mrb[12].mxu1  ;;  %18720 = vmatmul.mubr.msk.f32.vlgmr.msra.gmra.mrb[32].mxu1 %vm499_vm1, %v26313_v26  ;;  %v26321_v41 = vpack.c.bf16 %v5158_v31, %v5156_v29  ;;  %v4486_v45 = vpop.f32.mrb[13].mxu0  ;;  %5288 = vmatprep.mubr.f32.mxu0 %v25154_v7  ;;  %v5096_v49 = vadd.f32 %v26250_v11, %v4484_v37 }
 0x218   : > { %v26323_v42 = vpack.c.bf16 %v5166_v32, %v5164_v30  ;;  %v4587_v46 = vpop.f32.mrb[13].mxu1  ;;  %v26326_v47 = vpack.c.bf16 %v5159_v35, %v5157_v33  ;;  %5371 = vmatprep.mubr.f32.mxu1 %v25154_v7  ;;  %v5104_v50 = vadd.f32 %v26250_v11, %v4585_v38  ;;  %v5097_v52 = vadd.f32 %v26254_v14, %v4486_v45 }
 0x219   : > { %v26328_v48 = vpack.c.bf16 %v5167_v36, %v5165_v34  ;;  %v5105_v53 = vadd.f32 %v26254_v14, %v4587_v46  ;;  %v5160_v62 = vmax.f32 %v5096_v49, 0.0 }
 0x21a   : > { %v4490_v54 = vpop.f32.mrb[14].mxu0  ;;  %21746 = vmatprep.subr.bf16.mxu0 %v26326_v47  ;;  %18717 = vmatmul.mubr.msk.f32.gmra.mrb[34].mxu0 %vm499_vm1, %v26336_v51  ;;  %v5168_v63 = vmax.f32 %v5104_v50, 0.0  ;;  %v5161_v2 = vmax.f32 %v5097_v52, 0.0 }
 0x21b   : > { %v4591_v55 = vpop.f32.mrb[14].mxu1  ;;  %21756 = vmatprep.subr.bf16.mxu1 %v26328_v48  ;;  %v5098_v56 = vadd.f32 %v26250_v11, %v4490_v54  ;;  %v4492_v58 = vpop.f32.mrb[15].mxu0  ;;  %21748 = vmatpush1.bf16.msra.mxu0 %v26321_v41  ;;  %v5169_v8 = vmax.f32 %v5105_v53, 0.0 }
 0x21c   : > { %v5106_v57 = vadd.f32 %v26250_v11, %v4591_v55  ;;  %v4593_v59 = vpop.f32.mrb[15].mxu1  ;;  %21758 = vmatpush1.bf16.msra.mxu1 %v26323_v42  ;;  %v5099_v60 = vadd.f32 %v26254_v14, %v4492_v58  ;;  %5448 = vmatprep.mubr.f32.mxu0 %v25154_v7 }
 0x21d   : > { %v5107_v61 = vadd.f32 %v26254_v14, %v4593_v59  ;;  %18721 = vmatmul.mubr.msk.f32.gmra.mrb[34].mxu1 %vm499_vm1, %v26336_v51  ;;  %v5162_v0 = vmax.f32 %v5098_v56, 0.0 }
 0x21e   : > { %v5170_v1 = vmax.f32 %v5106_v57, 0.0  ;;  %5531 = vmatprep.mubr.f32.mxu1 %v25154_v7  ;;  %v5163_v12 = vmax.f32 %v5099_v60, 0.0  ;;  %v4674_v17 = vpop.f32.mrb[16].mxu0 }
 0x21f   : > { %v5171_v16 = vmax.f32 %v5107_v61, 0.0  ;;  %v4775_v18 = vpop.f32.mrb[16].mxu1  ;;  %v26354_v19 = vpack.c.bf16 %v5162_v0, %v5160_v62  ;;  %v4676_v21 = vpop.f32.mrb[17].mxu0  ;;  %v5108_v25 = vadd.f32 %v26250_v11, %v4674_v17 }
 0x220   : > { %v26356_v20 = vpack.c.bf16 %v5170_v1, %v5168_v63  ;;  %v4777_v22 = vpop.f32.mrb[17].mxu1  ;;  %v26358_v23 = vpack.c.bf16 %v5163_v12, %v5161_v2  ;;  %v5116_v27 = vadd.f32 %v26250_v11, %v4775_v18  ;;  %v5109_v28 = vadd.f32 %v26254_v14, %v4676_v21 }
 0x221   : > { %v26360_v24 = vpack.c.bf16 %v5171_v16, %v5169_v8  ;;  %v5117_v29 = vadd.f32 %v26254_v14, %v4777_v22  ;;  %v5172_v38 = vmax.f32 %v5108_v25, 0.0 }
 0x222   : > { %v4680_v30 = vpop.f32.mrb[18].mxu0  ;;  %21751 = vmatprep.subr.msk.bf16.mxu0 %vm25318_vm3, %v26358_v23  ;;  %v5180_v45 = vmax.f32 %v5116_v27, 0.0  ;;  %v5173_v50 = vmax.f32 %v5109_v28, 0.0 }
 0x223   : > { %v4781_v31 = vpop.f32.mrb[18].mxu1  ;;  %21761 = vmatprep.subr.msk.bf16.mxu1 %vm25318_vm3, %v26360_v24  ;;  %v5110_v32 = vadd.f32 %v26250_v11, %v4680_v30  ;;  %v4682_v34 = vpop.f32.mrb[19].mxu0  ;;  %21754 = vmatpush1.bf16.msk.msra.mxu0 %vm25318_vm3, %v26354_v19  ;;  %v5181_v52 = vmax.f32 %v5117_v29, 0.0 }
 0x224   : > { %v5118_v33 = vadd.f32 %v26250_v11, %v4781_v31  ;;  %v4783_v35 = vpop.f32.mrb[19].mxu1  ;;  %21764 = vmatpush1.bf16.msk.msra.mxu1 %vm25318_vm3, %v26356_v20  ;;  %v5111_v36 = vadd.f32 %v26254_v14, %v4682_v34 }
 0x225   : > { %v5119_v37 = vadd.f32 %v26254_v14, %v4783_v35  ;;  %v5174_v46 = vmax.f32 %v5110_v32, 0.0 }
 0x226   : > { %v5182_v49 = vmax.f32 %v5118_v33, 0.0  ;;  %v5175_v53 = vmax.f32 %v5111_v36, 0.0  ;;  %v4686_v55 = vpop.f32.mrb[20].mxu0  ;;  %18724 = vmatmul.mubr.msk.f32.vlgmr.msra.gmra.mrb[36].mxu0 %vm499_vm1, %v26313_v26 }
 0x227   : > { %v5183_v54 = vmax.f32 %v5119_v37, 0.0  ;;  %v4787_v56 = vpop.f32.mrb[20].mxu1  ;;  %18728 = vmatmul.mubr.msk.f32.vlgmr.msra.gmra.mrb[36].mxu1 %vm499_vm1, %v26313_v26  ;;  %v26386_v57 = vpack.c.bf16 %v5174_v46, %v5172_v38  ;;  %v4688_v59 = vpop.f32.mrb[21].mxu0  ;;  %5454 = vmatprep.mubr.f32.mxu0 %v25154_v7  ;;  %v5112_v63 = vadd.f32 %v26250_v11, %v4686_v55 }
 0x228   : > { %v26388_v58 = vpack.c.bf16 %v5182_v49, %v5180_v45  ;;  %v4789_v60 = vpop.f32.mrb[21].mxu1  ;;  %v26391_v61 = vpack.c.bf16 %v5175_v53, %v5173_v50  ;;  %5537 = vmatprep.mubr.f32.mxu1 %v25154_v7  ;;  %v5120_v0 = vadd.f32 %v26250_v11, %v4787_v56  ;;  %v5113_v1 = vadd.f32 %v26254_v14, %v4688_v59 }
 0x229   : > { %v26393_v62 = vpack.c.bf16 %v5183_v54, %v5181_v52  ;;  %v5121_v2 = vadd.f32 %v26254_v14, %v4789_v60  ;;  %v5176_v27 = vmax.f32 %v5112_v63, 0.0 }
 0x22a   : > { %v4692_v8 = vpop.f32.mrb[22].mxu0  ;;  %21766 = vmatprep.subr.bf16.mxu0 %v26391_v61  ;;  %18725 = vmatmul.mubr.msk.f32.gmra.mrb[38].mxu0 %vm499_vm1, %v26336_v51  ;;  %v5184_v28 = vmax.f32 %v5120_v0, 0.0  ;;  %v5177_v31 = vmax.f32 %v5113_v1, 0.0 }
 0x22b   : > { %v4793_v12 = vpop.f32.mrb[22].mxu1  ;;  %21776 = vmatprep.subr.bf16.mxu1 %v26393_v62  ;;  %v5114_v16 = vadd.f32 %v26250_v11, %v4692_v8  ;;  %v4694_v18 = vpop.f32.mrb[23].mxu0  ;;  %21768 = vmatpush1.bf16.msra.mxu0 %v26386_v57  ;;  %v5185_v32 = vmax.f32 %v5121_v2, 0.0 }
 0x22c   : > { %v5122_v17 = vadd.f32 %v26250_v11, %v4793_v12  ;;  %v4795_v21 = vpop.f32.mrb[23].mxu1  ;;  %21778 = vmatpush1.bf16.msra.mxu1 %v26388_v58  ;;  %v5115_v22 = vadd.f32 %v26254_v14, %v4694_v18  ;;  %5614 = vmatprep.mubr.f32.mxu0 %v25154_v7 }
 0x22d   : > { %v5123_v25 = vadd.f32 %v26254_v14, %v4795_v21  ;;  %18729 = vmatmul.mubr.msk.f32.gmra.mrb[38].mxu1 %vm499_vm1, %v26336_v51  ;;  %v5178_v29 = vmax.f32 %v5114_v16, 0.0 }
 0x22e   : > { %v5186_v30 = vmax.f32 %v5122_v17, 0.0  ;;  %5697 = vmatprep.mubr.f32.mxu1 %v25154_v7  ;;  %v5179_v33 = vmax.f32 %v5115_v22, 0.0  ;;  %v4876_v35 = vpop.f32.mrb[24].mxu0 }
 0x22f   : > { %v5187_v34 = vmax.f32 %v5123_v25, 0.0  ;;  %v4977_v36 = vpop.f32.mrb[24].mxu1  ;;  %v26414_v37 = vpack.c.bf16 %v5178_v29, %v5176_v27  ;;  %v4878_v45 = vpop.f32.mrb[25].mxu0  ;;  %v5124_v52 = vadd.f32 %v26250_v11, %v4876_v35 }
 0x230   : > { %v26416_v38 = vpack.c.bf16 %v5186_v30, %v5184_v28  ;;  %v4979_v46 = vpop.f32.mrb[25].mxu1  ;;  %v26418_v49 = vpack.c.bf16 %v5179_v33, %v5177_v31  ;;  %v5132_v53 = vadd.f32 %v26250_v11, %v4977_v36  ;;  %v5125_v54 = vadd.f32 %v26254_v14, %v4878_v45 }
 0x231   : > { %v26420_v50 = vpack.c.bf16 %v5187_v34, %v5185_v32  ;;  %v5133_v55 = vadd.f32 %v26254_v14, %v4979_v46  ;;  %v5188_v12 = vmax.f32 %v5124_v52, 0.0 }
 0x232   : > { %v4882_v56 = vpop.f32.mrb[26].mxu0  ;;  %21771 = vmatprep.subr.msk.bf16.mxu0 %vm25318_vm3, %v26418_v49  ;;  %v5196_v16 = vmax.f32 %v5132_v53, 0.0  ;;  %v5189_v21 = vmax.f32 %v5125_v54, 0.0 }
 0x233   : > { %v4983_v59 = vpop.f32.mrb[26].mxu1  ;;  %21781 = vmatprep.subr.msk.bf16.mxu1 %vm25318_vm3, %v26420_v50  ;;  %v5126_v60 = vadd.f32 %v26250_v11, %v4882_v56  ;;  %v4884_v0 = vpop.f32.mrb[27].mxu0  ;;  %21774 = vmatpush1.bf16.msk.msra.mxu0 %vm25318_vm3, %v26414_v37  ;;  %v5197_v22 = vmax.f32 %v5133_v55, 0.0 }
 0x234   : > { %v5134_v63 = vadd.f32 %v26250_v11, %v4983_v59  ;;  %v4985_v1 = vpop.f32.mrb[27].mxu1  ;;  %21784 = vmatpush1.bf16.msk.msra.mxu1 %vm25318_vm3, %v26416_v38  ;;  %v5127_v2 = vadd.f32 %v26254_v14, %v4884_v0 }
 0x235   : > { %v5135_v8 = vadd.f32 %v26254_v14, %v4985_v1  ;;  %v5190_v17 = vmax.f32 %v5126_v60, 0.0 }
 0x236   : > { %v5198_v18 = vmax.f32 %v5134_v63, 0.0  ;;  %v5191_v25 = vmax.f32 %v5127_v2, 0.0  ;;  %v4888_v28 = vpop.f32.mrb[28].mxu0  ;;  %18732 = vmatmul.mubr.msk.f32.vlgmr.msra.gmra.mrb[40].mxu0 %vm499_vm1, %v26313_v26 }
 0x237   : > { %v5199_v27 = vmax.f32 %v5135_v8, 0.0  ;;  %v4989_v29 = vpop.f32.mrb[28].mxu1  ;;  %18736 = vmatmul.mubr.msk.f32.vlgmr.msra.gmra.mrb[40].mxu1 %vm499_vm1, %v26313_v26  ;;  %v26446_v30 = vpack.c.bf16 %v5190_v17, %v5188_v12  ;;  %v4890_v32 = vpop.f32.mrb[29].mxu0  ;;  %5620 = vmatprep.mubr.f32.mxu0 %v25154_v7  ;;  %v5128_v36 = vadd.f32 %v26250_v11, %v4888_v28  ;;  %v6550_v28 = vld [vmem:[%s30684_s4 + $0x88] sm:$0xff] }
 0x238   : > { %v26448_v31 = vpack.c.bf16 %v5198_v18, %v5196_v16  ;;  %v4991_v33 = vpop.f32.mrb[29].mxu1  ;;  %v26451_v34 = vpack.c.bf16 %v5191_v25, %v5189_v21  ;;  %5703 = vmatprep.mubr.f32.mxu1 %v25154_v7  ;;  %v5136_v45 = vadd.f32 %v26250_v11, %v4989_v29  ;;  %v5129_v46 = vadd.f32 %v26254_v14, %v4890_v32 }
 0x239   : > { %v26453_v35 = vpack.c.bf16 %v5199_v27, %v5197_v22  ;;  %v5137_v52 = vadd.f32 %v26254_v14, %v4991_v33  ;;  %v5192_v1 = vmax.f32 %v5128_v36, 0.0  ;;  %v6549_v27 = vld [vmem:[%s30684_s4 + $0x80] sm:$0xff] }
 0x23a   : > { %v4894_v53 = vpop.f32.mrb[30].mxu0  ;;  %21786 = vmatprep.subr.bf16.mxu0 %v26451_v34  ;;  %18733 = vmatmul.mubr.msk.f32.gmra.mrb[42].mxu0 %vm499_vm1, %v26336_v51  ;;  %v5200_v2 = vmax.f32 %v5136_v45, 0.0  ;;  %v5193_v12 = vmax.f32 %v5129_v46, 0.0  ;;  %v26702_v29 = vpack.c.bf16 %v6550_v28, %v6549_v27  ;;  %v26723_v33 = vld [vmem:[%s30684_s4 + $0xa0] sm:$0xff] }
 0x23b   : > { %v4995_v54 = vpop.f32.mrb[30].mxu1  ;;  %21796 = vmatprep.subr.bf16.mxu1 %v26453_v35  ;;  %v5130_v55 = vadd.f32 %v26250_v11, %v4894_v53  ;;  %v4896_v59 = vpop.f32.mrb[31].mxu0  ;;  %21788 = vmatpush1.bf16.msra.mxu0 %v26446_v30  ;;  %v5201_v16 = vmax.f32 %v5137_v52, 0.0 }
 0x23c   : > { %v5138_v56 = vadd.f32 %v26250_v11, %v4995_v54  ;;  %v4997_v60 = vpop.f32.mrb[31].mxu1  ;;  %21798 = vmatpush1.bf16.msra.mxu1 %v26448_v31  ;;  %v5131_v63 = vadd.f32 %v26254_v14, %v4896_v59  ;;  %5780 = vmatprep.mubr.f32.mxu0 %v25154_v7 }
 0x23d   : > { %v5139_v0 = vadd.f32 %v26254_v14, %v4997_v60  ;;  %18737 = vmatmul.mubr.msk.f32.gmra.mrb[42].mxu1 %vm499_vm1, %v26336_v51  ;;  %v5194_v8 = vmax.f32 %v5130_v55, 0.0 }
 0x23e   : > { %v5202_v11 = vmax.f32 %v5138_v56, 0.0  ;;  %5863 = vmatprep.mubr.f32.mxu1 %v25154_v7  ;;  %v5195_v17 = vmax.f32 %v5131_v63, 0.0 }
 0x23f   : > { %v5203_v18 = vmax.f32 %v5139_v0, 0.0  ;;  %v26474_v21 = vpack.c.bf16 %v5194_v8, %v5192_v1 }
 0x240   : > { %v26476_v14 = vpack.c.bf16 %v5202_v11, %v5200_v2  ;;  %v21789_v22 = vpack.c.bf16 %v5195_v17, %v5193_v12 }
 0x241   : > { %v21799_v25 = vpack.c.bf16 %v5203_v18, %v5201_v16 }
 0x242   : > { %21791 = vmatprep.subr.msk.bf16.mxu0 %vm25318_vm3, %v21789_v22 }
 0x243   : > { %21801 = vmatprep.subr.msk.bf16.mxu1 %vm25318_vm3, %v21799_v25  ;;  %21794 = vmatpush1.bf16.msk.msra.mxu0 %vm25318_vm3, %v26474_v21 }
 0x244   : > { %21804 = vmatpush1.bf16.msk.msra.mxu1 %vm25318_vm3, %v26476_v14  ;;  %21806 = vmatprep.subr.bf16.mxu0 %v26268_v43  ;;  %v6533_v43 = vld [vmem:[%s30684_s4] sm:$0xff] }
 0x245   : > { %21816 = vmatprep.subr.bf16.mxu1 %v26270_v44  ;;  %v6534_v44 = vld [vmem:[%s30684_s4 + $0x8] sm:$0xff] }
 0x246   : > { %18740 = vmatmul.mubr.msk.f32.vlgmr.msra.gmra.mrb[44].mxu0 %vm499_vm1, %v26313_v26 }
 0x247   : > { %18744 = vmatmul.mubr.msk.f32.vlgmr.msra.gmra.mrb[44].mxu1 %vm499_vm1, %v26313_v26  ;;  %21808 = vmatpush1.bf16.msra.mxu0 %v26264_v39  ;;  %v18746_v39 = vld [vmem:[%s30683_s3 + $0x10] sm:$0xff]  ;;  %v6537_v26 = vld [vmem:[%s30684_s4 + $0x20] sm:$0xff] }
 0x248   : > { %21818 = vmatpush1.bf16.msra.mxu1 %v26266_v40  ;;  %21811 = vmatprep.subr.msk.bf16.mxu0 %vm25318_vm3, %v26288_v13  ;;  %v18747_v40 = vld [vmem:[%s30683_s3 + $0x18] sm:$0x3f] }
 0x249   : > { %21821 = vmatprep.subr.msk.bf16.mxu1 %vm25318_vm3, %v26290_v15  ;;  %5786 = vmatprep.mubr.f32.mxu0 %v25154_v7  ;;  %v6536_v13 = vld [vmem:[%s30684_s4 + $0x18] sm:$0xff] }
 0x24a   : > { %5869 = vmatprep.mubr.f32.mxu1 %v25154_v7  ;;  %18741 = vmatmul.mubr.msk.f32.gmra.mrb[46].mxu0 %vm499_vm1, %v26336_v51  ;;  %v26618_v15 = vpack.c.bf16 %v6536_v13, %v6535_v10 }
 0x24b   : > { %18745 = vmatmul.mubr.msk.f32.gmra.mrb[46].mxu1 %vm499_vm1, %v26336_v51  ;;  %21814 = vmatpush1.bf16.msk.msra.mxu0 %vm25318_vm3, %v26284_v3  ;;  %v26598_v3 = vpack.c.bf16 %v6534_v44, %v6533_v43 }
 0x24c   : > { %21824 = vmatpush1.bf16.msk.msra.mxu1 %vm25318_vm3, %v26286_v4  ;;  %21826 = vmatprep.subr.bf16.mxu0 %v26326_v47  ;;  %v25156_v4 = vmov 0.0|0.0   ;;  %v6539_v47 = vld [vmem:[%s30684_s4 + $0x30] sm:$0xff] }
 0x24d   : > { %21836 = vmatprep.subr.bf16.mxu1 %v26328_v48  ;;  %5949 = vmatprep.mubr.f32.mxu0 %v25154_v7  ;;  %v6540_v48 = vld [vmem:[%s30684_s4 + $0x38] sm:$0xff] }
 0x24e   : > { %6026 = vmatprep.mubr.f32.mxu1 %v25154_v7  ;;  %18750 = vmatmul.mubr.msk.f32.vlgmr.msra.gmra.mrb[48].mxu0 %vm499_vm1, %v18746_v39  ;;  %v26642_v51 = vpack.c.bf16 %v6540_v48, %v6539_v47 }
 0x24f   : > { %18754 = vmatmul.mubr.msk.f32.vlgmr.msra.gmra.mrb[48].mxu1 %vm499_vm1, %v18746_v39  ;;  %21828 = vmatpush1.bf16.msra.mxu0 %v26321_v41  ;;  %v6538_v41 = vld [vmem:[%s30684_s4 + $0x28] sm:$0xff] }
 0x250   : > { %21838 = vmatpush1.bf16.msra.mxu1 %v26323_v42  ;;  %21831 = vmatprep.subr.msk.bf16.mxu0 %vm25318_vm3, %v26358_v23  ;;  %v26630_v42 = vpack.c.bf16 %v6538_v41, %v6537_v26 }
 0x251   : > { %21841 = vmatprep.subr.msk.bf16.mxu1 %vm25318_vm3, %v26360_v24  ;;  %5955 = vmatprep.mubr.f32.mxu0 %v25154_v7  ;;  %v6543_v24 = vld [vmem:[%s30684_s4 + $0x50] sm:$0xff] }
 0x252   : > { %6032 = vmatprep.mubr.f32.mxu1 %v25154_v7  ;;  %18751 = vmatmul.mubr.msk.f32.gmra.mrb[50].mxu0 %vm499_vm1, %v18747_v40 }
 0x253   : > { %18755 = vmatmul.mubr.msk.f32.gmra.mrb[50].mxu1 %vm499_vm1, %v18747_v40  ;;  %21834 = vmatpush1.bf16.msk.msra.mxu0 %vm25318_vm3, %v26354_v19  ;;  %v6541_v19 = vld [vmem:[%s30684_s4 + $0x40] sm:$0xff] }
 0x254   : > { %21844 = vmatpush1.bf16.msk.msra.mxu1 %vm25318_vm3, %v26356_v20  ;;  %21846 = vmatprep.subr.bf16.mxu0 %v26391_v61  ;;  %v6542_v20 = vld [vmem:[%s30684_s4 + $0x48] sm:$0xff]  ;;  %v6545_v61 = vld [vmem:[%s30684_s4 + $0x60] sm:$0xff] }
 0x255   : > { %21856 = vmatprep.subr.bf16.mxu1 %v26393_v62  ;;  %6103 = vmatprep.mubr.f32.mxu0 %v25154_v7  ;;  %v26654_v23 = vpack.c.bf16 %v6542_v20, %v6541_v19  ;;  %v6546_v62 = vld [vmem:[%s30684_s4 + $0x68] sm:$0xff] }
 0x256   : > { %6180 = vmatprep.mubr.f32.mxu1 %v25154_v7  ;;  %18758 = vmatmul.mubr.msk.f32.vlgmr.msra.gmra.mrb[52].mxu0 %vm499_vm1, %v18746_v39 }
 0x257   : > { %18762 = vmatmul.mubr.msk.f32.vlgmr.msra.gmra.mrb[52].mxu1 %vm499_vm1, %v18746_v39  ;;  %21848 = vmatpush1.bf16.msra.mxu0 %v26386_v57  ;;  %v6544_v57 = vld [vmem:[%s30684_s4 + $0x58] sm:$0xff] }
 0x258   : > { %21858 = vmatpush1.bf16.msra.mxu1 %v26388_v58  ;;  %21851 = vmatprep.subr.msk.bf16.mxu0 %vm25318_vm3, %v26418_v49  ;;  %v26666_v58 = vpack.c.bf16 %v6544_v57, %v6543_v24  ;;  %v6548_v49 = vld [vmem:[%s30684_s4 + $0x78] sm:$0xff] }
 0x259   : > { %21861 = vmatprep.subr.msk.bf16.mxu1 %vm25318_vm3, %v26420_v50  ;;  %6109 = vmatprep.mubr.f32.mxu0 %v25154_v7 }
 0x25a   : > { %6186 = vmatprep.mubr.f32.mxu1 %v25154_v7  ;;  %18759 = vmatmul.mubr.msk.f32.gmra.mrb[54].mxu0 %vm499_vm1, %v18747_v40 }
 0x25b   : > { %18763 = vmatmul.mubr.msk.f32.gmra.mrb[54].mxu1 %vm499_vm1, %v18747_v40  ;;  %21854 = vmatpush1.bf16.msk.msra.mxu0 %vm25318_vm3, %v26414_v37  ;;  %v26678_v37 = vpack.c.bf16 %v6546_v62, %v6545_v61 }
 0x25c   : > { %21864 = vmatpush1.bf16.msk.msra.mxu1 %vm25318_vm3, %v26416_v38  ;;  %21866 = vmatprep.subr.bf16.mxu0 %v26451_v34  ;;  %v6547_v38 = vld [vmem:[%s30684_s4 + $0x70] sm:$0xff] }
 0x25d   : > { %21876 = vmatprep.subr.bf16.mxu1 %v26453_v35  ;;  %6257 = vmatprep.mubr.f32.mxu0 %v25154_v7  ;;  %v26688_v50 = vpack.c.bf16 %v6548_v49, %v6547_v38 }
 0x25e   : > { %6334 = vmatprep.mubr.f32.mxu1 %v25154_v7  ;;  %18766 = vmatmul.mubr.msk.f32.vlgmr.msra.gmra.mrb[56].mxu0 %vm499_vm1, %v18746_v39 }
 0x25f   : > { %18770 = vmatmul.mubr.msk.f32.vlgmr.msra.gmra.mrb[56].mxu1 %vm499_vm1, %v18746_v39  ;;  %21868 = vmatpush1.bf16.msra.mxu0 %v26446_v30  ;;  %v6551_v30 = vld [vmem:[%s30684_s4 + $0x90] sm:$0xff] }
 0x260   : > { %21878 = vmatpush1.bf16.msra.mxu1 %v26448_v31  ;;  %21871 = vmatprep.subr.msk.bf16.mxu0 %vm25318_vm3, %v21789_v22  ;;  %v6552_v31 = vld [vmem:[%s30684_s4 + $0x98] sm:$0xff] }
 0x261   : > { %21881 = vmatprep.subr.msk.bf16.mxu1 %vm25318_vm3, %v21799_v25  ;;  %6263 = vmatprep.mubr.f32.mxu0 %v25154_v7  ;;  %v26714_v32 = vpack.c.bf16 %v6552_v31, %v6551_v30 }
 0x262   : > { %6340 = vmatprep.mubr.f32.mxu1 %v25154_v7  ;;  %18767 = vmatmul.mubr.msk.f32.gmra.mrb[58].mxu0 %vm499_vm1, %v18747_v40 }
 0x263   : > { %18771 = vmatmul.mubr.msk.f32.gmra.mrb[58].mxu1 %vm499_vm1, %v18747_v40  ;;  %21874 = vmatpush1.bf16.msk.msra.mxu0 %vm25318_vm3, %v26474_v21 }
 0x264   : > { %21884 = vmatpush1.bf16.msk.msra.mxu1 %vm25318_vm3, %v26476_v14  ;;  %6411 = vmatprep.mubr.f32.mxu0 %v25154_v7 }
 0x265   : > { %6488 = vmatprep.mubr.f32.mxu1 %v25154_v7  ;;  %21885 = vmatprep.subr.bf16.mxu0 %v25156_v4 }
 0x266   : > { %21915 = vmatprep.subr.bf16.mxu1 %v25156_v4  ;;  %18774 = vmatmul.mubr.msk.f32.vlgmr.msra.gmra.mrb[60].mxu0 %vm499_vm1, %v18746_v39 }
 0x267   : > { %18778 = vmatmul.mubr.msk.f32.vlgmr.msra.gmra.mrb[60].mxu1 %vm499_vm1, %v18746_v39  ;;  %6417 = vmatprep.mubr.f32.mxu0 %v25154_v7 }
 0x268   : > { %6494 = vmatprep.mubr.f32.mxu1 %v25154_v7  ;;  %21887 = vmatpush1.bf16.msra.mxu0 %v26598_v3 }
 0x269   : > { %21917 = vmatpush1.bf16.msra.mxu1 %v26598_v3  ;;  %21888 = vmatprep.subr.bf16.mxu0 %v25156_v4 }
 0x26a   : > { %21918 = vmatprep.subr.bf16.mxu1 %v25156_v4  ;;  %18775 = vmatmul.mubr.msk.f32.gmra.mrb[62].mxu0 %vm499_vm1, %v18747_v40 }
 0x26b   : > { %18779 = vmatmul.mubr.msk.f32.gmra.mrb[62].mxu1 %vm499_vm1, %v18747_v40 }
 0x26c   : > { %21890 = vmatpush1.bf16.msra.mxu0 %v26618_v15 }
 0x26d   : > { %21920 = vmatpush1.bf16.msra.mxu1 %v26618_v15  ;;  %21891 = vmatprep.subr.bf16.mxu0 %v25156_v4 }
 0x26e   : > { %21921 = vmatprep.subr.bf16.mxu1 %v25156_v4 }
 0x270   : > { %21893 = vmatpush1.bf16.msra.mxu0 %v26630_v42 }
 0x271   : > { %21923 = vmatpush1.bf16.msra.mxu1 %v26630_v42  ;;  %21894 = vmatprep.subr.bf16.mxu0 %v25156_v4 }
 0x272   : > { %21924 = vmatprep.subr.bf16.mxu1 %v25156_v4 }
 0x274   : > { %21896 = vmatpush1.bf16.msra.mxu0 %v26642_v51 }
 0x275   : > { %21926 = vmatpush1.bf16.msra.mxu1 %v26642_v51  ;;  %21897 = vmatprep.subr.bf16.mxu0 %v25156_v4 }
 0x276   : > { %21927 = vmatprep.subr.bf16.mxu1 %v25156_v4 }
 0x278   : > { %21899 = vmatpush1.bf16.msra.mxu0 %v26654_v23 }
 0x279   : > { %21929 = vmatpush1.bf16.msra.mxu1 %v26654_v23  ;;  %21900 = vmatprep.subr.bf16.mxu0 %v25156_v4 }
 0x27a   : > { %21930 = vmatprep.subr.bf16.mxu1 %v25156_v4 }
 0x27c   : > { %21902 = vmatpush1.bf16.msra.mxu0 %v26666_v58 }
 0x27d   : > { %21932 = vmatpush1.bf16.msra.mxu1 %v26666_v58  ;;  %21903 = vmatprep.subr.bf16.mxu0 %v25156_v4 }
 0x27e   : > { %21933 = vmatprep.subr.bf16.mxu1 %v25156_v4 }
 0x280   : > { %21905 = vmatpush1.bf16.msra.mxu0 %v26678_v37 }
 0x281   : > { %21935 = vmatpush1.bf16.msra.mxu1 %v26678_v37  ;;  %21906 = vmatprep.subr.bf16.mxu0 %v25156_v4 }
 0x282   : > { %21936 = vmatprep.subr.bf16.mxu1 %v25156_v4 }
 0x284   : > { %21908 = vmatpush1.bf16.msra.mxu0 %v26688_v50 }
 0x285   : > { %21938 = vmatpush1.bf16.msra.mxu1 %v26688_v50  ;;  %21909 = vmatprep.subr.bf16.mxu0 %v25156_v4 }
 0x286   : > { %21939 = vmatprep.subr.bf16.mxu1 %v25156_v4 }
 0x288   : > { %21911 = vmatpush1.bf16.msra.mxu0 %v26702_v29 }
 0x289   : > { %21941 = vmatpush1.bf16.msra.mxu1 %v26702_v29  ;;  %21912 = vmatprep.subr.bf16.mxu0 %v25156_v4 }
 0x28a   : > { %21942 = vmatprep.subr.bf16.mxu1 %v25156_v4 }
 0x28c   : > { %21914 = vmatpush1.bf16.msra.mxu0 %v26714_v32 }
 0x28d   : > { %21944 = vmatpush1.bf16.msra.mxu1 %v26714_v32  ;;  %6601 = vmatprep.subr.mxu0 %v25154_v7 }
 0x28e   : > { %6682 = vmatprep.subr.mxu1 %v25154_v7 }
 0x290   : > { %6602 = vmatpush1.msra.mxu0 %v26723_v33 }
 0x291   : > { %6683 = vmatpush1.msra.mxu1 %v26723_v33  ;;  %21945 = vmatprep.subr.bf16.mxu0 %v25156_v4 }
 0x292   : > { %21975 = vmatprep.subr.bf16.mxu1 %v25156_v4 }
 0x2e9   : > { %v5284_v34 = vpop.f32.mrb[32].mxu0 }
 0x2ea   : > { %v5367_v35 = vpop.f32.mrb[32].mxu1  ;;  %v5286_v36 = vpop.f32.mrb[33].mxu0 }
 0x2eb   : > { %v5369_v45 = vpop.f32.mrb[33].mxu1 }
 0x2ed   : > { %v5290_v46 = vpop.f32.mrb[34].mxu0 }
 0x2ee   : > { %v5292_v53 = vpop.f32.mrb[35].mxu0 }
 0x2f0   : > { %v5373_v52 = vpop.f32.mrb[34].mxu1 }
 0x2f1   : > { %v5375_v54 = vpop.f32.mrb[35].mxu1 }
 0x2f9   : > { %v5450_v55 = vpop.f32.mrb[36].mxu0 }
 0x2fa   : > { %v5533_v56 = vpop.f32.mrb[36].mxu1  ;;  %v5452_v59 = vpop.f32.mrb[37].mxu0 }
 0x2fb   : > { %v5535_v60 = vpop.f32.mrb[37].mxu1 }
 0x2fd   : > { %v26729_v63 = vpop.f32.mrb[38].mxu0 }
 0x2fe   : > { %v26733_v1 = vpop.f32.mrb[39].mxu0 }
 0x300   : > { %v26731_v0 = vpop.f32.mrb[38].mxu1 }
 0x301   : > { %v26735_v2 = vpop.f32.mrb[39].mxu1 }
 0x309   : > { %v26737_v8 = vpop.f32.mrb[40].mxu0 }
 0x30a   : > { %v26739_v11 = vpop.f32.mrb[40].mxu1  ;;  %v26741_v12 = vpop.f32.mrb[41].mxu0 }
 0x30b   : > { %v26743_v16 = vpop.f32.mrb[41].mxu1 }
 0x30d   : > { %v26745_v17 = vpop.f32.mrb[42].mxu0 }
 0x30e   : > { %v26749_v21 = vpop.f32.mrb[43].mxu0 }
 0x310   : > { %v26747_v18 = vpop.f32.mrb[42].mxu1 }
 0x311   : > { %v26751_v14 = vpop.f32.mrb[43].mxu1 }
 0x319   : > { %v26753_v22 = vpop.f32.mrb[44].mxu0 }
 0x31a   : > { %v26755_v25 = vpop.f32.mrb[44].mxu1  ;;  %v26757_v39 = vpop.f32.mrb[45].mxu0 }
 0x31b   : > { %v26759_v40 = vpop.f32.mrb[45].mxu1 }
 0x31d   : > { %v26761_v43 = vpop.f32.mrb[46].mxu0 }
 0x31e   : > { %v26763_v44 = vpop.f32.mrb[46].mxu1  ;;  %v26765_v10 = vpop.f32.mrb[47].mxu0 }
 0x31f   : > { %v26767_v13 = vpop.f32.mrb[47].mxu1 }
 0x321   : > { %v5951_v26 = vpop.f32.mrb[48].mxu0 }
 0x322   : > { %v6028_v41 = vpop.f32.mrb[48].mxu1  ;;  %v26769_v47 = vmax.f32 %v5284_v34, %v5951_v26  ;;  %v5953_v19 = vpop.f32.mrb[49].mxu0 }
 0x323   : > { %v26771_v48 = vmax.f32 %v5367_v35, %v6028_v41  ;;  %v6030_v20 = vpop.f32.mrb[49].mxu1  ;;  %v26773_v24 = vmax.f32 %v5286_v36, %v5953_v19 }
 0x324   : > { %v26775_v57 = vmax.f32 %v5369_v45, %v6030_v20 }
 0x325   : > { %v5957_v61 = vpop.f32.mrb[50].mxu0  ;;  %18780 = vmatprep.mubr.msk.f32.mxu0 %vm6554_vm5, %v26773_v24 }
 0x326   : > { %v6034_v62 = vpop.f32.mrb[50].mxu1  ;;  %18782 = vmatprep.mubr.msk.f32.mxu1 %vm6554_vm5, %v26775_v57  ;;  %v26781_v38 = vmax.f32 %v5290_v46, %v5957_v61  ;;  %v5959_v27 = vpop.f32.mrb[51].mxu0  ;;  %6626 = vmatmul.mubr.f32.vlgmr.msra.gmra.mrb[64].mxu0 %v26769_v47 }
 0x327   : > { %v26783_v49 = vmax.f32 %v5373_v52, %v6034_v62  ;;  %v6036_v28 = vpop.f32.mrb[51].mxu1  ;;  %6707 = vmatmul.mubr.f32.vlgmr.msra.gmra.mrb[64].mxu1 %v26771_v48  ;;  %v26787_v30 = vmax.f32 %v5292_v53, %v5959_v27  ;;  %21947 = vmatpush1.bf16.msra.mxu0 %v26598_v3 }
 0x328   : > { %v26789_v31 = vmax.f32 %v5375_v54, %v6036_v28  ;;  %21977 = vmatpush1.bf16.msra.mxu1 %v26598_v3  ;;  %21948 = vmatprep.subr.bf16.mxu0 %v25156_v4 }
 0x329   : > { %21978 = vmatprep.subr.bf16.mxu1 %v25156_v4  ;;  %v6105_v34 = vpop.f32.mrb[52].mxu0  ;;  %18781 = vmatprep.mubr.msk.f32.mxu0 %vm6554_vm5, %v26787_v30 }
 0x32a   : > { %v6182_v35 = vpop.f32.mrb[52].mxu1  ;;  %18783 = vmatprep.mubr.msk.f32.mxu1 %vm6554_vm5, %v26789_v31  ;;  %v26799_v36 = vmax.f32 %v5450_v55, %v6105_v34  ;;  %v6107_v46 = vpop.f32.mrb[53].mxu0  ;;  %6631 = vmatmul.mubr.f32.gmra.mrb[66].mxu0 %v26781_v38 }
 0x32b   : > { %v26801_v45 = vmax.f32 %v5533_v56, %v6182_v35  ;;  %v6184_v52 = vpop.f32.mrb[53].mxu1  ;;  %6712 = vmatmul.mubr.f32.gmra.mrb[66].mxu1 %v26783_v49  ;;  %v26805_v53 = vmax.f32 %v5452_v59, %v6107_v46  ;;  %21950 = vmatpush1.bf16.msra.mxu0 %v26618_v15 }
 0x32c   : > { %v26807_v54 = vmax.f32 %v5535_v60, %v6184_v52  ;;  %21980 = vmatpush1.bf16.msra.mxu1 %v26618_v15  ;;  %21951 = vmatprep.subr.bf16.mxu0 %v25156_v4 }
 0x32d   : > { %21981 = vmatprep.subr.bf16.mxu1 %v25156_v4  ;;  %v6111_v55 = vpop.f32.mrb[54].mxu0  ;;  %18784 = vmatprep.mubr.msk.f32.mxu0 %vm6554_vm5, %v26805_v53 }
 0x32e   : > { %v6188_v56 = vpop.f32.mrb[54].mxu1  ;;  %18786 = vmatprep.mubr.msk.f32.mxu1 %vm6554_vm5, %v26807_v54  ;;  %v26818_v59 = vmax.f32 %v26729_v63, %v6111_v55  ;;  %v6113_v26 = vpop.f32.mrb[55].mxu0 }
 0x32f   : > { %v26821_v60 = vmax.f32 %v26731_v0, %v6188_v56  ;;  %v6190_v41 = vpop.f32.mrb[55].mxu1  ;;  %v26824_v19 = vmax.f32 %v26733_v1, %v6113_v26  ;;  %21953 = vmatpush1.bf16.msra.mxu0 %v26630_v42 }
 0x330   : > { %v26827_v20 = vmax.f32 %v26735_v2, %v6190_v41  ;;  %21983 = vmatpush1.bf16.msra.mxu1 %v26630_v42  ;;  %21954 = vmatprep.subr.bf16.mxu0 %v25156_v4 }
 0x331   : > { %21984 = vmatprep.subr.bf16.mxu1 %v25156_v4  ;;  %v6259_v63 = vpop.f32.mrb[56].mxu0 }
 0x332   : > { %v6336_v61 = vpop.f32.mrb[56].mxu1  ;;  %v26834_v0 = vmax.f32 %v26737_v8, %v6259_v63  ;;  %v6261_v1 = vpop.f32.mrb[57].mxu0 }
 0x333   : > { %v26837_v62 = vmax.f32 %v26739_v11, %v6336_v61  ;;  %v6338_v27 = vpop.f32.mrb[57].mxu1  ;;  %v26840_v2 = vmax.f32 %v26741_v12, %v6261_v1  ;;  %21956 = vmatpush1.bf16.msra.mxu0 %v26642_v51 }
 0x334   : > { %v26843_v28 = vmax.f32 %v26743_v16, %v6338_v27  ;;  %21986 = vmatpush1.bf16.msra.mxu1 %v26642_v51  ;;  %21957 = vmatprep.subr.bf16.mxu0 %v25156_v4 }
 0x335   : > { %21987 = vmatprep.subr.bf16.mxu1 %v25156_v4  ;;  %v6265_v8 = vpop.f32.mrb[58].mxu0 }
 0x336   : > { %v6342_v34 = vpop.f32.mrb[58].mxu1  ;;  %v26850_v11 = vmax.f32 %v26745_v17, %v6265_v8  ;;  %v6267_v12 = vpop.f32.mrb[59].mxu0 }
 0x337   : > { %v26853_v35 = vmax.f32 %v26747_v18, %v6342_v34  ;;  %v6344_v46 = vpop.f32.mrb[59].mxu1  ;;  %v26856_v16 = vmax.f32 %v26749_v21, %v6267_v12  ;;  %21959 = vmatpush1.bf16.msra.mxu0 %v26654_v23  ;;  %v18808_v34 = vld [vmem:[%s30684_s4 + $0x108] sm:$0xff]  ;;  %v18809_v12 = vld [vmem:[%s30684_s4 + $0x110] sm:$0xff] }
 0x338   : > { %v26859_v52 = vmax.f32 %v26751_v14, %v6344_v46  ;;  %21989 = vmatpush1.bf16.msra.mxu1 %v26654_v23  ;;  %21960 = vmatprep.subr.bf16.mxu0 %v25156_v4  ;;  %v27113_v46 = vpack.c.bf16 %v18809_v12, %v18808_v34  ;;  %v18847_v34 = vld [vmem:[%s30685_s5 + $0x120] sm:$0xff]  ;;  %v18850_v12 = vld [vmem:[%s30685_s5 + $0x138] sm:$0xff] }
 0x339   : > { %21990 = vmatprep.subr.bf16.mxu1 %v25156_v4  ;;  %v6413_v17 = vpop.f32.mrb[60].mxu0 }
 0x33a   : > { %v6490_v55 = vpop.f32.mrb[60].mxu1  ;;  %v26866_v18 = vmax.f32 %v26753_v22, %v6413_v17  ;;  %v6415_v21 = vpop.f32.mrb[61].mxu0  ;;  %v18810_v17 = vld [vmem:[%s30684_s4 + $0x118] sm:$0xff] }
 0x33b   : > { %v26869_v56 = vmax.f32 %v26755_v25, %v6490_v55  ;;  %v6492_v26 = vpop.f32.mrb[61].mxu1  ;;  %v26872_v14 = vmax.f32 %v26757_v39, %v6415_v21  ;;  %21962 = vmatpush1.bf16.msra.mxu0 %v26666_v58  ;;  %v18811_v55 = vld [vmem:[%s30684_s4 + $0x120] sm:$0xff] }
 0x33c   : > { %v26875_v41 = vmax.f32 %v26759_v40, %v6492_v26  ;;  %21992 = vmatpush1.bf16.msra.mxu1 %v26666_v58  ;;  %21963 = vmatprep.subr.bf16.mxu0 %v25156_v4  ;;  %v27125_v21 = vpack.c.bf16 %v18811_v55, %v18810_v17  ;;  %v18812_v26 = vld [vmem:[%s30684_s4 + $0x128] sm:$0xff] }
 0x33d   : > { %21993 = vmatprep.subr.bf16.mxu1 %v25156_v4  ;;  %v6419_v22 = vpop.f32.mrb[62].mxu0 }
 0x33e   : > { %v6496_v63 = vpop.f32.mrb[62].mxu1  ;;  %v26882_v25 = vmax.f32 %v26761_v43, %v6419_v22  ;;  %v6421_v39 = vpop.f32.mrb[63].mxu0  ;;  %v18813_v22 = vld [vmem:[%s30684_s4 + $0x130] sm:$0xff] }
 0x33f   : > { %v26885_v61 = vmax.f32 %v26763_v44, %v6496_v63  ;;  %v6498_v1 = vpop.f32.mrb[63].mxu1  ;;  %v26888_v40 = vmax.f32 %v26765_v10, %v6421_v39  ;;  %21965 = vmatpush1.bf16.msra.mxu0 %v26678_v37  ;;  %v18804_v44 = vld [vmem:[%s30684_s4 + $0xe8] sm:$0xff]  ;;  %v18805_v10 = vld [vmem:[%s30684_s4 + $0xf0] sm:$0xff]  ;;  %v27137_v63 = vpack.c.bf16 %v18813_v22, %v18812_v26  ;;  %v18814_v39 = vld [vmem:[%s30684_s4 + $0x138] sm:$0xff] }
 0x340   : > { %v26891_v27 = vmax.f32 %v26767_v13, %v6498_v1  ;;  %21995 = vmatpush1.bf16.msra.mxu1 %v26678_v37  ;;  %21966 = vmatprep.subr.bf16.mxu0 %v25156_v4  ;;  %v27089_v13 = vpack.c.bf16 %v18805_v10, %v18804_v44  ;;  %v18815_v1 = vld [vmem:[%s30684_s4 + $0x140] sm:$0xff]  ;;  %v18841_v10 = vld [vmem:[%s30685_s5 + $0xf0] sm:$0xff] }
 0x341   : > { %21996 = vmatprep.subr.bf16.mxu1 %v25156_v4  ;;  %v18851_v26 = vld [vmem:[%s30685_s5 + $0x140] sm:$0xff] }
 0x343   : > { %21968 = vmatpush1.bf16.msra.mxu0 %v26688_v50 }
 0x344   : > { %21998 = vmatpush1.bf16.msra.mxu1 %v26688_v50  ;;  %21969 = vmatprep.subr.bf16.mxu0 %v25156_v4 }
 0x345   : > { %21999 = vmatprep.subr.bf16.mxu1 %v25156_v4 }
 0x347   : > { %21971 = vmatpush1.bf16.msra.mxu0 %v26702_v29 }
 0x348   : > { %22001 = vmatpush1.bf16.msra.mxu1 %v26702_v29  ;;  %21972 = vmatprep.subr.bf16.mxu0 %v25156_v4 }
 0x349   : > { %22002 = vmatprep.subr.bf16.mxu1 %v25156_v4 }
 0x34b   : > { %21974 = vmatpush1.bf16.msra.mxu0 %v26714_v32 }
 0x34c   : > { %22004 = vmatpush1.bf16.msra.mxu1 %v26714_v32  ;;  %6763 = vmatprep.subr.mxu0 %v25154_v7 }
 0x34d   : > { %6844 = vmatprep.subr.mxu1 %v25154_v7 }
 0x34f   : > { %6764 = vmatpush1.msra.mxu0 %v26723_v33 }
 0x350   : > { %6845 = vmatpush1.msra.mxu1 %v26723_v33  ;;  %6788 = vmatmul.mubr.f32.vlgmr.msra.gmra.mrb[68].mxu0 %v26799_v36 }
 0x351   : > { %6869 = vmatmul.mubr.f32.vlgmr.msra.gmra.mrb[68].mxu1 %v26801_v45  ;;  %22005 = vmatprep.subr.bf16.mxu0 %v25156_v4 }
 0x352   : > { %22035 = vmatprep.subr.bf16.mxu1 %v25156_v4  ;;  %18785 = vmatprep.mubr.msk.f32.mxu0 %vm6554_vm5, %v26824_v19 }
 0x353   : > { %18787 = vmatprep.mubr.msk.f32.mxu1 %vm6554_vm5, %v26827_v20  ;;  %22007 = vmatpush1.bf16.msra.mxu0 %v26598_v3 }
 0x354   : > { %22037 = vmatpush1.bf16.msra.mxu1 %v26598_v3  ;;  %6793 = vmatmul.mubr.f32.gmra.mrb[70].mxu0 %v26818_v59 }
 0x355   : > { %6874 = vmatmul.mubr.f32.gmra.mrb[70].mxu1 %v26821_v60  ;;  %22008 = vmatprep.subr.bf16.mxu0 %v25156_v4 }
 0x356   : > { %22038 = vmatprep.subr.bf16.mxu1 %v25156_v4  ;;  %18788 = vmatprep.mubr.msk.f32.mxu0 %vm6554_vm5, %v26840_v2 }
 0x357   : > { %18790 = vmatprep.mubr.msk.f32.mxu1 %vm6554_vm5, %v26843_v28  ;;  %22010 = vmatpush1.bf16.msra.mxu0 %v26618_v15 }
 0x358   : > { %22040 = vmatpush1.bf16.msra.mxu1 %v26618_v15  ;;  %22011 = vmatprep.subr.bf16.mxu0 %v25156_v4 }
 0x359   : > { %22041 = vmatprep.subr.bf16.mxu1 %v25156_v4 }
 0x35b   : > { %22013 = vmatpush1.bf16.msra.mxu0 %v26630_v42 }
 0x35c   : > { %22043 = vmatpush1.bf16.msra.mxu1 %v26630_v42  ;;  %22014 = vmatprep.subr.bf16.mxu0 %v25156_v4 }
 0x35d   : > { %22044 = vmatprep.subr.bf16.mxu1 %v25156_v4 }
 0x35f   : > { %22016 = vmatpush1.bf16.msra.mxu0 %v26642_v51 }
 0x360   : > { %22046 = vmatpush1.bf16.msra.mxu1 %v26642_v51  ;;  %22017 = vmatprep.subr.bf16.mxu0 %v25156_v4 }
 0x361   : > { %22047 = vmatprep.subr.bf16.mxu1 %v25156_v4 }
 0x363   : > { %22019 = vmatpush1.bf16.msra.mxu0 %v26654_v23 }
 0x364   : > { %22049 = vmatpush1.bf16.msra.mxu1 %v26654_v23  ;;  %22020 = vmatprep.subr.bf16.mxu0 %v25156_v4 }
 0x365   : > { %22050 = vmatprep.subr.bf16.mxu1 %v25156_v4 }
 0x367   : > { %22022 = vmatpush1.bf16.msra.mxu0 %v26666_v58 }
 0x368   : > { %22052 = vmatpush1.bf16.msra.mxu1 %v26666_v58  ;;  %22023 = vmatprep.subr.bf16.mxu0 %v25156_v4 }
 0x369   : > { %22053 = vmatprep.subr.bf16.mxu1 %v25156_v4 }
 0x36b   : > { %22025 = vmatpush1.bf16.msra.mxu0 %v26678_v37 }
 0x36c   : > { %22055 = vmatpush1.bf16.msra.mxu1 %v26678_v37  ;;  %22026 = vmatprep.subr.bf16.mxu0 %v25156_v4 }
 0x36d   : > { %22056 = vmatprep.subr.bf16.mxu1 %v25156_v4 }
 0x36f   : > { %22028 = vmatpush1.bf16.msra.mxu0 %v26688_v50 }
 0x370   : > { %22058 = vmatpush1.bf16.msra.mxu1 %v26688_v50  ;;  %22029 = vmatprep.subr.bf16.mxu0 %v25156_v4 }
 0x371   : > { %22059 = vmatprep.subr.bf16.mxu1 %v25156_v4 }
 0x373   : > { %22031 = vmatpush1.bf16.msra.mxu0 %v26702_v29 }
 0x374   : > { %22061 = vmatpush1.bf16.msra.mxu1 %v26702_v29  ;;  %22032 = vmatprep.subr.bf16.mxu0 %v25156_v4 }
 0x375   : > { %22062 = vmatprep.subr.bf16.mxu1 %v25156_v4 }
 0x377   : > { %22034 = vmatpush1.bf16.msra.mxu0 %v26714_v32 }
 0x378   : > { %22064 = vmatpush1.bf16.msra.mxu1 %v26714_v32  ;;  %6925 = vmatprep.subr.mxu0 %v25154_v7 }
 0x379   : > { %7006 = vmatprep.subr.mxu1 %v25154_v7 }
 0x37b   : > { %6926 = vmatpush1.msra.mxu0 %v26723_v33 }
 0x37c   : > { %7007 = vmatpush1.msra.mxu1 %v26723_v33  ;;  %6950 = vmatmul.mubr.f32.vlgmr.msra.gmra.mrb[72].mxu0 %v26834_v0 }
 0x37d   : > { %7031 = vmatmul.mubr.f32.vlgmr.msra.gmra.mrb[72].mxu1 %v26837_v62  ;;  %22065 = vmatprep.subr.bf16.mxu0 %v25156_v4 }
 0x37e   : > { %22095 = vmatprep.subr.bf16.mxu1 %v25156_v4  ;;  %18789 = vmatprep.mubr.msk.f32.mxu0 %vm6554_vm5, %v26856_v16 }
 0x37f   : > { %18791 = vmatprep.mubr.msk.f32.mxu1 %vm6554_vm5, %v26859_v52  ;;  %22067 = vmatpush1.bf16.msra.mxu0 %v26598_v3 }
 0x380   : > { %22097 = vmatpush1.bf16.msra.mxu1 %v26598_v3  ;;  %6955 = vmatmul.mubr.f32.gmra.mrb[74].mxu0 %v26850_v11  ;;  %v18796_v3 = vld [vmem:[%s30684_s4 + $0xa8] sm:$0xff] }
 0x381   : > { %7036 = vmatmul.mubr.f32.gmra.mrb[74].mxu1 %v26853_v35  ;;  %22068 = vmatprep.subr.bf16.mxu0 %v25156_v4 }
 0x382   : > { %22098 = vmatprep.subr.bf16.mxu1 %v25156_v4  ;;  %18792 = vmatprep.mubr.msk.f32.mxu0 %vm6554_vm5, %v26872_v14 }
 0x383   : > { %18794 = vmatprep.mubr.msk.f32.mxu1 %vm6554_vm5, %v26875_v41  ;;  %22070 = vmatpush1.bf16.msra.mxu0 %v26618_v15 }
 0x384   : > { %22100 = vmatpush1.bf16.msra.mxu1 %v26618_v15  ;;  %22071 = vmatprep.subr.bf16.mxu0 %v25156_v4  ;;  %v18797_v15 = vld [vmem:[%s30684_s4 + $0xb0] sm:$0xff] }
 0x385   : > { %22101 = vmatprep.subr.bf16.mxu1 %v25156_v4 }
 0x387   : > { %22073 = vmatpush1.bf16.msra.mxu0 %v26630_v42 }
 0x388   : > { %22103 = vmatpush1.bf16.msra.mxu1 %v26630_v42  ;;  %22074 = vmatprep.subr.bf16.mxu0 %v25156_v4  ;;  %v27029_v42 = vpack.c.bf16 %v18797_v15, %v18796_v3  ;;  %v27149_v3 = vpack.c.bf16 %v18815_v1, %v18814_v39  ;;  %v27160_v15 = vld [vmem:[%s30684_s4 + $0x148] sm:$0xff]  ;;  %v27478_v39 = vld [vmem:[%s30685_s5 + $0x150] sm:$0xf] }
 0x389   : > { %22104 = vmatprep.subr.bf16.mxu1 %v25156_v4 }
 0x38b   : > { %22076 = vmatpush1.bf16.msra.mxu0 %v26642_v51 }
 0x38c   : > { %22106 = vmatpush1.bf16.msra.mxu1 %v26642_v51  ;;  %22077 = vmatprep.subr.bf16.mxu0 %v25156_v4  ;;  %v18798_v51 = vld [vmem:[%s30684_s4 + $0xb8] sm:$0xff] }
 0x38d   : > { %22107 = vmatprep.subr.bf16.mxu1 %v25156_v4 }
 0x38f   : > { %22079 = vmatpush1.bf16.msra.mxu0 %v26654_v23 }
 0x390   : > { %22109 = vmatpush1.bf16.msra.mxu1 %v26654_v23  ;;  %22080 = vmatprep.subr.bf16.mxu0 %v25156_v4  ;;  %v18799_v23 = vld [vmem:[%s30684_s4 + $0xc0] sm:$0xff] }
 0x391   : > { %22110 = vmatprep.subr.bf16.mxu1 %v25156_v4 }
 0x393   : > { %22082 = vmatpush1.bf16.msra.mxu0 %v26666_v58 }
 0x394   : > { %22112 = vmatpush1.bf16.msra.mxu1 %v26666_v58  ;;  %22083 = vmatprep.subr.bf16.mxu0 %v25156_v4  ;;  %v27047_v58 = vpack.c.bf16 %v18799_v23, %v18798_v51  ;;  %v18833_v23 = vld [vmem:[%s30685_s5 + $0xb0] sm:$0xff] }
 0x395   : > { %22113 = vmatprep.subr.bf16.mxu1 %v25156_v4 }
 0x397   : > { %22085 = vmatpush1.bf16.msra.mxu0 %v26678_v37 }
 0x398   : > { %22115 = vmatpush1.bf16.msra.mxu1 %v26678_v37  ;;  %22086 = vmatprep.subr.bf16.mxu0 %v25156_v4  ;;  %v18800_v37 = vld [vmem:[%s30684_s4 + $0xc8] sm:$0xff] }
 0x399   : > { %22116 = vmatprep.subr.bf16.mxu1 %v25156_v4 }
 0x39b   : > { %22088 = vmatpush1.bf16.msra.mxu0 %v26688_v50 }
 0x39c   : > { %22118 = vmatpush1.bf16.msra.mxu1 %v26688_v50  ;;  %22089 = vmatprep.subr.bf16.mxu0 %v25156_v4  ;;  %v18801_v50 = vld [vmem:[%s30684_s4 + $0xd0] sm:$0xff] }
 0x39d   : > { %22119 = vmatprep.subr.bf16.mxu1 %v25156_v4 }
 0x39f   : > { %22091 = vmatpush1.bf16.msra.mxu0 %v26702_v29 }
 0x3a0   : > { %22121 = vmatpush1.bf16.msra.mxu1 %v26702_v29  ;;  %22092 = vmatprep.subr.bf16.mxu0 %v25156_v4  ;;  %v27065_v29 = vpack.c.bf16 %v18801_v50, %v18800_v37  ;;  %v18838_v50 = vld [vmem:[%s30685_s5 + $0xd8] sm:$0xff] }
 0x3a1   : > { %22122 = vmatprep.subr.bf16.mxu1 %v25156_v4 }
 0x3a3   : > { %22094 = vmatpush1.bf16.msra.mxu0 %v26714_v32 }
 0x3a4   : > { %22124 = vmatpush1.bf16.msra.mxu1 %v26714_v32  ;;  %7087 = vmatprep.subr.mxu0 %v25154_v7  ;;  %v18802_v32 = vld [vmem:[%s30684_s4 + $0xd8] sm:$0xff] }
 0x3a5   : > { %7168 = vmatprep.subr.mxu1 %v25154_v7 }
 0x3a7   : > { %7088 = vmatpush1.msra.mxu0 %v26723_v33 }
 0x3a8   : > { %7169 = vmatpush1.msra.mxu1 %v26723_v33  ;;  %7112 = vmatmul.mubr.f32.vlgmr.msra.gmra.mrb[76].mxu0 %v26866_v18  ;;  %v18803_v33 = vld [vmem:[%s30684_s4 + $0xe0] sm:$0xff] }
 0x3a9   : > { %7193 = vmatmul.mubr.f32.vlgmr.msra.gmra.mrb[76].mxu1 %v26869_v56  ;;  %22125 = vmatprep.subr.bf16.mxu0 %v25156_v4  ;;  %v27077_v43 = vpack.c.bf16 %v18803_v33, %v18802_v32  ;;  %v18837_v33 = vld [vmem:[%s30685_s5 + $0xd0] sm:$0xff] }
 0x3aa   : > { %22155 = vmatprep.subr.bf16.mxu1 %v25156_v4  ;;  %18793 = vmatprep.mubr.msk.f32.mxu0 %vm6554_vm5, %v26888_v40 }
 0x3ab   : > { %18795 = vmatprep.mubr.msk.f32.mxu1 %vm6554_vm5, %v26891_v27  ;;  %22127 = vmatpush1.bf16.msra.mxu0 %v27029_v42 }
 0x3ac   : > { %22157 = vmatpush1.bf16.msra.mxu1 %v27029_v42  ;;  %7117 = vmatmul.mubr.f32.gmra.mrb[78].mxu0 %v26882_v25 }
 0x3ad   : > { %7198 = vmatmul.mubr.f32.gmra.mrb[78].mxu1 %v26885_v61  ;;  %22128 = vmatprep.subr.bf16.mxu0 %v25156_v4 }
 0x3ae   : > { %22158 = vmatprep.subr.bf16.mxu1 %v25156_v4  ;;  %18817 = vmatprep.mubr.msk.f32.mxu0 %vm6554_vm5, %v26773_v24  ;;  %v18806_v24 = vld [vmem:[%s30684_s4 + $0xf8] sm:$0xff] }
 0x3af   : > { %18819 = vmatprep.mubr.msk.f32.mxu1 %vm6554_vm5, %v26775_v57  ;;  %22130 = vmatpush1.bf16.msra.mxu0 %v27047_v58  ;;  %v18807_v57 = vld [vmem:[%s30684_s4 + $0x100] sm:$0xff] }
 0x3b0   : > { %22160 = vmatpush1.bf16.msra.mxu1 %v27047_v58  ;;  %22131 = vmatprep.subr.bf16.mxu0 %v25156_v4  ;;  %v27101_v8 = vpack.c.bf16 %v18807_v57, %v18806_v24 }
 0x3b1   : > { %22161 = vmatprep.subr.bf16.mxu1 %v25156_v4 }
 0x3b3   : > { %22133 = vmatpush1.bf16.msra.mxu0 %v27065_v29 }
 0x3b4   : > { %22163 = vmatpush1.bf16.msra.mxu1 %v27065_v29  ;;  %22134 = vmatprep.subr.bf16.mxu0 %v25156_v4 }
 0x3b5   : > { %22164 = vmatprep.subr.bf16.mxu1 %v25156_v4 }
 0x3b7   : > { %22136 = vmatpush1.bf16.msra.mxu0 %v27077_v43 }
 0x3b8   : > { %22166 = vmatpush1.bf16.msra.mxu1 %v27077_v43  ;;  %22137 = vmatprep.subr.bf16.mxu0 %v25156_v4 }
 0x3b9   : > { %22167 = vmatprep.subr.bf16.mxu1 %v25156_v4 }
 0x3bb   : > { %22139 = vmatpush1.bf16.msra.mxu0 %v27089_v13 }
 0x3bc   : > { %22169 = vmatpush1.bf16.msra.mxu1 %v27089_v13  ;;  %22140 = vmatprep.subr.bf16.mxu0 %v25156_v4 }
 0x3bd   : > { %22170 = vmatprep.subr.bf16.mxu1 %v25156_v4 }
 0x3bf   : > { %22142 = vmatpush1.bf16.msra.mxu0 %v27101_v8 }
 0x3c0   : > { %22172 = vmatpush1.bf16.msra.mxu1 %v27101_v8  ;;  %22143 = vmatprep.subr.bf16.mxu0 %v25156_v4 }
 0x3c1   : > { %22173 = vmatprep.subr.bf16.mxu1 %v25156_v4 }
 0x3c3   : > { %22145 = vmatpush1.bf16.msra.mxu0 %v27113_v46 }
 0x3c4   : > { %22175 = vmatpush1.bf16.msra.mxu1 %v27113_v46  ;;  %22146 = vmatprep.subr.bf16.mxu0 %v25156_v4 }
 0x3c5   : > { %22176 = vmatprep.subr.bf16.mxu1 %v25156_v4 }
 0x3c7   : > { %22148 = vmatpush1.bf16.msra.mxu0 %v27125_v21 }
 0x3c8   : > { %22178 = vmatpush1.bf16.msra.mxu1 %v27125_v21  ;;  %22149 = vmatprep.subr.bf16.mxu0 %v25156_v4 }
 0x3c9   : > { %22179 = vmatprep.subr.bf16.mxu1 %v25156_v4 }
 0x3cb   : > { %22151 = vmatpush1.bf16.msra.mxu0 %v27137_v63 }
 0x3cc   : > { %22181 = vmatpush1.bf16.msra.mxu1 %v27137_v63  ;;  %22152 = vmatprep.subr.bf16.mxu0 %v25156_v4 }
 0x3cd   : > { %22182 = vmatprep.subr.bf16.mxu1 %v25156_v4 }
 0x3cf   : > { %22154 = vmatpush1.bf16.msra.mxu0 %v27149_v3 }
 0x3d0   : > { %22184 = vmatpush1.bf16.msra.mxu1 %v27149_v3  ;;  %7265 = vmatprep.subr.mxu0 %v25154_v7 }
 0x3d1   : > { %7340 = vmatprep.subr.mxu1 %v25154_v7 }
 0x3d3   : > { %7266 = vmatpush1.msra.mxu0 %v27160_v15 }
 0x3d4   : > { %7341 = vmatpush1.msra.mxu1 %v27160_v15  ;;  %7290 = vmatmul.mubr.f32.vlgmr.msra.gmra.mrb[80].mxu0 %v26769_v47 }
 0x3d5   : > { %7365 = vmatmul.mubr.f32.vlgmr.msra.gmra.mrb[80].mxu1 %v26771_v48  ;;  %22185 = vmatprep.subr.bf16.mxu0 %v25156_v4 }
 0x3d6   : > { %22215 = vmatprep.subr.bf16.mxu1 %v25156_v4  ;;  %18818 = vmatprep.mubr.msk.f32.mxu0 %vm6554_vm5, %v26787_v30 }
 0x3d7   : > { %18820 = vmatprep.mubr.msk.f32.mxu1 %vm6554_vm5, %v26789_v31  ;;  %22187 = vmatpush1.bf16.msra.mxu0 %v27029_v42 }
 0x3d8   : > { %22217 = vmatpush1.bf16.msra.mxu1 %v27029_v42  ;;  %7295 = vmatmul.mubr.f32.gmra.mrb[82].mxu0 %v26781_v38 }
 0x3d9   : > { %7370 = vmatmul.mubr.f32.gmra.mrb[82].mxu1 %v26783_v49  ;;  %22188 = vmatprep.subr.bf16.mxu0 %v25156_v4 }
 0x3da   : > { %22218 = vmatprep.subr.bf16.mxu1 %v25156_v4  ;;  %18821 = vmatprep.mubr.msk.f32.mxu0 %vm6554_vm5, %v26805_v53 }
 0x3db   : > { %18823 = vmatprep.mubr.msk.f32.mxu1 %vm6554_vm5, %v26807_v54  ;;  %22190 = vmatpush1.bf16.msra.mxu0 %v27047_v58 }
 0x3dc   : > { %22220 = vmatpush1.bf16.msra.mxu1 %v27047_v58  ;;  %22191 = vmatprep.subr.bf16.mxu0 %v25156_v4 }
 0x3dd   : > { %22221 = vmatprep.subr.bf16.mxu1 %v25156_v4 }
 0x3df   : > { %22193 = vmatpush1.bf16.msra.mxu0 %v27065_v29 }
 0x3e0   : > { %22223 = vmatpush1.bf16.msra.mxu1 %v27065_v29  ;;  %22194 = vmatprep.subr.bf16.mxu0 %v25156_v4 }
 0x3e1   : > { %22224 = vmatprep.subr.bf16.mxu1 %v25156_v4 }
 0x3e3   : > { %22196 = vmatpush1.bf16.msra.mxu0 %v27077_v43 }
 0x3e4   : > { %22226 = vmatpush1.bf16.msra.mxu1 %v27077_v43  ;;  %22197 = vmatprep.subr.bf16.mxu0 %v25156_v4 }
 0x3e5   : > { %22227 = vmatprep.subr.bf16.mxu1 %v25156_v4 }
 0x3e7   : > { %22199 = vmatpush1.bf16.msra.mxu0 %v27089_v13 }
 0x3e8   : > { %22229 = vmatpush1.bf16.msra.mxu1 %v27089_v13  ;;  %22200 = vmatprep.subr.bf16.mxu0 %v25156_v4 }
 0x3e9   : > { %22230 = vmatprep.subr.bf16.mxu1 %v25156_v4 }
 0x3eb   : > { %22202 = vmatpush1.bf16.msra.mxu0 %v27101_v8 }
 0x3ec   : > { %22232 = vmatpush1.bf16.msra.mxu1 %v27101_v8  ;;  %22203 = vmatprep.subr.bf16.mxu0 %v25156_v4 }
 0x3ed   : > { %22233 = vmatprep.subr.bf16.mxu1 %v25156_v4 }
 0x3ef   : > { %22205 = vmatpush1.bf16.msra.mxu0 %v27113_v46 }
 0x3f0   : > { %22235 = vmatpush1.bf16.msra.mxu1 %v27113_v46  ;;  %22206 = vmatprep.subr.bf16.mxu0 %v25156_v4 }
 0x3f1   : > { %22236 = vmatprep.subr.bf16.mxu1 %v25156_v4 }
 0x3f3   : > { %22208 = vmatpush1.bf16.msra.mxu0 %v27125_v21 }
 0x3f4   : > { %22238 = vmatpush1.bf16.msra.mxu1 %v27125_v21  ;;  %22209 = vmatprep.subr.bf16.mxu0 %v25156_v4 }
 0x3f5   : > { %22239 = vmatprep.subr.bf16.mxu1 %v25156_v4 }
 0x3f7   : > { %22211 = vmatpush1.bf16.msra.mxu0 %v27137_v63 }
 0x3f8   : > { %22241 = vmatpush1.bf16.msra.mxu1 %v27137_v63  ;;  %22212 = vmatprep.subr.bf16.mxu0 %v25156_v4 }
 0x3f9   : > { %22242 = vmatprep.subr.bf16.mxu1 %v25156_v4  ;;  %v27214_v47 = vpop.f32.mrb[64].mxu0 }
 0x3fa   : > { %v27216_v48 = vpop.f32.mrb[64].mxu1  ;;  %v6629_v38 = vpop.f32.mrb[65].mxu0 }
 0x3fb   : > { %v6710_v49 = vpop.f32.mrb[65].mxu1  ;;  %22214 = vmatpush1.bf16.msra.mxu0 %v27149_v3 }
 0x3fc   : > { %22244 = vmatpush1.bf16.msra.mxu1 %v27149_v3  ;;  %7415 = vmatprep.subr.mxu0 %v25154_v7 }
 0x3fd   : > { %7490 = vmatprep.subr.mxu1 %v25154_v7  ;;  %v27222_v30 = vpop.f32.mrb[66].mxu0 }
 0x3fe   : > { %v27224_v31 = vpop.f32.mrb[66].mxu1  ;;  %v6634_v53 = vpop.f32.mrb[67].mxu0 }
 0x3ff   : > { %v6715_v54 = vpop.f32.mrb[67].mxu1  ;;  %7416 = vmatpush1.msra.mxu0 %v27160_v15 }
 0x400   : > { %7491 = vmatpush1.msra.mxu1 %v27160_v15  ;;  %7440 = vmatmul.mubr.f32.vlgmr.msra.gmra.mrb[84].mxu0 %v26799_v36 }
 0x401   : > { %7515 = vmatmul.mubr.f32.vlgmr.msra.gmra.mrb[84].mxu1 %v26801_v45  ;;  %22245 = vmatprep.subr.bf16.mxu0 %v25156_v4 }
 0x402   : > { %22275 = vmatprep.subr.bf16.mxu1 %v25156_v4  ;;  %18822 = vmatprep.mubr.msk.f32.mxu0 %vm6554_vm5, %v26824_v19 }
 0x403   : > { %18824 = vmatprep.mubr.msk.f32.mxu1 %vm6554_vm5, %v26827_v20  ;;  %22247 = vmatpush1.bf16.msra.mxu0 %v27029_v42 }
 0x404   : > { %22277 = vmatpush1.bf16.msra.mxu1 %v27029_v42  ;;  %7445 = vmatmul.mubr.f32.gmra.mrb[86].mxu0 %v26818_v59 }
 0x405   : > { %7520 = vmatmul.mubr.f32.gmra.mrb[86].mxu1 %v26821_v60  ;;  %22248 = vmatprep.subr.bf16.mxu0 %v25156_v4 }
 0x406   : > { %22278 = vmatprep.subr.bf16.mxu1 %v25156_v4  ;;  %18825 = vmatprep.mubr.msk.f32.mxu0 %vm6554_vm5, %v26840_v2 }
 0x407   : > { %18827 = vmatprep.mubr.msk.f32.mxu1 %vm6554_vm5, %v26843_v28  ;;  %22250 = vmatpush1.bf16.msra.mxu0 %v27047_v58 }
 0x408   : > { %22280 = vmatpush1.bf16.msra.mxu1 %v27047_v58  ;;  %22251 = vmatprep.subr.bf16.mxu0 %v25156_v4 }
 0x409   : > { %22281 = vmatprep.subr.bf16.mxu1 %v25156_v4 }
 0x40b   : > { %22253 = vmatpush1.bf16.msra.mxu0 %v27065_v29 }
 0x40c   : > { %22283 = vmatpush1.bf16.msra.mxu1 %v27065_v29  ;;  %22254 = vmatprep.subr.bf16.mxu0 %v25156_v4 }
 0x40d   : > { %22284 = vmatprep.subr.bf16.mxu1 %v25156_v4 }
 0x40f   : > { %22256 = vmatpush1.bf16.msra.mxu0 %v27077_v43 }
 0x410   : > { %22286 = vmatpush1.bf16.msra.mxu1 %v27077_v43  ;;  %22257 = vmatprep.subr.bf16.mxu0 %v25156_v4 }
 0x411   : > { %22287 = vmatprep.subr.bf16.mxu1 %v25156_v4 }
 0x413   : > { %22259 = vmatpush1.bf16.msra.mxu0 %v27089_v13 }
 0x414   : > { %22289 = vmatpush1.bf16.msra.mxu1 %v27089_v13  ;;  %22260 = vmatprep.subr.bf16.mxu0 %v25156_v4 }
 0x415   : > { %22290 = vmatprep.subr.bf16.mxu1 %v25156_v4 }
 0x417   : > { %22262 = vmatpush1.bf16.msra.mxu0 %v27101_v8 }
 0x418   : > { %22292 = vmatpush1.bf16.msra.mxu1 %v27101_v8  ;;  %22263 = vmatprep.subr.bf16.mxu0 %v25156_v4 }
 0x419   : > { %22293 = vmatprep.subr.bf16.mxu1 %v25156_v4 }
 0x41b   : > { %22265 = vmatpush1.bf16.msra.mxu0 %v27113_v46 }
 0x41c   : > { %22295 = vmatpush1.bf16.msra.mxu1 %v27113_v46  ;;  %22266 = vmatprep.subr.bf16.mxu0 %v25156_v4 }
 0x41d   : > { %22296 = vmatprep.subr.bf16.mxu1 %v25156_v4 }
 0x41f   : > { %22268 = vmatpush1.bf16.msra.mxu0 %v27125_v21 }
 0x420   : > { %22298 = vmatpush1.bf16.msra.mxu1 %v27125_v21  ;;  %22269 = vmatprep.subr.bf16.mxu0 %v25156_v4 }
 0x421   : > { %22299 = vmatprep.subr.bf16.mxu1 %v25156_v4 }
 0x423   : > { %22271 = vmatpush1.bf16.msra.mxu0 %v27137_v63  ;;  %v27276_v36 = vpop.f32.mrb[68].mxu0 }
 0x424   : > { %22301 = vmatpush1.bf16.msra.mxu1 %v27137_v63  ;;  %v27278_v45 = vpop.f32.mrb[68].mxu1  ;;  %22272 = vmatprep.subr.bf16.mxu0 %v25156_v4  ;;  %v6791_v59 = vpop.f32.mrb[69].mxu0 }
 0x425   : > { %22302 = vmatprep.subr.bf16.mxu1 %v25156_v4  ;;  %v6872_v60 = vpop.f32.mrb[69].mxu1 }
 0x427   : > { %22274 = vmatpush1.bf16.msra.mxu0 %v27149_v3  ;;  %v27284_v19 = vpop.f32.mrb[70].mxu0 }
 0x428   : > { %22304 = vmatpush1.bf16.msra.mxu1 %v27149_v3  ;;  %v27286_v20 = vpop.f32.mrb[70].mxu1  ;;  %7565 = vmatprep.subr.mxu0 %v25154_v7  ;;  %v6796_v2 = vpop.f32.mrb[71].mxu0 }
 0x429   : > { %7640 = vmatprep.subr.mxu1 %v25154_v7  ;;  %v6877_v28 = vpop.f32.mrb[71].mxu1 }
 0x42b   : > { %7566 = vmatpush1.msra.mxu0 %v27160_v15 }
 0x42c   : > { %7641 = vmatpush1.msra.mxu1 %v27160_v15  ;;  %7590 = vmatmul.mubr.f32.vlgmr.msra.gmra.mrb[88].mxu0 %v26834_v0 }
 0x42d   : > { %7665 = vmatmul.mubr.f32.vlgmr.msra.gmra.mrb[88].mxu1 %v26837_v62  ;;  %22305 = vmatprep.subr.bf16.mxu0 %v25156_v4 }
 0x42e   : > { %22335 = vmatprep.subr.bf16.mxu1 %v25156_v4  ;;  %18826 = vmatprep.mubr.msk.f32.mxu0 %vm6554_vm5, %v26856_v16 }
 0x42f   : > { %18828 = vmatprep.mubr.msk.f32.mxu1 %vm6554_vm5, %v26859_v52  ;;  %22307 = vmatpush1.bf16.msra.mxu0 %v27029_v42 }
 0x430   : > { %22337 = vmatpush1.bf16.msra.mxu1 %v27029_v42  ;;  %7595 = vmatmul.mubr.f32.gmra.mrb[90].mxu0 %v26850_v11 }
 0x431   : > { %7670 = vmatmul.mubr.f32.gmra.mrb[90].mxu1 %v26853_v35  ;;  %22308 = vmatprep.subr.bf16.mxu0 %v25156_v4 }
 0x432   : > { %22338 = vmatprep.subr.bf16.mxu1 %v25156_v4  ;;  %18829 = vmatprep.mubr.msk.f32.mxu0 %vm6554_vm5, %v26872_v14  ;;  %v18834_v14 = vld [vmem:[%s30685_s5 + $0xb8] sm:$0xff] }
 0x433   : > { %18831 = vmatprep.mubr.msk.f32.mxu1 %vm6554_vm5, %v26875_v41  ;;  %22310 = vmatpush1.bf16.msra.mxu0 %v27047_v58  ;;  %v18836_v41 = vld [vmem:[%s30685_s5 + $0xc8] sm:$0xff] }
 0x434   : > { %22340 = vmatpush1.bf16.msra.mxu1 %v27047_v58  ;;  %22311 = vmatprep.subr.bf16.mxu0 %v25156_v4  ;;  %v18835_v58 = vld [vmem:[%s30685_s5 + $0xc0] sm:$0xff]  ;;  %v27366_v37 = vpack.c.bf16 %v18836_v41, %v18834_v14 }
 0x435   : > { %22341 = vmatprep.subr.bf16.mxu1 %v25156_v4  ;;  %v27376_v32 = vpack.c.bf16 %v18835_v58, %v18833_v23 }
 0x437   : > { %22313 = vmatpush1.bf16.msra.mxu0 %v27065_v29 }
 0x438   : > { %22343 = vmatpush1.bf16.msra.mxu1 %v27065_v29  ;;  %22314 = vmatprep.subr.bf16.mxu0 %v25156_v4  ;;  %v18840_v29 = vld [vmem:[%s30685_s5 + $0xe8] sm:$0xff] }
 0x439   : > { %22344 = vmatprep.subr.bf16.mxu1 %v25156_v4  ;;  %v27390_v44 = vpack.c.bf16 %v18840_v29, %v18838_v50 }
 0x43b   : > { %22316 = vmatpush1.bf16.msra.mxu0 %v27077_v43 }
 0x43c   : > { %22346 = vmatpush1.bf16.msra.mxu1 %v27077_v43  ;;  %22317 = vmatprep.subr.bf16.mxu0 %v25156_v4  ;;  %v18839_v43 = vld [vmem:[%s30685_s5 + $0xe0] sm:$0xff] }
 0x43d   : > { %22347 = vmatprep.subr.bf16.mxu1 %v25156_v4 }
 0x43f   : > { %22319 = vmatpush1.bf16.msra.mxu0 %v27089_v13 }
 0x440   : > { %22349 = vmatpush1.bf16.msra.mxu1 %v27089_v13  ;;  %22320 = vmatprep.subr.bf16.mxu0 %v25156_v4  ;;  %v18843_v13 = vld [vmem:[%s30685_s5 + $0x100] sm:$0xff] }
 0x441   : > { %22350 = vmatprep.subr.bf16.mxu1 %v25156_v4  ;;  %v27426_v24 = vpack.c.bf16 %v18843_v13, %v18841_v10 }
 0x443   : > { %22322 = vmatpush1.bf16.msra.mxu0 %v27101_v8 }
 0x444   : > { %22352 = vmatpush1.bf16.msra.mxu1 %v27101_v8  ;;  %22323 = vmatprep.subr.bf16.mxu0 %v25156_v4  ;;  %v18845_v8 = vld [vmem:[%s30685_s5 + $0x110] sm:$0xff] }
 0x445   : > { %22353 = vmatprep.subr.bf16.mxu1 %v25156_v4  ;;  %v27446_v17 = vpack.c.bf16 %v18847_v34, %v18845_v8 }
 0x447   : > { %22325 = vmatpush1.bf16.msra.mxu0 %v27113_v46 }
 0x448   : > { %22355 = vmatpush1.bf16.msra.mxu1 %v27113_v46  ;;  %22326 = vmatprep.subr.bf16.mxu0 %v25156_v4  ;;  %v18852_v46 = vld [vmem:[%s30685_s5 + $0x148] sm:$0xff] }
 0x449   : > { %22356 = vmatprep.subr.bf16.mxu1 %v25156_v4  ;;  %v27450_v55 = vpack.c.bf16 %v18852_v46, %v18850_v12 }
 0x44b   : > { %22328 = vmatpush1.bf16.msra.mxu0 %v27125_v21 }
 0x44c   : > { %22358 = vmatpush1.bf16.msra.mxu1 %v27125_v21  ;;  %22329 = vmatprep.subr.bf16.mxu0 %v25156_v4  ;;  %v18849_v21 = vld [vmem:[%s30685_s5 + $0x130] sm:$0xff] }
 0x44d   : > { %22359 = vmatprep.subr.bf16.mxu1 %v25156_v4  ;;  %v27460_v22 = vpack.c.bf16 %v18851_v26, %v18849_v21 }
 0x44f   : > { %22331 = vmatpush1.bf16.msra.mxu0 %v27137_v63  ;;  %v27340_v0 = vpop.f32.mrb[72].mxu0 }
 0x450   : > { %22361 = vmatpush1.bf16.msra.mxu1 %v27137_v63  ;;  %v27342_v62 = vpop.f32.mrb[72].mxu1  ;;  %22332 = vmatprep.subr.bf16.mxu0 %v25156_v4  ;;  %v6953_v11 = vpop.f32.mrb[73].mxu0  ;;  %v27467_v63 = vld [vmem:[%s30685_s5 + $0x158] sm:$0xf] }
 0x451   : > { %22362 = vmatprep.subr.bf16.mxu1 %v25156_v4  ;;  %v7034_v35 = vpop.f32.mrb[73].mxu1 }
 0x453   : > { %22334 = vmatpush1.bf16.msra.mxu0 %v27149_v3  ;;  %v27348_v16 = vpop.f32.mrb[74].mxu0 }
 0x454   : > { %22364 = vmatpush1.bf16.msra.mxu1 %v27149_v3  ;;  %v27350_v52 = vpop.f32.mrb[74].mxu1  ;;  %7715 = vmatprep.subr.mxu0 %v25154_v7  ;;  %v6958_v42 = vpop.f32.mrb[75].mxu0 }
 0x455   : > { %7790 = vmatprep.subr.mxu1 %v25154_v7  ;;  %v7039_v51 = vpop.f32.mrb[75].mxu1 }
 0x457   : > { %7716 = vmatpush1.msra.mxu0 %v27160_v15 }
 0x458   : > { %7791 = vmatpush1.msra.mxu1 %v27160_v15  ;;  %7740 = vmatmul.mubr.f32.vlgmr.msra.gmra.mrb[92].mxu0 %v26866_v18  ;;  %v18842_v18 = vld [vmem:[%s30685_s5 + $0xf8] sm:$0xff] }
 0x459   : > { %7815 = vmatmul.mubr.f32.vlgmr.msra.gmra.mrb[92].mxu1 %v26869_v56  ;;  %18830 = vmatprep.mubr.msk.f32.mxu0 %vm6554_vm5, %v26888_v40  ;;  %v18844_v56 = vld [vmem:[%s30685_s5 + $0x108] sm:$0xff]  ;;  %v27402_v40 = vpack.c.bf16 %v18839_v43, %v18837_v33 }
 0x45a   : > { %18832 = vmatprep.mubr.msk.f32.mxu1 %vm6554_vm5, %v26891_v27  ;;  %22366 = vmatprep.subr.bf16.mxu0 %v27366_v37  ;;  %v27406_v27 = vpack.c.bf16 %v18844_v56, %v18842_v18 }
 0x45b   : > { %22386 = vmatprep.subr.bf16.mxu1 %v27366_v37  ;;  %22368 = vmatpush1.bf16.msra.mxu0 %v27376_v32 }
 0x45c   : > { %22388 = vmatpush1.bf16.msra.mxu1 %v27376_v32  ;;  %7745 = vmatmul.mubr.f32.gmra.mrb[94].mxu0 %v26882_v25  ;;  %v18846_v25 = vld [vmem:[%s30685_s5 + $0x118] sm:$0xff] }
 0x45d   : > { %7820 = vmatmul.mubr.f32.gmra.mrb[94].mxu1 %v26885_v61  ;;  %22370 = vmatprep.subr.bf16.mxu0 %v27390_v44  ;;  %v18848_v61 = vld [vmem:[%s30685_s5 + $0x128] sm:$0xff] }
 0x45e   : > { %22390 = vmatprep.subr.bf16.mxu1 %v27390_v44  ;;  %8012 = vmatprep.mubr.f32.mxu0 %v25154_v7  ;;  %v27430_v57 = vpack.c.bf16 %v18848_v61, %v18846_v25 }
 0x45f   : > { %8095 = vmatprep.mubr.f32.mxu1 %v25154_v7  ;;  %22372 = vmatpush1.bf16.msra.mxu0 %v27402_v40 }
 0x460   : > { %22392 = vmatpush1.bf16.msra.mxu1 %v27402_v40  ;;  %22374 = vmatprep.subr.bf16.mxu0 %v27406_v27 }
 0x461   : > { %22394 = vmatprep.subr.bf16.mxu1 %v27406_v27 }
 0x463   : > { %22376 = vmatpush1.bf16.msra.mxu0 %v27426_v24 }
 0x464   : > { %22396 = vmatpush1.bf16.msra.mxu1 %v27426_v24  ;;  %22378 = vmatprep.subr.bf16.mxu0 %v27430_v57 }
 0x465   : > { %22398 = vmatprep.subr.bf16.mxu1 %v27430_v57 }
 0x467   : > { %22380 = vmatpush1.bf16.msra.mxu0 %v27446_v17 }
 0x468   : > { %22400 = vmatpush1.bf16.msra.mxu1 %v27446_v17  ;;  %22382 = vmatprep.subr.bf16.mxu0 %v27450_v55 }
 0x469   : > { %22402 = vmatprep.subr.bf16.mxu1 %v27450_v55 }
 0x46b   : > { %22384 = vmatpush1.bf16.msra.mxu0 %v27460_v22 }
 0x46c   : > { %22404 = vmatpush1.bf16.msra.mxu1 %v27460_v22  ;;  %18855 = vmatprep.subr.msk.mxu0 %vm690_vm0, %v27467_v63 }
 0x46d   : > { %18859 = vmatprep.subr.msk.mxu1 %vm690_vm0, %v27467_v63 }
 0x46f   : > { %18856 = vmatpush1.msk.msra.mxu0 %vm690_vm0, %v27478_v39 }
 0x470   : > { %18860 = vmatpush1.msk.msra.mxu1 %vm690_vm0, %v27478_v39  ;;  %22406 = vmatprep.subr.bf16.mxu0 %v27366_v37 }
 0x471   : > { %22426 = vmatprep.subr.bf16.mxu1 %v27366_v37 }
 0x47b   : > { %v27486_v1 = vpop.f32.mrb[76].mxu0 }
 0x47c   : > { %v27488_v3 = vpop.f32.mrb[76].mxu1  ;;  %v7115_v15 = vpop.f32.mrb[77].mxu0 }
 0x47d   : > { %v7196_v38 = vpop.f32.mrb[77].mxu1 }
 0x47f   : > { %v27490_v49 = vpop.f32.mrb[78].mxu0 }
 0x480   : > { %v27492_v53 = vpop.f32.mrb[78].mxu1  ;;  %v7120_v54 = vpop.f32.mrb[79].mxu0 }
 0x481   : > { %v7201_v59 = vpop.f32.mrb[79].mxu1 }
 0x4a7   : > { %v7291_v60 = vpop.f32.mrb[80].mxu0 }
 0x4a8   : > { %v7366_v2 = vpop.f32.mrb[80].mxu1  ;;  %v7825_v28 = vmax.f32 %v27214_v47, %v7291_v60  ;;  %v7293_v35 = vpop.f32.mrb[81].mxu0 }
 0x4a9   : > { %v7827_v11 = vmax.f32 %v27216_v48, %v7366_v2  ;;  %v7368_v14 = vpop.f32.mrb[81].mxu1 }
 0x4aa   : > { %7842 = vst.msk [vmem:[#allocation3] sm:$0xff] %vm7841_vm6, %v7825_v28 }
 0x4ab   : > { %7845 = vst.msk [vmem:[#allocation3 + $0x10] sm:$0xff] %vm7841_vm6, %v7827_v11  ;;  %v7296_v41 = vpop.f32.mrb[82].mxu0 }
 0x4ac   : > { %v7371_v42 = vpop.f32.mrb[82].mxu1  ;;  %v7826_v51 = vmax.f32 %v27222_v30, %v7296_v41  ;;  %v7298_v58 = vpop.f32.mrb[83].mxu0 }
 0x4ad   : > { %v7828_v23 = vmax.f32 %v27224_v31, %v7371_v42  ;;  %v7373_v50 = vpop.f32.mrb[83].mxu1  ;;  %v7881_v58 = vld [vmem:[%s30685_s5 + $0x30] sm:$0xff] }
 0x4ae   : > { %7844 = vst.msk [vmem:[#allocation3 + $0x8] sm:$0x3f] %vm7843_vm7, %v7826_v51  ;;  %v7884_v50 = vld [vmem:[%s30685_s5 + $0x48] sm:$0xff] }
 0x4af   : > { %7846 = vst.msk [vmem:[#allocation3 + $0x18] sm:$0x3f] %vm7843_vm7, %v7828_v23  ;;  %v7879_v23 = vld [vmem:[%s30685_s5 + $0x20] sm:$0xff] }
 0x4b5   : > { %v7897_v47 = vld [vmem:[#allocation3 + $0x1] sm:$0xff]  ;;  %v7898_v30 = vld [vmem:[#allocation3 + $0x9] sm:$0x3] }
 0x4b6   : > { %v7899_v48 = vld [vmem:[#allocation3 + $0x11] sm:$0xff]  ;;  %18857 = vmatmul.mubr.msk.f32.vlgmr.msra.gmra.mrb[96].mxu0 %vm7841_vm6, %v7897_v47  ;;  %v7900_v31 = vld [vmem:[#allocation3 + $0x19] sm:$0x3] }
 0x4b7   : > { %18861 = vmatmul.mubr.msk.f32.vlgmr.msra.gmra.mrb[96].mxu1 %vm7841_vm6, %v7899_v48  ;;  %8018 = vmatprep.mubr.f32.mxu0 %v25154_v7 }
 0x4b8   : > { %8101 = vmatprep.mubr.f32.mxu1 %v25154_v7  ;;  %22408 = vmatpush1.bf16.msra.mxu0 %v27376_v32 }
 0x4b9   : > { %22428 = vmatpush1.bf16.msra.mxu1 %v27376_v32  ;;  %22410 = vmatprep.subr.bf16.mxu0 %v27390_v44 }
 0x4ba   : > { %22430 = vmatprep.subr.bf16.mxu1 %v27390_v44  ;;  %18858 = vmatmul.mubr.msk.f32.gmra.mrb[98].mxu0 %vm7841_vm6, %v7898_v30 }
 0x4bb   : > { %18862 = vmatmul.mubr.msk.f32.gmra.mrb[98].mxu1 %vm7841_vm6, %v7900_v31  ;;  %8178 = vmatprep.mubr.f32.mxu0 %v25154_v7  ;;  %v7886_v31 = vld [vmem:[%s30685_s5 + $0x58] sm:$0xff] }
 0x4bc   : > { %8261 = vmatprep.mubr.f32.mxu1 %v25154_v7  ;;  %22412 = vmatpush1.bf16.msra.mxu0 %v27402_v40 }
 0x4bd   : > { %22432 = vmatpush1.bf16.msra.mxu1 %v27402_v40  ;;  %22414 = vmatprep.subr.bf16.mxu0 %v27406_v27 }
 0x4be   : > { %22434 = vmatprep.subr.bf16.mxu1 %v27406_v27 }
 0x4c0   : > { %22416 = vmatpush1.bf16.msra.mxu0 %v27426_v24 }
 0x4c1   : > { %22436 = vmatpush1.bf16.msra.mxu1 %v27426_v24  ;;  %22418 = vmatprep.subr.bf16.mxu0 %v27430_v57 }
 0x4c2   : > { %22438 = vmatprep.subr.bf16.mxu1 %v27430_v57 }
 0x4c4   : > { %22420 = vmatpush1.bf16.msra.mxu0 %v27446_v17 }
 0x4c5   : > { %22440 = vmatpush1.bf16.msra.mxu1 %v27446_v17  ;;  %22422 = vmatprep.subr.bf16.mxu0 %v27450_v55 }
 0x4c6   : > { %22442 = vmatprep.subr.bf16.mxu1 %v27450_v55 }
 0x4c8   : > { %22424 = vmatpush1.bf16.msra.mxu0 %v27460_v22 }
 0x4c9   : > { %22444 = vmatpush1.bf16.msra.mxu1 %v27460_v22  ;;  %18863 = vmatprep.subr.msk.mxu0 %vm690_vm0, %v27467_v63 }
 0x4ca   : > { %18867 = vmatprep.subr.msk.mxu1 %vm690_vm0, %v27467_v63 }
 0x4cc   : > { %18864 = vmatpush1.msk.msra.mxu0 %vm690_vm0, %v27478_v39 }
 0x4cd   : > { %18868 = vmatpush1.msk.msra.mxu1 %vm690_vm0, %v27478_v39  ;;  %22446 = vmatprep.subr.bf16.mxu0 %v27366_v37 }
 0x4ce   : > { %22466 = vmatprep.subr.bf16.mxu1 %v27366_v37 }
 0x4d3   : > { %v7441_v29 = vpop.f32.mrb[84].mxu0 }
 0x4d4   : > { %v7516_v33 = vpop.f32.mrb[84].mxu1  ;;  %v7829_v43 = vmax.f32 %v27276_v36, %v7441_v29  ;;  %v7443_v56 = vpop.f32.mrb[85].mxu0  ;;  %v27674_v29 = vpack.c.bf16 %v7881_v58, %v7879_v23  ;;  %v18929_v58 = vld [vmem:[%s30685_s5 + $0x1b0] sm:$0xff] }
 0x4d5   : > { %v7831_v18 = vmax.f32 %v27278_v45, %v7516_v33  ;;  %v7518_v10 = vpop.f32.mrb[85].mxu1  ;;  %v27678_v33 = vpack.c.bf16 %v7886_v31, %v7884_v50  ;;  %v7888_v56 = vld [vmem:[%s30685_s5 + $0x68] sm:$0xff]  ;;  %v18931_v31 = vld [vmem:[%s30685_s5 + $0x1c0] sm:$0xff] }
 0x4d6   : > { %7847 = vst.msk [vmem:[#allocation3 + $0x20] sm:$0xff] %vm7841_vm6, %v7829_v43  ;;  %v7883_v43 = vld [vmem:[%s30685_s5 + $0x40] sm:$0xff]  ;;  %v18932_v50 = vld [vmem:[%s30685_s5 + $0x1c8] sm:$0xff] }
 0x4d7   : > { %7849 = vst.msk [vmem:[#allocation3 + $0x30] sm:$0xff] %vm7841_vm6, %v7831_v18  ;;  %v7446_v13 = vpop.f32.mrb[86].mxu0  ;;  %v7885_v18 = vld [vmem:[%s30685_s5 + $0x50] sm:$0xff] }
 0x4d8   : > { %v7521_v25 = vpop.f32.mrb[86].mxu1  ;;  %v7830_v61 = vmax.f32 %v27284_v19, %v7446_v13  ;;  %v7448_v34 = vpop.f32.mrb[87].mxu0 }
 0x4d9   : > { %v7832_v8 = vmax.f32 %v27286_v20, %v7521_v25  ;;  %v7523_v12 = vpop.f32.mrb[87].mxu1  ;;  %v7890_v25 = vld [vmem:[%s30685_s5 + $0x78] sm:$0xff]  ;;  %v7887_v34 = vld [vmem:[%s30685_s5 + $0x60] sm:$0xff] }
 0x4da   : > { %7848 = vst.msk [vmem:[#allocation3 + $0x28] sm:$0x3f] %vm7843_vm7, %v7830_v61  ;;  %v27698_v61 = vpack.c.bf16 %v7885_v18, %v7883_v43  ;;  %v7889_v12 = vld [vmem:[%s30685_s5 + $0x70] sm:$0xff]  ;;  %v18938_v43 = vld [vmem:[%s30685_s5 + $0x1f8] sm:$0xff] }
 0x4db   : > { %7850 = vst.msk [vmem:[#allocation3 + $0x38] sm:$0x3f] %vm7843_vm7, %v7832_v8  ;;  %v27702_v8 = vpack.c.bf16 %v7890_v25, %v7888_v56 }
 0x4e1   : > { %v7901_v36 = vld [vmem:[#allocation3 + $0x21] sm:$0xff]  ;;  %v7902_v19 = vld [vmem:[#allocation3 + $0x29] sm:$0x3] }
 0x4e2   : > { %v7903_v45 = vld [vmem:[#allocation3 + $0x31] sm:$0xff]  ;;  %18865 = vmatmul.mubr.msk.f32.vlgmr.msra.gmra.mrb[100].mxu0 %vm7841_vm6, %v7901_v36  ;;  %v7904_v20 = vld [vmem:[#allocation3 + $0x39] sm:$0x3]  ;;  %v7892_v36 = vld [vmem:[%s30685_s5 + $0x88] sm:$0xff] }
 0x4e3   : > { %18869 = vmatmul.mubr.msk.f32.vlgmr.msra.gmra.mrb[100].mxu1 %vm7841_vm6, %v7903_v45  ;;  %8184 = vmatprep.mubr.f32.mxu0 %v25154_v7  ;;  %v7894_v45 = vld [vmem:[%s30685_s5 + $0x98] sm:$0xff] }
 0x4e4   : > { %8267 = vmatprep.mubr.f32.mxu1 %v25154_v7  ;;  %22448 = vmatpush1.bf16.msra.mxu0 %v27376_v32 }
 0x4e5   : > { %22468 = vmatpush1.bf16.msra.mxu1 %v27376_v32  ;;  %22450 = vmatprep.subr.bf16.mxu0 %v27390_v44 }
 0x4e6   : > { %22470 = vmatprep.subr.bf16.mxu1 %v27390_v44  ;;  %18866 = vmatmul.mubr.msk.f32.gmra.mrb[102].mxu0 %vm7841_vm6, %v7902_v19  ;;  %v27720_v19 = vpack.c.bf16 %v7889_v12, %v7887_v34  ;;  %v9276_v34 = vld [vmem:[#allocation3 + $0x2] sm:$0xff]  ;;  %v9278_v12 = vld [vmem:[#allocation3 + $0x12] sm:$0xff] }
 0x4e7   : > { %18870 = vmatmul.mubr.msk.f32.gmra.mrb[102].mxu1 %vm7841_vm6, %v7904_v20  ;;  %8344 = vmatprep.mubr.f32.mxu0 %v25154_v7  ;;  %v27724_v20 = vpack.c.bf16 %v7894_v45, %v7892_v36  ;;  %v9277_v36 = vld [vmem:[#allocation3 + $0xa] sm:$0x3]  ;;  %v9279_v45 = vld [vmem:[#allocation3 + $0x1a] sm:$0x3] }
 0x4e8   : > { %8427 = vmatprep.mubr.f32.mxu1 %v25154_v7  ;;  %22452 = vmatpush1.bf16.msra.mxu0 %v27402_v40 }
 0x4e9   : > { %22472 = vmatpush1.bf16.msra.mxu1 %v27402_v40  ;;  %22454 = vmatprep.subr.bf16.mxu0 %v27406_v27 }
 0x4ea   : > { %22474 = vmatprep.subr.bf16.mxu1 %v27406_v27 }
 0x4ec   : > { %22456 = vmatpush1.bf16.msra.mxu0 %v27426_v24 }
 0x4ed   : > { %22476 = vmatpush1.bf16.msra.mxu1 %v27426_v24  ;;  %22458 = vmatprep.subr.bf16.mxu0 %v27430_v57 }
 0x4ee   : > { %22478 = vmatprep.subr.bf16.mxu1 %v27430_v57 }
 0x4f0   : > { %22460 = vmatpush1.bf16.msra.mxu0 %v27446_v17 }
 0x4f1   : > { %22480 = vmatpush1.bf16.msra.mxu1 %v27446_v17  ;;  %22462 = vmatprep.subr.bf16.mxu0 %v27450_v55 }
 0x4f2   : > { %22482 = vmatprep.subr.bf16.mxu1 %v27450_v55 }
 0x4f4   : > { %22464 = vmatpush1.bf16.msra.mxu0 %v27460_v22 }
 0x4f5   : > { %22484 = vmatpush1.bf16.msra.mxu1 %v27460_v22  ;;  %18871 = vmatprep.subr.msk.mxu0 %vm690_vm0, %v27467_v63 }
 0x4f6   : > { %18875 = vmatprep.subr.msk.mxu1 %vm690_vm0, %v27467_v63 }
 0x4f8   : > { %18872 = vmatpush1.msk.msra.mxu0 %vm690_vm0, %v27478_v39 }
 0x4f9   : > { %18876 = vmatpush1.msk.msra.mxu1 %vm690_vm0, %v27478_v39  ;;  %22486 = vmatprep.subr.bf16.mxu0 %v27366_v37 }
 0x4fa   : > { %22506 = vmatprep.subr.bf16.mxu1 %v27366_v37 }
 0x4ff   : > { %v7591_v46 = vpop.f32.mrb[88].mxu0 }
 0x500   : > { %v7666_v21 = vpop.f32.mrb[88].mxu1  ;;  %v7833_v26 = vmax.f32 %v27340_v0, %v7591_v46  ;;  %v7593_v38 = vpop.f32.mrb[89].mxu0  ;;  %v7891_v46 = vld [vmem:[%s30685_s5 + $0x80] sm:$0xff] }
 0x501   : > { %v7835_v15 = vmax.f32 %v27342_v62, %v7666_v21  ;;  %v7668_v54 = vpop.f32.mrb[89].mxu1  ;;  %v7893_v21 = vld [vmem:[%s30685_s5 + $0x90] sm:$0xff]  ;;  %v27752_v38 = vld [vmem:[%s30685_s5 + $0xa0] sm:$0xf] }
 0x502   : > { %7851 = vst.msk [vmem:[#allocation3 + $0x40] sm:$0xff] %vm7841_vm6, %v7833_v26  ;;  %v27734_v26 = vpack.c.bf16 %v7893_v21, %v7891_v46  ;;  %v7859_v54 = vld [vmem:[#allocation3] sm:$0xff]  ;;  %v9281_v46 = vld [vmem:[#allocation3 + $0x2a] sm:$0x3]  ;;  %v9283_v21 = vld [vmem:[#allocation3 + $0x3a] sm:$0x3] }
 0x503   : > { %7853 = vst.msk [vmem:[#allocation3 + $0x50] sm:$0xff] %vm7841_vm6, %v7835_v15  ;;  %v7596_v59 = vpop.f32.mrb[90].mxu0  ;;  %v27741_v15 = vld [vmem:[%s30685_s5 + $0xa8] sm:$0xf] }
 0x504   : > { %v7671_v60 = vpop.f32.mrb[90].mxu1  ;;  %v7834_v2 = vmax.f32 %v27348_v16, %v7596_v59  ;;  %v7598_v11 = vpop.f32.mrb[91].mxu0  ;;  %v7861_v59 = vld [vmem:[#allocation3 + $0x10] sm:$0xff] }
 0x505   : > { %v7836_v28 = vmax.f32 %v27350_v52, %v7671_v60  ;;  %v7673_v37 = vpop.f32.mrb[91].mxu1  ;;  %v7860_v60 = vld [vmem:[#allocation3 + $0x8] sm:$0x3]  ;;  %v7865_v11 = vld [vmem:[#allocation3 + $0x30] sm:$0xff] }
 0x506   : > { %7852 = vst.msk [vmem:[#allocation3 + $0x48] sm:$0x3f] %vm7843_vm7, %v7834_v2  ;;  %v7862_v2 = vld [vmem:[#allocation3 + $0x18] sm:$0x3]  ;;  %v7864_v37 = vld [vmem:[#allocation3 + $0x28] sm:$0x3] }
 0x507   : > { %7854 = vst.msk [vmem:[#allocation3 + $0x58] sm:$0x3f] %vm7843_vm7, %v7836_v28  ;;  %v7863_v28 = vld [vmem:[#allocation3 + $0x20] sm:$0xff] }
 0x50d   : > { %v7905_v0 = vld [vmem:[#allocation3 + $0x41] sm:$0xff]  ;;  %v7906_v16 = vld [vmem:[#allocation3 + $0x49] sm:$0x3] }
 0x50e   : > { %v7907_v62 = vld [vmem:[#allocation3 + $0x51] sm:$0xff]  ;;  %18873 = vmatmul.mubr.msk.f32.vlgmr.msra.gmra.mrb[104].mxu0 %vm7841_vm6, %v7905_v0  ;;  %v7908_v52 = vld [vmem:[#allocation3 + $0x59] sm:$0x3] }
 0x50f   : > { %18877 = vmatmul.mubr.msk.f32.vlgmr.msra.gmra.mrb[104].mxu1 %vm7841_vm6, %v7907_v62  ;;  %8350 = vmatprep.mubr.f32.mxu0 %v25154_v7  ;;  %v7866_v0 = vld [vmem:[#allocation3 + $0x38] sm:$0x3]  ;;  %v7867_v62 = vld [vmem:[#allocation3 + $0x40] sm:$0xff] }
 0x510   : > { %8433 = vmatprep.mubr.f32.mxu1 %v25154_v7  ;;  %22488 = vmatpush1.bf16.msra.mxu0 %v27376_v32 }
 0x511   : > { %22508 = vmatpush1.bf16.msra.mxu1 %v27376_v32  ;;  %22490 = vmatprep.subr.bf16.mxu0 %v27390_v44  ;;  %v7876_v32 = vld [vmem:[%s30685_s5 + $0x8] sm:$0xff] }
 0x512   : > { %22510 = vmatprep.subr.bf16.mxu1 %v27390_v44  ;;  %18874 = vmatmul.mubr.msk.f32.gmra.mrb[106].mxu0 %vm7841_vm6, %v7906_v16  ;;  %v7878_v44 = vld [vmem:[%s30685_s5 + $0x18] sm:$0xff]  ;;  %v7869_v16 = vld [vmem:[#allocation3 + $0x50] sm:$0xff] }
 0x513   : > { %18878 = vmatmul.mubr.msk.f32.gmra.mrb[106].mxu1 %vm7841_vm6, %v7908_v52  ;;  %8510 = vmatprep.mubr.f32.mxu0 %v25154_v7  ;;  %v7868_v52 = vld [vmem:[#allocation3 + $0x48] sm:$0x3] }
 0x514   : > { %8593 = vmatprep.mubr.f32.mxu1 %v25154_v7  ;;  %22492 = vmatpush1.bf16.msra.mxu0 %v27402_v40 }
 0x515   : > { %22512 = vmatpush1.bf16.msra.mxu1 %v27402_v40  ;;  %22494 = vmatprep.subr.bf16.mxu0 %v27406_v27  ;;  %v27626_v40 = vpack.c.bf16 %v7878_v44, %v7876_v32  ;;  %v7870_v32 = vld [vmem:[#allocation3 + $0x58] sm:$0x3]  ;;  %v18920_v44 = vld [vmem:[%s30685_s5 + $0x168] sm:$0xff] }
 0x516   : > { %22514 = vmatprep.subr.bf16.mxu1 %v27406_v27 }
 0x518   : > { %22496 = vmatpush1.bf16.msra.mxu0 %v27426_v24 }
 0x519   : > { %22516 = vmatpush1.bf16.msra.mxu1 %v27426_v24  ;;  %22498 = vmatprep.subr.bf16.mxu0 %v27430_v57 }
 0x51a   : > { %22518 = vmatprep.subr.bf16.mxu1 %v27430_v57 }
 0x51c   : > { %22500 = vmatpush1.bf16.msra.mxu0 %v27446_v17 }
 0x51d   : > { %22520 = vmatpush1.bf16.msra.mxu1 %v27446_v17  ;;  %22502 = vmatprep.subr.bf16.mxu0 %v27450_v55 }
 0x51e   : > { %22522 = vmatprep.subr.bf16.mxu1 %v27450_v55 }
 0x520   : > { %22504 = vmatpush1.bf16.msra.mxu0 %v27460_v22 }
 0x521   : > { %22524 = vmatpush1.bf16.msra.mxu1 %v27460_v22  ;;  %18879 = vmatprep.subr.msk.mxu0 %vm690_vm0, %v27467_v63 }
 0x522   : > { %18883 = vmatprep.subr.msk.mxu1 %vm690_vm0, %v27467_v63 }
 0x524   : > { %18880 = vmatpush1.msk.msra.mxu0 %vm690_vm0, %v27478_v39 }
 0x525   : > { %18884 = vmatpush1.msk.msra.mxu1 %vm690_vm0, %v27478_v39  ;;  %22526 = vmatprep.subr.bf16.mxu0 %v27626_v40 }
 0x526   : > { %22546 = vmatprep.subr.bf16.mxu1 %v27626_v40 }
 0x52b   : > { %v7741_v27 = vpop.f32.mrb[92].mxu0 }
 0x52c   : > { %v7816_v24 = vpop.f32.mrb[92].mxu1  ;;  %v7837_v57 = vmax.f32 %v27486_v1, %v7741_v27  ;;  %v7743_v55 = vpop.f32.mrb[93].mxu0  ;;  %v7875_v1 = vld [vmem:[%s30685_s5] sm:$0xff] }
 0x52d   : > { %v7839_v17 = vmax.f32 %v27488_v3, %v7816_v24  ;;  %v7818_v22 = vpop.f32.mrb[93].mxu1  ;;  %v7877_v3 = vld [vmem:[%s30685_s5 + $0x10] sm:$0xff]  ;;  %v18919_v27 = vld [vmem:[%s30685_s5 + $0x160] sm:$0xff]  ;;  %v18924_v55 = vld [vmem:[%s30685_s5 + $0x188] sm:$0xff] }
 0x52e   : > { %7855 = vst.msk [vmem:[#allocation3 + $0x60] sm:$0xff] %vm7841_vm6, %v7837_v57  ;;  %v27654_v51 = vpack.c.bf16 %v7877_v3, %v7875_v1  ;;  %v18921_v24 = vld [vmem:[%s30685_s5 + $0x170] sm:$0xff]  ;;  %v18926_v22 = vld [vmem:[%s30685_s5 + $0x198] sm:$0xff] }
 0x52f   : > { %7857 = vst.msk [vmem:[#allocation3 + $0x70] sm:$0xff] %vm7841_vm6, %v7839_v17  ;;  %v7746_v63 = vpop.f32.mrb[94].mxu0  ;;  %v27876_v17 = vpack.c.bf16 %v18921_v24, %v18919_v27  ;;  %v27904_v1 = vpack.c.bf16 %v18926_v22, %v18924_v55  ;;  %v18984_v27 = vld [vmem:[%s30685_s5 + $0x268] sm:$0xff] }
 0x530   : > { %v7821_v35 = vpop.f32.mrb[94].mxu1  ;;  %v7838_v39 = vmax.f32 %v27490_v49, %v7746_v63  ;;  %v7748_v41 = vpop.f32.mrb[95].mxu0  ;;  %v7880_v49 = vld [vmem:[%s30685_s5 + $0x28] sm:$0xff]  ;;  %v18923_v63 = vld [vmem:[%s30685_s5 + $0x180] sm:$0xff] }
 0x531   : > { %v7840_v14 = vmax.f32 %v27492_v53, %v7821_v35  ;;  %v7823_v42 = vpop.f32.mrb[95].mxu1  ;;  %v7882_v53 = vld [vmem:[%s30685_s5 + $0x38] sm:$0xff]  ;;  %v18928_v41 = vld [vmem:[%s30685_s5 + $0x1a8] sm:$0xff] }
 0x532   : > { %7856 = vst.msk [vmem:[#allocation3 + $0x68] sm:$0x3f] %vm7843_vm7, %v7838_v39  ;;  %v27665_v30 = vpack.c.bf16 %v7882_v53, %v7880_v49  ;;  %v18930_v42 = vld [vmem:[%s30685_s5 + $0x1b8] sm:$0xff]  ;;  %v18927_v49 = vld [vmem:[%s30685_s5 + $0x1a0] sm:$0xff] }
 0x533   : > { %7858 = vst.msk [vmem:[#allocation3 + $0x78] sm:$0x3f] %vm7843_vm7, %v7840_v14  ;;  %v18925_v14 = vld [vmem:[%s30685_s5 + $0x190] sm:$0xff]  ;;  %v27915_v23 = vpack.c.bf16 %v18930_v42, %v18928_v41 }
 0x534   : > { %v27908_v3 = vpack.c.bf16 %v18925_v14, %v18923_v63  ;;  %v18981_v63 = vld [vmem:[%s30685_s5 + $0x250] sm:$0xff]  ;;  %v18988_v14 = vld [vmem:[%s30685_s5 + $0x288] sm:$0xff] }
 0x535   : > { %v7871_v35 = vld [vmem:[#allocation3 + $0x60] sm:$0xff] }
 0x536   : > { %v7873_v39 = vld [vmem:[#allocation3 + $0x70] sm:$0xff] }
 0x539   : > { %v7909_v47 = vld [vmem:[#allocation3 + $0x61] sm:$0xff]  ;;  %v7910_v10 = vld [vmem:[#allocation3 + $0x69] sm:$0x3] }
 0x53a   : > { %v7911_v48 = vld [vmem:[#allocation3 + $0x71] sm:$0xff]  ;;  %18881 = vmatmul.mubr.msk.f32.vlgmr.msra.gmra.mrb[108].mxu0 %vm7841_vm6, %v7909_v47  ;;  %v7912_v13 = vld [vmem:[#allocation3 + $0x79] sm:$0x3]  ;;  %v7872_v53 = vld [vmem:[#allocation3 + $0x68] sm:$0x3] }
 0x53b   : > { %18885 = vmatmul.mubr.msk.f32.vlgmr.msra.gmra.mrb[108].mxu1 %vm7841_vm6, %v7911_v48  ;;  %22528 = vmatpush1.bf16.msra.mxu0 %v27654_v51  ;;  %v18934_v47 = vld [vmem:[%s30685_s5 + $0x1d8] sm:$0xff]  ;;  %v27932_v48 = vpack.c.bf16 %v18929_v58, %v18927_v49  ;;  %v18989_v58 = vld [vmem:[%s30685_s5 + $0x290] sm:$0xff] }
 0x53c   : > { %22548 = vmatpush1.bf16.msra.mxu1 %v27654_v51  ;;  %8516 = vmatprep.mubr.f32.mxu0 %v25154_v7  ;;  %v9291_v55 = vld [vmem:[#allocation3 + $0x7a] sm:$0x3] }
 0x53d   : > { %8599 = vmatprep.mubr.f32.mxu1 %v25154_v7  ;;  %22530 = vmatprep.subr.bf16.mxu0 %v27665_v30  ;;  %v18990_v49 = vld [vmem:[%s30685_s5 + $0x298] sm:$0xff] }
 0x53e   : > { %22550 = vmatprep.subr.bf16.mxu1 %v27665_v30  ;;  %18882 = vmatmul.mubr.msk.f32.gmra.mrb[110].mxu0 %vm7841_vm6, %v7910_v10  ;;  %v18935_v10 = vld [vmem:[%s30685_s5 + $0x1e0] sm:$0xff] }
 0x53f   : > { %18886 = vmatmul.mubr.msk.f32.gmra.mrb[110].mxu1 %vm7841_vm6, %v7912_v13  ;;  %22532 = vmatpush1.bf16.msra.mxu0 %v27674_v29  ;;  %v18937_v13 = vld [vmem:[%s30685_s5 + $0x1f0] sm:$0xff] }
 0x540   : > { %22552 = vmatpush1.bf16.msra.mxu1 %v27674_v29  ;;  %22534 = vmatprep.subr.bf16.mxu0 %v27678_v33  ;;  %v27968_v25 = vpack.c.bf16 %v18937_v13, %v18935_v10  ;;  %v10022_v10 = vld [vmem:[#allocation3 + $0x2b] sm:$0x3]  ;;  %v10024_v13 = vld [vmem:[#allocation3 + $0x3b] sm:$0x3] }
 0x541   : > { %22554 = vmatprep.subr.bf16.mxu1 %v27678_v33  ;;  %8682 = vmatprep.mubr.f32.mxu0 %v25154_v7 }
 0x542   : > { %8765 = vmatprep.mubr.f32.mxu1 %v25154_v7 }
 0x543   : > { %22536 = vmatpush1.bf16.msra.mxu0 %v27698_v61 }
 0x544   : > { %22556 = vmatpush1.bf16.msra.mxu1 %v27698_v61  ;;  %22538 = vmatprep.subr.bf16.mxu0 %v27702_v8 }
 0x545   : > { %22558 = vmatprep.subr.bf16.mxu1 %v27702_v8 }
 0x547   : > { %22540 = vmatpush1.bf16.msra.mxu0 %v27720_v19 }
 0x548   : > { %22560 = vmatpush1.bf16.msra.mxu1 %v27720_v19  ;;  %22542 = vmatprep.subr.bf16.mxu0 %v27724_v20 }
 0x549   : > { %22562 = vmatprep.subr.bf16.mxu1 %v27724_v20 }
 0x54b   : > { %22544 = vmatpush1.bf16.msra.mxu0 %v27734_v26 }
 0x54c   : > { %22564 = vmatpush1.bf16.msra.mxu1 %v27734_v26  ;;  %18887 = vmatprep.subr.msk.mxu0 %vm690_vm0, %v27741_v15 }
 0x54d   : > { %18891 = vmatprep.subr.msk.mxu1 %vm690_vm0, %v27741_v15 }
 0x54f   : > { %18888 = vmatpush1.msk.msra.mxu0 %vm690_vm0, %v27752_v38 }
 0x550   : > { %18892 = vmatpush1.msk.msra.mxu1 %vm690_vm0, %v27752_v38  ;;  %18889 = vmatmul.mubr.msk.f32.vlgmr.msra.gmra.mrb[96].mxu0 %vm7841_vm6, %v7859_v54  ;;  %v9287_v54 = vld [vmem:[#allocation3 + $0x5a] sm:$0x3] }
 0x551   : > { %18893 = vmatmul.mubr.msk.f32.vlgmr.msra.gmra.mrb[96].mxu1 %vm7841_vm6, %v7861_v59  ;;  %22566 = vmatprep.subr.bf16.mxu0 %v27626_v40  ;;  %v18974_v59 = vld [vmem:[%s30685_s5 + $0x218] sm:$0xff] }
 0x552   : > { %22586 = vmatprep.subr.bf16.mxu1 %v27626_v40  ;;  %22568 = vmatpush1.bf16.msra.mxu0 %v27654_v51 }
 0x553   : > { %22588 = vmatpush1.bf16.msra.mxu1 %v27654_v51  ;;  %8688 = vmatprep.mubr.f32.mxu0 %v25154_v7 }
 0x554   : > { %8771 = vmatprep.mubr.f32.mxu1 %v25154_v7  ;;  %18890 = vmatmul.mubr.msk.f32.gmra.mrb[98].mxu0 %vm7841_vm6, %v7860_v60  ;;  %v18976_v60 = vld [vmem:[%s30685_s5 + $0x228] sm:$0xff] }
 0x555   : > { %18894 = vmatmul.mubr.msk.f32.gmra.mrb[98].mxu1 %vm7841_vm6, %v7862_v2  ;;  %22570 = vmatprep.subr.bf16.mxu0 %v27665_v30  ;;  %v18973_v2 = vld [vmem:[%s30685_s5 + $0x210] sm:$0xff] }
 0x556   : > { %22590 = vmatprep.subr.bf16.mxu1 %v27665_v30  ;;  %22572 = vmatpush1.bf16.msra.mxu0 %v27674_v29 }
 0x557   : > { %22592 = vmatpush1.bf16.msra.mxu1 %v27674_v29  ;;  %22574 = vmatprep.subr.bf16.mxu0 %v27678_v33 }
 0x558   : > { %22594 = vmatprep.subr.bf16.mxu1 %v27678_v33  ;;  %8848 = vmatprep.mubr.f32.mxu0 %v25154_v7 }
 0x559   : > { %8931 = vmatprep.mubr.f32.mxu1 %v25154_v7 }
 0x55a   : > { %22576 = vmatpush1.bf16.msra.mxu0 %v27698_v61 }
 0x55b   : > { %22596 = vmatpush1.bf16.msra.mxu1 %v27698_v61  ;;  %22578 = vmatprep.subr.bf16.mxu0 %v27702_v8 }
 0x55c   : > { %22598 = vmatprep.subr.bf16.mxu1 %v27702_v8 }
 0x55e   : > { %22580 = vmatpush1.bf16.msra.mxu0 %v27720_v19 }
 0x55f   : > { %22600 = vmatpush1.bf16.msra.mxu1 %v27720_v19  ;;  %22582 = vmatprep.subr.bf16.mxu0 %v27724_v20 }
 0x560   : > { %22602 = vmatprep.subr.bf16.mxu1 %v27724_v20 }
 0x562   : > { %22584 = vmatpush1.bf16.msra.mxu0 %v27734_v26 }
 0x563   : > { %22604 = vmatpush1.bf16.msra.mxu1 %v27734_v26  ;;  %18895 = vmatprep.subr.msk.mxu0 %vm690_vm0, %v27741_v15 }
 0x564   : > { %18899 = vmatprep.subr.msk.mxu1 %vm690_vm0, %v27741_v15 }
 0x566   : > { %18896 = vmatpush1.msk.msra.mxu0 %vm690_vm0, %v27752_v38 }
 0x567   : > { %18900 = vmatpush1.msk.msra.mxu1 %vm690_vm0, %v27752_v38  ;;  %18897 = vmatmul.mubr.msk.f32.vlgmr.msra.gmra.mrb[100].mxu0 %vm7841_vm6, %v7863_v28  ;;  %v18975_v28 = vld [vmem:[%s30685_s5 + $0x220] sm:$0xff] }
 0x568   : > { %18901 = vmatmul.mubr.msk.f32.vlgmr.msra.gmra.mrb[100].mxu1 %vm7841_vm6, %v7865_v11  ;;  %22606 = vmatprep.subr.bf16.mxu0 %v27626_v40  ;;  %v28108_v11 = vpack.c.bf16 %v18976_v60, %v18974_v59  ;;  %v19033_v59 = vld [vmem:[%s30685_s5 + $0x2f0] sm:$0xff]  ;;  %v19036_v60 = vld [vmem:[%s30685_s5 + $0x308] sm:$0xff] }
 0x569   : > { %22626 = vmatprep.subr.bf16.mxu1 %v27626_v40  ;;  %22608 = vmatpush1.bf16.msra.mxu0 %v27654_v51 }
 0x56a   : > { %22628 = vmatpush1.bf16.msra.mxu1 %v27654_v51  ;;  %8854 = vmatprep.mubr.f32.mxu0 %v25154_v7 }
 0x56b   : > { %8937 = vmatprep.mubr.f32.mxu1 %v25154_v7  ;;  %18898 = vmatmul.mubr.msk.f32.gmra.mrb[102].mxu0 %vm7841_vm6, %v7864_v37  ;;  %v9288_v37 = vld [vmem:[#allocation3 + $0x62] sm:$0xff] }
 0x56c   : > { %18902 = vmatmul.mubr.msk.f32.gmra.mrb[102].mxu1 %vm7841_vm6, %v7866_v0  ;;  %22610 = vmatprep.subr.bf16.mxu0 %v27665_v30  ;;  %v28110_v0 = vpack.c.bf16 %v18975_v28, %v18973_v2  ;;  %v19038_v2 = vld [vmem:[%s30685_s5 + $0x318] sm:$0xff] }
 0x56d   : > { %22630 = vmatprep.subr.bf16.mxu1 %v27665_v30  ;;  %22612 = vmatpush1.bf16.msra.mxu0 %v27674_v29 }
 0x56e   : > { %22632 = vmatpush1.bf16.msra.mxu1 %v27674_v29  ;;  %22614 = vmatprep.subr.bf16.mxu0 %v27678_v33 }
 0x56f   : > { %22634 = vmatprep.subr.bf16.mxu1 %v27678_v33  ;;  %9014 = vmatprep.mubr.f32.mxu0 %v25154_v7 }
 0x570   : > { %9097 = vmatprep.mubr.f32.mxu1 %v25154_v7 }
 0x571   : > { %22616 = vmatpush1.bf16.msra.mxu0 %v27698_v61 }
 0x572   : > { %22636 = vmatpush1.bf16.msra.mxu1 %v27698_v61  ;;  %22618 = vmatprep.subr.bf16.mxu0 %v27702_v8 }
 0x573   : > { %22638 = vmatprep.subr.bf16.mxu1 %v27702_v8 }
 0x575   : > { %22620 = vmatpush1.bf16.msra.mxu0 %v27720_v19 }
 0x576   : > { %22640 = vmatpush1.bf16.msra.mxu1 %v27720_v19  ;;  %22622 = vmatprep.subr.bf16.mxu0 %v27724_v20 }
 0x577   : > { %22642 = vmatprep.subr.bf16.mxu1 %v27724_v20 }
 0x579   : > { %22624 = vmatpush1.bf16.msra.mxu0 %v27734_v26 }
 0x57a   : > { %22644 = vmatpush1.bf16.msra.mxu1 %v27734_v26  ;;  %18903 = vmatprep.subr.msk.mxu0 %vm690_vm0, %v27741_v15 }
 0x57b   : > { %18907 = vmatprep.subr.msk.mxu1 %vm690_vm0, %v27741_v15 }
 0x57d   : > { %18904 = vmatpush1.msk.msra.mxu0 %vm690_vm0, %v27752_v38 }
 0x57e   : > { %18908 = vmatpush1.msk.msra.mxu1 %vm690_vm0, %v27752_v38  ;;  %18905 = vmatmul.mubr.msk.f32.vlgmr.msra.gmra.mrb[104].mxu0 %vm7841_vm6, %v7867_v62  ;;  %v18978_v62 = vld [vmem:[%s30685_s5 + $0x238] sm:$0xff] }
 0x57f   : > { %18909 = vmatmul.mubr.msk.f32.vlgmr.msra.gmra.mrb[104].mxu1 %vm7841_vm6, %v7869_v16  ;;  %22646 = vmatprep.subr.bf16.mxu0 %v27626_v40  ;;  %v18980_v16 = vld [vmem:[%s30685_s5 + $0x248] sm:$0xff] }
 0x580   : > { %22666 = vmatprep.subr.bf16.mxu1 %v27626_v40  ;;  %22648 = vmatpush1.bf16.msra.mxu0 %v27654_v51  ;;  %v18922_v40 = vld [vmem:[%s30685_s5 + $0x178] sm:$0xff]  ;;  %v28138_v24 = vpack.c.bf16 %v18980_v16, %v18978_v62  ;;  %v28380_v62 = vpack.c.bf16 %v19038_v2, %v19036_v60  ;;  %v19035_v16 = vld [vmem:[%s30685_s5 + $0x300] sm:$0xff] }
 0x581   : > { %22668 = vmatpush1.bf16.msra.mxu1 %v27654_v51  ;;  %9020 = vmatprep.mubr.f32.mxu0 %v25154_v7  ;;  %v27874_v57 = vpack.c.bf16 %v18922_v40, %v18920_v44  ;;  %v7874_v51 = vld [vmem:[#allocation3 + $0x78] sm:$0x3]  ;;  %v18979_v44 = vld [vmem:[%s30685_s5 + $0x240] sm:$0xff] }
 0x582   : > { %9103 = vmatprep.mubr.f32.mxu1 %v25154_v7  ;;  %18906 = vmatmul.mubr.msk.f32.gmra.mrb[106].mxu0 %vm7841_vm6, %v7868_v52  ;;  %v9290_v52 = vld [vmem:[#allocation3 + $0x72] sm:$0xff] }
 0x583   : > { %18910 = vmatmul.mubr.msk.f32.gmra.mrb[106].mxu1 %vm7841_vm6, %v7870_v32  ;;  %22650 = vmatprep.subr.bf16.mxu0 %v27665_v30  ;;  %v18977_v32 = vld [vmem:[%s30685_s5 + $0x230] sm:$0xff]  ;;  %v18982_v40 = vld [vmem:[%s30685_s5 + $0x258] sm:$0xff] }
 0x584   : > { %22670 = vmatprep.subr.bf16.mxu1 %v27665_v30  ;;  %22652 = vmatpush1.bf16.msra.mxu0 %v27674_v29  ;;  %v27936_v30 = vpack.c.bf16 %v18934_v47, %v18932_v50  ;;  %v28146_v22 = vpack.c.bf16 %v18984_v27, %v18982_v40  ;;  %v18991_v50 = vld [vmem:[%s30685_s5 + $0x2a0] sm:$0xff] }
 0x585   : > { %22672 = vmatpush1.bf16.msra.mxu1 %v27674_v29  ;;  %22654 = vmatprep.subr.bf16.mxu0 %v27678_v33  ;;  %v18933_v29 = vld [vmem:[%s30685_s5 + $0x1d0] sm:$0xff]  ;;  %v28202_v47 = vpack.c.bf16 %v18991_v50, %v18989_v58  ;;  %v10763_v58 = vld [vmem:[#allocation3 + $0x2c] sm:$0x3]  ;;  %v10765_v50 = vld [vmem:[#allocation3 + $0x3c] sm:$0x3] }
 0x586   : > { %22674 = vmatprep.subr.bf16.mxu1 %v27678_v33  ;;  %9180 = vmatprep.mubr.f32.mxu0 %v25154_v7  ;;  %v18936_v33 = vld [vmem:[%s30685_s5 + $0x1e8] sm:$0xff]  ;;  %v27954_v18 = vpack.c.bf16 %v18933_v29, %v18931_v31  ;;  %v10019_v29 = vld [vmem:[#allocation3 + $0x13] sm:$0xff] }
 0x587   : > { %9263 = vmatprep.mubr.f32.mxu1 %v25154_v7  ;;  %v27958_v56 = vpack.c.bf16 %v18938_v43, %v18936_v33  ;;  %v10017_v31 = vld [vmem:[#allocation3 + $0x3] sm:$0xff]  ;;  %v10018_v33 = vld [vmem:[#allocation3 + $0xb] sm:$0x3]  ;;  %v10020_v43 = vld [vmem:[#allocation3 + $0x1b] sm:$0x3] }
 0x588   : > { %22656 = vmatpush1.bf16.msra.mxu0 %v27698_v61 }
 0x589   : > { %22676 = vmatpush1.bf16.msra.mxu1 %v27698_v61  ;;  %22658 = vmatprep.subr.bf16.mxu0 %v27702_v8  ;;  %v27975_v61 = vld [vmem:[%s30685_s5 + $0x208] sm:$0xf] }
 0x58a   : > { %22678 = vmatprep.subr.bf16.mxu1 %v27702_v8  ;;  %v27986_v8 = vld [vmem:[%s30685_s5 + $0x200] sm:$0xf] }
 0x58c   : > { %22660 = vmatpush1.bf16.msra.mxu0 %v27720_v19 }
 0x58d   : > { %22680 = vmatpush1.bf16.msra.mxu1 %v27720_v19  ;;  %22662 = vmatprep.subr.bf16.mxu0 %v27724_v20  ;;  %v9280_v19 = vld [vmem:[#allocation3 + $0x22] sm:$0xff] }
 0x58e   : > { %22682 = vmatprep.subr.bf16.mxu1 %v27724_v20  ;;  %v9282_v20 = vld [vmem:[#allocation3 + $0x32] sm:$0xff] }
 0x590   : > { %22664 = vmatpush1.bf16.msra.mxu0 %v27734_v26 }
 0x591   : > { %22684 = vmatpush1.bf16.msra.mxu1 %v27734_v26  ;;  %18911 = vmatprep.subr.msk.mxu0 %vm690_vm0, %v27741_v15  ;;  %v9284_v26 = vld [vmem:[#allocation3 + $0x42] sm:$0xff] }
 0x592   : > { %18915 = vmatprep.subr.msk.mxu1 %vm690_vm0, %v27741_v15  ;;  %v9286_v15 = vld [vmem:[#allocation3 + $0x52] sm:$0xff] }
 0x594   : > { %18912 = vmatpush1.msk.msra.mxu0 %vm690_vm0, %v27752_v38 }
 0x595   : > { %18916 = vmatpush1.msk.msra.mxu1 %vm690_vm0, %v27752_v38  ;;  %18913 = vmatmul.mubr.msk.f32.vlgmr.msra.gmra.mrb[108].mxu0 %vm7841_vm6, %v7871_v35  ;;  %v9285_v38 = vld [vmem:[#allocation3 + $0x4a] sm:$0x3]  ;;  %v18983_v35 = vld [vmem:[%s30685_s5 + $0x260] sm:$0xff] }
 0x596   : > { %18917 = vmatmul.mubr.msk.f32.vlgmr.msra.gmra.mrb[108].mxu1 %vm7841_vm6, %v7873_v39  ;;  %22686 = vmatprep.subr.bf16.mxu0 %v27874_v57  ;;  %v18986_v39 = vld [vmem:[%s30685_s5 + $0x278] sm:$0xff]  ;;  %v28166_v41 = vpack.c.bf16 %v18983_v35, %v18981_v63  ;;  %v19043_v35 = vld [vmem:[%s30685_s5 + $0x340] sm:$0xff] }
 0x597   : > { %22706 = vmatprep.subr.bf16.mxu1 %v27874_v57  ;;  %22688 = vmatpush1.bf16.msra.mxu0 %v27876_v17  ;;  %v28170_v42 = vpack.c.bf16 %v18988_v14, %v18986_v39  ;;  %v19045_v39 = vld [vmem:[%s30685_s5 + $0x350] sm:$0xff] }
 0x598   : > { %22708 = vmatpush1.bf16.msra.mxu1 %v27876_v17  ;;  %9186 = vmatprep.mubr.f32.mxu0 %v25154_v7  ;;  %v28436_v14 = vpack.c.bf16 %v19045_v39, %v19043_v35 }
 0x599   : > { %9269 = vmatprep.mubr.f32.mxu1 %v25154_v7  ;;  %18914 = vmatmul.mubr.msk.f32.gmra.mrb[110].mxu0 %vm7841_vm6, %v7872_v53  ;;  %v18992_v53 = vld [vmem:[%s30685_s5 + $0x2a8] sm:$0xff] }
 0x59a   : > { %18918 = vmatmul.mubr.msk.f32.gmra.mrb[110].mxu1 %vm7841_vm6, %v7874_v51  ;;  %22690 = vmatprep.subr.bf16.mxu0 %v27904_v1 }
 0x59b   : > { %22710 = vmatprep.subr.bf16.mxu1 %v27904_v1  ;;  %22692 = vmatpush1.bf16.msra.mxu0 %v27908_v3 }
 0x59c   : > { %22712 = vmatpush1.bf16.msra.mxu1 %v27908_v3  ;;  %22694 = vmatprep.subr.bf16.mxu0 %v27915_v23 }
 0x59d   : > { %22714 = vmatprep.subr.bf16.mxu1 %v27915_v23  ;;  %9391 = vmatprep.mubr.f32.mxu0 %v25154_v7 }
 0x59e   : > { %9474 = vmatprep.mubr.f32.mxu1 %v25154_v7 }
 0x59f   : > { %22696 = vmatpush1.bf16.msra.mxu0 %v27932_v48 }
 0x5a0   : > { %22716 = vmatpush1.bf16.msra.mxu1 %v27932_v48  ;;  %22698 = vmatprep.subr.bf16.mxu0 %v27936_v30 }
 0x5a1   : > { %22718 = vmatprep.subr.bf16.mxu1 %v27936_v30 }
 0x5a3   : > { %22700 = vmatpush1.bf16.msra.mxu0 %v27954_v18 }
 0x5a4   : > { %22720 = vmatpush1.bf16.msra.mxu1 %v27954_v18  ;;  %22702 = vmatprep.subr.bf16.mxu0 %v27958_v56 }
 0x5a5   : > { %22722 = vmatprep.subr.bf16.mxu1 %v27958_v56 }
 0x5a7   : > { %22704 = vmatpush1.bf16.msra.mxu0 %v27968_v25 }
 0x5a8   : > { %22724 = vmatpush1.bf16.msra.mxu1 %v27968_v25  ;;  %18941 = vmatprep.subr.msk.mxu0 %vm690_vm0, %v27975_v61 }
 0x5a9   : > { %18945 = vmatprep.subr.msk.mxu1 %vm690_vm0, %v27975_v61 }
 0x5ab   : > { %18942 = vmatpush1.msk.msra.mxu0 %vm690_vm0, %v27986_v8 }
 0x5ac   : > { %18946 = vmatpush1.msk.msra.mxu1 %vm690_vm0, %v27986_v8  ;;  %18943 = vmatmul.mubr.msk.f32.vlgmr.msra.gmra.mrb[96].mxu0 %vm7841_vm6, %v9276_v34  ;;  %v10028_v34 = vld [vmem:[#allocation3 + $0x5b] sm:$0x3] }
 0x5ad   : > { %18947 = vmatmul.mubr.msk.f32.vlgmr.msra.gmra.mrb[96].mxu1 %vm7841_vm6, %v9278_v12  ;;  %22726 = vmatprep.subr.bf16.mxu0 %v27874_v57  ;;  %v19028_v12 = vld [vmem:[%s30685_s5 + $0x2c8] sm:$0xff] }
 0x5ae   : > { %22746 = vmatprep.subr.bf16.mxu1 %v27874_v57  ;;  %22728 = vmatpush1.bf16.msra.mxu0 %v27876_v17 }
 0x5af   : > { %22748 = vmatpush1.bf16.msra.mxu1 %v27876_v17  ;;  %9397 = vmatprep.mubr.f32.mxu0 %v25154_v7 }
 0x5b0   : > { %9480 = vmatprep.mubr.f32.mxu1 %v25154_v7  ;;  %18944 = vmatmul.mubr.msk.f32.gmra.mrb[98].mxu0 %vm7841_vm6, %v9277_v36  ;;  %v19030_v36 = vld [vmem:[%s30685_s5 + $0x2d8] sm:$0xff] }
 0x5b1   : > { %18948 = vmatmul.mubr.msk.f32.gmra.mrb[98].mxu1 %vm7841_vm6, %v9279_v45  ;;  %22730 = vmatprep.subr.bf16.mxu0 %v27904_v1  ;;  %v19027_v45 = vld [vmem:[%s30685_s5 + $0x2c0] sm:$0xff] }
 0x5b2   : > { %22750 = vmatprep.subr.bf16.mxu1 %v27904_v1  ;;  %22732 = vmatpush1.bf16.msra.mxu0 %v27908_v3 }
 0x5b3   : > { %22752 = vmatpush1.bf16.msra.mxu1 %v27908_v3  ;;  %22734 = vmatprep.subr.bf16.mxu0 %v27915_v23 }
 0x5b4   : > { %22754 = vmatprep.subr.bf16.mxu1 %v27915_v23  ;;  %9557 = vmatprep.mubr.f32.mxu0 %v25154_v7 }
 0x5b5   : > { %9640 = vmatprep.mubr.f32.mxu1 %v25154_v7 }
 0x5b6   : > { %22736 = vmatpush1.bf16.msra.mxu0 %v27932_v48 }
 0x5b7   : > { %22756 = vmatpush1.bf16.msra.mxu1 %v27932_v48  ;;  %22738 = vmatprep.subr.bf16.mxu0 %v27936_v30 }
 0x5b8   : > { %22758 = vmatprep.subr.bf16.mxu1 %v27936_v30 }
 0x5ba   : > { %22740 = vmatpush1.bf16.msra.mxu0 %v27954_v18 }
 0x5bb   : > { %22760 = vmatpush1.bf16.msra.mxu1 %v27954_v18  ;;  %22742 = vmatprep.subr.bf16.mxu0 %v27958_v56 }
 0x5bc   : > { %22762 = vmatprep.subr.bf16.mxu1 %v27958_v56 }
 0x5be   : > { %22744 = vmatpush1.bf16.msra.mxu0 %v27968_v25 }
 0x5bf   : > { %22764 = vmatpush1.bf16.msra.mxu1 %v27968_v25  ;;  %18949 = vmatprep.subr.msk.mxu0 %vm690_vm0, %v27975_v61 }
 0x5c0   : > { %18953 = vmatprep.subr.msk.mxu1 %vm690_vm0, %v27975_v61 }
 0x5c2   : > { %18950 = vmatpush1.msk.msra.mxu0 %vm690_vm0, %v27986_v8 }
 0x5c3   : > { %18954 = vmatpush1.msk.msra.mxu1 %vm690_vm0, %v27986_v8  ;;  %18951 = vmatmul.mubr.msk.f32.vlgmr.msra.gmra.mrb[100].mxu0 %vm7841_vm6, %v9280_v19  ;;  %v19029_v19 = vld [vmem:[%s30685_s5 + $0x2d0] sm:$0xff] }
 0x5c4   : > { %18955 = vmatmul.mubr.msk.f32.vlgmr.msra.gmra.mrb[100].mxu1 %vm7841_vm6, %v9282_v20  ;;  %22766 = vmatprep.subr.bf16.mxu0 %v27874_v57  ;;  %v28342_v20 = vpack.c.bf16 %v19030_v36, %v19028_v12 }
 0x5c5   : > { %22786 = vmatprep.subr.bf16.mxu1 %v27874_v57  ;;  %22768 = vmatpush1.bf16.msra.mxu0 %v27876_v17 }
 0x5c6   : > { %22788 = vmatpush1.bf16.msra.mxu1 %v27876_v17  ;;  %9563 = vmatprep.mubr.f32.mxu0 %v25154_v7 }
 0x5c7   : > { %9646 = vmatprep.mubr.f32.mxu1 %v25154_v7  ;;  %18952 = vmatmul.mubr.msk.f32.gmra.mrb[102].mxu0 %vm7841_vm6, %v9281_v46  ;;  %v10029_v46 = vld [vmem:[#allocation3 + $0x63] sm:$0xff] }
 0x5c8   : > { %18956 = vmatmul.mubr.msk.f32.gmra.mrb[102].mxu1 %vm7841_vm6, %v9283_v21  ;;  %22770 = vmatprep.subr.bf16.mxu0 %v27904_v1  ;;  %v28344_v21 = vpack.c.bf16 %v19029_v19, %v19027_v45 }
 0x5c9   : > { %22790 = vmatprep.subr.bf16.mxu1 %v27904_v1  ;;  %22772 = vmatpush1.bf16.msra.mxu0 %v27908_v3 }
 0x5ca   : > { %22792 = vmatpush1.bf16.msra.mxu1 %v27908_v3  ;;  %22774 = vmatprep.subr.bf16.mxu0 %v27915_v23 }
 0x5cb   : > { %22794 = vmatprep.subr.bf16.mxu1 %v27915_v23  ;;  %9723 = vmatprep.mubr.f32.mxu0 %v25154_v7 }
 0x5cc   : > { %9806 = vmatprep.mubr.f32.mxu1 %v25154_v7 }
 0x5cd   : > { %22776 = vmatpush1.bf16.msra.mxu0 %v27932_v48 }
 0x5ce   : > { %22796 = vmatpush1.bf16.msra.mxu1 %v27932_v48  ;;  %22778 = vmatprep.subr.bf16.mxu0 %v27936_v30 }
 0x5cf   : > { %22798 = vmatprep.subr.bf16.mxu1 %v27936_v30 }
 0x5d1   : > { %22780 = vmatpush1.bf16.msra.mxu0 %v27954_v18 }
 0x5d2   : > { %22800 = vmatpush1.bf16.msra.mxu1 %v27954_v18  ;;  %22782 = vmatprep.subr.bf16.mxu0 %v27958_v56 }
 0x5d3   : > { %22802 = vmatprep.subr.bf16.mxu1 %v27958_v56 }
 0x5d5   : > { %22784 = vmatpush1.bf16.msra.mxu0 %v27968_v25 }
 0x5d6   : > { %22804 = vmatpush1.bf16.msra.mxu1 %v27968_v25  ;;  %18957 = vmatprep.subr.msk.mxu0 %vm690_vm0, %v27975_v61 }
 0x5d7   : > { %18961 = vmatprep.subr.msk.mxu1 %vm690_vm0, %v27975_v61 }
 0x5d9   : > { %18958 = vmatpush1.msk.msra.mxu0 %vm690_vm0, %v27986_v8 }
 0x5da   : > { %18962 = vmatpush1.msk.msra.mxu1 %vm690_vm0, %v27986_v8  ;;  %18959 = vmatmul.mubr.msk.f32.vlgmr.msra.gmra.mrb[104].mxu0 %vm7841_vm6, %v9284_v26  ;;  %v19032_v26 = vld [vmem:[%s30685_s5 + $0x2e8] sm:$0xff] }
 0x5db   : > { %18963 = vmatmul.mubr.msk.f32.vlgmr.msra.gmra.mrb[104].mxu1 %vm7841_vm6, %v9286_v15  ;;  %22806 = vmatprep.subr.bf16.mxu0 %v27874_v57  ;;  %v19034_v15 = vld [vmem:[%s30685_s5 + $0x2f8] sm:$0xff] }
 0x5dc   : > { %22826 = vmatprep.subr.bf16.mxu1 %v27874_v57  ;;  %22808 = vmatpush1.bf16.msra.mxu0 %v27876_v17  ;;  %v9289_v57 = vld [vmem:[#allocation3 + $0x6a] sm:$0x3]  ;;  %v28372_v28 = vpack.c.bf16 %v19034_v15, %v19032_v26 }
 0x5dd   : > { %22828 = vmatpush1.bf16.msra.mxu1 %v27876_v17  ;;  %9729 = vmatprep.mubr.f32.mxu0 %v25154_v7  ;;  %v28142_v17 = vpack.c.bf16 %v18979_v44, %v18977_v32  ;;  %v19040_v32 = vld [vmem:[%s30685_s5 + $0x328] sm:$0xff]  ;;  %v19042_v44 = vld [vmem:[%s30685_s5 + $0x338] sm:$0xff] }
 0x5de   : > { %9812 = vmatprep.mubr.f32.mxu1 %v25154_v7  ;;  %18960 = vmatmul.mubr.msk.f32.gmra.mrb[106].mxu0 %vm7841_vm6, %v9285_v38  ;;  %v10031_v38 = vld [vmem:[#allocation3 + $0x73] sm:$0xff]  ;;  %v28404_v27 = vpack.c.bf16 %v19042_v44, %v19040_v32  ;;  %v28623_v44 = vld [vmem:[%s30687_s7] sm:$0x1f] }
 0x5df   : > { %18964 = vmatmul.mubr.msk.f32.gmra.mrb[106].mxu1 %vm7841_vm6, %v9287_v54  ;;  %22810 = vmatprep.subr.bf16.mxu0 %v27904_v1  ;;  %v19031_v54 = vld [vmem:[%s30685_s5 + $0x2e0] sm:$0xff] }
 0x5e0   : > { %22830 = vmatprep.subr.bf16.mxu1 %v27904_v1  ;;  %22812 = vmatpush1.bf16.msra.mxu0 %v27908_v3  ;;  %v18985_v1 = vld [vmem:[%s30685_s5 + $0x270] sm:$0xff] }
 0x5e1   : > { %22832 = vmatpush1.bf16.msra.mxu1 %v27908_v3  ;;  %22814 = vmatprep.subr.bf16.mxu0 %v27915_v23  ;;  %v18987_v3 = vld [vmem:[%s30685_s5 + $0x280] sm:$0xff] }
 0x5e2   : > { %22834 = vmatprep.subr.bf16.mxu1 %v27915_v23  ;;  %9889 = vmatprep.mubr.f32.mxu0 %v25154_v7  ;;  %v28188_v51 = vpack.c.bf16 %v18987_v3, %v18985_v1  ;;  %v28192_v23 = vpack.c.bf16 %v18992_v53, %v18990_v49  ;;  %v10758_v1 = vld [vmem:[#allocation3 + $0x4] sm:$0xff]  ;;  %v10760_v3 = vld [vmem:[#allocation3 + $0x14] sm:$0xff]  ;;  %v10759_v49 = vld [vmem:[#allocation3 + $0xc] sm:$0x3] }
 0x5e3   : > { %9972 = vmatprep.mubr.f32.mxu1 %v25154_v7  ;;  %v10761_v53 = vld [vmem:[#allocation3 + $0x1c] sm:$0x3] }
 0x5e4   : > { %22816 = vmatpush1.bf16.msra.mxu0 %v27932_v48 }
 0x5e5   : > { %22836 = vmatpush1.bf16.msra.mxu1 %v27932_v48  ;;  %22818 = vmatprep.subr.bf16.mxu0 %v27936_v30  ;;  %v28209_v48 = vld [vmem:[%s30685_s5 + $0x2b8] sm:$0xf] }
 0x5e6   : > { %22838 = vmatprep.subr.bf16.mxu1 %v27936_v30  ;;  %v28220_v30 = vld [vmem:[%s30685_s5 + $0x2b0] sm:$0xf] }
 0x5e8   : > { %22820 = vmatpush1.bf16.msra.mxu0 %v27954_v18 }
 0x5e9   : > { %22840 = vmatpush1.bf16.msra.mxu1 %v27954_v18  ;;  %22822 = vmatprep.subr.bf16.mxu0 %v27958_v56  ;;  %v10021_v18 = vld [vmem:[#allocation3 + $0x23] sm:$0xff] }
 0x5ea   : > { %22842 = vmatprep.subr.bf16.mxu1 %v27958_v56  ;;  %v10023_v56 = vld [vmem:[#allocation3 + $0x33] sm:$0xff] }
 0x5ec   : > { %22824 = vmatpush1.bf16.msra.mxu0 %v27968_v25 }
 0x5ed   : > { %22844 = vmatpush1.bf16.msra.mxu1 %v27968_v25  ;;  %18965 = vmatprep.subr.msk.mxu0 %vm690_vm0, %v27975_v61  ;;  %v10025_v25 = vld [vmem:[#allocation3 + $0x43] sm:$0xff] }
 0x5ee   : > { %18969 = vmatprep.subr.msk.mxu1 %vm690_vm0, %v27975_v61  ;;  %v10027_v61 = vld [vmem:[#allocation3 + $0x53] sm:$0xff] }
 0x5f0   : > { %18966 = vmatpush1.msk.msra.mxu0 %vm690_vm0, %v27986_v8 }
 0x5f1   : > { %18970 = vmatpush1.msk.msra.mxu1 %vm690_vm0, %v27986_v8  ;;  %18967 = vmatmul.mubr.msk.f32.vlgmr.msra.gmra.mrb[108].mxu0 %vm7841_vm6, %v9288_v37  ;;  %v10026_v8 = vld [vmem:[#allocation3 + $0x4b] sm:$0x3]  ;;  %v28376_v37 = vpack.c.bf16 %v19033_v59, %v19031_v54 }
 0x5f2   : > { %18971 = vmatmul.mubr.msk.f32.vlgmr.msra.gmra.mrb[108].mxu1 %vm7841_vm6, %v9290_v52  ;;  %22846 = vmatprep.subr.bf16.mxu0 %v28108_v11  ;;  %v19037_v52 = vld [vmem:[%s30685_s5 + $0x310] sm:$0xff] }
 0x5f3   : > { %22866 = vmatprep.subr.bf16.mxu1 %v28108_v11  ;;  %22848 = vmatpush1.bf16.msra.mxu0 %v28110_v0  ;;  %v28400_v40 = vpack.c.bf16 %v19037_v52, %v19035_v16 }
 0x5f4   : > { %22868 = vmatpush1.bf16.msra.mxu1 %v28110_v0  ;;  %9895 = vmatprep.mubr.f32.mxu0 %v25154_v7 }
 0x5f5   : > { %9978 = vmatprep.mubr.f32.mxu1 %v25154_v7  ;;  %18968 = vmatmul.mubr.msk.f32.gmra.mrb[110].mxu0 %vm7841_vm6, %v9289_v57  ;;  %v19041_v57 = vld [vmem:[%s30685_s5 + $0x330] sm:$0xff] }
 0x5f6   : > { %18972 = vmatmul.mubr.msk.f32.gmra.mrb[110].mxu1 %vm7841_vm6, %v9291_v55  ;;  %22850 = vmatprep.subr.bf16.mxu0 %v28138_v24  ;;  %v19046_v55 = vld [vmem:[%s30685_s5 + $0x358] sm:$0xff] }
 0x5f7   : > { %22870 = vmatprep.subr.bf16.mxu1 %v28138_v24  ;;  %22852 = vmatpush1.bf16.msra.mxu0 %v28142_v17 }
 0x5f8   : > { %22872 = vmatpush1.bf16.msra.mxu1 %v28142_v17  ;;  %22854 = vmatprep.subr.bf16.mxu0 %v28146_v22 }
 0x5f9   : > { %22874 = vmatprep.subr.bf16.mxu1 %v28146_v22  ;;  %10132 = vmatprep.mubr.f32.mxu0 %v25154_v7 }
 0x5fa   : > { %10215 = vmatprep.mubr.f32.mxu1 %v25154_v7 }
 0x5fb   : > { %22856 = vmatpush1.bf16.msra.mxu0 %v28166_v41 }
 0x5fc   : > { %22876 = vmatpush1.bf16.msra.mxu1 %v28166_v41  ;;  %22858 = vmatprep.subr.bf16.mxu0 %v28170_v42 }
 0x5fd   : > { %22878 = vmatprep.subr.bf16.mxu1 %v28170_v42 }
 0x5ff   : > { %22860 = vmatpush1.bf16.msra.mxu0 %v28188_v51 }
 0x600   : > { %22880 = vmatpush1.bf16.msra.mxu1 %v28188_v51  ;;  %22862 = vmatprep.subr.bf16.mxu0 %v28192_v23 }
 0x601   : > { %22882 = vmatprep.subr.bf16.mxu1 %v28192_v23 }
 0x603   : > { %22864 = vmatpush1.bf16.msra.mxu0 %v28202_v47 }
 0x604   : > { %22884 = vmatpush1.bf16.msra.mxu1 %v28202_v47  ;;  %18995 = vmatprep.subr.msk.mxu0 %vm690_vm0, %v28209_v48 }
 0x605   : > { %18999 = vmatprep.subr.msk.mxu1 %vm690_vm0, %v28209_v48 }
 0x607   : > { %18996 = vmatpush1.msk.msra.mxu0 %vm690_vm0, %v28220_v30 }
 0x608   : > { %19000 = vmatpush1.msk.msra.mxu1 %vm690_vm0, %v28220_v30  ;;  %18997 = vmatmul.mubr.msk.f32.vlgmr.msra.gmra.mrb[96].mxu0 %vm7841_vm6, %v10017_v31  ;;  %v10769_v31 = vld [vmem:[#allocation3 + $0x5c] sm:$0x3] }
 0x609   : > { %19001 = vmatmul.mubr.msk.f32.vlgmr.msra.gmra.mrb[96].mxu1 %vm7841_vm6, %v10019_v29  ;;  %22886 = vmatprep.subr.bf16.mxu0 %v28108_v11  ;;  %v10770_v29 = vld [vmem:[#allocation3 + $0x64] sm:$0xff] }
 0x60a   : > { %22906 = vmatprep.subr.bf16.mxu1 %v28108_v11  ;;  %22888 = vmatpush1.bf16.msra.mxu0 %v28110_v0 }
 0x60b   : > { %22908 = vmatpush1.bf16.msra.mxu1 %v28110_v0  ;;  %10138 = vmatprep.mubr.f32.mxu0 %v25154_v7 }
 0x60c   : > { %10221 = vmatprep.mubr.f32.mxu1 %v25154_v7  ;;  %18998 = vmatmul.mubr.msk.f32.gmra.mrb[98].mxu0 %vm7841_vm6, %v10018_v33  ;;  %v10772_v33 = vld [vmem:[#allocation3 + $0x74] sm:$0xff] }
 0x60d   : > { %19002 = vmatmul.mubr.msk.f32.gmra.mrb[98].mxu1 %vm7841_vm6, %v10020_v43  ;;  %22890 = vmatprep.subr.bf16.mxu0 %v28138_v24  ;;  %v10771_v43 = vld [vmem:[#allocation3 + $0x6c] sm:$0x3] }
 0x60e   : > { %22910 = vmatprep.subr.bf16.mxu1 %v28138_v24  ;;  %22892 = vmatpush1.bf16.msra.mxu0 %v28142_v17 }
 0x60f   : > { %22912 = vmatpush1.bf16.msra.mxu1 %v28142_v17  ;;  %22894 = vmatprep.subr.bf16.mxu0 %v28146_v22 }
 0x610   : > { %22914 = vmatprep.subr.bf16.mxu1 %v28146_v22  ;;  %10298 = vmatprep.mubr.f32.mxu0 %v25154_v7 }
 0x611   : > { %10381 = vmatprep.mubr.f32.mxu1 %v25154_v7 }
 0x612   : > { %22896 = vmatpush1.bf16.msra.mxu0 %v28166_v41 }
 0x613   : > { %22916 = vmatpush1.bf16.msra.mxu1 %v28166_v41  ;;  %22898 = vmatprep.subr.bf16.mxu0 %v28170_v42 }
 0x614   : > { %22918 = vmatprep.subr.bf16.mxu1 %v28170_v42 }
 0x616   : > { %22900 = vmatpush1.bf16.msra.mxu0 %v28188_v51 }
 0x617   : > { %22920 = vmatpush1.bf16.msra.mxu1 %v28188_v51  ;;  %22902 = vmatprep.subr.bf16.mxu0 %v28192_v23 }
 0x618   : > { %22922 = vmatprep.subr.bf16.mxu1 %v28192_v23 }
 0x61a   : > { %22904 = vmatpush1.bf16.msra.mxu0 %v28202_v47 }
 0x61b   : > { %22924 = vmatpush1.bf16.msra.mxu1 %v28202_v47  ;;  %19003 = vmatprep.subr.msk.mxu0 %vm690_vm0, %v28209_v48 }
 0x61c   : > { %19007 = vmatprep.subr.msk.mxu1 %vm690_vm0, %v28209_v48 }
 0x61e   : > { %19004 = vmatpush1.msk.msra.mxu0 %vm690_vm0, %v28220_v30 }
 0x61f   : > { %19008 = vmatpush1.msk.msra.mxu1 %vm690_vm0, %v28220_v30  ;;  %19005 = vmatmul.mubr.msk.f32.vlgmr.msra.gmra.mrb[100].mxu0 %vm7841_vm6, %v10021_v18  ;;  %v10773_v18 = vld [vmem:[#allocation3 + $0x7c] sm:$0x3] }
 0x620   : > { %19009 = vmatmul.mubr.msk.f32.vlgmr.msra.gmra.mrb[100].mxu1 %vm7841_vm6, %v10023_v56  ;;  %22926 = vmatprep.subr.bf16.mxu0 %v28108_v11  ;;  %v11499_v56 = vld [vmem:[%s30686_s6] sm:$0x3] }
 0x621   : > { %22946 = vmatprep.subr.bf16.mxu1 %v28108_v11  ;;  %22928 = vmatpush1.bf16.msra.mxu0 %v28110_v0 }
 0x622   : > { %22948 = vmatpush1.bf16.msra.mxu1 %v28110_v0  ;;  %10304 = vmatprep.mubr.f32.mxu0 %v25154_v7 }
 0x623   : > { %10387 = vmatprep.mubr.f32.mxu1 %v25154_v7  ;;  %19006 = vmatmul.mubr.msk.f32.gmra.mrb[102].mxu0 %vm7841_vm6, %v10022_v10  ;;  %v28581_v10 = vrot.slane %v11499_v56, %v5068_v6 }
 0x624   : > { %19010 = vmatmul.mubr.msk.f32.gmra.mrb[102].mxu1 %vm7841_vm6, %v10024_v13  ;;  %22930 = vmatprep.subr.bf16.mxu0 %v28138_v24 }
 0x625   : > { %22950 = vmatprep.subr.bf16.mxu1 %v28138_v24  ;;  %22932 = vmatpush1.bf16.msra.mxu0 %v28142_v17 }
 0x626   : > { %22952 = vmatpush1.bf16.msra.mxu1 %v28142_v17  ;;  %22934 = vmatprep.subr.bf16.mxu0 %v28146_v22 }
 0x627   : > { %22954 = vmatprep.subr.bf16.mxu1 %v28146_v22  ;;  %10464 = vmatprep.mubr.f32.mxu0 %v25154_v7 }
 0x628   : > { %10547 = vmatprep.mubr.f32.mxu1 %v25154_v7 }
 0x629   : > { %22936 = vmatpush1.bf16.msra.mxu0 %v28166_v41 }
 0x62a   : > { %22956 = vmatpush1.bf16.msra.mxu1 %v28166_v41  ;;  %22938 = vmatprep.subr.bf16.mxu0 %v28170_v42 }
 0x62b   : > { %22958 = vmatprep.subr.bf16.mxu1 %v28170_v42 }
 0x62d   : > { %22940 = vmatpush1.bf16.msra.mxu0 %v28188_v51 }
 0x62e   : > { %22960 = vmatpush1.bf16.msra.mxu1 %v28188_v51  ;;  %22942 = vmatprep.subr.bf16.mxu0 %v28192_v23 }
 0x62f   : > { %22962 = vmatprep.subr.bf16.mxu1 %v28192_v23 }
 0x631   : > { %22944 = vmatpush1.bf16.msra.mxu0 %v28202_v47 }
 0x632   : > { %22964 = vmatpush1.bf16.msra.mxu1 %v28202_v47  ;;  %19011 = vmatprep.subr.msk.mxu0 %vm690_vm0, %v28209_v48 }
 0x633   : > { %19015 = vmatprep.subr.msk.mxu1 %vm690_vm0, %v28209_v48 }
 0x635   : > { %19012 = vmatpush1.msk.msra.mxu0 %vm690_vm0, %v28220_v30 }
 0x636   : > { %19016 = vmatpush1.msk.msra.mxu1 %vm690_vm0, %v28220_v30  ;;  %19013 = vmatmul.mubr.msk.f32.vlgmr.msra.gmra.mrb[104].mxu0 %vm7841_vm6, %v10025_v25 }
 0x637   : > { %19017 = vmatmul.mubr.msk.f32.vlgmr.msra.gmra.mrb[104].mxu1 %vm7841_vm6, %v10027_v61  ;;  %22966 = vmatprep.subr.bf16.mxu0 %v28108_v11  ;;  %v28585_v61 = vrot.slane %v11499_v56, %v5072_v9 }
 0x638   : > { %22986 = vmatprep.subr.bf16.mxu1 %v28108_v11  ;;  %22968 = vmatpush1.bf16.msra.mxu0 %v28110_v0  ;;  %v10030_v11 = vld [vmem:[#allocation3 + $0x6b] sm:$0x3] }
 0x639   : > { %22988 = vmatpush1.bf16.msra.mxu1 %v28110_v0  ;;  %10470 = vmatprep.mubr.f32.mxu0 %v25154_v7  ;;  %v10032_v0 = vld [vmem:[#allocation3 + $0x7b] sm:$0x3] }
 0x63a   : > { %10553 = vmatprep.mubr.f32.mxu1 %v25154_v7  ;;  %19014 = vmatmul.mubr.msk.f32.gmra.mrb[106].mxu0 %vm7841_vm6, %v10026_v8 }
 0x63b   : > { %19018 = vmatmul.mubr.msk.f32.gmra.mrb[106].mxu1 %vm7841_vm6, %v10028_v34  ;;  %22970 = vmatprep.subr.bf16.mxu0 %v28138_v24 }
 0x63c   : > { %22990 = vmatprep.subr.bf16.mxu1 %v28138_v24  ;;  %22972 = vmatpush1.bf16.msra.mxu0 %v28142_v17  ;;  %v19039_v24 = vld [vmem:[%s30685_s5 + $0x320] sm:$0xff] }
 0x63d   : > { %22992 = vmatpush1.bf16.msra.mxu1 %v28142_v17  ;;  %22974 = vmatprep.subr.bf16.mxu0 %v28146_v22  ;;  %v19044_v17 = vld [vmem:[%s30685_s5 + $0x348] sm:$0xff] }
 0x63e   : > { %22994 = vmatprep.subr.bf16.mxu1 %v28146_v22  ;;  %10630 = vmatprep.mubr.f32.mxu0 %v25154_v7  ;;  %v28422_v22 = vpack.c.bf16 %v19041_v57, %v19039_v24  ;;  %v28426_v63 = vpack.c.bf16 %v19046_v55, %v19044_v17 }
 0x63f   : > { %10713 = vmatprep.mubr.f32.mxu1 %v25154_v7 }
 0x640   : > { %22976 = vmatpush1.bf16.msra.mxu0 %v28166_v41 }
 0x641   : > { %22996 = vmatpush1.bf16.msra.mxu1 %v28166_v41  ;;  %22978 = vmatprep.subr.bf16.mxu0 %v28170_v42  ;;  %v28443_v41 = vld [vmem:[%s30685_s5 + $0x368] sm:$0xf] }
 0x642   : > { %22998 = vmatprep.subr.bf16.mxu1 %v28170_v42  ;;  %v28454_v42 = vld [vmem:[%s30685_s5 + $0x360] sm:$0xf] }
 0x644   : > { %22980 = vmatpush1.bf16.msra.mxu0 %v28188_v51 }
 0x645   : > { %23000 = vmatpush1.bf16.msra.mxu1 %v28188_v51  ;;  %22982 = vmatprep.subr.bf16.mxu0 %v28192_v23  ;;  %v10762_v51 = vld [vmem:[#allocation3 + $0x24] sm:$0xff] }
 0x646   : > { %23002 = vmatprep.subr.bf16.mxu1 %v28192_v23  ;;  %v10764_v23 = vld [vmem:[#allocation3 + $0x34] sm:$0xff] }
 0x648   : > { %22984 = vmatpush1.bf16.msra.mxu0 %v28202_v47 }
 0x649   : > { %23004 = vmatpush1.bf16.msra.mxu1 %v28202_v47  ;;  %19019 = vmatprep.subr.msk.mxu0 %vm690_vm0, %v28209_v48  ;;  %v10766_v47 = vld [vmem:[#allocation3 + $0x44] sm:$0xff] }
 0x64a   : > { %19023 = vmatprep.subr.msk.mxu1 %vm690_vm0, %v28209_v48  ;;  %v10768_v48 = vld [vmem:[#allocation3 + $0x54] sm:$0xff] }
 0x64c   : > { %19020 = vmatpush1.msk.msra.mxu0 %vm690_vm0, %v28220_v30 }
 0x64d   : > { %19024 = vmatpush1.msk.msra.mxu1 %vm690_vm0, %v28220_v30  ;;  %19021 = vmatmul.mubr.msk.f32.vlgmr.msra.gmra.mrb[108].mxu0 %vm7841_vm6, %v10029_v46  ;;  %v10767_v30 = vld [vmem:[#allocation3 + $0x4c] sm:$0x3] }
 0x64e   : > { %19025 = vmatmul.mubr.msk.f32.vlgmr.msra.gmra.mrb[108].mxu1 %vm7841_vm6, %v10031_v38  ;;  %23006 = vmatprep.subr.bf16.mxu0 %v28342_v20 }
 0x64f   : > { %23026 = vmatprep.subr.bf16.mxu1 %v28342_v20  ;;  %23008 = vmatpush1.bf16.msra.mxu0 %v28344_v21 }
 0x650   : > { %23028 = vmatpush1.bf16.msra.mxu1 %v28344_v21  ;;  %10636 = vmatprep.mubr.f32.mxu0 %v25154_v7 }
 0x651   : > { %10719 = vmatprep.mubr.f32.mxu1 %v25154_v7  ;;  %19022 = vmatmul.mubr.msk.f32.gmra.mrb[110].mxu0 %vm7841_vm6, %v10030_v11 }
 0x652   : > { %19026 = vmatmul.mubr.msk.f32.gmra.mrb[110].mxu1 %vm7841_vm6, %v10032_v0  ;;  %23010 = vmatprep.subr.bf16.mxu0 %v28372_v28 }
 0x653   : > { %23030 = vmatprep.subr.bf16.mxu1 %v28372_v28  ;;  %23012 = vmatpush1.bf16.msra.mxu0 %v28376_v37 }
 0x654   : > { %23032 = vmatpush1.bf16.msra.mxu1 %v28376_v37  ;;  %23014 = vmatprep.subr.bf16.mxu0 %v28380_v62 }
 0x655   : > { %23034 = vmatprep.subr.bf16.mxu1 %v28380_v62  ;;  %10873 = vmatprep.mubr.f32.mxu0 %v25154_v7 }
 0x656   : > { %10956 = vmatprep.mubr.f32.mxu1 %v25154_v7 }
 0x657   : > { %23016 = vmatpush1.bf16.msra.mxu0 %v28400_v40 }
 0x658   : > { %23036 = vmatpush1.bf16.msra.mxu1 %v28400_v40  ;;  %23018 = vmatprep.subr.bf16.mxu0 %v28404_v27 }
 0x659   : > { %23038 = vmatprep.subr.bf16.mxu1 %v28404_v27 }
 0x65b   : > { %23020 = vmatpush1.bf16.msra.mxu0 %v28422_v22 }
 0x65c   : > { %23040 = vmatpush1.bf16.msra.mxu1 %v28422_v22  ;;  %23022 = vmatprep.subr.bf16.mxu0 %v28426_v63 }
 0x65d   : > { %23042 = vmatprep.subr.bf16.mxu1 %v28426_v63 }
 0x65f   : > { %23024 = vmatpush1.bf16.msra.mxu0 %v28436_v14 }
 0x660   : > { %23044 = vmatpush1.bf16.msra.mxu1 %v28436_v14  ;;  %19049 = vmatprep.subr.msk.mxu0 %vm690_vm0, %v28443_v41 }
 0x661   : > { %19053 = vmatprep.subr.msk.mxu1 %vm690_vm0, %v28443_v41 }
 0x663   : > { %19050 = vmatpush1.msk.msra.mxu0 %vm690_vm0, %v28454_v42 }
 0x664   : > { %19054 = vmatpush1.msk.msra.mxu1 %vm690_vm0, %v28454_v42  ;;  %19051 = vmatmul.mubr.msk.f32.vlgmr.msra.gmra.mrb[96].mxu0 %vm7841_vm6, %v10758_v1 }
 0x665   : > { %19055 = vmatmul.mubr.msk.f32.vlgmr.msra.gmra.mrb[96].mxu1 %vm7841_vm6, %v10760_v3  ;;  %23046 = vmatprep.subr.bf16.mxu0 %v28342_v20 }
 0x666   : > { %23066 = vmatprep.subr.bf16.mxu1 %v28342_v20  ;;  %23048 = vmatpush1.bf16.msra.mxu0 %v28344_v21 }
 0x667   : > { %23068 = vmatpush1.bf16.msra.mxu1 %v28344_v21  ;;  %10879 = vmatprep.mubr.f32.mxu0 %v25154_v7 }
 0x668   : > { %10962 = vmatprep.mubr.f32.mxu1 %v25154_v7  ;;  %19052 = vmatmul.mubr.msk.f32.gmra.mrb[98].mxu0 %vm7841_vm6, %v10759_v49 }
 0x669   : > { %19056 = vmatmul.mubr.msk.f32.gmra.mrb[98].mxu1 %vm7841_vm6, %v10761_v53  ;;  %23050 = vmatprep.subr.bf16.mxu0 %v28372_v28 }
 0x66a   : > { %23070 = vmatprep.subr.bf16.mxu1 %v28372_v28  ;;  %23052 = vmatpush1.bf16.msra.mxu0 %v28376_v37 }
 0x66b   : > { %23072 = vmatpush1.bf16.msra.mxu1 %v28376_v37  ;;  %23054 = vmatprep.subr.bf16.mxu0 %v28380_v62 }
 0x66c   : > { %23074 = vmatprep.subr.bf16.mxu1 %v28380_v62  ;;  %11039 = vmatprep.mubr.f32.mxu0 %v25154_v7 }
 0x66d   : > { %11122 = vmatprep.mubr.f32.mxu1 %v25154_v7 }
 0x66e   : > { %23056 = vmatpush1.bf16.msra.mxu0 %v28400_v40 }
 0x66f   : > { %23076 = vmatpush1.bf16.msra.mxu1 %v28400_v40  ;;  %23058 = vmatprep.subr.bf16.mxu0 %v28404_v27 }
 0x670   : > { %23078 = vmatprep.subr.bf16.mxu1 %v28404_v27 }
 0x672   : > { %23060 = vmatpush1.bf16.msra.mxu0 %v28422_v22 }
 0x673   : > { %23080 = vmatpush1.bf16.msra.mxu1 %v28422_v22  ;;  %23062 = vmatprep.subr.bf16.mxu0 %v28426_v63 }
 0x674   : > { %23082 = vmatprep.subr.bf16.mxu1 %v28426_v63 }
 0x676   : > { %23064 = vmatpush1.bf16.msra.mxu0 %v28436_v14 }
 0x677   : > { %23084 = vmatpush1.bf16.msra.mxu1 %v28436_v14  ;;  %19057 = vmatprep.subr.msk.mxu0 %vm690_vm0, %v28443_v41 }
 0x678   : > { %19061 = vmatprep.subr.msk.mxu1 %vm690_vm0, %v28443_v41 }
 0x67a   : > { %19058 = vmatpush1.msk.msra.mxu0 %vm690_vm0, %v28454_v42 }
 0x67b   : > { %19062 = vmatpush1.msk.msra.mxu1 %vm690_vm0, %v28454_v42  ;;  %19059 = vmatmul.mubr.msk.f32.vlgmr.msra.gmra.mrb[100].mxu0 %vm7841_vm6, %v10762_v51 }
 0x67c   : > { %19063 = vmatmul.mubr.msk.f32.vlgmr.msra.gmra.mrb[100].mxu1 %vm7841_vm6, %v10764_v23  ;;  %23086 = vmatprep.subr.bf16.mxu0 %v28342_v20 }
 0x67d   : > { %23106 = vmatprep.subr.bf16.mxu1 %v28342_v20  ;;  %23088 = vmatpush1.bf16.msra.mxu0 %v28344_v21 }
 0x67e   : > { %23108 = vmatpush1.bf16.msra.mxu1 %v28344_v21  ;;  %11045 = vmatprep.mubr.f32.mxu0 %v25154_v7 }
 0x67f   : > { %11128 = vmatprep.mubr.f32.mxu1 %v25154_v7  ;;  %19060 = vmatmul.mubr.msk.f32.gmra.mrb[102].mxu0 %vm7841_vm6, %v10763_v58 }
 0x680   : > { %19064 = vmatmul.mubr.msk.f32.gmra.mrb[102].mxu1 %vm7841_vm6, %v10765_v50  ;;  %23090 = vmatprep.subr.bf16.mxu0 %v28372_v28 }
 0x681   : > { %23110 = vmatprep.subr.bf16.mxu1 %v28372_v28  ;;  %23092 = vmatpush1.bf16.msra.mxu0 %v28376_v37 }
 0x682   : > { %23112 = vmatpush1.bf16.msra.mxu1 %v28376_v37  ;;  %23094 = vmatprep.subr.bf16.mxu0 %v28380_v62 }
 0x683   : > { %23114 = vmatprep.subr.bf16.mxu1 %v28380_v62  ;;  %11205 = vmatprep.mubr.f32.mxu0 %v25154_v7 }
 0x684   : > { %11288 = vmatprep.mubr.f32.mxu1 %v25154_v7 }
 0x685   : > { %23096 = vmatpush1.bf16.msra.mxu0 %v28400_v40 }
 0x686   : > { %23116 = vmatpush1.bf16.msra.mxu1 %v28400_v40  ;;  %23098 = vmatprep.subr.bf16.mxu0 %v28404_v27 }
 0x687   : > { %23118 = vmatprep.subr.bf16.mxu1 %v28404_v27 }
 0x689   : > { %23100 = vmatpush1.bf16.msra.mxu0 %v28422_v22 }
 0x68a   : > { %23120 = vmatpush1.bf16.msra.mxu1 %v28422_v22  ;;  %23102 = vmatprep.subr.bf16.mxu0 %v28426_v63 }
 0x68b   : > { %23122 = vmatprep.subr.bf16.mxu1 %v28426_v63 }
 0x68d   : > { %23104 = vmatpush1.bf16.msra.mxu0 %v28436_v14 }
 0x68e   : > { %23124 = vmatpush1.bf16.msra.mxu1 %v28436_v14  ;;  %19065 = vmatprep.subr.msk.mxu0 %vm690_vm0, %v28443_v41 }
 0x68f   : > { %19069 = vmatprep.subr.msk.mxu1 %vm690_vm0, %v28443_v41 }
 0x691   : > { %19066 = vmatpush1.msk.msra.mxu0 %vm690_vm0, %v28454_v42 }
 0x692   : > { %19070 = vmatpush1.msk.msra.mxu1 %vm690_vm0, %v28454_v42  ;;  %19067 = vmatmul.mubr.msk.f32.vlgmr.msra.gmra.mrb[104].mxu0 %vm7841_vm6, %v10766_v47 }
 0x693   : > { %19071 = vmatmul.mubr.msk.f32.vlgmr.msra.gmra.mrb[104].mxu1 %vm7841_vm6, %v10768_v48  ;;  %23126 = vmatprep.subr.bf16.mxu0 %v28342_v20 }
 0x694   : > { %23146 = vmatprep.subr.bf16.mxu1 %v28342_v20  ;;  %23128 = vmatpush1.bf16.msra.mxu0 %v28344_v21 }
 0x695   : > { %23148 = vmatpush1.bf16.msra.mxu1 %v28344_v21  ;;  %11211 = vmatprep.mubr.f32.mxu0 %v25154_v7 }
 0x696   : > { %11294 = vmatprep.mubr.f32.mxu1 %v25154_v7  ;;  %19068 = vmatmul.mubr.msk.f32.gmra.mrb[106].mxu0 %vm7841_vm6, %v10767_v30 }
 0x697   : > { %19072 = vmatmul.mubr.msk.f32.gmra.mrb[106].mxu1 %vm7841_vm6, %v10769_v31  ;;  %23130 = vmatprep.subr.bf16.mxu0 %v28372_v28 }
 0x698   : > { %23150 = vmatprep.subr.bf16.mxu1 %v28372_v28  ;;  %23132 = vmatpush1.bf16.msra.mxu0 %v28376_v37 }
 0x699   : > { %23152 = vmatpush1.bf16.msra.mxu1 %v28376_v37  ;;  %23134 = vmatprep.subr.bf16.mxu0 %v28380_v62 }
 0x69a   : > { %23154 = vmatprep.subr.bf16.mxu1 %v28380_v62  ;;  %11371 = vmatprep.mubr.f32.mxu0 %v25154_v7 }
 0x69b   : > { %11454 = vmatprep.mubr.f32.mxu1 %v25154_v7 }
 0x69c   : > { %23136 = vmatpush1.bf16.msra.mxu0 %v28400_v40 }
 0x69d   : > { %23156 = vmatpush1.bf16.msra.mxu1 %v28400_v40  ;;  %23138 = vmatprep.subr.bf16.mxu0 %v28404_v27 }
 0x69e   : > { %23158 = vmatprep.subr.bf16.mxu1 %v28404_v27 }
 0x6a0   : > { %23140 = vmatpush1.bf16.msra.mxu0 %v28422_v22 }
 0x6a1   : > { %23160 = vmatpush1.bf16.msra.mxu1 %v28422_v22  ;;  %23142 = vmatprep.subr.bf16.mxu0 %v28426_v63 }
 0x6a2   : > { %23162 = vmatprep.subr.bf16.mxu1 %v28426_v63 }
 0x6a4   : > { %23144 = vmatpush1.bf16.msra.mxu0 %v28436_v14 }
 0x6a5   : > { %23164 = vmatpush1.bf16.msra.mxu1 %v28436_v14  ;;  %19073 = vmatprep.subr.msk.mxu0 %vm690_vm0, %v28443_v41 }
 0x6a6   : > { %19077 = vmatprep.subr.msk.mxu1 %vm690_vm0, %v28443_v41 }
 0x6a8   : > { %19074 = vmatpush1.msk.msra.mxu0 %vm690_vm0, %v28454_v42 }
 0x6a9   : > { %19078 = vmatpush1.msk.msra.mxu1 %vm690_vm0, %v28454_v42  ;;  %19075 = vmatmul.mubr.msk.f32.vlgmr.msra.gmra.mrb[108].mxu0 %vm7841_vm6, %v10770_v29 }
 0x6aa   : > { %19079 = vmatmul.mubr.msk.f32.vlgmr.msra.gmra.mrb[108].mxu1 %vm7841_vm6, %v10772_v33  ;;  %11377 = vmatprep.mubr.f32.mxu0 %v25154_v7 }
 0x6ab   : > { %11460 = vmatprep.mubr.f32.mxu1 %v25154_v7 }
 0x6ad   : > { %19076 = vmatmul.mubr.msk.f32.gmra.mrb[110].mxu0 %vm7841_vm6, %v10771_v43 }
 0x6ae   : > { %19080 = vmatmul.mubr.msk.f32.gmra.mrb[110].mxu1 %vm7841_vm6, %v10773_v18  ;;  %11651 = vmatprep.mubr.f32.mxu0 %v25154_v7 }
 0x6af   : > { %11728 = vmatprep.mubr.f32.mxu1 %v25154_v7 }
 0x737   : > { %v10875_v13 = vpop.f32.mrb[96].mxu0 }
 0x738   : > { %v10958_v25 = vpop.f32.mrb[96].mxu1  ;;  %v10877_v8 = vpop.f32.mrb[97].mxu0  ;;  %v11511_v12 = vadd.f32 %v28581_v10, %v10875_v13 }
 0x739   : > { %v10960_v34 = vpop.f32.mrb[97].mxu1  ;;  %v11515_v36 = vadd.f32 %v28581_v10, %v10958_v25  ;;  %v11512_v45 = vadd.f32 %v28585_v61, %v10877_v8 }
 0x73a   : > { %v11516_v19 = vadd.f32 %v28585_v61, %v10960_v34  ;;  %v11543_v38 = vmax.f32 %v11511_v12, 0.0 }
 0x73b   : > { %v10881_v20 = vpop.f32.mrb[98].mxu0  ;;  %v11547_v54 = vmax.f32 %v11515_v36, 0.0  ;;  %v11544_v2 = vmax.f32 %v11512_v45, 0.0 }
 0x73c   : > { %v10964_v46 = vpop.f32.mrb[98].mxu1  ;;  %v11513_v6 = vadd.f32 %v28581_v10, %v10881_v20  ;;  %v10883_v26 = vpop.f32.mrb[99].mxu0  ;;  %v11548_v28 = vmax.f32 %v11516_v19, 0.0 }
 0x73d   : > { %v11517_v21 = vadd.f32 %v28581_v10, %v10964_v46  ;;  %v10966_v5 = vpop.f32.mrb[99].mxu1  ;;  %v11514_v9 = vadd.f32 %v28585_v61, %v10883_v26 }
 0x73e   : > { %v11518_v15 = vadd.f32 %v28585_v61, %v10966_v5  ;;  %v11545_v59 = vmax.f32 %v11513_v6, 0.0 }
 0x73f   : > { %v11549_v60 = vmax.f32 %v11517_v21, 0.0  ;;  %v11546_v11 = vmax.f32 %v11514_v9, 0.0 }
 0x740   : > { %v11550_v37 = vmax.f32 %v11518_v15, 0.0  ;;  %v28595_v0 = vpack.c.bf16 %v11545_v59, %v11543_v38 }
 0x741   : > { %v28597_v62 = vpack.c.bf16 %v11549_v60, %v11547_v54  ;;  %v28604_v52 = vpack.c.bf16 %v11546_v11, %v11544_v2 }
 0x742   : > { %v28606_v32 = vpack.c.bf16 %v11550_v37, %v11548_v28 }
 0x743   : > { %23167 = vmatprep.subr.msk.bf16.mxu0 %vm28600_vm9, %v28604_v52 }
 0x744   : > { %23173 = vmatprep.subr.msk.bf16.mxu1 %vm28600_vm9, %v28606_v32  ;;  %23170 = vmatpush1.bf16.msk.msra.mxu0 %vm28600_vm9, %v28595_v0 }
 0x745   : > { %23176 = vmatpush1.bf16.msk.msra.mxu1 %vm28600_vm9, %v28597_v62 }
 0x747   : > { %19083 = vmatmul.mubr.msk.f32.vlgmr.msra.gmra.mrb[112].mxu0 %vm11576_vm10, %v28623_v44 }
 0x748   : > { %19086 = vmatmul.mubr.msk.f32.vlgmr.msra.gmra.mrb[112].mxu1 %vm11576_vm10, %v28623_v44  ;;  %11805 = vmatprep.mubr.f32.mxu0 %v25154_v7 }
 0x749   : > { %11882 = vmatprep.mubr.f32.mxu1 %v25154_v7 }
 0x74e   : > { %v11041_v40 = vpop.f32.mrb[100].mxu0 }
 0x74f   : > { %v11124_v27 = vpop.f32.mrb[100].mxu1  ;;  %v11043_v24 = vpop.f32.mrb[101].mxu0  ;;  %v11519_v17 = vadd.f32 %v28581_v10, %v11041_v40 }
 0x750   : > { %v11126_v57 = vpop.f32.mrb[101].mxu1  ;;  %v11523_v55 = vadd.f32 %v28581_v10, %v11124_v27  ;;  %v11520_v22 = vadd.f32 %v28585_v61, %v11043_v24 }
 0x751   : > { %v11524_v63 = vadd.f32 %v28585_v61, %v11126_v57  ;;  %v11551_v53 = vmax.f32 %v11519_v17, 0.0 }
 0x752   : > { %v11047_v35 = vpop.f32.mrb[102].mxu0  ;;  %v11555_v51 = vmax.f32 %v11523_v55, 0.0  ;;  %v11552_v50 = vmax.f32 %v11520_v22, 0.0 }
 0x753   : > { %v11130_v39 = vpop.f32.mrb[102].mxu1  ;;  %v11521_v14 = vadd.f32 %v28581_v10, %v11047_v35  ;;  %v11049_v42 = vpop.f32.mrb[103].mxu0  ;;  %v11556_v47 = vmax.f32 %v11524_v63, 0.0 }
 0x754   : > { %v11525_v41 = vadd.f32 %v28581_v10, %v11130_v39  ;;  %v11132_v1 = vpop.f32.mrb[103].mxu1  ;;  %v11522_v3 = vadd.f32 %v28585_v61, %v11049_v42 }
 0x755   : > { %v11526_v49 = vadd.f32 %v28585_v61, %v11132_v1  ;;  %v11553_v23 = vmax.f32 %v11521_v14, 0.0 }
 0x756   : > { %v11557_v58 = vmax.f32 %v11525_v41, 0.0  ;;  %v11554_v48 = vmax.f32 %v11522_v3, 0.0 }
 0x757   : > { %v11558_v30 = vmax.f32 %v11526_v49, 0.0  ;;  %v28639_v31 = vpack.c.bf16 %v11553_v23, %v11551_v53 }
 0x758   : > { %v28641_v29 = vpack.c.bf16 %v11557_v58, %v11555_v51  ;;  %v28643_v33 = vpack.c.bf16 %v11554_v48, %v11552_v50 }
 0x759   : > { %v28645_v43 = vpack.c.bf16 %v11558_v30, %v11556_v47 }
 0x75a   : > { %23179 = vmatprep.subr.msk.bf16.mxu0 %vm28600_vm9, %v28643_v33 }
 0x75b   : > { %23185 = vmatprep.subr.msk.bf16.mxu1 %vm28600_vm9, %v28645_v43  ;;  %23182 = vmatpush1.bf16.msk.msra.mxu0 %vm28600_vm9, %v28639_v31 }
 0x75c   : > { %23188 = vmatpush1.bf16.msk.msra.mxu1 %vm28600_vm9, %v28641_v29 }
 0x75e   : > { %19089 = vmatmul.mubr.msk.f32.vlgmr.msra.gmra.mrb[114].mxu0 %vm11576_vm10, %v28623_v44 }
 0x75f   : > { %19092 = vmatmul.mubr.msk.f32.vlgmr.msra.gmra.mrb[114].mxu1 %vm11576_vm10, %v28623_v44  ;;  %11959 = vmatprep.mubr.f32.mxu0 %v25154_v7 }
 0x760   : > { %12036 = vmatprep.mubr.f32.mxu1 %v25154_v7 }
 0x765   : > { %v11207_v18 = vpop.f32.mrb[104].mxu0 }
 0x766   : > { %v11290_v56 = vpop.f32.mrb[104].mxu1  ;;  %v11209_v13 = vpop.f32.mrb[105].mxu0  ;;  %v11527_v8 = vadd.f32 %v28581_v10, %v11207_v18 }
 0x767   : > { %v11292_v25 = vpop.f32.mrb[105].mxu1  ;;  %v11531_v34 = vadd.f32 %v28581_v10, %v11290_v56  ;;  %v11528_v12 = vadd.f32 %v28585_v61, %v11209_v13 }
 0x768   : > { %v11532_v36 = vadd.f32 %v28585_v61, %v11292_v25  ;;  %v11559_v9 = vmax.f32 %v11527_v8, 0.0 }
 0x769   : > { %v11213_v45 = vpop.f32.mrb[106].mxu0  ;;  %v11563_v15 = vmax.f32 %v11531_v34, 0.0  ;;  %v11560_v59 = vmax.f32 %v11528_v12, 0.0 }
 0x76a   : > { %v11296_v19 = vpop.f32.mrb[106].mxu1  ;;  %v11529_v20 = vadd.f32 %v28581_v10, %v11213_v45  ;;  %v11215_v6 = vpop.f32.mrb[107].mxu0  ;;  %v11564_v60 = vmax.f32 %v11532_v36, 0.0  ;;  %v12794_v36 = vld [vmem:[%s30688_s8 + $0x40] sm:$0xff]  ;;  %v12795_v45 = vld [vmem:[%s30688_s8 + $0x48] sm:$0xff] }
 0x76b   : > { %v11533_v46 = vadd.f32 %v28581_v10, %v11296_v19  ;;  %v11298_v21 = vpop.f32.mrb[107].mxu1  ;;  %v11530_v26 = vadd.f32 %v28585_v61, %v11215_v6  ;;  %v28828_v19 = vpack.c.bf16 %v12795_v45, %v12794_v36 }
 0x76c   : > { %v11534_v5 = vadd.f32 %v28585_v61, %v11298_v21  ;;  %v11561_v38 = vmax.f32 %v11529_v20, 0.0  ;;  %v12796_v20 = vld [vmem:[%s30688_s8 + $0x50] sm:$0xff]  ;;  %v12798_v21 = vld [vmem:[%s30688_s8 + $0x60] sm:$0xff] }
 0x76d   : > { %v11565_v54 = vmax.f32 %v11533_v46, 0.0  ;;  %v11562_v2 = vmax.f32 %v11530_v26, 0.0  ;;  %v12797_v46 = vld [vmem:[%s30688_s8 + $0x58] sm:$0xff]  ;;  %v12799_v26 = vld [vmem:[%s30688_s8 + $0x68] sm:$0xff] }
 0x76e   : > { %v11566_v28 = vmax.f32 %v11534_v5, 0.0  ;;  %v28673_v11 = vpack.c.bf16 %v11561_v38, %v11559_v9  ;;  %v28840_v6 = vpack.c.bf16 %v12797_v46, %v12796_v20  ;;  %v28854_v5 = vpack.c.bf16 %v12799_v26, %v12798_v21  ;;  %v12800_v9 = vld [vmem:[%s30688_s8 + $0x70] sm:$0xff] }
 0x76f   : > { %v28675_v37 = vpack.c.bf16 %v11565_v54, %v11563_v15  ;;  %v23189_v40 = vpack.c.bf16 %v11562_v2, %v11560_v59  ;;  %v12801_v15 = vld [vmem:[%s30688_s8 + $0x78] sm:$0xff]  ;;  %v12802_v54 = vld [vmem:[%s30688_s8 + $0x80] sm:$0xff]  ;;  %v12803_v59 = vld [vmem:[%s30688_s8 + $0x88] sm:$0xff] }
 0x770   : > { %v23195_v27 = vpack.c.bf16 %v11566_v28, %v11564_v60  ;;  %v28866_v38 = vpack.c.bf16 %v12801_v15, %v12800_v9  ;;  %v28878_v60 = vpack.c.bf16 %v12803_v59, %v12802_v54  ;;  %v12804_v2 = vld [vmem:[%s30688_s8 + $0x90] sm:$0xff]  ;;  %v12805_v28 = vld [vmem:[%s30688_s8 + $0x98] sm:$0xff] }
 0x771   : > { %23191 = vmatprep.subr.msk.bf16.mxu0 %vm28600_vm9, %v23189_v40  ;;  %v19144_v59 = vld [vmem:[%s30688_s8 + $0xd0] sm:$0xff] }
 0x772   : > { %23197 = vmatprep.subr.msk.bf16.mxu1 %vm28600_vm9, %v23195_v27  ;;  %23194 = vmatpush1.bf16.msk.msra.mxu0 %vm28600_vm9, %v28673_v11 }
 0x773   : > { %23200 = vmatpush1.bf16.msk.msra.mxu1 %vm28600_vm9, %v28675_v37 }
 0x775   : > { %19095 = vmatmul.mubr.msk.f32.vlgmr.msra.gmra.mrb[116].mxu0 %vm11576_vm10, %v28623_v44 }
 0x776   : > { %19098 = vmatmul.mubr.msk.f32.vlgmr.msra.gmra.mrb[116].mxu1 %vm11576_vm10, %v28623_v44  ;;  %12113 = vmatprep.mubr.f32.mxu0 %v25154_v7 }
 0x777   : > { %12190 = vmatprep.mubr.f32.mxu1 %v25154_v7 }
 0x77c   : > { %v11373_v24 = vpop.f32.mrb[108].mxu0 }
 0x77d   : > { %v11456_v57 = vpop.f32.mrb[108].mxu1  ;;  %v11375_v17 = vpop.f32.mrb[109].mxu0  ;;  %v11535_v22 = vadd.f32 %v28581_v10, %v11373_v24 }
 0x77e   : > { %v11458_v55 = vpop.f32.mrb[109].mxu1  ;;  %v11539_v63 = vadd.f32 %v28581_v10, %v11456_v57  ;;  %v11536_v35 = vadd.f32 %v28585_v61, %v11375_v17 }
 0x77f   : > { %v11540_v39 = vadd.f32 %v28585_v61, %v11458_v55  ;;  %v11567_v23 = vmax.f32 %v11535_v22, 0.0 }
 0x780   : > { %v11379_v14 = vpop.f32.mrb[110].mxu0  ;;  %v11571_v58 = vmax.f32 %v11539_v63, 0.0  ;;  %v11568_v48 = vmax.f32 %v11536_v35, 0.0 }
 0x781   : > { %v11462_v41 = vpop.f32.mrb[110].mxu1  ;;  %v11537_v42 = vadd.f32 %v28581_v10, %v11379_v14  ;;  %v11381_v3 = vpop.f32.mrb[111].mxu0  ;;  %v11572_v30 = vmax.f32 %v11540_v39, 0.0 }
 0x782   : > { %v11541_v1 = vadd.f32 %v28581_v10, %v11462_v41  ;;  %v11464_v49 = vpop.f32.mrb[111].mxu1  ;;  %v11538_v53 = vadd.f32 %v28585_v61, %v11381_v3  ;;  %v19105_v10 = vld [vmem:[%s30687_s7 + $0x8] sm:$0x1f] }
 0x783   : > { %v11542_v51 = vadd.f32 %v28585_v61, %v11464_v49  ;;  %v11569_v50 = vmax.f32 %v11537_v42, 0.0  ;;  %v12786_v61 = vld [vmem:[%s30688_s8] sm:$0xff] }
 0x784   : > { %v11573_v47 = vmax.f32 %v11541_v1, 0.0  ;;  %v11570_v18 = vmax.f32 %v11538_v53, 0.0 }
 0x785   : > { %v11574_v56 = vmax.f32 %v11542_v51, 0.0  ;;  %v23204_v13 = vpack.c.bf16 %v11569_v50, %v11567_v23 }
 0x786   : > { %v23210_v25 = vpack.c.bf16 %v11573_v47, %v11571_v58  ;;  %v23201_v8 = vpack.c.bf16 %v11570_v18, %v11568_v48 }
 0x787   : > { %v23207_v34 = vpack.c.bf16 %v11574_v56, %v11572_v30 }
 0x788   : > { %23203 = vmatprep.subr.msk.bf16.mxu0 %vm28600_vm9, %v23201_v8 }
 0x789   : > { %23209 = vmatprep.subr.msk.bf16.mxu1 %vm28600_vm9, %v23207_v34  ;;  %23206 = vmatpush1.bf16.msk.msra.mxu0 %vm28600_vm9, %v23204_v13 }
 0x78a   : > { %23212 = vmatpush1.bf16.msk.msra.mxu1 %vm28600_vm9, %v23210_v25  ;;  %23215 = vmatprep.subr.msk.bf16.mxu0 %vm28600_vm9, %v28604_v52  ;;  %v12788_v52 = vld [vmem:[%s30688_s8 + $0x10] sm:$0xff] }
 0x78b   : > { %23221 = vmatprep.subr.msk.bf16.mxu1 %vm28600_vm9, %v28606_v32  ;;  %v12789_v32 = vld [vmem:[%s30688_s8 + $0x18] sm:$0xff] }
 0x78c   : > { %19101 = vmatmul.mubr.msk.f32.vlgmr.msra.gmra.mrb[118].mxu0 %vm11576_vm10, %v28623_v44  ;;  %v28792_v16 = vpack.c.bf16 %v12789_v32, %v12788_v52 }
 0x78d   : > { %19104 = vmatmul.mubr.msk.f32.vlgmr.msra.gmra.mrb[118].mxu1 %vm11576_vm10, %v28623_v44  ;;  %23218 = vmatpush1.bf16.msk.msra.mxu0 %vm28600_vm9, %v28595_v0  ;;  %v12787_v0 = vld [vmem:[%s30688_s8 + $0x8] sm:$0xff]  ;;  %v12790_v44 = vld [vmem:[%s30688_s8 + $0x20] sm:$0xff] }
 0x78e   : > { %23224 = vmatpush1.bf16.msk.msra.mxu1 %vm28600_vm9, %v28597_v62  ;;  %23227 = vmatprep.subr.msk.bf16.mxu0 %vm28600_vm9, %v28643_v33  ;;  %v28776_v62 = vpack.c.bf16 %v12787_v0, %v12786_v61  ;;  %v12792_v33 = vld [vmem:[%s30688_s8 + $0x30] sm:$0xff] }
 0x78f   : > { %23233 = vmatprep.subr.msk.bf16.mxu1 %vm28600_vm9, %v28645_v43  ;;  %12266 = vmatprep.mubr.f32.mxu0 %v25154_v7  ;;  %v12793_v43 = vld [vmem:[%s30688_s8 + $0x38] sm:$0xff] }
 0x790   : > { %12337 = vmatprep.mubr.f32.mxu1 %v25154_v7  ;;  %19108 = vmatmul.mubr.msk.f32.vlgmr.msra.gmra.mrb[120].mxu0 %vm11576_vm10, %v19105_v10  ;;  %v28816_v12 = vpack.c.bf16 %v12793_v43, %v12792_v33 }
 0x791   : > { %19111 = vmatmul.mubr.msk.f32.vlgmr.msra.gmra.mrb[120].mxu1 %vm11576_vm10, %v19105_v10  ;;  %23230 = vmatpush1.bf16.msk.msra.mxu0 %vm28600_vm9, %v28639_v31  ;;  %v12791_v31 = vld [vmem:[%s30688_s8 + $0x28] sm:$0xff] }
 0x792   : > { %23236 = vmatpush1.bf16.msk.msra.mxu1 %vm28600_vm9, %v28641_v29  ;;  %23239 = vmatprep.subr.msk.bf16.mxu0 %vm28600_vm9, %v23189_v40  ;;  %v28804_v29 = vpack.c.bf16 %v12791_v31, %v12790_v44 }
 0x793   : > { %23245 = vmatprep.subr.msk.bf16.mxu1 %vm28600_vm9, %v23195_v27  ;;  %12408 = vmatprep.mubr.f32.mxu0 %v25154_v7 }
 0x794   : > { %12479 = vmatprep.mubr.f32.mxu1 %v25154_v7  ;;  %19114 = vmatmul.mubr.msk.f32.vlgmr.msra.gmra.mrb[122].mxu0 %vm11576_vm10, %v19105_v10 }
 0x795   : > { %19117 = vmatmul.mubr.msk.f32.vlgmr.msra.gmra.mrb[122].mxu1 %vm11576_vm10, %v19105_v10  ;;  %23242 = vmatpush1.bf16.msk.msra.mxu0 %vm28600_vm9, %v28673_v11  ;;  %v28890_v11 = vpack.c.bf16 %v12805_v28, %v12804_v2  ;;  %v19146_v28 = vld [vmem:[%s30688_s8 + $0xe0] sm:$0xff] }
 0x796   : > { %23248 = vmatpush1.bf16.msk.msra.mxu1 %vm28600_vm9, %v28675_v37  ;;  %23251 = vmatprep.subr.msk.bf16.mxu0 %vm28600_vm9, %v23201_v8 }
 0x797   : > { %23257 = vmatprep.subr.msk.bf16.mxu1 %vm28600_vm9, %v23207_v34  ;;  %12550 = vmatprep.mubr.f32.mxu0 %v25154_v7 }
 0x798   : > { %12621 = vmatprep.mubr.f32.mxu1 %v25154_v7  ;;  %19120 = vmatmul.mubr.msk.f32.vlgmr.msra.gmra.mrb[124].mxu0 %vm11576_vm10, %v19105_v10 }
 0x799   : > { %19123 = vmatmul.mubr.msk.f32.vlgmr.msra.gmra.mrb[124].mxu1 %vm11576_vm10, %v19105_v10  ;;  %23254 = vmatpush1.bf16.msk.msra.mxu0 %vm28600_vm9, %v23204_v13 }
 0x79a   : > { %23260 = vmatpush1.bf16.msk.msra.mxu1 %vm28600_vm9, %v23210_v25  ;;  %12692 = vmatprep.mubr.f32.mxu0 %v25154_v7 }
 0x79b   : > { %12763 = vmatprep.mubr.f32.mxu1 %v25154_v7  ;;  %23261 = vmatprep.subr.bf16.mxu0 %v25156_v4 }
 0x79c   : > { %23291 = vmatprep.subr.bf16.mxu1 %v25156_v4  ;;  %19126 = vmatmul.mubr.msk.f32.vlgmr.msra.gmra.mrb[126].mxu0 %vm11576_vm10, %v19105_v10 }
 0x79d   : > { %19129 = vmatmul.mubr.msk.f32.vlgmr.msra.gmra.mrb[126].mxu1 %vm11576_vm10, %v19105_v10  ;;  %23263 = vmatpush1.bf16.msra.mxu0 %v28776_v62 }
 0x79e   : > { %23293 = vmatpush1.bf16.msra.mxu1 %v28776_v62  ;;  %23264 = vmatprep.subr.bf16.mxu0 %v25156_v4 }
 0x79f   : > { %23294 = vmatprep.subr.bf16.mxu1 %v25156_v4 }
 0x7a1   : > { %23266 = vmatpush1.bf16.msra.mxu0 %v28792_v16 }
 0x7a2   : > { %23296 = vmatpush1.bf16.msra.mxu1 %v28792_v16  ;;  %23267 = vmatprep.subr.bf16.mxu0 %v25156_v4 }
 0x7a3   : > { %23297 = vmatprep.subr.bf16.mxu1 %v25156_v4 }
 0x7a5   : > { %23269 = vmatpush1.bf16.msra.mxu0 %v28804_v29 }
 0x7a6   : > { %23299 = vmatpush1.bf16.msra.mxu1 %v28804_v29  ;;  %23270 = vmatprep.subr.bf16.mxu0 %v25156_v4 }
 0x7a7   : > { %23300 = vmatprep.subr.bf16.mxu1 %v25156_v4 }
 0x7a9   : > { %23272 = vmatpush1.bf16.msra.mxu0 %v28816_v12 }
 0x7aa   : > { %23302 = vmatpush1.bf16.msra.mxu1 %v28816_v12  ;;  %23273 = vmatprep.subr.bf16.mxu0 %v25156_v4 }
 0x7ab   : > { %23303 = vmatprep.subr.bf16.mxu1 %v25156_v4 }
 0x7ad   : > { %23275 = vmatpush1.bf16.msra.mxu0 %v28828_v19 }
 0x7ae   : > { %23305 = vmatpush1.bf16.msra.mxu1 %v28828_v19  ;;  %23276 = vmatprep.subr.bf16.mxu0 %v25156_v4 }
 0x7af   : > { %23306 = vmatprep.subr.bf16.mxu1 %v25156_v4 }
 0x7b1   : > { %23278 = vmatpush1.bf16.msra.mxu0 %v28840_v6 }
 0x7b2   : > { %23308 = vmatpush1.bf16.msra.mxu1 %v28840_v6  ;;  %23279 = vmatprep.subr.bf16.mxu0 %v25156_v4 }
 0x7b3   : > { %23309 = vmatprep.subr.bf16.mxu1 %v25156_v4 }
 0x7b5   : > { %23281 = vmatpush1.bf16.msra.mxu0 %v28854_v5 }
 0x7b6   : > { %23311 = vmatpush1.bf16.msra.mxu1 %v28854_v5  ;;  %23282 = vmatprep.subr.bf16.mxu0 %v25156_v4 }
 0x7b7   : > { %23312 = vmatprep.subr.bf16.mxu1 %v25156_v4 }
 0x7b9   : > { %23284 = vmatpush1.bf16.msra.mxu0 %v28866_v38 }
 0x7ba   : > { %23314 = vmatpush1.bf16.msra.mxu1 %v28866_v38  ;;  %23285 = vmatprep.subr.bf16.mxu0 %v25156_v4 }
 0x7bb   : > { %23315 = vmatprep.subr.bf16.mxu1 %v25156_v4 }
 0x7bd   : > { %23287 = vmatpush1.bf16.msra.mxu0 %v28878_v60 }
 0x7be   : > { %23317 = vmatpush1.bf16.msra.mxu1 %v28878_v60  ;;  %23288 = vmatprep.subr.bf16.mxu0 %v25156_v4 }
 0x7bf   : > { %23318 = vmatprep.subr.bf16.mxu1 %v25156_v4 }
 0x7c1   : > { %23290 = vmatpush1.bf16.msra.mxu0 %v28890_v11 }
 0x7c2   : > { %23320 = vmatpush1.bf16.msra.mxu1 %v28890_v11  ;;  %23321 = vmatprep.subr.bf16.mxu0 %v25156_v4 }
 0x7c3   : > { %23351 = vmatprep.subr.bf16.mxu1 %v25156_v4 }
 0x81a   : > { %v11653_v37 = vpop.f32.mrb[112].mxu0 }
 0x81b   : > { %v11730_v40 = vpop.f32.mrb[112].mxu1  ;;  %v11655_v27 = vpop.f32.mrb[113].mxu0 }
 0x81c   : > { %v11732_v24 = vpop.f32.mrb[113].mxu1 }
 0x831   : > { %v11807_v57 = vpop.f32.mrb[114].mxu0 }
 0x832   : > { %v11884_v17 = vpop.f32.mrb[114].mxu1  ;;  %v11809_v55 = vpop.f32.mrb[115].mxu0 }
 0x833   : > { %v11886_v22 = vpop.f32.mrb[115].mxu1 }
 0x848   : > { %v11961_v63 = vpop.f32.mrb[116].mxu0 }
 0x849   : > { %v12038_v35 = vpop.f32.mrb[116].mxu1  ;;  %v11963_v39 = vpop.f32.mrb[117].mxu0 }
 0x84a   : > { %v12040_v14 = vpop.f32.mrb[117].mxu1 }
 0x85f   : > { %v12115_v41 = vpop.f32.mrb[118].mxu0 }
 0x860   : > { %v12192_v42 = vpop.f32.mrb[118].mxu1  ;;  %v12117_v1 = vpop.f32.mrb[119].mxu0 }
 0x861   : > { %v12194_v3 = vpop.f32.mrb[119].mxu1 }
 0x863   : > { %v12268_v49 = vpop.f32.mrb[120].mxu0 }
 0x864   : > { %v12339_v53 = vpop.f32.mrb[120].mxu1  ;;  %v28896_v51 = vmax.f32 %v11653_v37, %v12268_v49  ;;  %v12270_v58 = vpop.f32.mrb[121].mxu0 }
 0x865   : > { %v28898_v23 = vmax.f32 %v11730_v40, %v12339_v53  ;;  %v12341_v50 = vpop.f32.mrb[121].mxu1  ;;  %v28900_v47 = vmax.f32 %v11655_v27, %v12270_v58  ;;  %v19148_v40 = vld [vmem:[%s30688_s8 + $0xf0] sm:$0xff]  ;;  %v19149_v27 = vld [vmem:[%s30688_s8 + $0xf8] sm:$0xff] }
 0x866   : > { %v28902_v48 = vmax.f32 %v11732_v24, %v12341_v50  ;;  %v29139_v24 = vpack.c.bf16 %v19149_v27, %v19148_v40 }
 0x867   : > { %v12410_v30 = vpop.f32.mrb[122].mxu0  ;;  %19130 = vmatprep.mubr.msk.f32.mxu0 %vm12806_vm11, %v28900_v47 }
 0x868   : > { %v12481_v18 = vpop.f32.mrb[122].mxu1  ;;  %19131 = vmatprep.mubr.msk.f32.mxu1 %vm12806_vm11, %v28902_v48  ;;  %v28908_v56 = vmax.f32 %v11807_v57, %v12410_v30  ;;  %v12412_v25 = vpop.f32.mrb[123].mxu0  ;;  %12875 = vmatmul.mubr.f32.vlgmr.msra.gmra.mrb[128].mxu0 %v28896_v51  ;;  %v19150_v57 = vld [vmem:[%s30688_s8 + $0x100] sm:$0xff]  ;;  %v19166_v30 = vld [vmem:[%s30689_s9 + $0x50] sm:$0xff] }
 0x869   : > { %v28910_v13 = vmax.f32 %v11884_v17, %v12481_v18  ;;  %v12483_v8 = vpop.f32.mrb[123].mxu1  ;;  %12948 = vmatmul.mubr.f32.vlgmr.msra.gmra.mrb[128].mxu1 %v28898_v23  ;;  %v28914_v34 = vmax.f32 %v11809_v55, %v12412_v25  ;;  %23323 = vmatpush1.bf16.msra.mxu0 %v28776_v62  ;;  %v19151_v17 = vld [vmem:[%s30688_s8 + $0x108] sm:$0xff]  ;;  %v19167_v18 = vld [vmem:[%s30689_s9 + $0x58] sm:$0xff] }
 0x86a   : > { %v28916_v10 = vmax.f32 %v11886_v22, %v12483_v8  ;;  %23353 = vmatpush1.bf16.msra.mxu1 %v28776_v62  ;;  %23324 = vmatprep.subr.bf16.mxu0 %v25156_v4  ;;  %v29151_v55 = vpack.c.bf16 %v19151_v17, %v19150_v57  ;;  %v19152_v22 = vld [vmem:[%s30688_s8 + $0x110] sm:$0xff]  ;;  %v19169_v25 = vld [vmem:[%s30689_s9 + $0x68] sm:$0xff] }
 0x86b   : > { %23354 = vmatprep.subr.bf16.mxu1 %v25156_v4  ;;  %v12552_v61 = vpop.f32.mrb[124].mxu0  ;;  %19132 = vmatprep.mubr.msk.f32.mxu0 %vm12806_vm11, %v28914_v34 }
 0x86c   : > { %v12623_v0 = vpop.f32.mrb[124].mxu1  ;;  %19133 = vmatprep.mubr.msk.f32.mxu1 %vm12806_vm11, %v28916_v10  ;;  %v28926_v52 = vmax.f32 %v11961_v63, %v12552_v61  ;;  %v12554_v44 = vpop.f32.mrb[125].mxu0  ;;  %v19153_v63 = vld [vmem:[%s30688_s8 + $0x118] sm:$0xff] }
 0x86d   : > { %v28928_v32 = vmax.f32 %v12038_v35, %v12623_v0  ;;  %v12625_v31 = vpop.f32.mrb[125].mxu1  ;;  %v28930_v33 = vmax.f32 %v11963_v39, %v12554_v44  ;;  %23326 = vmatpush1.bf16.msra.mxu0 %v28792_v16  ;;  %v29163_v35 = vpack.c.bf16 %v19153_v63, %v19152_v22  ;;  %v19154_v39 = vld [vmem:[%s30688_s8 + $0x120] sm:$0xff]  ;;  %v19174_v44 = vld [vmem:[%s30689_s9 + $0x90] sm:$0xff] }
 0x86e   : > { %v28932_v43 = vmax.f32 %v12040_v14, %v12625_v31  ;;  %23356 = vmatpush1.bf16.msra.mxu1 %v28792_v16  ;;  %23327 = vmatprep.subr.bf16.mxu0 %v25156_v4  ;;  %v19155_v14 = vld [vmem:[%s30688_s8 + $0x128] sm:$0xff]  ;;  %v19172_v0 = vld [vmem:[%s30689_s9 + $0x80] sm:$0xff]  ;;  %v19175_v31 = vld [vmem:[%s30689_s9 + $0x98] sm:$0xff] }
 0x86f   : > { %23357 = vmatprep.subr.bf16.mxu1 %v25156_v4  ;;  %v12694_v36 = vpop.f32.mrb[126].mxu0 }
 0x870   : > { %v12765_v45 = vpop.f32.mrb[126].mxu1  ;;  %v28938_v20 = vmax.f32 %v12115_v41, %v12694_v36  ;;  %v12696_v21 = vpop.f32.mrb[127].mxu0  ;;  %v29175_v41 = vpack.c.bf16 %v19155_v14, %v19154_v39 }
 0x871   : > { %v28940_v46 = vmax.f32 %v12192_v42, %v12765_v45  ;;  %v12767_v26 = vpop.f32.mrb[127].mxu1  ;;  %v28942_v9 = vmax.f32 %v12117_v1, %v12696_v21  ;;  %23329 = vmatpush1.bf16.msra.mxu0 %v28804_v29  ;;  %v19156_v42 = vld [vmem:[%s30688_s8 + $0x130] sm:$0xff]  ;;  %v19157_v1 = vld [vmem:[%s30688_s8 + $0x138] sm:$0xff] }
 0x872   : > { %v28944_v15 = vmax.f32 %v12194_v3, %v12767_v26  ;;  %23359 = vmatpush1.bf16.msra.mxu1 %v28804_v29  ;;  %23330 = vmatprep.subr.bf16.mxu0 %v25156_v4  ;;  %v29187_v3 = vpack.c.bf16 %v19157_v1, %v19156_v42 }
 0x873   : > { %23360 = vmatprep.subr.bf16.mxu1 %v25156_v4 }
 0x875   : > { %23332 = vmatpush1.bf16.msra.mxu0 %v28816_v12 }
 0x876   : > { %23362 = vmatpush1.bf16.msra.mxu1 %v28816_v12  ;;  %23333 = vmatprep.subr.bf16.mxu0 %v25156_v4 }
 0x877   : > { %23363 = vmatprep.subr.bf16.mxu1 %v25156_v4 }
 0x879   : > { %23335 = vmatpush1.bf16.msra.mxu0 %v28828_v19 }
 0x87a   : > { %23365 = vmatpush1.bf16.msra.mxu1 %v28828_v19  ;;  %23336 = vmatprep.subr.bf16.mxu0 %v25156_v4 }
 0x87b   : > { %23366 = vmatprep.subr.bf16.mxu1 %v25156_v4 }
 0x87d   : > { %23338 = vmatpush1.bf16.msra.mxu0 %v28840_v6 }
 0x87e   : > { %23368 = vmatpush1.bf16.msra.mxu1 %v28840_v6  ;;  %23339 = vmatprep.subr.bf16.mxu0 %v25156_v4 }
 0x87f   : > { %23369 = vmatprep.subr.bf16.mxu1 %v25156_v4 }
 0x881   : > { %23341 = vmatpush1.bf16.msra.mxu0 %v28854_v5 }
 0x882   : > { %23371 = vmatpush1.bf16.msra.mxu1 %v28854_v5  ;;  %23342 = vmatprep.subr.bf16.mxu0 %v25156_v4 }
 0x883   : > { %23372 = vmatprep.subr.bf16.mxu1 %v25156_v4 }
 0x885   : > { %23344 = vmatpush1.bf16.msra.mxu0 %v28866_v38 }
 0x886   : > { %23374 = vmatpush1.bf16.msra.mxu1 %v28866_v38  ;;  %23345 = vmatprep.subr.bf16.mxu0 %v25156_v4 }
 0x887   : > { %23375 = vmatprep.subr.bf16.mxu1 %v25156_v4 }
 0x889   : > { %23347 = vmatpush1.bf16.msra.mxu0 %v28878_v60 }
 0x88a   : > { %23377 = vmatpush1.bf16.msra.mxu1 %v28878_v60  ;;  %23348 = vmatprep.subr.bf16.mxu0 %v25156_v4 }
 0x88b   : > { %23378 = vmatprep.subr.bf16.mxu1 %v25156_v4 }
 0x88d   : > { %23350 = vmatpush1.bf16.msra.mxu0 %v28890_v11 }
 0x88e   : > { %23380 = vmatpush1.bf16.msra.mxu1 %v28890_v11  ;;  %23381 = vmatprep.subr.bf16.mxu0 %v25156_v4 }
 0x88f   : > { %23411 = vmatprep.subr.bf16.mxu1 %v25156_v4 }
 0x890   : > { %13021 = vmatmul.mubr.f32.vlgmr.msra.gmra.mrb[130].mxu0 %v28908_v56 }
 0x891   : > { %13094 = vmatmul.mubr.f32.vlgmr.msra.gmra.mrb[130].mxu1 %v28910_v13  ;;  %23383 = vmatpush1.bf16.msra.mxu0 %v28776_v62 }
 0x892   : > { %19134 = vmatprep.mubr.msk.f32.mxu0 %vm12806_vm11, %v28930_v33  ;;  %23413 = vmatpush1.bf16.msra.mxu1 %v28776_v62 }
 0x893   : > { %19135 = vmatprep.mubr.msk.f32.mxu1 %vm12806_vm11, %v28932_v43  ;;  %23384 = vmatprep.subr.bf16.mxu0 %v25156_v4 }
 0x894   : > { %23414 = vmatprep.subr.bf16.mxu1 %v25156_v4 }
 0x895   : > { %23386 = vmatpush1.bf16.msra.mxu0 %v28792_v16 }
 0x896   : > { %23416 = vmatpush1.bf16.msra.mxu1 %v28792_v16  ;;  %23387 = vmatprep.subr.bf16.mxu0 %v25156_v4 }
 0x897   : > { %23417 = vmatprep.subr.bf16.mxu1 %v25156_v4 }
 0x899   : > { %23389 = vmatpush1.bf16.msra.mxu0 %v28804_v29 }
 0x89a   : > { %23419 = vmatpush1.bf16.msra.mxu1 %v28804_v29  ;;  %23390 = vmatprep.subr.bf16.mxu0 %v25156_v4 }
 0x89b   : > { %23420 = vmatprep.subr.bf16.mxu1 %v25156_v4 }
 0x89d   : > { %23392 = vmatpush1.bf16.msra.mxu0 %v28816_v12 }
 0x89e   : > { %23422 = vmatpush1.bf16.msra.mxu1 %v28816_v12  ;;  %23393 = vmatprep.subr.bf16.mxu0 %v25156_v4 }
 0x89f   : > { %23423 = vmatprep.subr.bf16.mxu1 %v25156_v4 }
 0x8a1   : > { %23395 = vmatpush1.bf16.msra.mxu0 %v28828_v19 }
 0x8a2   : > { %23425 = vmatpush1.bf16.msra.mxu1 %v28828_v19  ;;  %23396 = vmatprep.subr.bf16.mxu0 %v25156_v4 }
 0x8a3   : > { %23426 = vmatprep.subr.bf16.mxu1 %v25156_v4 }
 0x8a5   : > { %23398 = vmatpush1.bf16.msra.mxu0 %v28840_v6 }
 0x8a6   : > { %23428 = vmatpush1.bf16.msra.mxu1 %v28840_v6  ;;  %23399 = vmatprep.subr.bf16.mxu0 %v25156_v4 }
 0x8a7   : > { %23429 = vmatprep.subr.bf16.mxu1 %v25156_v4 }
 0x8a9   : > { %23401 = vmatpush1.bf16.msra.mxu0 %v28854_v5 }
 0x8aa   : > { %23431 = vmatpush1.bf16.msra.mxu1 %v28854_v5  ;;  %23402 = vmatprep.subr.bf16.mxu0 %v25156_v4 }
 0x8ab   : > { %23432 = vmatprep.subr.bf16.mxu1 %v25156_v4 }
 0x8ad   : > { %23404 = vmatpush1.bf16.msra.mxu0 %v28866_v38 }
 0x8ae   : > { %23434 = vmatpush1.bf16.msra.mxu1 %v28866_v38  ;;  %23405 = vmatprep.subr.bf16.mxu0 %v25156_v4 }
 0x8af   : > { %23435 = vmatprep.subr.bf16.mxu1 %v25156_v4 }
 0x8b1   : > { %23407 = vmatpush1.bf16.msra.mxu0 %v28878_v60 }
 0x8b2   : > { %23437 = vmatpush1.bf16.msra.mxu1 %v28878_v60  ;;  %23408 = vmatprep.subr.bf16.mxu0 %v25156_v4 }
 0x8b3   : > { %23438 = vmatprep.subr.bf16.mxu1 %v25156_v4 }
 0x8b5   : > { %23410 = vmatpush1.bf16.msra.mxu0 %v28890_v11 }
 0x8b6   : > { %23440 = vmatpush1.bf16.msra.mxu1 %v28890_v11  ;;  %23441 = vmatprep.subr.bf16.mxu0 %v25156_v4 }
 0x8b7   : > { %23471 = vmatprep.subr.bf16.mxu1 %v25156_v4 }
 0x8b8   : > { %13167 = vmatmul.mubr.f32.vlgmr.msra.gmra.mrb[132].mxu0 %v28926_v52 }
 0x8b9   : > { %13240 = vmatmul.mubr.f32.vlgmr.msra.gmra.mrb[132].mxu1 %v28928_v32  ;;  %23443 = vmatpush1.bf16.msra.mxu0 %v28776_v62 }
 0x8ba   : > { %19136 = vmatprep.mubr.msk.f32.mxu0 %vm12806_vm11, %v28942_v9  ;;  %23473 = vmatpush1.bf16.msra.mxu1 %v28776_v62  ;;  %v19138_v62 = vld [vmem:[%s30688_s8 + $0xa0] sm:$0xff] }
 0x8bb   : > { %19137 = vmatprep.mubr.msk.f32.mxu1 %vm12806_vm11, %v28944_v15  ;;  %23444 = vmatprep.subr.bf16.mxu0 %v25156_v4 }
 0x8bc   : > { %23474 = vmatprep.subr.bf16.mxu1 %v25156_v4 }
 0x8bd   : > { %23446 = vmatpush1.bf16.msra.mxu0 %v28792_v16 }
 0x8be   : > { %23476 = vmatpush1.bf16.msra.mxu1 %v28792_v16  ;;  %23447 = vmatprep.subr.bf16.mxu0 %v25156_v4  ;;  %v19139_v16 = vld [vmem:[%s30688_s8 + $0xa8] sm:$0xff] }
 0x8bf   : > { %23477 = vmatprep.subr.bf16.mxu1 %v25156_v4 }
 0x8c1   : > { %23449 = vmatpush1.bf16.msra.mxu0 %v28804_v29 }
 0x8c2   : > { %23479 = vmatpush1.bf16.msra.mxu1 %v28804_v29  ;;  %23450 = vmatprep.subr.bf16.mxu0 %v25156_v4  ;;  %v29073_v29 = vpack.c.bf16 %v19139_v16, %v19138_v62 }
 0x8c3   : > { %23480 = vmatprep.subr.bf16.mxu1 %v25156_v4 }
 0x8c5   : > { %23452 = vmatpush1.bf16.msra.mxu0 %v28816_v12 }
 0x8c6   : > { %23482 = vmatpush1.bf16.msra.mxu1 %v28816_v12  ;;  %23453 = vmatprep.subr.bf16.mxu0 %v25156_v4  ;;  %v19140_v12 = vld [vmem:[%s30688_s8 + $0xb0] sm:$0xff] }
 0x8c7   : > { %23483 = vmatprep.subr.bf16.mxu1 %v25156_v4 }
 0x8c9   : > { %23455 = vmatpush1.bf16.msra.mxu0 %v28828_v19 }
 0x8ca   : > { %23485 = vmatpush1.bf16.msra.mxu1 %v28828_v19  ;;  %23456 = vmatprep.subr.bf16.mxu0 %v25156_v4  ;;  %v19141_v19 = vld [vmem:[%s30688_s8 + $0xb8] sm:$0xff] }
 0x8cb   : > { %23486 = vmatprep.subr.bf16.mxu1 %v25156_v4 }
 0x8cd   : > { %23458 = vmatpush1.bf16.msra.mxu0 %v28840_v6 }
 0x8ce   : > { %23488 = vmatpush1.bf16.msra.mxu1 %v28840_v6  ;;  %23459 = vmatprep.subr.bf16.mxu0 %v25156_v4  ;;  %v29087_v6 = vpack.c.bf16 %v19141_v19, %v19140_v12 }
 0x8cf   : > { %23489 = vmatprep.subr.bf16.mxu1 %v25156_v4 }
 0x8d1   : > { %23461 = vmatpush1.bf16.msra.mxu0 %v28854_v5 }
 0x8d2   : > { %23491 = vmatpush1.bf16.msra.mxu1 %v28854_v5  ;;  %23462 = vmatprep.subr.bf16.mxu0 %v25156_v4  ;;  %v19142_v5 = vld [vmem:[%s30688_s8 + $0xc0] sm:$0xff] }
 0x8d3   : > { %23492 = vmatprep.subr.bf16.mxu1 %v25156_v4 }
 0x8d5   : > { %23464 = vmatpush1.bf16.msra.mxu0 %v28866_v38 }
 0x8d6   : > { %23494 = vmatpush1.bf16.msra.mxu1 %v28866_v38  ;;  %23465 = vmatprep.subr.bf16.mxu0 %v25156_v4  ;;  %v19143_v38 = vld [vmem:[%s30688_s8 + $0xc8] sm:$0xff] }
 0x8d7   : > { %23495 = vmatprep.subr.bf16.mxu1 %v25156_v4  ;;  %v29103_v54 = vpack.c.bf16 %v19143_v38, %v19142_v5 }
 0x8d9   : > { %23467 = vmatpush1.bf16.msra.mxu0 %v28878_v60 }
 0x8da   : > { %23497 = vmatpush1.bf16.msra.mxu1 %v28878_v60  ;;  %23468 = vmatprep.subr.bf16.mxu0 %v25156_v4  ;;  %v19145_v60 = vld [vmem:[%s30688_s8 + $0xd8] sm:$0xff] }
 0x8db   : > { %23498 = vmatprep.subr.bf16.mxu1 %v25156_v4  ;;  %v29115_v2 = vpack.c.bf16 %v19145_v60, %v19144_v59 }
 0x8dd   : > { %23470 = vmatpush1.bf16.msra.mxu0 %v28890_v11 }
 0x8de   : > { %23500 = vmatpush1.bf16.msra.mxu1 %v28890_v11  ;;  %23501 = vmatprep.subr.bf16.mxu0 %v25156_v4  ;;  %v19147_v11 = vld [vmem:[%s30688_s8 + $0xe8] sm:$0xff] }
 0x8df   : > { %23531 = vmatprep.subr.bf16.mxu1 %v25156_v4  ;;  %v29127_v37 = vpack.c.bf16 %v19147_v11, %v19146_v28 }
 0x8e0   : > { %13313 = vmatmul.mubr.f32.vlgmr.msra.gmra.mrb[134].mxu0 %v28938_v20 }
 0x8e1   : > { %13386 = vmatmul.mubr.f32.vlgmr.msra.gmra.mrb[134].mxu1 %v28940_v46  ;;  %23503 = vmatpush1.bf16.msra.mxu0 %v29073_v29 }
 0x8e2   : > { %19158 = vmatprep.mubr.msk.f32.mxu0 %vm12806_vm11, %v28900_v47  ;;  %23533 = vmatpush1.bf16.msra.mxu1 %v29073_v29 }
 0x8e3   : > { %19159 = vmatprep.mubr.msk.f32.mxu1 %vm12806_vm11, %v28902_v48  ;;  %23504 = vmatprep.subr.bf16.mxu0 %v25156_v4 }
 0x8e4   : > { %23534 = vmatprep.subr.bf16.mxu1 %v25156_v4 }
 0x8e5   : > { %23506 = vmatpush1.bf16.msra.mxu0 %v29087_v6 }
 0x8e6   : > { %23536 = vmatpush1.bf16.msra.mxu1 %v29087_v6  ;;  %23507 = vmatprep.subr.bf16.mxu0 %v25156_v4 }
 0x8e7   : > { %23537 = vmatprep.subr.bf16.mxu1 %v25156_v4 }
 0x8e9   : > { %23509 = vmatpush1.bf16.msra.mxu0 %v29103_v54 }
 0x8ea   : > { %23539 = vmatpush1.bf16.msra.mxu1 %v29103_v54  ;;  %23510 = vmatprep.subr.bf16.mxu0 %v25156_v4 }
 0x8eb   : > { %23540 = vmatprep.subr.bf16.mxu1 %v25156_v4 }
 0x8ed   : > { %23512 = vmatpush1.bf16.msra.mxu0 %v29115_v2 }
 0x8ee   : > { %23542 = vmatpush1.bf16.msra.mxu1 %v29115_v2  ;;  %23513 = vmatprep.subr.bf16.mxu0 %v25156_v4 }
 0x8ef   : > { %23543 = vmatprep.subr.bf16.mxu1 %v25156_v4 }
 0x8f1   : > { %23515 = vmatpush1.bf16.msra.mxu0 %v29127_v37 }
 0x8f2   : > { %23545 = vmatpush1.bf16.msra.mxu1 %v29127_v37  ;;  %23516 = vmatprep.subr.bf16.mxu0 %v25156_v4 }
 0x8f3   : > { %23546 = vmatprep.subr.bf16.mxu1 %v25156_v4 }
 0x8f5   : > { %23518 = vmatpush1.bf16.msra.mxu0 %v29139_v24 }
 0x8f6   : > { %23548 = vmatpush1.bf16.msra.mxu1 %v29139_v24  ;;  %23519 = vmatprep.subr.bf16.mxu0 %v25156_v4 }
 0x8f7   : > { %23549 = vmatprep.subr.bf16.mxu1 %v25156_v4 }
 0x8f9   : > { %23521 = vmatpush1.bf16.msra.mxu0 %v29151_v55 }
 0x8fa   : > { %23551 = vmatpush1.bf16.msra.mxu1 %v29151_v55  ;;  %23522 = vmatprep.subr.bf16.mxu0 %v25156_v4 }
 0x8fb   : > { %23552 = vmatprep.subr.bf16.mxu1 %v25156_v4 }
 0x8fd   : > { %23524 = vmatpush1.bf16.msra.mxu0 %v29163_v35 }
 0x8fe   : > { %23554 = vmatpush1.bf16.msra.mxu1 %v29163_v35  ;;  %23525 = vmatprep.subr.bf16.mxu0 %v25156_v4 }
 0x8ff   : > { %23555 = vmatprep.subr.bf16.mxu1 %v25156_v4 }
 0x901   : > { %23527 = vmatpush1.bf16.msra.mxu0 %v29175_v41 }
 0x902   : > { %23557 = vmatpush1.bf16.msra.mxu1 %v29175_v41  ;;  %23528 = vmatprep.subr.bf16.mxu0 %v25156_v4 }
 0x903   : > { %23558 = vmatprep.subr.bf16.mxu1 %v25156_v4 }
 0x905   : > { %23530 = vmatpush1.bf16.msra.mxu0 %v29187_v3 }
 0x906   : > { %23560 = vmatpush1.bf16.msra.mxu1 %v29187_v3  ;;  %23561 = vmatprep.subr.bf16.mxu0 %v25156_v4 }
 0x907   : > { %23591 = vmatprep.subr.bf16.mxu1 %v25156_v4 }
 0x908   : > { %13477 = vmatmul.mubr.f32.vlgmr.msra.gmra.mrb[136].mxu0 %v28896_v51 }
 0x909   : > { %13547 = vmatmul.mubr.f32.vlgmr.msra.gmra.mrb[136].mxu1 %v28898_v23  ;;  %23563 = vmatpush1.bf16.msra.mxu0 %v29073_v29 }
 0x90a   : > { %19160 = vmatprep.mubr.msk.f32.mxu0 %vm12806_vm11, %v28914_v34  ;;  %23593 = vmatpush1.bf16.msra.mxu1 %v29073_v29  ;;  %v19170_v34 = vld [vmem:[%s30689_s9 + $0x70] sm:$0xff] }
 0x90b   : > { %19161 = vmatprep.mubr.msk.f32.mxu1 %vm12806_vm11, %v28916_v10  ;;  %23564 = vmatprep.subr.bf16.mxu0 %v25156_v4  ;;  %v19171_v10 = vld [vmem:[%s30689_s9 + $0x78] sm:$0xff] }
 0x90c   : > { %23594 = vmatprep.subr.bf16.mxu1 %v25156_v4  ;;  %v29375_v61 = vpack.c.bf16 %v19171_v10, %v19170_v34  ;;  %v14006_v34 = vld [vmem:[%s30689_s9 + $0x48] sm:$0xff] }
 0x90d   : > { %23566 = vmatpush1.bf16.msra.mxu0 %v29087_v6 }
 0x90e   : > { %23596 = vmatpush1.bf16.msra.mxu1 %v29087_v6  ;;  %23567 = vmatprep.subr.bf16.mxu0 %v25156_v4 }
 0x90f   : > { %23597 = vmatprep.subr.bf16.mxu1 %v25156_v4 }
 0x911   : > { %23569 = vmatpush1.bf16.msra.mxu0 %v29103_v54 }
 0x912   : > { %23599 = vmatpush1.bf16.msra.mxu1 %v29103_v54  ;;  %23570 = vmatprep.subr.bf16.mxu0 %v25156_v4 }
 0x913   : > { %23600 = vmatprep.subr.bf16.mxu1 %v25156_v4 }
 0x915   : > { %23572 = vmatpush1.bf16.msra.mxu0 %v29115_v2 }
 0x916   : > { %23602 = vmatpush1.bf16.msra.mxu1 %v29115_v2  ;;  %23573 = vmatprep.subr.bf16.mxu0 %v25156_v4 }
 0x917   : > { %23603 = vmatprep.subr.bf16.mxu1 %v25156_v4 }
 0x919   : > { %23575 = vmatpush1.bf16.msra.mxu0 %v29127_v37 }
 0x91a   : > { %23605 = vmatpush1.bf16.msra.mxu1 %v29127_v37  ;;  %23576 = vmatprep.subr.bf16.mxu0 %v25156_v4 }
 0x91b   : > { %23606 = vmatprep.subr.bf16.mxu1 %v25156_v4 }
 0x91d   : > { %23578 = vmatpush1.bf16.msra.mxu0 %v29139_v24 }
 0x91e   : > { %23608 = vmatpush1.bf16.msra.mxu1 %v29139_v24  ;;  %23579 = vmatprep.subr.bf16.mxu0 %v25156_v4 }
 0x91f   : > { %23609 = vmatprep.subr.bf16.mxu1 %v25156_v4 }
 0x921   : > { %23581 = vmatpush1.bf16.msra.mxu0 %v29151_v55 }
 0x922   : > { %23611 = vmatpush1.bf16.msra.mxu1 %v29151_v55  ;;  %23582 = vmatprep.subr.bf16.mxu0 %v25156_v4 }
 0x923   : > { %23612 = vmatprep.subr.bf16.mxu1 %v25156_v4 }
 0x925   : > { %23584 = vmatpush1.bf16.msra.mxu0 %v29163_v35 }
 0x926   : > { %23614 = vmatpush1.bf16.msra.mxu1 %v29163_v35  ;;  %23585 = vmatprep.subr.bf16.mxu0 %v25156_v4 }
 0x927   : > { %23615 = vmatprep.subr.bf16.mxu1 %v25156_v4 }
 0x929   : > { %23587 = vmatpush1.bf16.msra.mxu0 %v29175_v41 }
 0x92a   : > { %23617 = vmatpush1.bf16.msra.mxu1 %v29175_v41  ;;  %23588 = vmatprep.subr.bf16.mxu0 %v25156_v4 }
 0x92b   : > { %23618 = vmatprep.subr.bf16.mxu1 %v25156_v4 }
 0x92d   : > { %23590 = vmatpush1.bf16.msra.mxu0 %v29187_v3 }
 0x92e   : > { %23620 = vmatpush1.bf16.msra.mxu1 %v29187_v3  ;;  %23621 = vmatprep.subr.bf16.mxu0 %v25156_v4 }
 0x92f   : > { %23651 = vmatprep.subr.bf16.mxu1 %v25156_v4 }
 0x930   : > { %13617 = vmatmul.mubr.f32.vlgmr.msra.gmra.mrb[138].mxu0 %v28908_v56  ;;  %v29345_v56 = vpack.c.bf16 %v19167_v18, %v19166_v30  ;;  %v14002_v30 = vld [vmem:[%s30689_s9 + $0x28] sm:$0xff] }
 0x931   : > { %13687 = vmatmul.mubr.f32.vlgmr.msra.gmra.mrb[138].mxu1 %v28910_v13  ;;  %23623 = vmatpush1.bf16.msra.mxu0 %v29073_v29  ;;  %v19168_v13 = vld [vmem:[%s30689_s9 + $0x60] sm:$0xff] }
 0x932   : > { %19162 = vmatprep.mubr.msk.f32.mxu0 %vm12806_vm11, %v28930_v33  ;;  %23653 = vmatpush1.bf16.msra.mxu1 %v29073_v29  ;;  %v29359_v8 = vpack.c.bf16 %v19169_v25, %v19168_v13  ;;  %v14004_v13 = vld [vmem:[%s30689_s9 + $0x38] sm:$0xff] }
 0x933   : > { %19163 = vmatprep.mubr.msk.f32.mxu1 %vm12806_vm11, %v28932_v43  ;;  %23624 = vmatprep.subr.bf16.mxu0 %v25156_v4 }
 0x934   : > { %23654 = vmatprep.subr.bf16.mxu1 %v25156_v4 }
 0x935   : > { %23626 = vmatpush1.bf16.msra.mxu0 %v29087_v6 }
 0x936   : > { %23656 = vmatpush1.bf16.msra.mxu1 %v29087_v6  ;;  %23627 = vmatprep.subr.bf16.mxu0 %v25156_v4 }
 0x937   : > { %23657 = vmatprep.subr.bf16.mxu1 %v25156_v4 }
 0x939   : > { %23629 = vmatpush1.bf16.msra.mxu0 %v29103_v54 }
 0x93a   : > { %23659 = vmatpush1.bf16.msra.mxu1 %v29103_v54  ;;  %23630 = vmatprep.subr.bf16.mxu0 %v25156_v4 }
 0x93b   : > { %v29259_v49 = vpop.f32.mrb[128].mxu0  ;;  %23660 = vmatprep.subr.bf16.mxu1 %v25156_v4 }
 0x93c   : > { %v29261_v53 = vpop.f32.mrb[128].mxu1  ;;  %v12878_v51 = vpop.f32.mrb[129].mxu0 }
 0x93d   : > { %v12951_v23 = vpop.f32.mrb[129].mxu1  ;;  %23632 = vmatpush1.bf16.msra.mxu0 %v29115_v2  ;;  %v13999_v51 = vld [vmem:[%s30689_s9 + $0x10] sm:$0xff] }
 0x93e   : > { %23662 = vmatpush1.bf16.msra.mxu1 %v29115_v2  ;;  %23633 = vmatprep.subr.bf16.mxu0 %v25156_v4  ;;  %v14000_v23 = vld [vmem:[%s30689_s9 + $0x18] sm:$0xff] }
 0x93f   : > { %23663 = vmatprep.subr.bf16.mxu1 %v25156_v4 }
 0x941   : > { %23635 = vmatpush1.bf16.msra.mxu0 %v29127_v37 }
 0x942   : > { %23665 = vmatpush1.bf16.msra.mxu1 %v29127_v37  ;;  %23636 = vmatprep.subr.bf16.mxu0 %v25156_v4 }
 0x943   : > { %23666 = vmatprep.subr.bf16.mxu1 %v25156_v4 }
 0x945   : > { %23638 = vmatpush1.bf16.msra.mxu0 %v29139_v24 }
 0x946   : > { %23668 = vmatpush1.bf16.msra.mxu1 %v29139_v24  ;;  %23639 = vmatprep.subr.bf16.mxu0 %v25156_v4 }
 0x947   : > { %23669 = vmatprep.subr.bf16.mxu1 %v25156_v4 }
 0x949   : > { %23641 = vmatpush1.bf16.msra.mxu0 %v29151_v55 }
 0x94a   : > { %23671 = vmatpush1.bf16.msra.mxu1 %v29151_v55  ;;  %23642 = vmatprep.subr.bf16.mxu0 %v25156_v4 }
 0x94b   : > { %23672 = vmatprep.subr.bf16.mxu1 %v25156_v4 }
 0x94d   : > { %23644 = vmatpush1.bf16.msra.mxu0 %v29163_v35 }
 0x94e   : > { %23674 = vmatpush1.bf16.msra.mxu1 %v29163_v35  ;;  %23645 = vmatprep.subr.bf16.mxu0 %v25156_v4 }
 0x94f   : > { %23675 = vmatprep.subr.bf16.mxu1 %v25156_v4 }
 0x951   : > { %23647 = vmatpush1.bf16.msra.mxu0 %v29175_v41 }
 0x952   : > { %23677 = vmatpush1.bf16.msra.mxu1 %v29175_v41  ;;  %23648 = vmatprep.subr.bf16.mxu0 %v25156_v4 }
 0x953   : > { %23678 = vmatprep.subr.bf16.mxu1 %v25156_v4 }
 0x955   : > { %23650 = vmatpush1.bf16.msra.mxu0 %v29187_v3 }
 0x956   : > { %23680 = vmatpush1.bf16.msra.mxu1 %v29187_v3  ;;  %23681 = vmatprep.subr.bf16.mxu0 %v25156_v4 }
 0x957   : > { %23711 = vmatprep.subr.bf16.mxu1 %v25156_v4 }
 0x958   : > { %13757 = vmatmul.mubr.f32.vlgmr.msra.gmra.mrb[140].mxu0 %v28926_v52  ;;  %v19173_v52 = vld [vmem:[%s30689_s9 + $0x88] sm:$0xff] }
 0x959   : > { %13827 = vmatmul.mubr.f32.vlgmr.msra.gmra.mrb[140].mxu1 %v28928_v32  ;;  %23683 = vmatpush1.bf16.msra.mxu0 %v29073_v29  ;;  %v29387_v32 = vpack.c.bf16 %v19173_v52, %v19172_v0 }
 0x95a   : > { %19164 = vmatprep.mubr.msk.f32.mxu0 %vm12806_vm11, %v28942_v9  ;;  %23713 = vmatpush1.bf16.msra.mxu1 %v29073_v29 }
 0x95b   : > { %19165 = vmatprep.mubr.msk.f32.mxu1 %vm12806_vm11, %v28944_v15  ;;  %23684 = vmatprep.subr.bf16.mxu0 %v25156_v4 }
 0x95c   : > { %23714 = vmatprep.subr.bf16.mxu1 %v25156_v4 }
 0x95d   : > { %23686 = vmatpush1.bf16.msra.mxu0 %v29087_v6 }
 0x95e   : > { %23716 = vmatpush1.bf16.msra.mxu1 %v29087_v6  ;;  %23687 = vmatprep.subr.bf16.mxu0 %v25156_v4 }
 0x95f   : > { %23717 = vmatprep.subr.bf16.mxu1 %v25156_v4 }
 0x961   : > { %23689 = vmatpush1.bf16.msra.mxu0 %v29103_v54 }
 0x962   : > { %23719 = vmatpush1.bf16.msra.mxu1 %v29103_v54  ;;  %23690 = vmatprep.subr.bf16.mxu0 %v25156_v4 }
 0x963   : > { %v29309_v58 = vpop.f32.mrb[130].mxu0  ;;  %23720 = vmatprep.subr.bf16.mxu1 %v25156_v4 }
 0x964   : > { %v29311_v50 = vpop.f32.mrb[130].mxu1  ;;  %v13024_v47 = vpop.f32.mrb[131].mxu0 }
 0x965   : > { %v13097_v48 = vpop.f32.mrb[131].mxu1  ;;  %23692 = vmatpush1.bf16.msra.mxu0 %v29115_v2  ;;  %v29527_v47 = vpack.c.bf16 %v14000_v23, %v13999_v51  ;;  %v19216_v51 = vld [vmem:[%s30689_s9 + $0x120] sm:$0xff]  ;;  %v19217_v23 = vld [vmem:[%s30689_s9 + $0x128] sm:$0xff] }
 0x966   : > { %23722 = vmatpush1.bf16.msra.mxu1 %v29115_v2  ;;  %23693 = vmatprep.subr.bf16.mxu0 %v25156_v4  ;;  %v14001_v48 = vld [vmem:[%s30689_s9 + $0x20] sm:$0xff] }
 0x967   : > { %23723 = vmatprep.subr.bf16.mxu1 %v25156_v4  ;;  %v29543_v18 = vpack.c.bf16 %v14002_v30, %v14001_v48 }
 0x969   : > { %23695 = vmatpush1.bf16.msra.mxu0 %v29127_v37 }
 0x96a   : > { %23725 = vmatpush1.bf16.msra.mxu1 %v29127_v37  ;;  %23696 = vmatprep.subr.bf16.mxu0 %v25156_v4 }
 0x96b   : > { %23726 = vmatprep.subr.bf16.mxu1 %v25156_v4 }
 0x96d   : > { %23698 = vmatpush1.bf16.msra.mxu0 %v29139_v24 }
 0x96e   : > { %23728 = vmatpush1.bf16.msra.mxu1 %v29139_v24  ;;  %23699 = vmatprep.subr.bf16.mxu0 %v25156_v4 }
 0x96f   : > { %23729 = vmatprep.subr.bf16.mxu1 %v25156_v4 }
 0x971   : > { %23701 = vmatpush1.bf16.msra.mxu0 %v29151_v55 }
 0x972   : > { %23731 = vmatpush1.bf16.msra.mxu1 %v29151_v55  ;;  %23702 = vmatprep.subr.bf16.mxu0 %v25156_v4 }
 0x973   : > { %23732 = vmatprep.subr.bf16.mxu1 %v25156_v4 }
 0x975   : > { %23704 = vmatpush1.bf16.msra.mxu0 %v29163_v35 }
 0x976   : > { %23734 = vmatpush1.bf16.msra.mxu1 %v29163_v35  ;;  %23705 = vmatprep.subr.bf16.mxu0 %v25156_v4 }
 0x977   : > { %23735 = vmatprep.subr.bf16.mxu1 %v25156_v4 }
 0x979   : > { %23707 = vmatpush1.bf16.msra.mxu0 %v29175_v41 }
 0x97a   : > { %23737 = vmatpush1.bf16.msra.mxu1 %v29175_v41  ;;  %23708 = vmatprep.subr.bf16.mxu0 %v25156_v4 }
 0x97b   : > { %23738 = vmatprep.subr.bf16.mxu1 %v25156_v4 }
 0x97d   : > { %23710 = vmatpush1.bf16.msra.mxu0 %v29187_v3 }
 0x97e   : > { %23740 = vmatpush1.bf16.msra.mxu1 %v29187_v3  ;;  %23741 = vmatprep.subr.bf16.mxu0 %v25156_v4  ;;  %v13997_v3 = vld [vmem:[%s30689_s9] sm:$0xff] }
 0x97f   : > { %23756 = vmatprep.subr.bf16.mxu1 %v25156_v4 }
 0x980   : > { %13897 = vmatmul.mubr.f32.vlgmr.msra.gmra.mrb[142].mxu0 %v28938_v20  ;;  %v29403_v20 = vpack.c.bf16 %v19175_v31, %v19174_v44 }
 0x981   : > { %13967 = vmatmul.mubr.f32.vlgmr.msra.gmra.mrb[142].mxu1 %v28940_v46  ;;  %23743 = vmatpush3.bf16.msra.mxu0 %v29345_v56 }
 0x982   : > { %23758 = vmatpush3.bf16.msra.mxu1 %v29345_v56  ;;  %23744 = vmatprep.subr.bf16.mxu0 %v25156_v4 }
 0x983   : > { %23759 = vmatprep.subr.bf16.mxu1 %v25156_v4  ;;  %19961 = vmatprep.mubr.msk.f32.mxu0 %vm25157_vm12, %v25154_v7 }
 0x984   : > { %19984 = vmatprep.mubr.msk.f32.mxu1 %vm25157_vm12, %v25154_v7 }
 0x985   : > { %23746 = vmatpush3.bf16.msra.mxu0 %v29359_v8 }
 0x986   : > { %23761 = vmatpush3.bf16.msra.mxu1 %v29359_v8  ;;  %23747 = vmatprep.subr.bf16.mxu0 %v25156_v4 }
 0x987   : > { %23762 = vmatprep.subr.bf16.mxu1 %v25156_v4 }
 0x989   : > { %23749 = vmatpush3.bf16.msra.mxu0 %v29375_v61 }
 0x98a   : > { %23764 = vmatpush3.bf16.msra.mxu1 %v29375_v61  ;;  %23750 = vmatprep.subr.bf16.mxu0 %v25156_v4 }
 0x98b   : > { %v29397_v33 = vpop.f32.mrb[132].mxu0  ;;  %23765 = vmatprep.subr.bf16.mxu1 %v25156_v4 }
 0x98c   : > { %v29400_v43 = vpop.f32.mrb[132].mxu1  ;;  %v13170_v36 = vpop.f32.mrb[133].mxu0 }
 0x98d   : > { %v13243_v45 = vpop.f32.mrb[133].mxu1  ;;  %23752 = vmatpush3.bf16.msra.mxu0 %v29387_v32 }
 0x98e   : > { %23767 = vmatpush3.bf16.msra.mxu1 %v29387_v32  ;;  %23753 = vmatprep.subr.bf16.mxu0 %v25156_v4  ;;  %v19194_v45 = vld [vmem:[%s30689_s9 + $0xb0] sm:$0xff] }
 0x98f   : > { %23768 = vmatprep.subr.bf16.mxu1 %v25156_v4 }
 0x991   : > { %23755 = vmatpush3.bf16.msra.mxu0 %v29403_v20 }
 0x992   : > { %23770 = vmatpush3.bf16.msra.mxu1 %v29403_v20  ;;  %23771 = vmatprep.subr.bf16.mxu0 %v25156_v4 }
 0x993   : > { %23786 = vmatprep.subr.bf16.mxu1 %v25156_v4 }
 0x9b3   : > { %v29412_v46 = vpop.f32.mrb[134].mxu0 }
 0x9b4   : > { %v29414_v21 = vpop.f32.mrb[134].mxu1  ;;  %v13316_v26 = vpop.f32.mrb[135].mxu0 }
 0x9b5   : > { %v13389_v9 = vpop.f32.mrb[135].mxu1 }
 0x9b6   : > { %v19196_v9 = vld [vmem:[%s30689_s9 + $0xc0] sm:$0xff] }
 0x9db   : > { %v13478_v15 = vpop.f32.mrb[136].mxu0 }
 0x9dc   : > { %v13972_v62 = vmax.f32 %v29259_v49, %v13478_v15  ;;  %v13548_v16 = vpop.f32.mrb[136].mxu1  ;;  %v13480_v29 = vpop.f32.mrb[137].mxu0  ;;  %v13998_v49 = vld [vmem:[%s30689_s9 + $0x8] sm:$0xff] }
 0x9dd   : > { %v13973_v12 = vmax.f32 %v29261_v53, %v13548_v16  ;;  %v13550_v19 = vpop.f32.mrb[137].mxu1  ;;  %v29516_v53 = vpack.c.bf16 %v13998_v49, %v13997_v3  ;;  %v19197_v15 = vld [vmem:[%s30689_s9 + $0xc8] sm:$0xff]  ;;  %v19198_v16 = vld [vmem:[%s30689_s9 + $0xd0] sm:$0xff]  ;;  %v19199_v29 = vld [vmem:[%s30689_s9 + $0xd8] sm:$0xff] }
 0x9de   : > { %13981 = vst.msk [vmem:[#allocation4] sm:$0x1f] %vm13980_vm13, %v13972_v62  ;;  %v29687_v62 = vpack.c.bf16 %v19197_v15, %v19196_v9  ;;  %v19200_v19 = vld [vmem:[%s30689_s9 + $0xe0] sm:$0xff]  ;;  %v19214_v3 = vld [vmem:[%s30689_s9 + $0x110] sm:$0xff]  ;;  %v19215_v49 = vld [vmem:[%s30689_s9 + $0x118] sm:$0xff] }
 0x9df   : > { %13982 = vst.msk [vmem:[#allocation4 + $0x8] sm:$0x1f] %vm13980_vm13, %v13973_v12  ;;  %v29699_v12 = vpack.c.bf16 %v19199_v29, %v19198_v16  ;;  %v19230_v15 = vld [vmem:[%s30689_s9 + $0x150] sm:$0xff] }
 0x9e5   : > { %v14007_v6 = vld [vmem:[#allocation4 + $0x1] sm:$0x1] }
 0x9e6   : > { %19962 = vmatmul.mubr.msk.f32.vlgmr.msra.gmra.mrb[144].mxu0 %vm14026_vm14, %v14007_v6  ;;  %v14008_v5 = vld [vmem:[#allocation4 + $0x9] sm:$0x1]  ;;  %v13990_v0 = vld [vmem:[#allocation4 + $0x8] sm:$0x1] }
 0x9e7   : > { %19985 = vmatmul.mubr.msk.f32.vlgmr.msra.gmra.mrb[144].mxu1 %vm14026_vm14, %v14008_v5  ;;  %23773 = vmatpush3.bf16.msra.mxu0 %v29345_v56  ;;  %v19201_v6 = vld [vmem:[%s30689_s9 + $0xe8] sm:$0xff] }
 0x9e8   : > { %23788 = vmatpush3.bf16.msra.mxu1 %v29345_v56  ;;  %23774 = vmatprep.subr.bf16.mxu0 %v25156_v4 }
 0x9e9   : > { %23789 = vmatprep.subr.bf16.mxu1 %v25156_v4  ;;  %20007 = vmatprep.mubr.msk.f32.mxu0 %vm25157_vm12, %v25154_v7 }
 0x9ea   : > { %20030 = vmatprep.mubr.msk.f32.mxu1 %vm25157_vm12, %v25154_v7 }
 0x9eb   : > { %23776 = vmatpush3.bf16.msra.mxu0 %v29359_v8 }
 0x9ec   : > { %23791 = vmatpush3.bf16.msra.mxu1 %v29359_v8  ;;  %23777 = vmatprep.subr.bf16.mxu0 %v25156_v4 }
 0x9ed   : > { %23792 = vmatprep.subr.bf16.mxu1 %v25156_v4 }
 0x9ef   : > { %23779 = vmatpush3.bf16.msra.mxu0 %v29375_v61 }
 0x9f0   : > { %23794 = vmatpush3.bf16.msra.mxu1 %v29375_v61  ;;  %23780 = vmatprep.subr.bf16.mxu0 %v25156_v4 }
 0x9f1   : > { %23795 = vmatprep.subr.bf16.mxu1 %v25156_v4 }
 0x9f3   : > { %23782 = vmatpush3.bf16.msra.mxu0 %v29387_v32 }
 0x9f4   : > { %23797 = vmatpush3.bf16.msra.mxu1 %v29387_v32  ;;  %23783 = vmatprep.subr.bf16.mxu0 %v25156_v4 }
 0x9f5   : > { %23798 = vmatprep.subr.bf16.mxu1 %v25156_v4 }
 0x9f7   : > { %23785 = vmatpush3.bf16.msra.mxu0 %v29403_v20 }
 0x9f8   : > { %23800 = vmatpush3.bf16.msra.mxu1 %v29403_v20  ;;  %23801 = vmatprep.subr.bf16.mxu0 %v25156_v4 }
 0x9f9   : > { %23816 = vmatprep.subr.bf16.mxu1 %v25156_v4 }
 0xa03   : > { %v13618_v38 = vpop.f32.mrb[138].mxu0 }
 0xa04   : > { %v13974_v54 = vmax.f32 %v29309_v58, %v13618_v38  ;;  %v13688_v59 = vpop.f32.mrb[138].mxu1  ;;  %v13620_v60 = vpop.f32.mrb[139].mxu0 }
 0xa05   : > { %v13975_v2 = vmax.f32 %v29311_v50, %v13688_v59  ;;  %v13690_v28 = vpop.f32.mrb[139].mxu1  ;;  %v29715_v60 = vpack.c.bf16 %v19201_v6, %v19200_v19  ;;  %v19232_v19 = vld [vmem:[%s30689_s9 + $0x160] sm:$0xff]  ;;  %v19233_v6 = vld [vmem:[%s30689_s9 + $0x168] sm:$0xff] }
 0xa06   : > { %13983 = vst.msk [vmem:[#allocation4 + $0x10] sm:$0x1f] %vm13980_vm13, %v13974_v54  ;;  %v15196_v28 = vld [vmem:[#allocation4 + $0xa] sm:$0x1] }
 0xa07   : > { %13984 = vst.msk [vmem:[#allocation4 + $0x18] sm:$0x1f] %vm13980_vm13, %v13975_v2  ;;  %v15195_v2 = vld [vmem:[#allocation4 + $0x2] sm:$0x1] }
 0xa0d   : > { %v14009_v11 = vld [vmem:[#allocation4 + $0x11] sm:$0x1]  ;;  %v13991_v52 = vld [vmem:[#allocation4 + $0x10] sm:$0x1] }
 0xa0e   : > { %20008 = vmatmul.mubr.msk.f32.vlgmr.msra.gmra.mrb[146].mxu0 %vm14026_vm14, %v14009_v11  ;;  %v14010_v37 = vld [vmem:[#allocation4 + $0x19] sm:$0x1]  ;;  %v15197_v11 = vld [vmem:[#allocation4 + $0x12] sm:$0x1] }
 0xa0f   : > { %20031 = vmatmul.mubr.msk.f32.vlgmr.msra.gmra.mrb[146].mxu1 %vm14026_vm14, %v14010_v37  ;;  %23803 = vmatpush3.bf16.msra.mxu0 %v29345_v56  ;;  %v15198_v37 = vld [vmem:[#allocation4 + $0x1a] sm:$0x1] }
 0xa10   : > { %23818 = vmatpush3.bf16.msra.mxu1 %v29345_v56  ;;  %23804 = vmatprep.subr.bf16.mxu0 %v25156_v4 }
 0xa11   : > { %23819 = vmatprep.subr.bf16.mxu1 %v25156_v4  ;;  %20053 = vmatprep.mubr.msk.f32.mxu0 %vm25157_vm12, %v25154_v7 }
 0xa12   : > { %20076 = vmatprep.mubr.msk.f32.mxu1 %vm25157_vm12, %v25154_v7 }
 0xa13   : > { %23806 = vmatpush3.bf16.msra.mxu0 %v29359_v8 }
 0xa14   : > { %23821 = vmatpush3.bf16.msra.mxu1 %v29359_v8  ;;  %23807 = vmatprep.subr.bf16.mxu0 %v25156_v4 }
 0xa15   : > { %23822 = vmatprep.subr.bf16.mxu1 %v25156_v4 }
 0xa17   : > { %23809 = vmatpush3.bf16.msra.mxu0 %v29375_v61 }
 0xa18   : > { %23824 = vmatpush3.bf16.msra.mxu1 %v29375_v61  ;;  %23810 = vmatprep.subr.bf16.mxu0 %v25156_v4 }
 0xa19   : > { %23825 = vmatprep.subr.bf16.mxu1 %v25156_v4 }
 0xa1b   : > { %23812 = vmatpush3.bf16.msra.mxu0 %v29387_v32 }
 0xa1c   : > { %23827 = vmatpush3.bf16.msra.mxu1 %v29387_v32  ;;  %23813 = vmatprep.subr.bf16.mxu0 %v25156_v4 }
 0xa1d   : > { %23828 = vmatprep.subr.bf16.mxu1 %v25156_v4 }
 0xa1f   : > { %23815 = vmatpush3.bf16.msra.mxu0 %v29403_v20 }
 0xa20   : > { %23830 = vmatpush3.bf16.msra.mxu1 %v29403_v20  ;;  %23831 = vmatprep.subr.bf16.mxu0 %v25156_v4 }
 0xa21   : > { %23846 = vmatprep.subr.bf16.mxu1 %v25156_v4 }
 0xa2b   : > { %v13758_v40 = vpop.f32.mrb[140].mxu0 }
 0xa2c   : > { %v13976_v27 = vmax.f32 %v29397_v33, %v13758_v40  ;;  %v13828_v24 = vpop.f32.mrb[140].mxu1  ;;  %v13760_v57 = vpop.f32.mrb[141].mxu0  ;;  %v19192_v33 = vld [vmem:[%s30689_s9 + $0xa0] sm:$0xff] }
 0xa2d   : > { %v13977_v17 = vmax.f32 %v29400_v43, %v13828_v24  ;;  %v13830_v55 = vpop.f32.mrb[141].mxu1  ;;  %v19193_v43 = vld [vmem:[%s30689_s9 + $0xa8] sm:$0xff] }
 0xa2e   : > { %13985 = vst.msk [vmem:[#allocation4 + $0x20] sm:$0x1f] %vm13980_vm13, %v13976_v27  ;;  %v29657_v36 = vpack.c.bf16 %v19193_v43, %v19192_v33 }
 0xa2f   : > { %13986 = vst.msk [vmem:[#allocation4 + $0x28] sm:$0x1f] %vm13980_vm13, %v13977_v17 }
 0xa35   : > { %v14011_v22 = vld [vmem:[#allocation4 + $0x21] sm:$0x1]  ;;  %v13993_v44 = vld [vmem:[#allocation4 + $0x20] sm:$0x1]  ;;  %v15199_v17 = vld [vmem:[#allocation4 + $0x22] sm:$0x1] }
 0xa36   : > { %20054 = vmatmul.mubr.msk.f32.vlgmr.msra.gmra.mrb[148].mxu0 %vm14026_vm14, %v14011_v22  ;;  %v14012_v63 = vld [vmem:[#allocation4 + $0x29] sm:$0x1]  ;;  %v13994_v31 = vld [vmem:[#allocation4 + $0x28] sm:$0x1]  ;;  %v15200_v55 = vld [vmem:[#allocation4 + $0x2a] sm:$0x1] }
 0xa37   : > { %20077 = vmatmul.mubr.msk.f32.vlgmr.msra.gmra.mrb[148].mxu1 %vm14026_vm14, %v14012_v63  ;;  %23833 = vmatpush3.bf16.msra.mxu0 %v29345_v56  ;;  %v19210_v22 = vld [vmem:[%s30689_s9 + $0xf0] sm:$0xff]  ;;  %v19211_v63 = vld [vmem:[%s30689_s9 + $0xf8] sm:$0xff] }
 0xa38   : > { %23848 = vmatpush3.bf16.msra.mxu1 %v29345_v56  ;;  %23834 = vmatprep.subr.bf16.mxu0 %v25156_v4  ;;  %v14003_v56 = vld [vmem:[%s30689_s9 + $0x30] sm:$0xff] }
 0xa39   : > { %23849 = vmatprep.subr.bf16.mxu1 %v25156_v4  ;;  %20099 = vmatprep.mubr.msk.f32.mxu0 %vm25157_vm12, %v25154_v7  ;;  %v29555_v25 = vpack.c.bf16 %v14004_v13, %v14003_v56 }
 0xa3a   : > { %20122 = vmatprep.mubr.msk.f32.mxu1 %vm25157_vm12, %v25154_v7 }
 0xa3b   : > { %23836 = vmatpush3.bf16.msra.mxu0 %v29359_v8 }
 0xa3c   : > { %23851 = vmatpush3.bf16.msra.mxu1 %v29359_v8  ;;  %23837 = vmatprep.subr.bf16.mxu0 %v25156_v4  ;;  %v14005_v8 = vld [vmem:[%s30689_s9 + $0x40] sm:$0xff] }
 0xa3d   : > { %23852 = vmatprep.subr.bf16.mxu1 %v25156_v4  ;;  %v29567_v10 = vpack.c.bf16 %v14006_v34, %v14005_v8  ;;  %v15807_v8 = vld [vmem:[#allocation4 + $0xb] sm:$0x1]  ;;  %v15808_v34 = vld [vmem:[#allocation4 + $0x13] sm:$0x1] }
 0xa3f   : > { %23839 = vmatpush3.bf16.msra.mxu0 %v29375_v61 }
 0xa40   : > { %23854 = vmatpush3.bf16.msra.mxu1 %v29375_v61  ;;  %23840 = vmatprep.subr.bf16.mxu0 %v25156_v4  ;;  %v13989_v61 = vld [vmem:[#allocation4] sm:$0x1] }
 0xa41   : > { %23855 = vmatprep.subr.bf16.mxu1 %v25156_v4 }
 0xa43   : > { %23842 = vmatpush3.bf16.msra.mxu0 %v29387_v32 }
 0xa44   : > { %23857 = vmatpush3.bf16.msra.mxu1 %v29387_v32  ;;  %23843 = vmatprep.subr.bf16.mxu0 %v25156_v4  ;;  %v13992_v32 = vld [vmem:[#allocation4 + $0x18] sm:$0x1] }
 0xa45   : > { %23858 = vmatprep.subr.bf16.mxu1 %v25156_v4 }
 0xa47   : > { %23845 = vmatpush3.bf16.msra.mxu0 %v29403_v20 }
 0xa48   : > { %23860 = vmatpush3.bf16.msra.mxu1 %v29403_v20  ;;  %23861 = vmatprep.subr.bf16.mxu0 %v25156_v4  ;;  %v19195_v20 = vld [vmem:[%s30689_s9 + $0xb8] sm:$0xff] }
 0xa49   : > { %23876 = vmatprep.subr.bf16.mxu1 %v25156_v4  ;;  %v29671_v26 = vpack.c.bf16 %v19195_v20, %v19194_v45 }
 0xa53   : > { %v13898_v35 = vpop.f32.mrb[142].mxu0 }
 0xa54   : > { %v13978_v39 = vmax.f32 %v29412_v46, %v13898_v35  ;;  %v13968_v14 = vpop.f32.mrb[142].mxu1  ;;  %v13900_v41 = vpop.f32.mrb[143].mxu0  ;;  %v29809_v35 = vpack.c.bf16 %v19211_v63, %v19210_v22 }
 0xa55   : > { %v13979_v42 = vmax.f32 %v29414_v21, %v13968_v14  ;;  %v13970_v1 = vpop.f32.mrb[143].mxu1  ;;  %v19213_v14 = vld [vmem:[%s30689_s9 + $0x108] sm:$0xff] }
 0xa56   : > { %13987 = vst.msk [vmem:[#allocation4 + $0x30] sm:$0x1f] %vm13980_vm13, %v13978_v39  ;;  %v19212_v39 = vld [vmem:[%s30689_s9 + $0x100] sm:$0xff] }
 0xa57   : > { %13988 = vst.msk [vmem:[#allocation4 + $0x38] sm:$0x1f] %vm13980_vm13, %v13979_v42  ;;  %v29823_v1 = vpack.c.bf16 %v19213_v14, %v19212_v39 }
 0xa5d   : > { %v14013_v58 = vld [vmem:[#allocation4 + $0x31] sm:$0x1]  ;;  %v13995_v46 = vld [vmem:[#allocation4 + $0x30] sm:$0x1]  ;;  %v15201_v41 = vld [vmem:[#allocation4 + $0x32] sm:$0x1] }
 0xa5e   : > { %20100 = vmatmul.mubr.msk.f32.vlgmr.msra.gmra.mrb[150].mxu0 %vm14026_vm14, %v14013_v58  ;;  %v14014_v50 = vld [vmem:[#allocation4 + $0x39] sm:$0x1]  ;;  %v13996_v21 = vld [vmem:[#allocation4 + $0x38] sm:$0x1]  ;;  %v15202_v42 = vld [vmem:[#allocation4 + $0x3a] sm:$0x1]  ;;  %v29851_v58 = vpack.c.bf16 %v19217_v23, %v19216_v51 }
 0xa5f   : > { %20123 = vmatmul.mubr.msk.f32.vlgmr.msra.gmra.mrb[150].mxu1 %vm14026_vm14, %v14014_v50  ;;  %23863 = vmatpush3.bf16.msra.mxu0 %v29516_v53  ;;  %v19218_v50 = vld [vmem:[%s30689_s9 + $0x130] sm:$0xff]  ;;  %v15813_v29 = vld [vmem:[#allocation4 + $0x3b] sm:$0x1] }
 0xa60   : > { %23878 = vmatpush3.bf16.msra.mxu1 %v29516_v53  ;;  %23864 = vmatprep.subr.bf16.mxu0 %v25156_v4  ;;  %v15812_v16 = vld [vmem:[#allocation4 + $0x33] sm:$0x1] }
 0xa61   : > { %23879 = vmatprep.subr.bf16.mxu1 %v25156_v4  ;;  %20145 = vmatprep.mubr.msk.f32.mxu0 %vm25157_vm12, %v25154_v7 }
 0xa62   : > { %20168 = vmatprep.mubr.msk.f32.mxu1 %vm25157_vm12, %v25154_v7 }
 0xa63   : > { %23866 = vmatpush3.bf16.msra.mxu0 %v29527_v47 }
 0xa64   : > { %23881 = vmatpush3.bf16.msra.mxu1 %v29527_v47  ;;  %23867 = vmatprep.subr.bf16.mxu0 %v25156_v4 }
 0xa65   : > { %23882 = vmatprep.subr.bf16.mxu1 %v25156_v4 }
 0xa67   : > { %23869 = vmatpush3.bf16.msra.mxu0 %v29543_v18 }
 0xa68   : > { %23884 = vmatpush3.bf16.msra.mxu1 %v29543_v18  ;;  %23870 = vmatprep.subr.bf16.mxu0 %v25156_v4 }
 0xa69   : > { %23885 = vmatprep.subr.bf16.mxu1 %v25156_v4 }
 0xa6b   : > { %23872 = vmatpush3.bf16.msra.mxu0 %v29555_v25 }
 0xa6c   : > { %23887 = vmatpush3.bf16.msra.mxu1 %v29555_v25  ;;  %23873 = vmatprep.subr.bf16.mxu0 %v25156_v4 }
 0xa6d   : > { %23888 = vmatprep.subr.bf16.mxu1 %v25156_v4 }
 0xa6f   : > { %23875 = vmatpush3.bf16.msra.mxu0 %v29567_v10 }
 0xa70   : > { %23890 = vmatpush3.bf16.msra.mxu1 %v29567_v10  ;;  %23891 = vmatprep.subr.bf16.mxu0 %v25156_v4 }
 0xa71   : > { %23906 = vmatprep.subr.bf16.mxu1 %v25156_v4 }
 0xa72   : > { %20146 = vmatmul.mubr.msk.f32.vlgmr.msra.gmra.mrb[152].mxu0 %vm14026_vm14, %v13989_v61 }
 0xa73   : > { %20169 = vmatmul.mubr.msk.f32.vlgmr.msra.gmra.mrb[152].mxu1 %vm14026_vm14, %v13990_v0  ;;  %23893 = vmatpush3.bf16.msra.mxu0 %v29516_v53 }
 0xa74   : > { %23908 = vmatpush3.bf16.msra.mxu1 %v29516_v53  ;;  %23894 = vmatprep.subr.bf16.mxu0 %v25156_v4 }
 0xa75   : > { %23909 = vmatprep.subr.bf16.mxu1 %v25156_v4  ;;  %20191 = vmatprep.mubr.msk.f32.mxu0 %vm25157_vm12, %v25154_v7 }
 0xa76   : > { %20214 = vmatprep.mubr.msk.f32.mxu1 %vm25157_vm12, %v25154_v7 }
 0xa77   : > { %23896 = vmatpush3.bf16.msra.mxu0 %v29527_v47 }
 0xa78   : > { %23911 = vmatpush3.bf16.msra.mxu1 %v29527_v47  ;;  %23897 = vmatprep.subr.bf16.mxu0 %v25156_v4 }
 0xa79   : > { %23912 = vmatprep.subr.bf16.mxu1 %v25156_v4 }
 0xa7b   : > { %23899 = vmatpush3.bf16.msra.mxu0 %v29543_v18 }
 0xa7c   : > { %23914 = vmatpush3.bf16.msra.mxu1 %v29543_v18  ;;  %23900 = vmatprep.subr.bf16.mxu0 %v25156_v4 }
 0xa7d   : > { %23915 = vmatprep.subr.bf16.mxu1 %v25156_v4 }
 0xa7f   : > { %23902 = vmatpush3.bf16.msra.mxu0 %v29555_v25 }
 0xa80   : > { %23917 = vmatpush3.bf16.msra.mxu1 %v29555_v25  ;;  %23903 = vmatprep.subr.bf16.mxu0 %v25156_v4 }
 0xa81   : > { %23918 = vmatprep.subr.bf16.mxu1 %v25156_v4 }
 0xa83   : > { %23905 = vmatpush3.bf16.msra.mxu0 %v29567_v10 }
 0xa84   : > { %23920 = vmatpush3.bf16.msra.mxu1 %v29567_v10  ;;  %23921 = vmatprep.subr.bf16.mxu0 %v25156_v4 }
 0xa85   : > { %23936 = vmatprep.subr.bf16.mxu1 %v25156_v4 }
 0xa86   : > { %20192 = vmatmul.mubr.msk.f32.vlgmr.msra.gmra.mrb[154].mxu0 %vm14026_vm14, %v13991_v52 }
 0xa87   : > { %20215 = vmatmul.mubr.msk.f32.vlgmr.msra.gmra.mrb[154].mxu1 %vm14026_vm14, %v13992_v32  ;;  %23923 = vmatpush3.bf16.msra.mxu0 %v29516_v53 }
 0xa88   : > { %23938 = vmatpush3.bf16.msra.mxu1 %v29516_v53  ;;  %23924 = vmatprep.subr.bf16.mxu0 %v25156_v4 }
 0xa89   : > { %23939 = vmatprep.subr.bf16.mxu1 %v25156_v4  ;;  %20237 = vmatprep.mubr.msk.f32.mxu0 %vm25157_vm12, %v25154_v7 }
 0xa8a   : > { %20260 = vmatprep.mubr.msk.f32.mxu1 %vm25157_vm12, %v25154_v7 }
 0xa8b   : > { %23926 = vmatpush3.bf16.msra.mxu0 %v29527_v47 }
 0xa8c   : > { %23941 = vmatpush3.bf16.msra.mxu1 %v29527_v47  ;;  %23927 = vmatprep.subr.bf16.mxu0 %v25156_v4 }
 0xa8d   : > { %23942 = vmatprep.subr.bf16.mxu1 %v25156_v4 }
 0xa8f   : > { %23929 = vmatpush3.bf16.msra.mxu0 %v29543_v18 }
 0xa90   : > { %23944 = vmatpush3.bf16.msra.mxu1 %v29543_v18  ;;  %23930 = vmatprep.subr.bf16.mxu0 %v25156_v4 }
 0xa91   : > { %23945 = vmatprep.subr.bf16.mxu1 %v25156_v4 }
 0xa93   : > { %23932 = vmatpush3.bf16.msra.mxu0 %v29555_v25 }
 0xa94   : > { %23947 = vmatpush3.bf16.msra.mxu1 %v29555_v25  ;;  %23933 = vmatprep.subr.bf16.mxu0 %v25156_v4 }
 0xa95   : > { %23948 = vmatprep.subr.bf16.mxu1 %v25156_v4 }
 0xa97   : > { %23935 = vmatpush3.bf16.msra.mxu0 %v29567_v10 }
 0xa98   : > { %23950 = vmatpush3.bf16.msra.mxu1 %v29567_v10  ;;  %23951 = vmatprep.subr.bf16.mxu0 %v25156_v4 }
 0xa99   : > { %23966 = vmatprep.subr.bf16.mxu1 %v25156_v4 }
 0xa9a   : > { %20238 = vmatmul.mubr.msk.f32.vlgmr.msra.gmra.mrb[156].mxu0 %vm14026_vm14, %v13993_v44  ;;  %v15810_v44 = vld [vmem:[#allocation4 + $0x23] sm:$0x1] }
 0xa9b   : > { %20261 = vmatmul.mubr.msk.f32.vlgmr.msra.gmra.mrb[156].mxu1 %vm14026_vm14, %v13994_v31  ;;  %23953 = vmatpush3.bf16.msra.mxu0 %v29516_v53  ;;  %v15811_v31 = vld [vmem:[#allocation4 + $0x2b] sm:$0x1] }
 0xa9c   : > { %23968 = vmatpush3.bf16.msra.mxu1 %v29516_v53  ;;  %23954 = vmatprep.subr.bf16.mxu0 %v25156_v4  ;;  %v29839_v53 = vpack.c.bf16 %v19215_v49, %v19214_v3 }
 0xa9d   : > { %23969 = vmatprep.subr.bf16.mxu1 %v25156_v4  ;;  %20283 = vmatprep.mubr.msk.f32.mxu0 %vm25157_vm12, %v25154_v7 }
 0xa9e   : > { %20306 = vmatprep.mubr.msk.f32.mxu1 %vm25157_vm12, %v25154_v7 }
 0xa9f   : > { %23956 = vmatpush3.bf16.msra.mxu0 %v29527_v47 }
 0xaa0   : > { %23971 = vmatpush3.bf16.msra.mxu1 %v29527_v47  ;;  %23957 = vmatprep.subr.bf16.mxu0 %v25156_v4  ;;  %v19219_v47 = vld [vmem:[%s30689_s9 + $0x138] sm:$0xff] }
 0xaa1   : > { %23972 = vmatprep.subr.bf16.mxu1 %v25156_v4  ;;  %v29867_v13 = vpack.c.bf16 %v19219_v47, %v19218_v50  ;;  %v16421_v50 = vld [vmem:[#allocation4 + $0x24] sm:$0x1]  ;;  %v16422_v47 = vld [vmem:[#allocation4 + $0x2c] sm:$0x1] }
 0xaa3   : > { %23959 = vmatpush3.bf16.msra.mxu0 %v29543_v18 }
 0xaa4   : > { %23974 = vmatpush3.bf16.msra.mxu1 %v29543_v18  ;;  %23960 = vmatprep.subr.bf16.mxu0 %v25156_v4 }
 0xaa5   : > { %23975 = vmatprep.subr.bf16.mxu1 %v25156_v4 }
 0xaa7   : > { %23962 = vmatpush3.bf16.msra.mxu0 %v29555_v25 }
 0xaa8   : > { %23977 = vmatpush3.bf16.msra.mxu1 %v29555_v25  ;;  %23963 = vmatprep.subr.bf16.mxu0 %v25156_v4  ;;  %v15806_v25 = vld [vmem:[#allocation4 + $0x3] sm:$0x1] }
 0xaa9   : > { %23978 = vmatprep.subr.bf16.mxu1 %v25156_v4 }
 0xaab   : > { %23965 = vmatpush3.bf16.msra.mxu0 %v29567_v10 }
 0xaac   : > { %23980 = vmatpush3.bf16.msra.mxu1 %v29567_v10  ;;  %23981 = vmatprep.subr.bf16.mxu0 %v25156_v4  ;;  %v15809_v10 = vld [vmem:[#allocation4 + $0x1b] sm:$0x1] }
 0xaad   : > { %23996 = vmatprep.subr.bf16.mxu1 %v25156_v4 }
 0xaae   : > { %20284 = vmatmul.mubr.msk.f32.vlgmr.msra.gmra.mrb[158].mxu0 %vm14026_vm14, %v13995_v46 }
 0xaaf   : > { %20307 = vmatmul.mubr.msk.f32.vlgmr.msra.gmra.mrb[158].mxu1 %vm14026_vm14, %v13996_v21  ;;  %23983 = vmatpush3.bf16.msra.mxu0 %v29657_v36  ;;  %v19228_v21 = vld [vmem:[%s30689_s9 + $0x140] sm:$0xff] }
 0xab0   : > { %23998 = vmatpush3.bf16.msra.mxu1 %v29657_v36  ;;  %23984 = vmatprep.subr.bf16.mxu0 %v25156_v4 }
 0xab1   : > { %23999 = vmatprep.subr.bf16.mxu1 %v25156_v4  ;;  %20329 = vmatprep.mubr.msk.f32.mxu0 %vm25157_vm12, %v25154_v7 }
 0xab2   : > { %20352 = vmatprep.mubr.msk.f32.mxu1 %vm25157_vm12, %v25154_v7 }
 0xab3   : > { %23986 = vmatpush3.bf16.msra.mxu0 %v29671_v26 }
 0xab4   : > { %24001 = vmatpush3.bf16.msra.mxu1 %v29671_v26  ;;  %23987 = vmatprep.subr.bf16.mxu0 %v25156_v4 }
 0xab5   : > { %24002 = vmatprep.subr.bf16.mxu1 %v25156_v4 }
 0xab7   : > { %23989 = vmatpush3.bf16.msra.mxu0 %v29687_v62 }
 0xab8   : > { %24004 = vmatpush3.bf16.msra.mxu1 %v29687_v62  ;;  %23990 = vmatprep.subr.bf16.mxu0 %v25156_v4 }
 0xab9   : > { %v29709_v5 = vpop.f32.mrb[144].mxu0  ;;  %24005 = vmatprep.subr.bf16.mxu1 %v25156_v4 }
 0xaba   : > { %v29712_v38 = vpop.f32.mrb[144].mxu1  ;;  %v19963_v54 = vpop.f32.mrb[145].mxu0 }
 0xabb   : > { %v19986_v59 = vpop.f32.mrb[145].mxu1  ;;  %23992 = vmatpush3.bf16.msra.mxu0 %v29699_v12  ;;  %v19235_v54 = vld [vmem:[%s30689_s9 + $0x178] sm:$0xff] }
 0xabc   : > { %24007 = vmatpush3.bf16.msra.mxu1 %v29699_v12  ;;  %23993 = vmatprep.subr.bf16.mxu0 %v25156_v4 }
 0xabd   : > { %24008 = vmatprep.subr.bf16.mxu1 %v25156_v4 }
 0xabf   : > { %23995 = vmatpush3.bf16.msra.mxu0 %v29715_v60 }
 0xac0   : > { %24010 = vmatpush3.bf16.msra.mxu1 %v29715_v60  ;;  %24011 = vmatprep.subr.bf16.mxu0 %v25156_v4 }
 0xac1   : > { %24026 = vmatprep.subr.bf16.mxu1 %v25156_v4 }
 0xac2   : > { %20330 = vmatmul.mubr.msk.f32.vlgmr.msra.gmra.mrb[160].mxu0 %vm14026_vm14, %v15195_v2  ;;  %v19237_v2 = vld [vmem:[%s30689_s9 + $0x188] sm:$0xff] }
 0xac3   : > { %20353 = vmatmul.mubr.msk.f32.vlgmr.msra.gmra.mrb[160].mxu1 %vm14026_vm14, %v15196_v28  ;;  %24013 = vmatpush3.bf16.msra.mxu0 %v29657_v36 }
 0xac4   : > { %24028 = vmatpush3.bf16.msra.mxu1 %v29657_v36  ;;  %24014 = vmatprep.subr.bf16.mxu0 %v25156_v4 }
 0xac5   : > { %24029 = vmatprep.subr.bf16.mxu1 %v25156_v4  ;;  %20375 = vmatprep.mubr.msk.f32.mxu0 %vm25157_vm12, %v25154_v7 }
 0xac6   : > { %20398 = vmatprep.mubr.msk.f32.mxu1 %vm25157_vm12, %v25154_v7 }
 0xac7   : > { %24016 = vmatpush3.bf16.msra.mxu0 %v29671_v26 }
 0xac8   : > { %24031 = vmatpush3.bf16.msra.mxu1 %v29671_v26  ;;  %24017 = vmatprep.subr.bf16.mxu0 %v25156_v4 }
 0xac9   : > { %24032 = vmatprep.subr.bf16.mxu1 %v25156_v4 }
 0xacb   : > { %24019 = vmatpush3.bf16.msra.mxu0 %v29687_v62 }
 0xacc   : > { %24034 = vmatpush3.bf16.msra.mxu1 %v29687_v62  ;;  %24020 = vmatprep.subr.bf16.mxu0 %v25156_v4 }
 0xacd   : > { %24035 = vmatprep.subr.bf16.mxu1 %v25156_v4 }
 0xacf   : > { %24022 = vmatpush3.bf16.msra.mxu0 %v29699_v12 }
 0xad0   : > { %24037 = vmatpush3.bf16.msra.mxu1 %v29699_v12  ;;  %24023 = vmatprep.subr.bf16.mxu0 %v25156_v4 }
 0xad1   : > { %24038 = vmatprep.subr.bf16.mxu1 %v25156_v4 }
 0xad3   : > { %24025 = vmatpush3.bf16.msra.mxu0 %v29715_v60 }
 0xad4   : > { %24040 = vmatpush3.bf16.msra.mxu1 %v29715_v60  ;;  %24041 = vmatprep.subr.bf16.mxu0 %v25156_v4 }
 0xad5   : > { %24056 = vmatprep.subr.bf16.mxu1 %v25156_v4 }
 0xad6   : > { %20376 = vmatmul.mubr.msk.f32.vlgmr.msra.gmra.mrb[162].mxu0 %vm14026_vm14, %v15197_v11 }
 0xad7   : > { %20399 = vmatmul.mubr.msk.f32.vlgmr.msra.gmra.mrb[162].mxu1 %vm14026_vm14, %v15198_v37  ;;  %24043 = vmatpush3.bf16.msra.mxu0 %v29657_v36 }
 0xad8   : > { %24058 = vmatpush3.bf16.msra.mxu1 %v29657_v36  ;;  %24044 = vmatprep.subr.bf16.mxu0 %v25156_v4 }
 0xad9   : > { %24059 = vmatprep.subr.bf16.mxu1 %v25156_v4  ;;  %20421 = vmatprep.mubr.msk.f32.mxu0 %vm25157_vm12, %v25154_v7 }
 0xada   : > { %20444 = vmatprep.mubr.msk.f32.mxu1 %vm25157_vm12, %v25154_v7 }
 0xadb   : > { %24046 = vmatpush3.bf16.msra.mxu0 %v29671_v26 }
 0xadc   : > { %24061 = vmatpush3.bf16.msra.mxu1 %v29671_v26  ;;  %24047 = vmatprep.subr.bf16.mxu0 %v25156_v4 }
 0xadd   : > { %24062 = vmatprep.subr.bf16.mxu1 %v25156_v4 }
 0xadf   : > { %24049 = vmatpush3.bf16.msra.mxu0 %v29687_v62 }
 0xae0   : > { %24064 = vmatpush3.bf16.msra.mxu1 %v29687_v62  ;;  %24050 = vmatprep.subr.bf16.mxu0 %v25156_v4 }
 0xae1   : > { %v29767_v40 = vpop.f32.mrb[146].mxu0  ;;  %24065 = vmatprep.subr.bf16.mxu1 %v25156_v4 }
 0xae2   : > { %v29770_v27 = vpop.f32.mrb[146].mxu1  ;;  %v20009_v24 = vpop.f32.mrb[147].mxu0 }
 0xae3   : > { %v20032_v57 = vpop.f32.mrb[147].mxu1  ;;  %24052 = vmatpush3.bf16.msra.mxu0 %v29699_v12 }
 0xae4   : > { %24067 = vmatpush3.bf16.msra.mxu1 %v29699_v12  ;;  %24053 = vmatprep.subr.bf16.mxu0 %v25156_v4 }
 0xae5   : > { %24068 = vmatprep.subr.bf16.mxu1 %v25156_v4 }
 0xae7   : > { %24055 = vmatpush3.bf16.msra.mxu0 %v29715_v60 }
 0xae8   : > { %24070 = vmatpush3.bf16.msra.mxu1 %v29715_v60  ;;  %24071 = vmatprep.subr.bf16.mxu0 %v25156_v4 }
 0xae9   : > { %24086 = vmatprep.subr.bf16.mxu1 %v25156_v4 }
 0xaea   : > { %20422 = vmatmul.mubr.msk.f32.vlgmr.msra.gmra.mrb[164].mxu0 %vm14026_vm14, %v15199_v17 }
 0xaeb   : > { %20445 = vmatmul.mubr.msk.f32.vlgmr.msra.gmra.mrb[164].mxu1 %vm14026_vm14, %v15200_v55  ;;  %24073 = vmatpush3.bf16.msra.mxu0 %v29657_v36 }
 0xaec   : > { %24088 = vmatpush3.bf16.msra.mxu1 %v29657_v36  ;;  %24074 = vmatprep.subr.bf16.mxu0 %v25156_v4 }
 0xaed   : > { %24089 = vmatprep.subr.bf16.mxu1 %v25156_v4  ;;  %20467 = vmatprep.mubr.msk.f32.mxu0 %vm25157_vm12, %v25154_v7 }
 0xaee   : > { %20490 = vmatprep.mubr.msk.f32.mxu1 %vm25157_vm12, %v25154_v7 }
 0xaef   : > { %24076 = vmatpush3.bf16.msra.mxu0 %v29671_v26 }
 0xaf0   : > { %24091 = vmatpush3.bf16.msra.mxu1 %v29671_v26  ;;  %24077 = vmatprep.subr.bf16.mxu0 %v25156_v4  ;;  %v19229_v26 = vld [vmem:[%s30689_s9 + $0x148] sm:$0xff] }
 0xaf1   : > { %24092 = vmatprep.subr.bf16.mxu1 %v25156_v4  ;;  %v29967_v9 = vpack.c.bf16 %v19229_v26, %v19228_v21  ;;  %v17053_v21 = vld [vmem:[%s30691_s11 + $0x40] sm:$0xff]  ;;  %v17054_v26 = vld [vmem:[%s30691_s11 + $0x48] sm:$0xff] }
 0xaf3   : > { %24079 = vmatpush3.bf16.msra.mxu0 %v29687_v62 }
 0xaf4   : > { %24094 = vmatpush3.bf16.msra.mxu1 %v29687_v62  ;;  %24080 = vmatprep.subr.bf16.mxu0 %v25156_v4  ;;  %v19231_v62 = vld [vmem:[%s30689_s9 + $0x158] sm:$0xff] }
 0xaf5   : > { %24095 = vmatprep.subr.bf16.mxu1 %v25156_v4 }
 0xaf7   : > { %24082 = vmatpush3.bf16.msra.mxu0 %v29699_v12 }
 0xaf8   : > { %24097 = vmatpush3.bf16.msra.mxu1 %v29699_v12  ;;  %24083 = vmatprep.subr.bf16.mxu0 %v25156_v4  ;;  %v29981_v12 = vpack.c.bf16 %v19231_v62, %v19230_v15 }
 0xaf9   : > { %24098 = vmatprep.subr.bf16.mxu1 %v25156_v4 }
 0xafb   : > { %24085 = vmatpush3.bf16.msra.mxu0 %v29715_v60 }
 0xafc   : > { %24100 = vmatpush3.bf16.msra.mxu1 %v29715_v60  ;;  %24101 = vmatprep.subr.bf16.mxu0 %v25156_v4  ;;  %v19236_v60 = vld [vmem:[%s30689_s9 + $0x180] sm:$0xff] }
 0xafd   : > { %24116 = vmatprep.subr.bf16.mxu1 %v25156_v4  ;;  %v30027_v55 = vpack.c.bf16 %v19237_v2, %v19236_v60  ;;  %v30227_v60 = vld [vmem:[%s30691_s11 + $0x70] sm:$0xff] }
 0xafe   : > { %20468 = vmatmul.mubr.msk.f32.vlgmr.msra.gmra.mrb[166].mxu0 %vm14026_vm14, %v15201_v41 }
 0xaff   : > { %20491 = vmatmul.mubr.msk.f32.vlgmr.msra.gmra.mrb[166].mxu1 %vm14026_vm14, %v15202_v42  ;;  %24103 = vmatpush3.bf16.msra.mxu0 %v29809_v35  ;;  %v16419_v42 = vld [vmem:[#allocation4 + $0x14] sm:$0x1] }
 0xb00   : > { %24118 = vmatpush3.bf16.msra.mxu1 %v29809_v35  ;;  %24104 = vmatprep.subr.bf16.mxu0 %v25156_v4 }
 0xb01   : > { %24119 = vmatprep.subr.bf16.mxu1 %v25156_v4  ;;  %20513 = vmatprep.mubr.msk.f32.mxu0 %vm25157_vm12, %v25154_v7 }
 0xb02   : > { %20536 = vmatprep.mubr.msk.f32.mxu1 %vm25157_vm12, %v25154_v7 }
 0xb03   : > { %24106 = vmatpush3.bf16.msra.mxu0 %v29823_v1 }
 0xb04   : > { %24121 = vmatpush3.bf16.msra.mxu1 %v29823_v1  ;;  %24107 = vmatprep.subr.bf16.mxu0 %v25156_v4 }
 0xb05   : > { %24122 = vmatprep.subr.bf16.mxu1 %v25156_v4 }
 0xb07   : > { %24109 = vmatpush3.bf16.msra.mxu0 %v29839_v53 }
 0xb08   : > { %24124 = vmatpush3.bf16.msra.mxu1 %v29839_v53  ;;  %24110 = vmatprep.subr.bf16.mxu0 %v25156_v4 }
 0xb09   : > { %v29861_v48 = vpop.f32.mrb[148].mxu0  ;;  %24125 = vmatprep.subr.bf16.mxu1 %v25156_v4 }
 0xb0a   : > { %v29864_v30 = vpop.f32.mrb[148].mxu1  ;;  %v20055_v18 = vpop.f32.mrb[149].mxu0 }
 0xb0b   : > { %v20078_v56 = vpop.f32.mrb[149].mxu1  ;;  %24112 = vmatpush3.bf16.msra.mxu0 %v29851_v58 }
 0xb0c   : > { %24127 = vmatpush3.bf16.msra.mxu1 %v29851_v58  ;;  %24113 = vmatprep.subr.bf16.mxu0 %v25156_v4 }
 0xb0d   : > { %24128 = vmatprep.subr.bf16.mxu1 %v25156_v4 }
 0xb0f   : > { %24115 = vmatpush3.bf16.msra.mxu0 %v29867_v13 }
 0xb10   : > { %24130 = vmatpush3.bf16.msra.mxu1 %v29867_v13  ;;  %24131 = vmatprep.subr.bf16.mxu0 %v25156_v4 }
 0xb11   : > { %24146 = vmatprep.subr.bf16.mxu1 %v25156_v4 }
 0xb12   : > { %20514 = vmatmul.mubr.msk.f32.vlgmr.msra.gmra.mrb[168].mxu0 %vm14026_vm14, %v15806_v25 }
 0xb13   : > { %20537 = vmatmul.mubr.msk.f32.vlgmr.msra.gmra.mrb[168].mxu1 %vm14026_vm14, %v15807_v8  ;;  %24133 = vmatpush3.bf16.msra.mxu0 %v29809_v35  ;;  %v17045_v8 = vld [vmem:[%s30691_s11] sm:$0xff] }
 0xb14   : > { %24148 = vmatpush3.bf16.msra.mxu1 %v29809_v35  ;;  %24134 = vmatprep.subr.bf16.mxu0 %v25156_v4 }
 0xb15   : > { %24149 = vmatprep.subr.bf16.mxu1 %v25156_v4  ;;  %20559 = vmatprep.mubr.msk.f32.mxu0 %vm25157_vm12, %v25154_v7 }
 0xb16   : > { %20582 = vmatprep.mubr.msk.f32.mxu1 %vm25157_vm12, %v25154_v7 }
 0xb17   : > { %24136 = vmatpush3.bf16.msra.mxu0 %v29823_v1 }
 0xb18   : > { %24151 = vmatpush3.bf16.msra.mxu1 %v29823_v1  ;;  %24137 = vmatprep.subr.bf16.mxu0 %v25156_v4 }
 0xb19   : > { %24152 = vmatprep.subr.bf16.mxu1 %v25156_v4 }
 0xb1b   : > { %24139 = vmatpush3.bf16.msra.mxu0 %v29839_v53 }
 0xb1c   : > { %24154 = vmatpush3.bf16.msra.mxu1 %v29839_v53  ;;  %24140 = vmatprep.subr.bf16.mxu0 %v25156_v4 }
 0xb1d   : > { %24155 = vmatprep.subr.bf16.mxu1 %v25156_v4 }
 0xb1f   : > { %24142 = vmatpush3.bf16.msra.mxu0 %v29851_v58 }
 0xb20   : > { %24157 = vmatpush3.bf16.msra.mxu1 %v29851_v58  ;;  %24143 = vmatprep.subr.bf16.mxu0 %v25156_v4 }
 0xb21   : > { %24158 = vmatprep.subr.bf16.mxu1 %v25156_v4 }
 0xb23   : > { %24145 = vmatpush3.bf16.msra.mxu0 %v29867_v13 }
 0xb24   : > { %24160 = vmatpush3.bf16.msra.mxu1 %v29867_v13  ;;  %24161 = vmatprep.subr.bf16.mxu0 %v25156_v4 }
 0xb25   : > { %24176 = vmatprep.subr.bf16.mxu1 %v25156_v4 }
 0xb26   : > { %20560 = vmatmul.mubr.msk.f32.vlgmr.msra.gmra.mrb[170].mxu0 %vm14026_vm14, %v15808_v34  ;;  %v17046_v34 = vld [vmem:[%s30691_s11 + $0x8] sm:$0xff] }
 0xb27   : > { %20583 = vmatmul.mubr.msk.f32.vlgmr.msra.gmra.mrb[170].mxu1 %vm14026_vm14, %v15809_v10  ;;  %24163 = vmatpush3.bf16.msra.mxu0 %v29809_v35  ;;  %v30135_v10 = vpack.c.bf16 %v17046_v34, %v17045_v8 }
 0xb28   : > { %24178 = vmatpush3.bf16.msra.mxu1 %v29809_v35  ;;  %24164 = vmatprep.subr.bf16.mxu0 %v25156_v4 }
 0xb29   : > { %24179 = vmatprep.subr.bf16.mxu1 %v25156_v4  ;;  %20605 = vmatprep.mubr.msk.f32.mxu0 %vm25157_vm12, %v25154_v7 }
 0xb2a   : > { %20628 = vmatprep.mubr.msk.f32.mxu1 %vm25157_vm12, %v25154_v7 }
 0xb2b   : > { %24166 = vmatpush3.bf16.msra.mxu0 %v29823_v1 }
 0xb2c   : > { %24181 = vmatpush3.bf16.msra.mxu1 %v29823_v1  ;;  %24167 = vmatprep.subr.bf16.mxu0 %v25156_v4 }
 0xb2d   : > { %24182 = vmatprep.subr.bf16.mxu1 %v25156_v4 }
 0xb2f   : > { %24169 = vmatpush3.bf16.msra.mxu0 %v29839_v53 }
 0xb30   : > { %24184 = vmatpush3.bf16.msra.mxu1 %v29839_v53  ;;  %24170 = vmatprep.subr.bf16.mxu0 %v25156_v4 }
 0xb31   : > { %v29919_v61 = vpop.f32.mrb[150].mxu0  ;;  %24185 = vmatprep.subr.bf16.mxu1 %v25156_v4 }
 0xb32   : > { %v29922_v0 = vpop.f32.mrb[150].mxu1  ;;  %v20101_v52 = vpop.f32.mrb[151].mxu0 }
 0xb33   : > { %v20124_v32 = vpop.f32.mrb[151].mxu1  ;;  %24172 = vmatpush3.bf16.msra.mxu0 %v29851_v58  ;;  %v17047_v52 = vld [vmem:[%s30691_s11 + $0x10] sm:$0xff] }
 0xb34   : > { %24187 = vmatpush3.bf16.msra.mxu1 %v29851_v58  ;;  %24173 = vmatprep.subr.bf16.mxu0 %v25156_v4  ;;  %v17048_v32 = vld [vmem:[%s30691_s11 + $0x18] sm:$0xff] }
 0xb35   : > { %24188 = vmatprep.subr.bf16.mxu1 %v25156_v4 }
 0xb37   : > { %24175 = vmatpush3.bf16.msra.mxu0 %v29867_v13 }
 0xb38   : > { %24190 = vmatpush3.bf16.msra.mxu1 %v29867_v13  ;;  %24191 = vmatprep.subr.bf16.mxu0 %v25156_v4 }
 0xb39   : > { %24206 = vmatprep.subr.bf16.mxu1 %v25156_v4 }
 0xb3a   : > { %20606 = vmatmul.mubr.msk.f32.vlgmr.msra.gmra.mrb[172].mxu0 %vm14026_vm14, %v15810_v44  ;;  %v30154_v44 = vpack.c.bf16 %v17048_v32, %v17047_v52  ;;  %v30250_v32 = vld [vmem:[%s30690_s10] sm:$0x1] }
 0xb3b   : > { %20629 = vmatmul.mubr.msk.f32.vlgmr.msra.gmra.mrb[172].mxu1 %vm14026_vm14, %v15811_v31  ;;  %24193 = vmatpush3.bf16.msra.mxu0 %v29809_v35  ;;  %v17049_v31 = vld [vmem:[%s30691_s11 + $0x20] sm:$0xff] }
 0xb3c   : > { %24208 = vmatpush3.bf16.msra.mxu1 %v29809_v35  ;;  %24194 = vmatprep.subr.bf16.mxu0 %v25156_v4 }
 0xb3d   : > { %24209 = vmatprep.subr.bf16.mxu1 %v25156_v4  ;;  %20651 = vmatprep.mubr.msk.f32.mxu0 %vm25157_vm12, %v25154_v7 }
 0xb3e   : > { %20674 = vmatprep.mubr.msk.f32.mxu1 %vm25157_vm12, %v25154_v7 }
 0xb3f   : > { %24196 = vmatpush3.bf16.msra.mxu0 %v29823_v1 }
 0xb40   : > { %24211 = vmatpush3.bf16.msra.mxu1 %v29823_v1  ;;  %24197 = vmatprep.subr.bf16.mxu0 %v25156_v4  ;;  %v16420_v1 = vld [vmem:[#allocation4 + $0x1c] sm:$0x1] }
 0xb41   : > { %24212 = vmatprep.subr.bf16.mxu1 %v25156_v4 }
 0xb43   : > { %24199 = vmatpush3.bf16.msra.mxu0 %v29839_v53 }
 0xb44   : > { %24214 = vmatpush3.bf16.msra.mxu1 %v29839_v53  ;;  %24200 = vmatprep.subr.bf16.mxu0 %v25156_v4 }
 0xb45   : > { %v14680_v33 = vpop.f32.mrb[152].mxu0  ;;  %24215 = vmatprep.subr.bf16.mxu1 %v25156_v4 }
 0xb46   : > { %v29951_v43 = vadd.f32 %v14680_v33, %v29709_v5  ;;  %v14753_v36 = vpop.f32.mrb[152].mxu1  ;;  %v20147_v45 = vpop.f32.mrb[153].mxu0  ;;  %v29997_v5 = vpack.c.bf16 %v19233_v6, %v19232_v19  ;;  %v17050_v33 = vld [vmem:[%s30691_s11 + $0x28] sm:$0xff]  ;;  %v17055_v19 = vld [vmem:[%s30691_s11 + $0x50] sm:$0xff]  ;;  %v17056_v6 = vld [vmem:[%s30691_s11 + $0x58] sm:$0xff] }
 0xb47   : > { %v29954_v20 = vadd.f32 %v14753_v36, %v29712_v38  ;;  %v20170_v46 = vpop.f32.mrb[153].mxu1  ;;  %24202 = vmatpush3.bf16.msra.mxu0 %v29851_v58  ;;  %v19234_v38 = vld [vmem:[%s30689_s9 + $0x170] sm:$0xff]  ;;  %v17052_v45 = vld [vmem:[%s30691_s11 + $0x38] sm:$0xff] }
 0xb48   : > { %24217 = vmatpush3.bf16.msra.mxu1 %v29851_v58  ;;  %24203 = vmatprep.subr.bf16.mxu0 %v25156_v4  ;;  %v30009_v59 = vpack.c.bf16 %v19235_v54, %v19234_v38  ;;  %v17051_v36 = vld [vmem:[%s30691_s11 + $0x30] sm:$0xff]  ;;  %v17057_v38 = vld [vmem:[%s30691_s11 + $0x60] sm:$0xff]  ;;  %v17058_v54 = vld [vmem:[%s30691_s11 + $0x68] sm:$0xff] }
 0xb49   : > { %24218 = vmatprep.subr.bf16.mxu1 %v25156_v4 }
 0xb4b   : > { %24205 = vmatpush3.bf16.msra.mxu0 %v29867_v13 }
 0xb4c   : > { %24220 = vmatpush3.bf16.msra.mxu1 %v29867_v13  ;;  %24221 = vmatprep.subr.bf16.mxu0 %v25156_v4 }
 0xb4d   : > { %24236 = vmatprep.subr.bf16.mxu1 %v25156_v4 }
 0xb4e   : > { %20652 = vmatmul.mubr.msk.f32.vlgmr.msra.gmra.mrb[174].mxu0 %vm14026_vm14, %v15812_v16 }
 0xb4f   : > { %20675 = vmatmul.mubr.msk.f32.vlgmr.msra.gmra.mrb[174].mxu1 %vm14026_vm14, %v15813_v29  ;;  %24223 = vmatpush3.bf16.msra.mxu0 %v29967_v9 }
 0xb50   : > { %24238 = vmatpush3.bf16.msra.mxu1 %v29967_v9  ;;  %24224 = vmatprep.subr.bf16.mxu0 %v25156_v4 }
 0xb51   : > { %24239 = vmatprep.subr.bf16.mxu1 %v25156_v4  ;;  %20697 = vmatprep.mubr.msk.f32.mxu0 %vm25157_vm12, %v25154_v7 }
 0xb52   : > { %20720 = vmatprep.mubr.msk.f32.mxu1 %vm25157_vm12, %v25154_v7 }
 0xb53   : > { %24226 = vmatpush3.bf16.msra.mxu0 %v29981_v12 }
 0xb54   : > { %24241 = vmatpush3.bf16.msra.mxu1 %v29981_v12  ;;  %24227 = vmatprep.subr.bf16.mxu0 %v25156_v4 }
 0xb55   : > { %24242 = vmatprep.subr.bf16.mxu1 %v25156_v4 }
 0xb57   : > { %24229 = vmatpush3.bf16.msra.mxu0 %v29997_v5 }
 0xb58   : > { %24244 = vmatpush3.bf16.msra.mxu1 %v29997_v5  ;;  %24230 = vmatprep.subr.bf16.mxu0 %v25156_v4 }
 0xb59   : > { %v14826_v28 = vpop.f32.mrb[154].mxu0  ;;  %24245 = vmatprep.subr.bf16.mxu1 %v25156_v4 }
 0xb5a   : > { %v30021_v11 = vadd.f32 %v14826_v28, %v29767_v40  ;;  %v14899_v37 = vpop.f32.mrb[154].mxu1  ;;  %v20193_v24 = vpop.f32.mrb[155].mxu0  ;;  %v16417_v40 = vld [vmem:[#allocation4 + $0x4] sm:$0x1] }
 0xb5b   : > { %v30024_v57 = vadd.f32 %v14899_v37, %v29770_v27  ;;  %v20216_v17 = vpop.f32.mrb[155].mxu1  ;;  %24232 = vmatpush3.bf16.msra.mxu0 %v30009_v59  ;;  %v16418_v27 = vld [vmem:[#allocation4 + $0xc] sm:$0x1] }
 0xb5c   : > { %24247 = vmatpush3.bf16.msra.mxu1 %v30009_v59  ;;  %24233 = vmatprep.subr.bf16.mxu0 %v25156_v4 }
 0xb5d   : > { %24248 = vmatprep.subr.bf16.mxu1 %v25156_v4 }
 0xb5f   : > { %24235 = vmatpush3.bf16.msra.mxu0 %v30027_v55 }
 0xb60   : > { %24250 = vmatpush3.bf16.msra.mxu1 %v30027_v55  ;;  %24251 = vmatprep.subr.bf16.mxu0 %v25156_v4 }
 0xb61   : > { %24266 = vmatprep.subr.bf16.mxu1 %v25156_v4 }
 0xb62   : > { %20698 = vmatmul.mubr.msk.f32.vlgmr.msra.gmra.mrb[176].mxu0 %vm14026_vm14, %v16417_v40 }
 0xb63   : > { %20721 = vmatmul.mubr.msk.f32.vlgmr.msra.gmra.mrb[176].mxu1 %vm14026_vm14, %v16418_v27  ;;  %24253 = vmatpush3.bf16.msra.mxu0 %v29967_v9 }
 0xb64   : > { %24268 = vmatpush3.bf16.msra.mxu1 %v29967_v9  ;;  %24254 = vmatprep.subr.bf16.mxu0 %v25156_v4 }
 0xb65   : > { %24269 = vmatprep.subr.bf16.mxu1 %v25156_v4  ;;  %20743 = vmatprep.mubr.msk.f32.mxu0 %vm25157_vm12, %v25154_v7 }
 0xb66   : > { %20766 = vmatprep.mubr.msk.f32.mxu1 %vm25157_vm12, %v25154_v7 }
 0xb67   : > { %24256 = vmatpush3.bf16.msra.mxu0 %v29981_v12 }
 0xb68   : > { %24271 = vmatpush3.bf16.msra.mxu1 %v29981_v12  ;;  %24257 = vmatprep.subr.bf16.mxu0 %v25156_v4 }
 0xb69   : > { %24272 = vmatprep.subr.bf16.mxu1 %v25156_v4 }
 0xb6b   : > { %24259 = vmatpush3.bf16.msra.mxu0 %v29997_v5 }
 0xb6c   : > { %24274 = vmatpush3.bf16.msra.mxu1 %v29997_v5  ;;  %24260 = vmatprep.subr.bf16.mxu0 %v25156_v4 }
 0xb6d   : > { %v14972_v22 = vpop.f32.mrb[156].mxu0  ;;  %24275 = vmatprep.subr.bf16.mxu1 %v25156_v4 }
 0xb6e   : > { %v30055_v63 = vadd.f32 %v14972_v22, %v29861_v48  ;;  %v15045_v35 = vpop.f32.mrb[156].mxu1  ;;  %v20239_v39 = vpop.f32.mrb[157].mxu0 }
 0xb6f   : > { %v30058_v14 = vadd.f32 %v15045_v35, %v29864_v30  ;;  %v20262_v41 = vpop.f32.mrb[157].mxu1  ;;  %24262 = vmatpush3.bf16.msra.mxu0 %v30009_v59 }
 0xb70   : > { %24277 = vmatpush3.bf16.msra.mxu1 %v30009_v59  ;;  %24263 = vmatprep.subr.bf16.mxu0 %v25156_v4 }
 0xb71   : > { %24278 = vmatprep.subr.bf16.mxu1 %v25156_v4 }
 0xb73   : > { %24265 = vmatpush3.bf16.msra.mxu0 %v30027_v55 }
 0xb74   : > { %24280 = vmatpush3.bf16.msra.mxu1 %v30027_v55  ;;  %24281 = vmatprep.subr.bf16.mxu0 %v25156_v4 }
 0xb75   : > { %24296 = vmatprep.subr.bf16.mxu1 %v25156_v4 }
 0xb76   : > { %20744 = vmatmul.mubr.msk.f32.vlgmr.msra.gmra.mrb[178].mxu0 %vm14026_vm14, %v16419_v42 }
 0xb77   : > { %20767 = vmatmul.mubr.msk.f32.vlgmr.msra.gmra.mrb[178].mxu1 %vm14026_vm14, %v16420_v1  ;;  %24283 = vmatpush3.bf16.msra.mxu0 %v29967_v9 }
 0xb78   : > { %24298 = vmatpush3.bf16.msra.mxu1 %v29967_v9  ;;  %24284 = vmatprep.subr.bf16.mxu0 %v25156_v4 }
 0xb79   : > { %24299 = vmatprep.subr.bf16.mxu1 %v25156_v4  ;;  %20789 = vmatprep.mubr.msk.f32.mxu0 %vm25157_vm12, %v25154_v7 }
 0xb7a   : > { %20812 = vmatprep.mubr.msk.f32.mxu1 %vm25157_vm12, %v25154_v7 }
 0xb7b   : > { %24286 = vmatpush3.bf16.msra.mxu0 %v29981_v12 }
 0xb7c   : > { %24301 = vmatpush3.bf16.msra.mxu1 %v29981_v12  ;;  %24287 = vmatprep.subr.bf16.mxu0 %v25156_v4 }
 0xb7d   : > { %24302 = vmatprep.subr.bf16.mxu1 %v25156_v4 }
 0xb7f   : > { %24289 = vmatpush3.bf16.msra.mxu0 %v29997_v5 }
 0xb80   : > { %24304 = vmatpush3.bf16.msra.mxu1 %v29997_v5  ;;  %24290 = vmatprep.subr.bf16.mxu0 %v25156_v4 }
 0xb81   : > { %v15118_v3 = vpop.f32.mrb[158].mxu0  ;;  %24305 = vmatprep.subr.bf16.mxu1 %v25156_v4 }
 0xb82   : > { %v30087_v49 = vadd.f32 %v15118_v3, %v29919_v61  ;;  %v15191_v53 = vpop.f32.mrb[158].mxu1  ;;  %v20285_v51 = vpop.f32.mrb[159].mxu0  ;;  %v16423_v61 = vld [vmem:[#allocation4 + $0x34] sm:$0x1] }
 0xb83   : > { %v30090_v23 = vadd.f32 %v15191_v53, %v29922_v0  ;;  %v20308_v58 = vpop.f32.mrb[159].mxu1  ;;  %24292 = vmatpush3.bf16.msra.mxu0 %v30009_v59  ;;  %v16424_v0 = vld [vmem:[#allocation4 + $0x3c] sm:$0x1] }
 0xb84   : > { %24307 = vmatpush3.bf16.msra.mxu1 %v30009_v59  ;;  %24293 = vmatprep.subr.bf16.mxu0 %v25156_v4 }
 0xb85   : > { %24308 = vmatprep.subr.bf16.mxu1 %v25156_v4 }
 0xb87   : > { %24295 = vmatpush3.bf16.msra.mxu0 %v30027_v55 }
 0xb88   : > { %24310 = vmatpush3.bf16.msra.mxu1 %v30027_v55  ;;  %24311 = vmatprep.subr.bf16.mxu0 %v25156_v4 }
 0xb89   : > { %24326 = vmatprep.subr.bf16.mxu1 %v25156_v4 }
 0xb8a   : > { %20790 = vmatmul.mubr.msk.f32.vlgmr.msra.gmra.mrb[180].mxu0 %vm14026_vm14, %v16421_v50 }
 0xb8b   : > { %20813 = vmatmul.mubr.msk.f32.vlgmr.msra.gmra.mrb[180].mxu1 %vm14026_vm14, %v16422_v47  ;;  %24313 = vmatpush3.bf16.msra.mxu0 %v29967_v9 }
 0xb8c   : > { %24328 = vmatpush3.bf16.msra.mxu1 %v29967_v9  ;;  %24314 = vmatprep.subr.bf16.mxu0 %v25156_v4 }
 0xb8d   : > { %24329 = vmatprep.subr.bf16.mxu1 %v25156_v4  ;;  %20835 = vmatprep.mubr.msk.f32.mxu0 %vm25157_vm12, %v25154_v7 }
 0xb8e   : > { %20858 = vmatprep.mubr.msk.f32.mxu1 %vm25157_vm12, %v25154_v7 }
 0xb8f   : > { %24316 = vmatpush3.bf16.msra.mxu0 %v29981_v12 }
 0xb90   : > { %24331 = vmatpush3.bf16.msra.mxu1 %v29981_v12  ;;  %24317 = vmatprep.subr.bf16.mxu0 %v25156_v4  ;;  %v30192_v12 = vpack.c.bf16 %v17054_v26, %v17053_v21 }
 0xb91   : > { %24332 = vmatprep.subr.bf16.mxu1 %v25156_v4 }
 0xb93   : > { %24319 = vmatpush3.bf16.msra.mxu0 %v29997_v5 }
 0xb94   : > { %24334 = vmatpush3.bf16.msra.mxu1 %v29997_v5  ;;  %24320 = vmatprep.subr.bf16.mxu0 %v25156_v4  ;;  %v30204_v5 = vpack.c.bf16 %v17056_v6, %v17055_v19 }
 0xb95   : > { %v15283_v48 = vpop.f32.mrb[160].mxu0  ;;  %24335 = vmatprep.subr.bf16.mxu1 %v25156_v4 }
 0xb96   : > { %v30119_v30 = vadd.f32 %v15283_v48, %v29951_v43  ;;  %v15356_v18 = vpop.f32.mrb[160].mxu1  ;;  %v20331_v56 = vpop.f32.mrb[161].mxu0  ;;  %v30166_v43 = vpack.c.bf16 %v17050_v33, %v17049_v31 }
 0xb97   : > { %v30122_v13 = vadd.f32 %v15356_v18, %v29954_v20  ;;  %v20354_v25 = vpop.f32.mrb[161].mxu1  ;;  %24322 = vmatpush3.bf16.msra.mxu0 %v30009_v59  ;;  %v30178_v20 = vpack.c.bf16 %v17052_v45, %v17051_v36 }
 0xb98   : > { %24337 = vmatpush3.bf16.msra.mxu1 %v30009_v59  ;;  %24323 = vmatprep.subr.bf16.mxu0 %v25156_v4  ;;  %v30218_v59 = vpack.c.bf16 %v17058_v54, %v17057_v38 }
 0xb99   : > { %24338 = vmatprep.subr.bf16.mxu1 %v25156_v4 }
 0xb9b   : > { %24325 = vmatpush3.bf16.msra.mxu0 %v30027_v55 }
 0xb9c   : > { %24340 = vmatpush3.bf16.msra.mxu1 %v30027_v55  ;;  %24341 = vmatprep.subr.bf16.mxu0 %v25156_v4 }
 0xb9d   : > { %24362 = vmatprep.subr.bf16.mxu1 %v25156_v4 }
 0xb9e   : > { %20836 = vmatmul.mubr.msk.f32.vlgmr.msra.gmra.mrb[182].mxu0 %vm14026_vm14, %v16423_v61 }
 0xb9f   : > { %20859 = vmatmul.mubr.msk.f32.vlgmr.msra.gmra.mrb[182].mxu1 %vm14026_vm14, %v16424_v0  ;;  %24343 = vmatpush3.bf16.msra.mxu0 %v30135_v10 }
 0xba0   : > { %24364 = vmatpush3.bf16.msra.mxu1 %v30135_v10  ;;  %24344 = vmatprep.subr.bf16.mxu0 %v25156_v4 }
 0xba1   : > { %24365 = vmatprep.subr.bf16.mxu1 %v25156_v4  ;;  %20891 = vmatprep.mubr.msk.f32.mxu0 %vm25157_vm12, %v25154_v7 }
 0xba2   : > { %20924 = vmatprep.mubr.msk.f32.mxu1 %vm25157_vm12, %v25154_v7 }
 0xba3   : > { %24346 = vmatpush3.bf16.msra.mxu0 %v30154_v44 }
 0xba4   : > { %24367 = vmatpush3.bf16.msra.mxu1 %v30154_v44  ;;  %24347 = vmatprep.subr.bf16.mxu0 %v25156_v4 }
 0xba5   : > { %24368 = vmatprep.subr.bf16.mxu1 %v25156_v4 }
 0xba7   : > { %24349 = vmatpush3.bf16.msra.mxu0 %v30166_v43 }
 0xba8   : > { %24370 = vmatpush3.bf16.msra.mxu1 %v30166_v43  ;;  %24350 = vmatprep.subr.bf16.mxu0 %v25156_v4 }
 0xba9   : > { %v15429_v46 = vpop.f32.mrb[162].mxu0  ;;  %24371 = vmatprep.subr.bf16.mxu1 %v25156_v4 }
 0xbaa   : > { %v15800_v9 = vadd.f32 %v15429_v46, %v30021_v11  ;;  %v15502_v15 = vpop.f32.mrb[162].mxu1  ;;  %v20377_v62 = vpop.f32.mrb[163].mxu0 }
 0xbab   : > { %v15801_v16 = vadd.f32 %v15502_v15, %v30024_v57  ;;  %v20400_v29 = vpop.f32.mrb[163].mxu1  ;;  %24352 = vmatpush3.bf16.msra.mxu0 %v30178_v20 }
 0xbac   : > { %24373 = vmatpush3.bf16.msra.mxu1 %v30178_v20  ;;  %24353 = vmatprep.subr.bf16.mxu0 %v25156_v4 }
 0xbad   : > { %24374 = vmatprep.subr.bf16.mxu1 %v25156_v4 }
 0xbaf   : > { %24355 = vmatpush3.bf16.msra.mxu0 %v30192_v12 }
 0xbb0   : > { %24376 = vmatpush3.bf16.msra.mxu1 %v30192_v12  ;;  %24356 = vmatprep.subr.bf16.mxu0 %v25156_v4 }
 0xbb1   : > { %24377 = vmatprep.subr.bf16.mxu1 %v25156_v4 }
 0xbb3   : > { %24358 = vmatpush3.bf16.msra.mxu0 %v30204_v5 }
 0xbb4   : > { %24379 = vmatpush3.bf16.msra.mxu1 %v30204_v5  ;;  %24359 = vmatprep.subr.bf16.mxu0 %v25156_v4 }
 0xbb5   : > { %24380 = vmatprep.subr.bf16.mxu1 %v25156_v4 }
 0xbb7   : > { %24361 = vmatpush3.bf16.msra.mxu0 %v30218_v59 }
 0xbb8   : > { %24382 = vmatpush3.bf16.msra.mxu1 %v30218_v59  ;;  %20889 = vmatprep.subr.mxu0 %v25154_v7 }
 0xbb9   : > { %20922 = vmatprep.subr.mxu1 %v25154_v7 }
 0xbbb   : > { %20890 = vmatpush3.msra.mxu0 %v30227_v60 }
 0xbbc   : > { %20923 = vmatpush3.msra.mxu1 %v30227_v60  ;;  %24383 = vmatprep.subr.bf16.mxu0 %v25156_v4 }
 0xbbd   : > { %v15575_v2 = vpop.f32.mrb[164].mxu0  ;;  %24404 = vmatprep.subr.bf16.mxu1 %v25156_v4 }
 0xbbe   : > { %v15802_v28 = vadd.f32 %v15575_v2, %v30055_v63  ;;  %v15648_v11 = vpop.f32.mrb[164].mxu1  ;;  %v20423_v37 = vpop.f32.mrb[165].mxu0 }
 0xbbf   : > { %v15803_v24 = vadd.f32 %v15648_v11, %v30058_v14  ;;  %v20446_v57 = vpop.f32.mrb[165].mxu1 }
 0xbd1   : > { %v15721_v17 = vpop.f32.mrb[166].mxu0 }
 0xbd2   : > { %v15804_v55 = vadd.f32 %v15721_v17, %v30087_v49  ;;  %v15794_v40 = vpop.f32.mrb[166].mxu1  ;;  %v20469_v27 = vpop.f32.mrb[167].mxu0 }
 0xbd3   : > { %v15805_v22 = vadd.f32 %v15794_v40, %v30090_v23  ;;  %v20492_v35 = vpop.f32.mrb[167].mxu1 }
 0xbe5   : > { %v15894_v39 = vpop.f32.mrb[168].mxu0 }
 0xbe6   : > { %v16409_v41 = vadd.f32 %v15894_v39, %v30119_v30  ;;  %v15967_v42 = vpop.f32.mrb[168].mxu1  ;;  %v20515_v1 = vpop.f32.mrb[169].mxu0 }
 0xbe7   : > { %v16410_v63 = vadd.f32 %v15967_v42, %v30122_v13  ;;  %v20538_v3 = vpop.f32.mrb[169].mxu1 }
 0xbf9   : > { %v16040_v53 = vpop.f32.mrb[170].mxu0 }
 0xbfa   : > { %v16411_v51 = vadd.f32 %v16040_v53, %v15800_v9  ;;  %v16113_v14 = vpop.f32.mrb[170].mxu1  ;;  %v20561_v58 = vpop.f32.mrb[171].mxu0 }
 0xbfb   : > { %v16412_v50 = vadd.f32 %v16113_v14, %v15801_v16  ;;  %v20584_v47 = vpop.f32.mrb[171].mxu1  ;;  %v17657_v58 = vld [vmem:[%s30693_s13 + $0x18] sm:$0xff] }
 0xc0d   : > { %v16186_v49 = vpop.f32.mrb[172].mxu0 }
 0xc0e   : > { %v30239_v48 = vadd.f32 %v16186_v49, %v15802_v28  ;;  %v16259_v18 = vpop.f32.mrb[172].mxu1  ;;  %v20607_v23 = vpop.f32.mrb[173].mxu0  ;;  %v17660_v49 = vld [vmem:[%s30693_s13 + $0x30] sm:$0xff] }
 0xc0f   : > { %v30241_v56 = vadd.f32 %v16259_v18, %v15803_v24  ;;  %v20630_v25 = vpop.f32.mrb[173].mxu1  ;;  %v17662_v23 = vld [vmem:[%s30693_s13 + $0x40] sm:$0xff] }
 0xc21   : > { %v16332_v30 = vpop.f32.mrb[174].mxu0 }
 0xc22   : > { %v30243_v8 = vadd.f32 %v16332_v30, %v15804_v55  ;;  %v16405_v34 = vpop.f32.mrb[174].mxu1  ;;  %v20653_v13 = vpop.f32.mrb[175].mxu0  ;;  %v30446_v30 = vld [vmem:[%s30693_s13 + $0x50] sm:$0xf] }
 0xc23   : > { %v30245_v61 = vadd.f32 %v16405_v34, %v15805_v22  ;;  %v20676_v0 = vpop.f32.mrb[175].mxu1 }
 0xc35   : > { %v16505_v52 = vpop.f32.mrb[176].mxu0 }
 0xc36   : > { %v17020_v31 = vadd.f32 %v16505_v52, %v16409_v41  ;;  %v16578_v33 = vpop.f32.mrb[176].mxu1  ;;  %v20699_v36 = vpop.f32.mrb[177].mxu0 }
 0xc37   : > { %v17021_v45 = vadd.f32 %v16578_v33, %v16410_v63  ;;  %v20722_v46 = vpop.f32.mrb[177].mxu1 }
 0xc38   : > { %v17029_v21 = vadd.f32 %v30250_v32, %v17020_v31 }
 0xc39   : > { %v17030_v26 = vadd.f32 %v30250_v32, %v17021_v45 }
 0xc3a   : > { %v17037_v9 = vmax.f32 %v17029_v21, 0.0 }
 0xc3b   : > { %v17038_v15 = vmax.f32 %v17030_v26, 0.0 }
 0xc3c   : > { %20892 = vmatmul.mubr.msk.f32.vlgmr.msra.gmra.mrb[184].mxu0 %vm17061_vm15, %v17037_v9 }
 0xc3d   : > { %20925 = vmatmul.mubr.msk.f32.vlgmr.msra.gmra.mrb[184].mxu1 %vm17061_vm15, %v17038_v15  ;;  %24385 = vmatpush3.bf16.msra.mxu0 %v30135_v10 }
 0xc3e   : > { %24406 = vmatpush3.bf16.msra.mxu1 %v30135_v10  ;;  %24386 = vmatprep.subr.bf16.mxu0 %v25156_v4 }
 0xc3f   : > { %24407 = vmatprep.subr.bf16.mxu1 %v25156_v4  ;;  %20957 = vmatprep.mubr.msk.f32.mxu0 %vm25157_vm12, %v25154_v7 }
 0xc40   : > { %20990 = vmatprep.mubr.msk.f32.mxu1 %vm25157_vm12, %v25154_v7 }
 0xc41   : > { %24388 = vmatpush3.bf16.msra.mxu0 %v30154_v44 }
 0xc42   : > { %24409 = vmatpush3.bf16.msra.mxu1 %v30154_v44  ;;  %24389 = vmatprep.subr.bf16.mxu0 %v25156_v4 }
 0xc43   : > { %24410 = vmatprep.subr.bf16.mxu1 %v25156_v4 }
 0xc45   : > { %24391 = vmatpush3.bf16.msra.mxu0 %v30166_v43 }
 0xc46   : > { %24412 = vmatpush3.bf16.msra.mxu1 %v30166_v43  ;;  %24392 = vmatprep.subr.bf16.mxu0 %v25156_v4 }
 0xc47   : > { %24413 = vmatprep.subr.bf16.mxu1 %v25156_v4 }
 0xc49   : > { %24394 = vmatpush3.bf16.msra.mxu0 %v30178_v20  ;;  %v16651_v62 = vpop.f32.mrb[178].mxu0 }
 0xc4a   : > { %24415 = vmatpush3.bf16.msra.mxu1 %v30178_v20  ;;  %v17022_v16 = vadd.f32 %v16651_v62, %v16411_v51  ;;  %v16724_v29 = vpop.f32.mrb[178].mxu1  ;;  %v20745_v19 = vpop.f32.mrb[179].mxu0  ;;  %24395 = vmatprep.subr.bf16.mxu0 %v25156_v4 }
 0xc4b   : > { %v17023_v6 = vadd.f32 %v16724_v29, %v16412_v50  ;;  %v20768_v38 = vpop.f32.mrb[179].mxu1  ;;  %24416 = vmatprep.subr.bf16.mxu1 %v25156_v4  ;;  %v17659_v50 = vld [vmem:[%s30693_s13 + $0x28] sm:$0xff] }
 0xc4c   : > { %v17031_v54 = vadd.f32 %v30250_v32, %v17022_v16 }
 0xc4d   : > { %24397 = vmatpush3.bf16.msra.mxu0 %v30192_v12  ;;  %v17032_v2 = vadd.f32 %v30250_v32, %v17023_v6 }
 0xc4e   : > { %24418 = vmatpush3.bf16.msra.mxu1 %v30192_v12  ;;  %24398 = vmatprep.subr.bf16.mxu0 %v25156_v4  ;;  %v17039_v28 = vmax.f32 %v17031_v54, 0.0 }
 0xc4f   : > { %24419 = vmatprep.subr.bf16.mxu1 %v25156_v4  ;;  %v17040_v11 = vmax.f32 %v17032_v2, 0.0 }
 0xc51   : > { %24400 = vmatpush3.bf16.msra.mxu0 %v30204_v5 }
 0xc52   : > { %24421 = vmatpush3.bf16.msra.mxu1 %v30204_v5  ;;  %24401 = vmatprep.subr.bf16.mxu0 %v25156_v4 }
 0xc53   : > { %24422 = vmatprep.subr.bf16.mxu1 %v25156_v4 }
 0xc55   : > { %24403 = vmatpush3.bf16.msra.mxu0 %v30218_v59 }
 0xc56   : > { %24424 = vmatpush3.bf16.msra.mxu1 %v30218_v59  ;;  %20955 = vmatprep.subr.mxu0 %v25154_v7 }
 0xc57   : > { %20988 = vmatprep.subr.mxu1 %v25154_v7 }
 0xc59   : > { %20956 = vmatpush3.msra.mxu0 %v30227_v60 }
 0xc5a   : > { %20989 = vmatpush3.msra.mxu1 %v30227_v60  ;;  %20958 = vmatmul.mubr.msk.f32.vlgmr.msra.gmra.mrb[186].mxu0 %vm17061_vm15, %v17039_v28 }
 0xc5b   : > { %20991 = vmatmul.mubr.msk.f32.vlgmr.msra.gmra.mrb[186].mxu1 %vm17061_vm15, %v17040_v11  ;;  %24425 = vmatprep.subr.bf16.mxu0 %v25156_v4 }
 0xc5c   : > { %24446 = vmatprep.subr.bf16.mxu1 %v25156_v4  ;;  %24427 = vmatpush3.bf16.msra.mxu0 %v30135_v10 }
 0xc5d   : > { %24448 = vmatpush3.bf16.msra.mxu1 %v30135_v10  ;;  %v16797_v37 = vpop.f32.mrb[180].mxu0  ;;  %24428 = vmatprep.subr.bf16.mxu0 %v25156_v4 }
 0xc5e   : > { %v17024_v24 = vadd.f32 %v16797_v37, %v30239_v48  ;;  %v16870_v57 = vpop.f32.mrb[180].mxu1  ;;  %24449 = vmatprep.subr.bf16.mxu1 %v25156_v4  ;;  %v20791_v17 = vpop.f32.mrb[181].mxu0  ;;  %21023 = vmatprep.mubr.msk.f32.mxu0 %vm25157_vm12, %v25154_v7  ;;  %v17661_v48 = vld [vmem:[%s30693_s13 + $0x38] sm:$0xff] }
 0xc5f   : > { %v17025_v55 = vadd.f32 %v16870_v57, %v30241_v56  ;;  %v20814_v40 = vpop.f32.mrb[181].mxu1  ;;  %21056 = vmatprep.mubr.msk.f32.mxu1 %vm25157_vm12, %v25154_v7  ;;  %v30423_v18 = vpack.c.bf16 %v17661_v48, %v17660_v49  ;;  %v17663_v56 = vld [vmem:[%s30693_s13 + $0x48] sm:$0xff] }
 0xc60   : > { %24430 = vmatpush3.bf16.msra.mxu0 %v30154_v44  ;;  %v17033_v41 = vadd.f32 %v30250_v32, %v17024_v24  ;;  %v30435_v25 = vpack.c.bf16 %v17663_v56, %v17662_v23 }
 0xc61   : > { %24451 = vmatpush3.bf16.msra.mxu1 %v30154_v44  ;;  %24431 = vmatprep.subr.bf16.mxu0 %v25156_v4  ;;  %v17034_v63 = vadd.f32 %v30250_v32, %v17025_v55 }
 0xc62   : > { %24452 = vmatprep.subr.bf16.mxu1 %v25156_v4  ;;  %v17041_v51 = vmax.f32 %v17033_v41, 0.0 }
 0xc63   : > { %v17042_v14 = vmax.f32 %v17034_v63, 0.0 }
 0xc64   : > { %24433 = vmatpush3.bf16.msra.mxu0 %v30166_v43 }
 0xc65   : > { %24454 = vmatpush3.bf16.msra.mxu1 %v30166_v43  ;;  %24434 = vmatprep.subr.bf16.mxu0 %v25156_v4 }
 0xc66   : > { %24455 = vmatprep.subr.bf16.mxu1 %v25156_v4 }
 0xc68   : > { %24436 = vmatpush3.bf16.msra.mxu0 %v30178_v20 }
 0xc69   : > { %24457 = vmatpush3.bf16.msra.mxu1 %v30178_v20  ;;  %24437 = vmatprep.subr.bf16.mxu0 %v25156_v4 }
 0xc6a   : > { %24458 = vmatprep.subr.bf16.mxu1 %v25156_v4 }
 0xc6c   : > { %24439 = vmatpush3.bf16.msra.mxu0 %v30192_v12 }
 0xc6d   : > { %24460 = vmatpush3.bf16.msra.mxu1 %v30192_v12  ;;  %24440 = vmatprep.subr.bf16.mxu0 %v25156_v4 }
 0xc6e   : > { %24461 = vmatprep.subr.bf16.mxu1 %v25156_v4 }
 0xc70   : > { %24442 = vmatpush3.bf16.msra.mxu0 %v30204_v5 }
 0xc71   : > { %24463 = vmatpush3.bf16.msra.mxu1 %v30204_v5  ;;  %v16943_v27 = vpop.f32.mrb[182].mxu0  ;;  %24443 = vmatprep.subr.bf16.mxu0 %v25156_v4 }
 0xc72   : > { %v17026_v22 = vadd.f32 %v16943_v27, %v30243_v8  ;;  %v17016_v35 = vpop.f32.mrb[182].mxu1  ;;  %24464 = vmatprep.subr.bf16.mxu1 %v25156_v4  ;;  %v20837_v39 = vpop.f32.mrb[183].mxu0  ;;  %v30458_v8 = vld [vmem:[%s30692_s12] sm:$0x1] }
 0xc73   : > { %v17027_v42 = vadd.f32 %v17016_v35, %v30245_v61  ;;  %v20860_v1 = vpop.f32.mrb[183].mxu1 }
 0xc74   : > { %v17035_v3 = vadd.f32 %v30250_v32, %v17026_v22  ;;  %24445 = vmatpush3.bf16.msra.mxu0 %v30218_v59 }
 0xc75   : > { %v17036_v53 = vadd.f32 %v30250_v32, %v17027_v42  ;;  %24466 = vmatpush3.bf16.msra.mxu1 %v30218_v59  ;;  %21021 = vmatprep.subr.mxu0 %v25154_v7 }
 0xc76   : > { %21054 = vmatprep.subr.mxu1 %v25154_v7 }
 0xc78   : > { %21022 = vmatpush3.msra.mxu0 %v30227_v60 }
 0xc79   : > { %21055 = vmatpush3.msra.mxu1 %v30227_v60  ;;  %21024 = vmatmul.mubr.msk.f32.vlgmr.msra.gmra.mrb[188].mxu0 %vm17061_vm15, %v17041_v51 }
 0xc7a   : > { %21057 = vmatmul.mubr.msk.f32.vlgmr.msra.gmra.mrb[188].mxu1 %vm17061_vm15, %v17042_v14  ;;  %24467 = vmatprep.subr.bf16.mxu0 %v25156_v4 }
 0xc7b   : > { %24488 = vmatprep.subr.bf16.mxu1 %v25156_v4  ;;  %24469 = vmatpush3.bf16.msra.mxu0 %v30135_v10 }
 0xc7c   : > { %24490 = vmatpush3.bf16.msra.mxu1 %v30135_v10  ;;  %24470 = vmatprep.subr.bf16.mxu0 %v25156_v4  ;;  %v17654_v10 = vld [vmem:[%s30693_s13] sm:$0xff] }
 0xc7d   : > { %24491 = vmatprep.subr.bf16.mxu1 %v25156_v4  ;;  %21089 = vmatprep.mubr.msk.f32.mxu0 %vm25157_vm12, %v25154_v7 }
 0xc7e   : > { %21122 = vmatprep.mubr.msk.f32.mxu1 %vm25157_vm12, %v25154_v7 }
 0xc7f   : > { %24472 = vmatpush3.bf16.msra.mxu0 %v30154_v44 }
 0xc80   : > { %24493 = vmatpush3.bf16.msra.mxu1 %v30154_v44  ;;  %24473 = vmatprep.subr.bf16.mxu0 %v25156_v4  ;;  %v17655_v44 = vld [vmem:[%s30693_s13 + $0x8] sm:$0xff] }
 0xc81   : > { %24494 = vmatprep.subr.bf16.mxu1 %v25156_v4 }
 0xc83   : > { %24475 = vmatpush3.bf16.msra.mxu0 %v30166_v43 }
 0xc84   : > { %24496 = vmatpush3.bf16.msra.mxu1 %v30166_v43  ;;  %24476 = vmatprep.subr.bf16.mxu0 %v25156_v4  ;;  %v17043_v43 = vmax.f32 %v17035_v3, 0.0 }
 0xc85   : > { %24497 = vmatprep.subr.bf16.mxu1 %v25156_v4 }
 0xc87   : > { %24478 = vmatpush3.bf16.msra.mxu0 %v30178_v20 }
 0xc88   : > { %24499 = vmatpush3.bf16.msra.mxu1 %v30178_v20  ;;  %24479 = vmatprep.subr.bf16.mxu0 %v25156_v4  ;;  %v30380_v20 = vpack.c.bf16 %v17655_v44, %v17654_v10 }
 0xc89   : > { %24500 = vmatprep.subr.bf16.mxu1 %v25156_v4 }
 0xc8b   : > { %24481 = vmatpush3.bf16.msra.mxu0 %v30192_v12 }
 0xc8c   : > { %24502 = vmatpush3.bf16.msra.mxu1 %v30192_v12  ;;  %24482 = vmatprep.subr.bf16.mxu0 %v25156_v4  ;;  %v17044_v12 = vmax.f32 %v17036_v53, 0.0 }
 0xc8d   : > { %24503 = vmatprep.subr.bf16.mxu1 %v25156_v4 }
 0xc8f   : > { %24484 = vmatpush3.bf16.msra.mxu0 %v30204_v5 }
 0xc90   : > { %24505 = vmatpush3.bf16.msra.mxu1 %v30204_v5  ;;  %24485 = vmatprep.subr.bf16.mxu0 %v25156_v4  ;;  %v17656_v5 = vld [vmem:[%s30693_s13 + $0x10] sm:$0xff] }
 0xc91   : > { %24506 = vmatprep.subr.bf16.mxu1 %v25156_v4 }
 0xc93   : > { %24487 = vmatpush3.bf16.msra.mxu0 %v30218_v59 }
 0xc94   : > { %24508 = vmatpush3.bf16.msra.mxu1 %v30218_v59  ;;  %21087 = vmatprep.subr.mxu0 %v25154_v7  ;;  %v30395_v59 = vpack.c.bf16 %v17657_v58, %v17656_v5 }
 0xc95   : > { %21120 = vmatprep.subr.mxu1 %v25154_v7 }
 0xc97   : > { %21088 = vmatpush3.msra.mxu0 %v30227_v60 }
 0xc98   : > { %21121 = vmatpush3.msra.mxu1 %v30227_v60  ;;  %21090 = vmatmul.mubr.msk.f32.vlgmr.msra.gmra.mrb[190].mxu0 %vm17061_vm15, %v17043_v43  ;;  %v17658_v60 = vld [vmem:[%s30693_s13 + $0x20] sm:$0xff] }
 0xc99   : > { %21123 = vmatmul.mubr.msk.f32.vlgmr.msra.gmra.mrb[190].mxu1 %vm17061_vm15, %v17044_v12  ;;  %24509 = vmatprep.subr.bf16.mxu0 %v25156_v4  ;;  %v30411_v47 = vpack.c.bf16 %v17659_v50, %v17658_v60 }
 0xc9a   : > { %24524 = vmatprep.subr.bf16.mxu1 %v25156_v4  ;;  %24511 = vmatpush3.bf16.msra.mxu0 %v30380_v20 }
 0xc9b   : > { %24526 = vmatpush3.bf16.msra.mxu1 %v30380_v20  ;;  %24512 = vmatprep.subr.bf16.mxu0 %v25156_v4 }
 0xc9c   : > { %24527 = vmatprep.subr.bf16.mxu1 %v25156_v4  ;;  %21147 = vmatprep.mubr.msk.f32.mxu0 %vm25157_vm12, %v25154_v7 }
 0xc9d   : > { %21172 = vmatprep.mubr.msk.f32.mxu1 %vm25157_vm12, %v25154_v7 }
 0xc9e   : > { %24514 = vmatpush3.bf16.msra.mxu0 %v30395_v59 }
 0xc9f   : > { %24529 = vmatpush3.bf16.msra.mxu1 %v30395_v59  ;;  %24515 = vmatprep.subr.bf16.mxu0 %v25156_v4 }
 0xca0   : > { %24530 = vmatprep.subr.bf16.mxu1 %v25156_v4 }
 0xca2   : > { %24517 = vmatpush3.bf16.msra.mxu0 %v30411_v47 }
 0xca3   : > { %24532 = vmatpush3.bf16.msra.mxu1 %v30411_v47  ;;  %24518 = vmatprep.subr.bf16.mxu0 %v25156_v4 }
 0xca4   : > { %24533 = vmatprep.subr.bf16.mxu1 %v25156_v4 }
 0xca6   : > { %24520 = vmatpush3.bf16.msra.mxu0 %v30423_v18 }
 0xca7   : > { %24535 = vmatpush3.bf16.msra.mxu1 %v30423_v18  ;;  %24521 = vmatprep.subr.bf16.mxu0 %v25156_v4 }
 0xca8   : > { %24536 = vmatprep.subr.bf16.mxu1 %v25156_v4 }
 0xcaa   : > { %24523 = vmatpush3.bf16.msra.mxu0 %v30435_v25 }
 0xcab   : > { %24538 = vmatpush3.bf16.msra.mxu1 %v30435_v25  ;;  %21145 = vmatprep.subr.mxu0 %v25154_v7 }
 0xcac   : > { %21170 = vmatprep.subr.mxu1 %v25154_v7 }
 0xcae   : > { %21146 = vmatpush3.msk.msra.mxu0 %vm690_vm0, %v30446_v30 }
 0xcaf   : > { %21171 = vmatpush3.msk.msra.mxu1 %vm690_vm0, %v30446_v30  ;;  %24539 = vmatprep.subr.bf16.mxu0 %v25156_v4 }
 0xcb0   : > { %24554 = vmatprep.subr.bf16.mxu1 %v25156_v4 }
 0xd0f   : > { %v17131_v34 = vpop.f32.mrb[184].mxu0 }
 0xd10   : > { %v17132_v13 = vadd.f32 %v17131_v34, %v30458_v8  ;;  %v17204_v61 = vpop.f32.mrb[184].mxu1  ;;  %v20893_v0 = vpop.f32.mrb[185].mxu0 }
 0xd11   : > { %v17205_v52 = vadd.f32 %v17204_v61, %v30458_v8  ;;  %v20926_v32 = vpop.f32.mrb[185].mxu1 }
 0xd12   : > { %v17646_v31 = vmax.f32 %v17132_v13, 0.0 }
 0xd13   : > { %v17647_v33 = vmax.f32 %v17205_v52, 0.0 }
 0xd14   : > { %21148 = vmatmul.mubr.msk.f32.vlgmr.msra.gmra.mrb[192].mxu0 %vm7841_vm6, %v17646_v31 }
 0xd15   : > { %21173 = vmatmul.mubr.msk.f32.vlgmr.msra.gmra.mrb[192].mxu1 %vm7841_vm6, %v17647_v33  ;;  %24541 = vmatpush3.bf16.msra.mxu0 %v30380_v20 }
 0xd16   : > { %24556 = vmatpush3.bf16.msra.mxu1 %v30380_v20  ;;  %24542 = vmatprep.subr.bf16.mxu0 %v25156_v4 }
 0xd17   : > { %24557 = vmatprep.subr.bf16.mxu1 %v25156_v4  ;;  %21197 = vmatprep.mubr.msk.f32.mxu0 %vm25157_vm12, %v25154_v7 }
 0xd18   : > { %21222 = vmatprep.mubr.msk.f32.mxu1 %vm25157_vm12, %v25154_v7 }
 0xd19   : > { %24544 = vmatpush3.bf16.msra.mxu0 %v30395_v59 }
 0xd1a   : > { %24559 = vmatpush3.bf16.msra.mxu1 %v30395_v59  ;;  %24545 = vmatprep.subr.bf16.mxu0 %v25156_v4 }
 0xd1b   : > { %24560 = vmatprep.subr.bf16.mxu1 %v25156_v4 }
 0xd1d   : > { %24547 = vmatpush3.bf16.msra.mxu0 %v30411_v47 }
 0xd1e   : > { %24562 = vmatpush3.bf16.msra.mxu1 %v30411_v47  ;;  %24548 = vmatprep.subr.bf16.mxu0 %v25156_v4 }
 0xd1f   : > { %24563 = vmatprep.subr.bf16.mxu1 %v25156_v4 }
 0xd21   : > { %24550 = vmatpush3.bf16.msra.mxu0 %v30423_v18 }
 0xd22   : > { %24565 = vmatpush3.bf16.msra.mxu1 %v30423_v18  ;;  %24551 = vmatprep.subr.bf16.mxu0 %v25156_v4 }
 0xd23   : > { %24566 = vmatprep.subr.bf16.mxu1 %v25156_v4 }
 0xd25   : > { %24553 = vmatpush3.bf16.msra.mxu0 %v30435_v25 }
 0xd26   : > { %24568 = vmatpush3.bf16.msra.mxu1 %v30435_v25  ;;  %21195 = vmatprep.subr.mxu0 %v25154_v7 }
 0xd27   : > { %21220 = vmatprep.subr.mxu1 %v25154_v7 }
 0xd29   : > { %21196 = vmatpush3.msk.msra.mxu0 %vm690_vm0, %v30446_v30 }
 0xd2a   : > { %21221 = vmatpush3.msk.msra.mxu1 %vm690_vm0, %v30446_v30  ;;  %24569 = vmatprep.subr.bf16.mxu0 %v25156_v4 }
 0xd2b   : > { %24584 = vmatprep.subr.bf16.mxu1 %v25156_v4 }
 0xd2d   : > { %v17277_v36 = vpop.f32.mrb[186].mxu0 }
 0xd2e   : > { %v17278_v45 = vadd.f32 %v17277_v36, %v30458_v8  ;;  %v17350_v46 = vpop.f32.mrb[186].mxu1  ;;  %v20959_v21 = vpop.f32.mrb[187].mxu0 }
 0xd2f   : > { %v17351_v26 = vadd.f32 %v17350_v46, %v30458_v8  ;;  %v20992_v9 = vpop.f32.mrb[187].mxu1 }
 0xd30   : > { %v17648_v15 = vmax.f32 %v17278_v45, 0.0 }
 0xd31   : > { %v17649_v62 = vmax.f32 %v17351_v26, 0.0 }
 0xd32   : > { %21198 = vmatmul.mubr.msk.f32.vlgmr.msra.gmra.mrb[194].mxu0 %vm7841_vm6, %v17648_v15 }
 0xd33   : > { %21223 = vmatmul.mubr.msk.f32.vlgmr.msra.gmra.mrb[194].mxu1 %vm7841_vm6, %v17649_v62  ;;  %24571 = vmatpush3.bf16.msra.mxu0 %v30380_v20 }
 0xd34   : > { %24586 = vmatpush3.bf16.msra.mxu1 %v30380_v20  ;;  %24572 = vmatprep.subr.bf16.mxu0 %v25156_v4 }
 0xd35   : > { %24587 = vmatprep.subr.bf16.mxu1 %v25156_v4  ;;  %21247 = vmatprep.mubr.msk.f32.mxu0 %vm25157_vm12, %v25154_v7 }
 0xd36   : > { %21272 = vmatprep.mubr.msk.f32.mxu1 %vm25157_vm12, %v25154_v7 }
 0xd37   : > { %24574 = vmatpush3.bf16.msra.mxu0 %v30395_v59 }
 0xd38   : > { %24589 = vmatpush3.bf16.msra.mxu1 %v30395_v59  ;;  %24575 = vmatprep.subr.bf16.mxu0 %v25156_v4 }
 0xd39   : > { %24590 = vmatprep.subr.bf16.mxu1 %v25156_v4 }
 0xd3b   : > { %24577 = vmatpush3.bf16.msra.mxu0 %v30411_v47 }
 0xd3c   : > { %24592 = vmatpush3.bf16.msra.mxu1 %v30411_v47  ;;  %24578 = vmatprep.subr.bf16.mxu0 %v25156_v4 }
 0xd3d   : > { %24593 = vmatprep.subr.bf16.mxu1 %v25156_v4 }
 0xd3f   : > { %24580 = vmatpush3.bf16.msra.mxu0 %v30423_v18 }
 0xd40   : > { %24595 = vmatpush3.bf16.msra.mxu1 %v30423_v18  ;;  %24581 = vmatprep.subr.bf16.mxu0 %v25156_v4 }
 0xd41   : > { %24596 = vmatprep.subr.bf16.mxu1 %v25156_v4 }
 0xd43   : > { %24583 = vmatpush3.bf16.msra.mxu0 %v30435_v25 }
 0xd44   : > { %24598 = vmatpush3.bf16.msra.mxu1 %v30435_v25  ;;  %21245 = vmatprep.subr.mxu0 %v25154_v7 }
 0xd45   : > { %21270 = vmatprep.subr.mxu1 %v25154_v7 }
 0xd47   : > { %21246 = vmatpush3.msk.msra.mxu0 %vm690_vm0, %v30446_v30 }
 0xd48   : > { %21271 = vmatpush3.msk.msra.mxu1 %vm690_vm0, %v30446_v30  ;;  %24599 = vmatprep.subr.bf16.mxu0 %v25156_v4 }
 0xd49   : > { %24614 = vmatprep.subr.bf16.mxu1 %v25156_v4 }
 0xd4c   : > { %v17423_v16 = vpop.f32.mrb[188].mxu0 }
 0xd4d   : > { %v17424_v29 = vadd.f32 %v17423_v16, %v30458_v8  ;;  %v17496_v19 = vpop.f32.mrb[188].mxu1  ;;  %v21025_v6 = vpop.f32.mrb[189].mxu0 }
 0xd4e   : > { %v17497_v38 = vadd.f32 %v17496_v19, %v30458_v8  ;;  %v21058_v54 = vpop.f32.mrb[189].mxu1 }
 0xd4f   : > { %v17650_v2 = vmax.f32 %v17424_v29, 0.0 }
 0xd50   : > { %v17651_v28 = vmax.f32 %v17497_v38, 0.0 }
 0xd51   : > { %21248 = vmatmul.mubr.msk.f32.vlgmr.msra.gmra.mrb[196].mxu0 %vm7841_vm6, %v17650_v2 }
 0xd52   : > { %21273 = vmatmul.mubr.msk.f32.vlgmr.msra.gmra.mrb[196].mxu1 %vm7841_vm6, %v17651_v28  ;;  %24601 = vmatpush3.bf16.msra.mxu0 %v30380_v20 }
 0xd53   : > { %24616 = vmatpush3.bf16.msra.mxu1 %v30380_v20  ;;  %24602 = vmatprep.subr.bf16.mxu0 %v25156_v4 }
 0xd54   : > { %24617 = vmatprep.subr.bf16.mxu1 %v25156_v4  ;;  %21297 = vmatprep.mubr.msk.f32.mxu0 %vm25157_vm12, %v25154_v7 }
 0xd55   : > { %21322 = vmatprep.mubr.msk.f32.mxu1 %vm25157_vm12, %v25154_v7 }
 0xd56   : > { %24604 = vmatpush3.bf16.msra.mxu0 %v30395_v59 }
 0xd57   : > { %24619 = vmatpush3.bf16.msra.mxu1 %v30395_v59  ;;  %24605 = vmatprep.subr.bf16.mxu0 %v25156_v4 }
 0xd58   : > { %24620 = vmatprep.subr.bf16.mxu1 %v25156_v4 }
 0xd5a   : > { %24607 = vmatpush3.bf16.msra.mxu0 %v30411_v47 }
 0xd5b   : > { %24622 = vmatpush3.bf16.msra.mxu1 %v30411_v47  ;;  %24608 = vmatprep.subr.bf16.mxu0 %v25156_v4 }
 0xd5c   : > { %24623 = vmatprep.subr.bf16.mxu1 %v25156_v4 }
 0xd5e   : > { %24610 = vmatpush3.bf16.msra.mxu0 %v30423_v18 }
 0xd5f   : > { %24625 = vmatpush3.bf16.msra.mxu1 %v30423_v18  ;;  %24611 = vmatprep.subr.bf16.mxu0 %v25156_v4 }
 0xd60   : > { %24626 = vmatprep.subr.bf16.mxu1 %v25156_v4 }
 0xd62   : > { %24613 = vmatpush3.bf16.msra.mxu0 %v30435_v25 }
 0xd63   : > { %24628 = vmatpush3.bf16.msra.mxu1 %v30435_v25  ;;  %21295 = vmatprep.subr.mxu0 %v25154_v7 }
 0xd64   : > { %21320 = vmatprep.subr.mxu1 %v25154_v7  ;;  %v17665_v7 = vld [vmem:[%s30694_s14] sm:$0x1] }
 0xd66   : > { %21296 = vmatpush3.msk.msra.mxu0 %vm690_vm0, %v30446_v30 }
 0xd67   : > { %21321 = vmatpush3.msk.msra.mxu1 %vm690_vm0, %v30446_v30  ;;  %vm18253_vm0 = vcmask 1040384  }
 0xd6b   : > { %v17569_v11 = vpop.f32.mrb[190].mxu0 }
 0xd6c   : > { %v17570_v37 = vadd.f32 %v17569_v11, %v30458_v8  ;;  %v17642_v24 = vpop.f32.mrb[190].mxu1  ;;  %v21091_v57 = vpop.f32.mrb[191].mxu0 }
 0xd6d   : > { %v17643_v4 = vadd.f32 %v17642_v24, %v30458_v8  ;;  %v21124_v17 = vpop.f32.mrb[191].mxu1 }
 0xd6e   : > { %v17652_v55 = vmax.f32 %v17570_v37, 0.0 }
 0xd6f   : > { %v17653_v40 = vmax.f32 %v17643_v4, 0.0 }
 0xd70   : > { %21298 = vmatmul.mubr.msk.f32.vlgmr.msra.gmra.mrb[198].mxu0 %vm7841_vm6, %v17652_v55 }
 0xd71   : > { %21323 = vmatmul.mubr.msk.f32.vlgmr.msra.gmra.mrb[198].mxu1 %vm7841_vm6, %v17653_v40 }
 0xde7   : > { %v17738_v27 = vpop.f32.mrb[192].mxu0 }
 0xde8   : > { %v17739_v22 = vadd.f32 %v17738_v27, %v17665_v7  ;;  %v17811_v35 = vpop.f32.mrb[192].mxu1  ;;  %v21149_v39 = vpop.f32.mrb[193].mxu0 }
 0xde9   : > { %v21174_v41 = vpop.f32.mrb[193].mxu1  ;;  %v17812_v42 = vadd.f32 %v17811_v35, %v17665_v7 }
 0xdea   : > { %v18254_v1 = vsel %vm18253_vm0, %v17739_v22, -inf }
 0xdeb   : > { %18255 = vmax.xlane.f32.xlu0 %v18254_v1  ;;  %v18257_v63 = vsel %vm18253_vm0, %v17812_v42, -inf }
 0xdef   : > { %18258 = vmax.xlane.f32.xlu0 %v18257_v63 }
 0xe05   : > { %v17884_v3 = vpop.f32.mrb[194].mxu0 }
 0xe06   : > { %v17885_v53 = vadd.f32 %v17884_v3, %v17665_v7  ;;  %v17957_v51 = vpop.f32.mrb[194].mxu1  ;;  %v21199_v14 = vpop.f32.mrb[195].mxu0 }
 0xe07   : > { %v21224_v10 = vpop.f32.mrb[195].mxu1  ;;  %v17958_v44 = vadd.f32 %v17957_v51, %v17665_v7 }
 0xe08   : > { %v18260_v43 = vsel %vm18253_vm0, %v17885_v53, -inf }
 0xe09   : > { %18261 = vmax.xlane.f32.xlu1 %v18260_v43  ;;  %v18263_v20 = vsel %vm18253_vm0, %v17958_v44, -inf }
 0xe0d   : > { %18264 = vmax.xlane.f32.xlu1 %v18263_v20 }
 0xe24   : > { %v18030_v12 = vpop.f32.mrb[196].mxu0 }
 0xe25   : > { %v18031_v5 = vadd.f32 %v18030_v12, %v17665_v7  ;;  %v18103_v58 = vpop.f32.mrb[196].mxu1  ;;  %v21249_v59 = vpop.f32.mrb[197].mxu0 }
 0xe26   : > { %v18104_v60 = vadd.f32 %v18103_v58, %v17665_v7  ;;  %v21274_v50 = vpop.f32.mrb[197].mxu1 }
 0xe27   : > { %v18266_v47 = vsel %vm18253_vm0, %v18031_v5, -inf }
 0xe28   : > { %v18269_v49 = vsel %vm18253_vm0, %v18104_v60, -inf  ;;  %18267 = vmax.xlane.f32.xlu0 %v18266_v47 }
 0xe29   : > { %18270 = vmax.xlane.f32.xlu1 %v18269_v49 }
 0xe43   : > { %v18176_v48 = vpop.f32.mrb[198].mxu0 }
 0xe44   : > { %v18177_v18 = vadd.f32 %v18176_v48, %v17665_v7  ;;  %v18249_v23 = vpop.f32.mrb[198].mxu1  ;;  %v21299_v56 = vpop.f32.mrb[199].mxu0 }
 0xe45   : > { %v18250_v25 = vadd.f32 %v18249_v23, %v17665_v7  ;;  %v21324_v30 = vpop.f32.mrb[199].mxu1 }
 0xe46   : > { %v18272_v8 = vsel %vm18253_vm0, %v18177_v18, -inf }
 0xe47   : > { %v18275_v34 = vsel %vm18253_vm0, %v18250_v25, -inf  ;;  %18273 = vmax.xlane.f32.xlu0 %v18272_v8 }
 0xe48   : > { %18276 = vmax.xlane.f32.xlu1 %v18275_v34 }
 0xe78   : > { %v18256_v13 = vpop.xlane.xlu0 %18255 }
 0xe79   : > { %v30575_v61 = vsub.f32 %v17739_v22, %v18256_v13 }
 0xe7b   : > { %v18286_v0 = vmul.f32 1.442695, %v30575_v61 }
 0xe7c   : > { %v18259_v52 = vpop.xlane.xlu0 %18258 }
 0xe7d   : > { %25058 = vpow2.f32 %v18286_v0  ;;  %v30578_v32 = vsub.f32 %v17812_v42, %v18259_v52 }
 0xe7f   : > { %v18288_v31 = vmul.f32 1.442695, %v30578_v32 }
 0xe81   : > { %25060 = vpow2.f32 %v18288_v31 }
 0xe87   : > { %v25059_v33 = vpop.eup %25058 }
 0xe88   : > { %v18302_v36 = vsel %vm18253_vm0, %v25059_v33, 0.0 }
 0xe89   : > { %18303 = vadd.xlane.f32.xlu0 %v18302_v36 }
 0xe8b   : > { %v25061_v45 = vpop.eup %25060 }
 0xe8c   : > { %v18305_v46 = vsel %vm18253_vm0, %v25061_v45, 0.0 }
 0xe8d   : > { %18306 = vadd.xlane.f32.xlu1 %v18305_v46 }
 0xe96   : > { %v18262_v21 = vpop.xlane.xlu1 %18261 }
 0xe97   : > { %v30583_v26 = vsub.f32 %v17885_v53, %v18262_v21 }
 0xe99   : > { %v18290_v9 = vmul.f32 1.442695, %v30583_v26 }
 0xe9a   : > { %v18265_v15 = vpop.xlane.xlu1 %18264 }
 0xe9b   : > { %25062 = vpow2.f32 %v18290_v9  ;;  %v30586_v62 = vsub.f32 %v17958_v44, %v18265_v15 }
 0xe9d   : > { %v18292_v16 = vmul.f32 1.442695, %v30586_v62 }
 0xe9f   : > { %25064 = vpow2.f32 %v18292_v16 }
 0xea5   : > { %v25063_v29 = vpop.eup %25062 }
 0xea6   : > { %v18308_v19 = vsel %vm18253_vm0, %v25063_v29, 0.0 }
 0xea7   : > { %18309 = vadd.xlane.f32.xlu0 %v18308_v19 }
 0xea9   : > { %v25065_v6 = vpop.eup %25064 }
 0xeaa   : > { %v18311_v38 = vsel %vm18253_vm0, %v25065_v6, 0.0 }
 0xeab   : > { %18312 = vadd.xlane.f32.xlu1 %v18311_v38 }
 0xeb5   : > { %v18268_v54 = vpop.xlane.xlu0 %18267 }
 0xeb6   : > { %v18271_v2 = vpop.xlane.xlu1 %18270  ;;  %v30591_v28 = vsub.f32 %v18031_v5, %v18268_v54 }
 0xeb7   : > { %v30593_v11 = vsub.f32 %v18104_v60, %v18271_v2 }
 0xeb8   : > { %v18294_v37 = vmul.f32 1.442695, %v30591_v28 }
 0xeb9   : > { %v18296_v24 = vmul.f32 1.442695, %v30593_v11 }
 0xeba   : > { %25066 = vpow2.f32 %v18294_v37 }
 0xebb   : > { %25068 = vpow2.f32 %v18296_v24 }
 0xec4   : > { %v25067_v57 = vpop.eup %25066 }
 0xec5   : > { %v25069_v4 = vpop.eup %25068  ;;  %v18314_v17 = vsel %vm18253_vm0, %v25067_v57, 0.0 }
 0xec6   : > { %v18317_v55 = vsel %vm18253_vm0, %v25069_v4, 0.0  ;;  %18315 = vadd.xlane.f32.xlu0 %v18314_v17 }
 0xec7   : > { %18318 = vadd.xlane.f32.xlu1 %v18317_v55 }
 0xed4   : > { %v18274_v40 = vpop.xlane.xlu0 %18273 }
 0xed5   : > { %v18277_v7 = vpop.xlane.xlu1 %18276  ;;  %v30599_v27 = vsub.f32 %v18177_v18, %v18274_v40 }
 0xed6   : > { %v30601_v22 = vsub.f32 %v18250_v25, %v18277_v7 }
 0xed7   : > { %v18298_v35 = vmul.f32 1.442695, %v30599_v27 }
 0xed8   : > { %v18300_v39 = vmul.f32 1.442695, %v30601_v22 }
 0xed9   : > { %25070 = vpow2.f32 %v18298_v35 }
 0xeda   : > { %25072 = vpow2.f32 %v18300_v39 }
 0xee3   : > { %v25071_v41 = vpop.eup %25070 }
 0xee4   : > { %v25073_v42 = vpop.eup %25072  ;;  %v18320_v1 = vsel %vm18253_vm0, %v25071_v41, 0.0 }
 0xee5   : > { %v18323_v63 = vsel %vm18253_vm0, %v25073_v42, 0.0  ;;  %18321 = vadd.xlane.f32.xlu0 %v18320_v1 }
 0xee6   : > { %18324 = vadd.xlane.f32.xlu1 %v18323_v63 }
 0xf16   : > { %v18304_v3 = vpop.xlane.xlu0 %18303 }
 0xf17   : > { %25074 = vlog2.f32 %v18304_v3 }
 0xf1a   : > { %v18307_v53 = vpop.xlane.xlu1 %18306 }
 0xf1b   : > { %25076 = vlog2.f32 %v18307_v53 }
 0xf21   : > { %v25075_v51 = vpop.eup %25074 }
 0xf22   : > { %v18327_v14 = vmul.f32 0.6931472, %v25075_v51 }
 0xf24   : > { %v18342_v10 = vsub.f32 %v30575_v61, %v18327_v14 }
 0xf25   : > { %v25077_v44 = vpop.eup %25076 }
 0xf26   : > { %18350 = vst [vmem:[%s30611_s29] sm:$0x1] %v18342_v10  ;;  %v18329_v43 = vmul.f32 0.6931472, %v25077_v44 }
 0xf28   : > { %v18343_v20 = vsub.f32 %v30578_v32, %v18329_v43 }
 0xf2a   : > { %18351 = vst [vmem:[%s30611_s29 + $0x1] sm:$0x1] %v18343_v20 }
 0xf34   : > { %v18310_v12 = vpop.xlane.xlu0 %18309 }
 0xf35   : > { %25078 = vlog2.f32 %v18310_v12 }
 0xf38   : > { %v18313_v5 = vpop.xlane.xlu1 %18312 }
 0xf39   : > { %25080 = vlog2.f32 %v18313_v5 }
 0xf3f   : > { %v25079_v58 = vpop.eup %25078 }
 0xf40   : > { %v18331_v59 = vmul.f32 0.6931472, %v25079_v58 }
 0xf42   : > { %v18344_v60 = vsub.f32 %v30583_v26, %v18331_v59 }
 0xf43   : > { %v25081_v50 = vpop.eup %25080 }
 0xf44   : > { %18352 = vst [vmem:[%s30611_s29 + $0x2] sm:$0x1] %v18344_v60  ;;  %v18333_v47 = vmul.f32 0.6931472, %v25081_v50 }
 0xf46   : > { %v18345_v49 = vsub.f32 %v30586_v62, %v18333_v47 }
 0xf48   : > { %18353 = vst [vmem:[%s30611_s29 + $0x3] sm:$0x1] %v18345_v49 }
 0xf53   : > { %v18316_v48 = vpop.xlane.xlu0 %18315 }
 0xf54   : > { %v18319_v18 = vpop.xlane.xlu1 %18318  ;;  %25082 = vlog2.f32 %v18316_v48 }
 0xf55   : > { %25084 = vlog2.f32 %v18319_v18 }
 0xf5e   : > { %v25083_v23 = vpop.eup %25082 }
 0xf5f   : > { %v25085_v56 = vpop.eup %25084  ;;  %v18335_v25 = vmul.f32 0.6931472, %v25083_v23 }
 0xf60   : > { %v18337_v30 = vmul.f32 0.6931472, %v25085_v56 }
 0xf61   : > { %v18346_v8 = vsub.f32 %v30591_v28, %v18335_v25 }
 0xf62   : > { %v18347_v34 = vsub.f32 %v30593_v11, %v18337_v30 }
 0xf63   : > { %18354 = vst [vmem:[%s30611_s29 + $0x4] sm:$0x1] %v18346_v8 }
 0xf64   : > { %18355 = vst [vmem:[%s30611_s29 + $0x5] sm:$0x1] %v18347_v34 }
 0xf72   : > { %v18322_v13 = vpop.xlane.xlu0 %18321 }
 0xf73   : > { %v18325_v61 = vpop.xlane.xlu1 %18324  ;;  %25086 = vlog2.f32 %v18322_v13 }
 0xf74   : > { %25088 = vlog2.f32 %v18325_v61 }
 0xf7d   : > { %v25087_v0 = vpop.eup %25086 }
 0xf7e   : > { %v25089_v52 = vpop.eup %25088  ;;  %v18339_v32 = vmul.f32 0.6931472, %v25087_v0 }
 0xf7f   : > { %v18341_v31 = vmul.f32 0.6931472, %v25089_v52 }
 0xf80   : > { %v18348_v33 = vsub.f32 %v30599_v27, %v18339_v32 }
 0xf81   : > { %v18349_v36 = vsub.f32 %v30601_v22, %v18341_v31 }
 0xf82   : > { %18356 = vst [vmem:[%s30611_s29 + $0x6] sm:$0x1] %v18348_v33 }
 0xf83   : > { %18357 = vst [vmem:[%s30611_s29 + $0x7] sm:$0x1] %v18349_v36 }
 0xf84   : > { %25103 = shalt.err (!%p25100_p3)
}
 0xf85   : > { %s25104_s24 = scalar_lea.hbm %s30630_s16, 128  ;;  %s25108_s30 = scalar_lea.hbm %s30695_s15, 256 }
 0xf86   : > { %p25105_p4 = scmp.ne.s32.totalorder %s30630_s16, %s25104_s24  ;;  %p25109_p9 = scmp.lt.u32.totalorder %s30630_s16, %s30695_s15 }
 0xf87   : > { %p25110_p10 = scmp.lt.u32.totalorder %s25108_s30, %s25104_s24  ;;  %p25112_p12 = scmp.lt.u32.totalorder %s25104_s24, %s30630_s16 }
 0xf88   : > { %p25106_p7 = pnand %p25105_p4, %p25279_p5 }
 0xf89   : > { %p25111_p11 = por %p25110_p10, %p25109_p9 }
 0xf8a   : > { %p25107_p8 = pneg %p25106_p7 }
 0xf8b   : > { %p25113_p13 = por %p25112_p12, %p25111_p11 }
 0xf8d   : > { %p25114_p0 = pnand %p25113_p13, %p25107_p8 }
 0xf8f   : > { %25117 = shalt.err (!%p25114_p0)
}
 0xf90   : > { %s25159_s17 = smov 16   ;;  %s25160_s23 = smov 1  }
 0xf91   : > { %25013 = dma.vmem_to_hbm [thread:$0]  (%p25279_p5), %s30632_s25, 128, %s30630_s16, %s30639_s22, %s25159_s17, %s25159_s17, %s25160_s23  }
 0xf92 PF: > { %p25019_p1 = scmp.ge.s32.totalorder %s25152_s21, 2  ;;  %s18387_s26 = sand.u32 1, %s25140_s18  }
 0xf93   : > { %s18388_s24 = scalar_lea.sflag [#allocation6], %s18387_s26 }
 0xf94   : > { %p25016_p2 = pnand %p25019_p1, %p25283_p6 }
 0xf96   : > { %25135 = dma.done.wait (!%p25016_p2), %s18388_s24, 128  }
 0xf97   : > { %25137 = vsyncadd (!%p25016_p2), %s18388_s24, 4294967168  ;;  %s30712_s21 = sld [smem:[#allocation9_spill]]  ;;  %s30713_s30 = sld [smem:[#allocation8_spill]] }
 0xf98   : > { %s30714_s20 = sld [smem:[#allocation10_spill]]  ;;  %s30715_s18 = smov %s25144_s19 }
 0xf9d   : > { %p25_p3 = scmp.ge.s32.totalorder %s30712_s21, 4   ;;  %s30716_s19 = smov %s30713_s30 }
 0xf9f   :  { %27 = sbr.rel (!%p25_p3) target bundleno = 3 (0x3), region = 131 }
 0xfa6   :  { %18393 = vsyncpa [#allocation6], 1 }
 0xfa7   :  { %18395 = vsyncpa [#allocation6 + $0x1], 1 }

</bundles_post_ra>
